<compile_context>
chip_gen: v7x
topology: tpu7x:2x2x1
jax: 0.10.0
libtpu: 0.0.40
codegen_flags: <defaults>
</compile_context>

<pallas_src>
import jax
import jax.numpy as jnp
from jax import lax
from jax.experimental import pallas as pl
from jax.experimental.pallas import tpu as pltpu


def discriminator_kernel(x_ref, w1_ref, b1_ref, w2_ref, b2_ref,
                         w3_ref, b3_ref, w4row_ref, b4_ref, o_ref):
    def leaky(h):  # f32 elementwise (VPU)
        return jnp.where(h > 0, h, 0.2 * h)

    # In-kernel bf16 cast: the input arrives as f32 straight from HBM; the
    # convert is VPU work hidden under the DMA instead of a separate XLA pass.
    h = x_ref[...].astype(jnp.bfloat16)                              # (R, 784) bf16
    h = leaky(jnp.dot(h, w1_ref[...],
                      preferred_element_type=jnp.float32) + b1_ref[...])
    h = leaky(jnp.dot(h.astype(jnp.bfloat16), w2_ref[...],
                      preferred_element_type=jnp.float32) + b2_ref[...])
    h = leaky(jnp.dot(h.astype(jnp.bfloat16), w3_ref[...],
                      preferred_element_type=jnp.float32) + b3_ref[...])
    # TODO(synk): nn.Dropout(p=0.3) is treated as eval-mode identity (deterministic forward).
    # fc4 has a single output column: contract (1,H) against (R,H) on the H
    # axis so the result is a lane-dense (1, R) row -> unmasked stores and a
    # single contiguous writeback DMA.
    out = lax.dot_general(w4row_ref[...], h.astype(jnp.bfloat16),
                          dimension_numbers=(((1,), (1,)), ((), ())),
                          preferred_element_type=jnp.float32)        # (1, R) f32
    o_ref[...] = (out + b4_ref[...]).astype(o_ref.dtype)


def discriminator_forward(x, params):
    """x: any shape with 784 * input_size elements (PyTorch does x.view(784, -1))."""
    w1, b1, w2, b2, w3, b3, w4, b4 = params

    # Glue: reproduce x.view(28*28, -1).  Stays f32; metadata-only for a
    # contiguous input.  The bf16 cast happens inside the kernel.
    x2 = x.reshape(28 * 28, -1)
    R, F = x2.shape
    assert F == w1.shape[0], "x.view(784,-1) last dim must equal fc1 in_features"
    assert R % 8 == 0
    H, O = w4.shape
    assert O == 1, "fc4 lane-dense path assumes a single output column"
    w4_row = w4.T                                                    # (1, hidden) bf16

    # Advisory cost estimate (tiny kernel; helps XLA overlap it with neighbors).
    flops = 2 * R * (F * w1.shape[1] + w1.shape[1] * w2.shape[1]
                     + w2.shape[1] * w3.shape[1] + w3.shape[1] * O)
    bytes_accessed = (x2.size * 4                                    # f32 input
                      + (w1.size + w2.size + w3.size + w4.size) * 2  # bf16 weights
                      + (b1.size + b2.size + b3.size + b4.size) * 4  # f32 biases
                      + R * O * 4)                                   # f32 output

    # Single grid step: whole problem (<6 MB VMEM incl. double buffers) fits
    # every generation's scoped-VMEM default, and extra steps are pure
    # per-step overhead for an overhead-bound kernel.
    full = lambda i: (0, 0)
    out = pl.pallas_call(
        discriminator_kernel,
        out_shape=jax.ShapeDtypeStruct((1, R), jnp.float32),
        grid_spec=pltpu.PrefetchScalarGridSpec(
            num_scalar_prefetch=0,
            grid=(1,),
            in_specs=[
                pl.BlockSpec((R, F), full),                          # x (f32)
                pl.BlockSpec(w1.shape, full), pl.BlockSpec(b1.shape, full),
                pl.BlockSpec(w2.shape, full), pl.BlockSpec(b2.shape, full),
                pl.BlockSpec(w3.shape, full), pl.BlockSpec(b3.shape, full),
                pl.BlockSpec(w4_row.shape, full), pl.BlockSpec(b4.shape, full),
            ],
            out_specs=pl.BlockSpec((1, R), full),
        ),
        compiler_params=pltpu.CompilerParams(
            dimension_semantics=("arbitrary",)),
        cost_estimate=pl.CostEstimate(flops=flops, transcendentals=0,
                                      bytes_accessed=bytes_accessed),
    )(x2, w1, b1, w2, b2, w3, b3, w4_row, b4)
    return out.reshape(R, O)                                         # (784, 1)


def init_discriminator_params(key, input_size, hidden_size, output_size):
    """Deterministic PyTorch-Linear-style init.

    Weights stored as (in, out) in bf16 (MXU operands); biases kept in f32.
    """
    dims = [(input_size, hidden_size * 4),
            (hidden_size * 4, hidden_size * 2),
            (hidden_size * 2, hidden_size),
            (hidden_size, output_size)]
    params = []
    for (fan_in, fan_out) in dims:
        key, kw, kb = jax.random.split(key, 3)
        bound = 1.0 / jnp.sqrt(fan_in)
        w = jax.random.uniform(kw, (fan_in, fan_out), jnp.float32, -bound, bound)
        b = jax.random.uniform(kb, (1, fan_out), jnp.float32, -bound, bound)
        params += [w.astype(jnp.bfloat16), b]
    return tuple(params)


def discriminator_reference(x, params, *, emulate_bf16=False):
    """Pure-JAX reference. With emulate_bf16=True, quantizes activations to bf16
    before each matmul (mirrors the kernel's MXU operand precision)."""
    w1, b1, w2, b2, w3, b3, w4, b4 = params

    def cast(h):
        return h.astype(jnp.bfloat16).astype(jnp.float32) if emulate_bf16 else h

    lrelu = lambda v: jnp.where(v > 0, v, 0.2 * v)
    h = x.reshape(28 * 28, -1).astype(jnp.float32)
    h = lrelu(cast(h) @ w1.astype(jnp.float32) + b1)
    h = lrelu(cast(h) @ w2.astype(jnp.float32) + b2)
    h = lrelu(cast(h) @ w3.astype(jnp.float32) + b3)
    return cast(h) @ w4.astype(jnp.float32) + b4


if __name__ == "__main__":
    input_size = 28 * 28     # fc1 in_features (matches the script's global)
    hidden_size = 32         # layers: 784 -> 128 -> 64 -> 32 -> 1
    output_size = 1

    key = jax.random.PRNGKey(0)
    kx, kp = jax.random.split(key)
    params = init_discriminator_params(kp, input_size, hidden_size, output_size)

    # The hard-coded x.view(784, -1) + fc1(in=784) forces 784*784 total elements:
    # this is a "batch" of 784 flattened 28x28 images.
    x = jax.random.normal(kx, (784, input_size), dtype=jnp.float32)

    out = discriminator_forward(x, params)
    out = jax.block_until_ready(out)
    assert out.shape == (784, output_size)

    # Tight check against a bf16-operand-emulating reference...
    ref_bf16 = discriminator_reference(x, params, emulate_bf16=True)
    assert jnp.allclose(out, ref_bf16, atol=5e-3, rtol=5e-3), \
        "mismatch vs bf16-emulating reference"
    # ...and a looser sanity check against the full-f32 reference.
    ref_f32 = discriminator_reference(x, params, emulate_bf16=False)
    assert jnp.allclose(out, ref_f32, atol=5e-2, rtol=5e-2), \
        "mismatch vs f32 reference"

    print("KERNEL_OK")
</pallas_src>

<mosaic_0001>
module attributes {stable_mosaic.version = 11 : i64} {
  func.func @discriminator_kernel(%arg0: i32, %arg1: memref<784x784xf32, #tpu.memory_space<vmem>>, %arg2: memref<784x128xbf16, #tpu.memory_space<vmem>>, %arg3: memref<1x128xf32, #tpu.memory_space<vmem>>, %arg4: memref<128x64xbf16, #tpu.memory_space<vmem>>, %arg5: memref<1x64xf32, #tpu.memory_space<vmem>>, %arg6: memref<64x32xbf16, #tpu.memory_space<vmem>>, %arg7: memref<1x32xf32, #tpu.memory_space<vmem>>, %arg8: memref<1x32xbf16, #tpu.memory_space<vmem>>, %arg9: memref<1x1xf32, #tpu.memory_space<vmem>>, %arg10: memref<1x784xf32, #tpu.memory_space<vmem>>) attributes {dimension_semantics = [#tpu.dimension_semantics<arbitrary>], iteration_bounds = array<i64: 1>, scalar_prefetch = 0 : i64, scratch_operands = 0 : i64, tpu.core_type = #tpu.core_type<tc>, window_params = [{pipeline_mode = #tpu.pipeline_mode<synchronous>, transform_indices = @transform_0, window_bounds = array<i64: 784, 784>}, {pipeline_mode = #tpu.pipeline_mode<synchronous>, transform_indices = @transform_1, window_bounds = array<i64: 784, 128>}, {pipeline_mode = #tpu.pipeline_mode<synchronous>, transform_indices = @transform_2, window_bounds = array<i64: 1, 128>}, {pipeline_mode = #tpu.pipeline_mode<synchronous>, transform_indices = @transform_3, window_bounds = array<i64: 128, 64>}, {pipeline_mode = #tpu.pipeline_mode<synchronous>, transform_indices = @transform_4, window_bounds = array<i64: 1, 64>}, {pipeline_mode = #tpu.pipeline_mode<synchronous>, transform_indices = @transform_5, window_bounds = array<i64: 64, 32>}, {pipeline_mode = #tpu.pipeline_mode<synchronous>, transform_indices = @transform_6, window_bounds = array<i64: 1, 32>}, {pipeline_mode = #tpu.pipeline_mode<synchronous>, transform_indices = @transform_7, window_bounds = array<i64: 1, 32>}, {pipeline_mode = #tpu.pipeline_mode<synchronous>, transform_indices = @transform_8, window_bounds = array<i64: 1, 1>}, {pipeline_mode = #tpu.pipeline_mode<synchronous>, transform_indices = @transform_9, window_bounds = array<i64: 1, 784>}]} {
    %c0 = arith.constant 0 : index
    %c0_0 = arith.constant 0 : index
    %0 = vector.load %arg1[%c0, %c0_0] : memref<784x784xf32, #tpu.memory_space<vmem>>, vector<784x784xf32>
    %1 = arith.truncf %0 : vector<784x784xf32> to vector<784x784xbf16>
    %c0_1 = arith.constant 0 : index
    %c0_2 = arith.constant 0 : index
    %2 = vector.load %arg2[%c0_1, %c0_2] : memref<784x128xbf16, #tpu.memory_space<vmem>>, vector<784x128xbf16>
    %cst = arith.constant dense<0.000000e+00> : vector<784x128xf32>
    %3 = tpu.matmul %1, %2, %cst {dimension_numbers = #tpu.dot_dimension_numbers<[1], [0], [0], [1], [0, 0, 1, 1], [], []>} : vector<784x784xbf16>, vector<784x128xbf16>, vector<784x128xf32> -> vector<784x128xf32>
    %c0_3 = arith.constant 0 : index
    %c0_4 = arith.constant 0 : index
    %4 = vector.load %arg3[%c0_3, %c0_4] : memref<1x128xf32, #tpu.memory_space<vmem>>, vector<1x128xf32>
    %5 = vector.broadcast %4 : vector<1x128xf32> to vector<784x128xf32>
    %6 = arith.addf %3, %5 : vector<784x128xf32>
    %cst_5 = arith.constant 0.000000e+00 : f32
    %7 = vector.broadcast %cst_5 : f32 to vector<784x128xf32>
    %8 = arith.cmpf ogt, %6, %7 : vector<784x128xf32>
    %cst_6 = arith.constant 2.000000e-01 : f32
    %9 = vector.broadcast %cst_6 : f32 to vector<784x128xf32>
    %10 = arith.mulf %9, %6 : vector<784x128xf32>
    %11 = arith.select %8, %6, %10 : vector<784x128xi1>, vector<784x128xf32>
    %12 = arith.truncf %11 : vector<784x128xf32> to vector<784x128xbf16>
    %c0_7 = arith.constant 0 : index
    %c0_8 = arith.constant 0 : index
    %13 = vector.load %arg4[%c0_7, %c0_8] : memref<128x64xbf16, #tpu.memory_space<vmem>>, vector<128x64xbf16>
    %cst_9 = arith.constant dense<0.000000e+00> : vector<784x64xf32>
    %14 = tpu.matmul %12, %13, %cst_9 {dimension_numbers = #tpu.dot_dimension_numbers<[1], [0], [0], [1], [0, 0, 1, 1], [], []>} : vector<784x128xbf16>, vector<128x64xbf16>, vector<784x64xf32> -> vector<784x64xf32>
    %c0_10 = arith.constant 0 : index
    %c0_11 = arith.constant 0 : index
    %15 = vector.load %arg5[%c0_10, %c0_11] : memref<1x64xf32, #tpu.memory_space<vmem>>, vector<1x64xf32>
    %16 = vector.broadcast %15 : vector<1x64xf32> to vector<784x64xf32>
    %17 = arith.addf %14, %16 : vector<784x64xf32>
    %cst_12 = arith.constant 0.000000e+00 : f32
    %18 = vector.broadcast %cst_12 : f32 to vector<784x64xf32>
    %19 = arith.cmpf ogt, %17, %18 : vector<784x64xf32>
    %cst_13 = arith.constant 2.000000e-01 : f32
    %20 = vector.broadcast %cst_13 : f32 to vector<784x64xf32>
    %21 = arith.mulf %20, %17 : vector<784x64xf32>
    %22 = arith.select %19, %17, %21 : vector<784x64xi1>, vector<784x64xf32>
    %23 = arith.truncf %22 : vector<784x64xf32> to vector<784x64xbf16>
    %c0_14 = arith.constant 0 : index
    %c0_15 = arith.constant 0 : index
    %24 = vector.load %arg6[%c0_14, %c0_15] : memref<64x32xbf16, #tpu.memory_space<vmem>>, vector<64x32xbf16>
    %cst_16 = arith.constant dense<0.000000e+00> : vector<784x32xf32>
    %25 = tpu.matmul %23, %24, %cst_16 {dimension_numbers = #tpu.dot_dimension_numbers<[1], [0], [0], [1], [0, 0, 1, 1], [], []>} : vector<784x64xbf16>, vector<64x32xbf16>, vector<784x32xf32> -> vector<784x32xf32>
    %c0_17 = arith.constant 0 : index
    %c0_18 = arith.constant 0 : index
    %26 = vector.load %arg7[%c0_17, %c0_18] : memref<1x32xf32, #tpu.memory_space<vmem>>, vector<1x32xf32>
    %27 = vector.broadcast %26 : vector<1x32xf32> to vector<784x32xf32>
    %28 = arith.addf %25, %27 : vector<784x32xf32>
    %cst_19 = arith.constant 0.000000e+00 : f32
    %29 = vector.broadcast %cst_19 : f32 to vector<784x32xf32>
    %30 = arith.cmpf ogt, %28, %29 : vector<784x32xf32>
    %cst_20 = arith.constant 2.000000e-01 : f32
    %31 = vector.broadcast %cst_20 : f32 to vector<784x32xf32>
    %32 = arith.mulf %31, %28 : vector<784x32xf32>
    %33 = arith.select %30, %28, %32 : vector<784x32xi1>, vector<784x32xf32>
    %c0_21 = arith.constant 0 : index
    %c0_22 = arith.constant 0 : index
    %34 = vector.load %arg8[%c0_21, %c0_22] : memref<1x32xbf16, #tpu.memory_space<vmem>>, vector<1x32xbf16>
    %35 = arith.truncf %33 : vector<784x32xf32> to vector<784x32xbf16>
    %cst_23 = arith.constant dense<0.000000e+00> : vector<1x784xf32>
    %36 = tpu.matmul %34, %35, %cst_23 {dimension_numbers = #tpu.dot_dimension_numbers<[1], [1], [0], [0], [0, 0, 1, 0], [], []>} : vector<1x32xbf16>, vector<784x32xbf16>, vector<1x784xf32> -> vector<1x784xf32>
    %c0_24 = arith.constant 0 : index
    %c0_25 = arith.constant 0 : index
    %37 = vector.load %arg9[%c0_24, %c0_25] : memref<1x1xf32, #tpu.memory_space<vmem>>, vector<1x1xf32>
    %38 = vector.broadcast %37 : vector<1x1xf32> to vector<1x784xf32>
    %39 = arith.addf %36, %38 : vector<1x784xf32>
    %c0_26 = arith.constant 0 : index
    %c0_27 = arith.constant 0 : index
    %40 = vector.load %arg10[%c0_26, %c0_27] : memref<1x784xf32, #tpu.memory_space<vmem>>, vector<1x784xf32>
    tpu.vector_store %arg10[%c0_26, %c0_27], %39 {strides = array<i32>} : memref<1x784xf32, #tpu.memory_space<vmem>>, vector<1x784xf32>,
    return
  }
  func.func @transform_0(%arg0: i32) -> (i32, i32) {
    %c0_i32 = arith.constant 0 : i32
    %c0_i32_0 = arith.constant 0 : i32
    %c0_i32_1 = arith.constant 0 : i32
    return %c0_i32, %c0_i32_0 : i32, i32
  }
  func.func @transform_1(%arg0: i32) -> (i32, i32) {
    %c0_i32 = arith.constant 0 : i32
    %c0_i32_0 = arith.constant 0 : i32
    %c0_i32_1 = arith.constant 0 : i32
    return %c0_i32, %c0_i32_0 : i32, i32
  }
  func.func @transform_2(%arg0: i32) -> (i32, i32) {
    %c0_i32 = arith.constant 0 : i32
    %c0_i32_0 = arith.constant 0 : i32
    %c0_i32_1 = arith.constant 0 : i32
    return %c0_i32, %c0_i32_0 : i32, i32
  }
  func.func @transform_3(%arg0: i32) -> (i32, i32) {
    %c0_i32 = arith.constant 0 : i32
    %c0_i32_0 = arith.constant 0 : i32
    %c0_i32_1 = arith.constant 0 : i32
    return %c0_i32, %c0_i32_0 : i32, i32
  }
  func.func @transform_4(%arg0: i32) -> (i32, i32) {
    %c0_i32 = arith.constant 0 : i32
    %c0_i32_0 = arith.constant 0 : i32
    %c0_i32_1 = arith.constant 0 : i32
    return %c0_i32, %c0_i32_0 : i32, i32
  }
  func.func @transform_5(%arg0: i32) -> (i32, i32) {
    %c0_i32 = arith.constant 0 : i32
    %c0_i32_0 = arith.constant 0 : i32
    %c0_i32_1 = arith.constant 0 : i32
    return %c0_i32, %c0_i32_0 : i32, i32
  }
  func.func @transform_6(%arg0: i32) -> (i32, i32) {
    %c0_i32 = arith.constant 0 : i32
    %c0_i32_0 = arith.constant 0 : i32
    %c0_i32_1 = arith.constant 0 : i32
    return %c0_i32, %c0_i32_0 : i32, i32
  }
  func.func @transform_7(%arg0: i32) -> (i32, i32) {
    %c0_i32 = arith.constant 0 : i32
    %c0_i32_0 = arith.constant 0 : i32
    %c0_i32_1 = arith.constant 0 : i32
    return %c0_i32, %c0_i32_0 : i32, i32
  }
  func.func @transform_8(%arg0: i32) -> (i32, i32) {
    %c0_i32 = arith.constant 0 : i32
    %c0_i32_0 = arith.constant 0 : i32
    %c0_i32_1 = arith.constant 0 : i32
    return %c0_i32, %c0_i32_0 : i32, i32
  }
  func.func @transform_9(%arg0: i32) -> (i32, i32) {
    %c0_i32 = arith.constant 0 : i32
    %c0_i32_0 = arith.constant 0 : i32
    %c0_i32_1 = arith.constant 0 : i32
    return %c0_i32, %c0_i32_0 : i32, i32
  }
}

</mosaic_0001>

<bundles_post_ra>
// kernel: tpu_custom_call.1
= control target key start
LH: loop header
LB: loop body
LE: loop exit
PB: predicated region body
PF: predicated region fallthrough
CT: control target
= control target key end

     0   :  { %s10124_s0 = inlined_call_operand.hbm [shape: f32[784,784], index: 0, kind: input, shape index: {}]   ;;  %s10125_s1 = inlined_call_operand.hbm [shape: bf16[784,128], index: 1, kind: input, shape index: {}]   ;;  %s10126_s2 = inlined_call_operand.hbm [shape: f32[1,128], index: 2, kind: input, shape index: {}]   ;;  %s10127_s3 = inlined_call_operand.vmem [shape: bf16[128,64], index: 3, kind: input, shape index: {}]   ;;  %s10128_s4 = inlined_call_operand.hbm [shape: f32[1,64], index: 4, kind: input, shape index: {}]   ;;  %s10129_s5 = inlined_call_operand.vmem [shape: bf16[64,32], index: 5, kind: input, shape index: {}]   ;;  %s10130_s6 = inlined_call_operand.hbm [shape: f32[1,32], index: 6, kind: input, shape index: {}]   ;;  %s10131_s7 = inlined_call_operand.hbm [shape: bf16[1,32], index: 7, kind: input, shape index: {}]   ;;  %s10132_s8 = inlined_call_operand.<no memory space> [shape: f32[1,1], index: 8, kind: input, shape index: {}]   ;;  %s10133_s9 = inlined_call_operand.hbm [shape: f32[1,784], index: 9, kind: output, shape index: {}]  }
   0x1   :  { %v14_v0 = vstv %s10132_s8 }
   0x2   :  { %15 = vst [vmem:[#allocation2] sm:$0x1] %v14_v0 }
   0x3   :  { %16 = vsyncpa [#allocation4], 0 }
   0x4   :  { %17 = vsyncpa [#allocation7], 0 }
   0x5   :  { %18 = vsyncpa [#allocation10], 0 }
   0x6   :  { %19 = vsyncpa [#allocation13], 0 }
   0x7   :  { %20 = vsyncpa [#allocation5], 0  ;;  %s7799_s11 = smov [#allocation6]   ;;  %s7635_s15 = scalar_lea.hbm %s10125_s1, 6272 }
   0x8   :  { %s38_s12 = sshll.u32 %s7799_s11, 4  ;;  %p7636_p0 = scmp.ne.s32.totalorder %s10125_s1, %s7635_s15  ;;  %s39_s12 = int_to_ptr.vmem [resolvable:$true] %s38_s12 }
   0x9   :  { %p7639_p1 = scmp.lt.u32.totalorder %s7635_s15, %s10125_s1 }
   0xb   :  { %p7641_p2 = pnand %p7639_p1, %p7636_p0 }
   0xd   :  { %7644 = shalt.err (!%p7641_p2)
}
   0xe   :  { %s7645_s8 = scalar_lea.vmem %s39_s12, 6272  ;;  %p7650_p4 = scmp.lt.s32.totalorder %s39_s12, %s39_s12 }
   0xf   :  { %p7646_p3 = scmp.ne.s32.totalorder %s39_s12, %s7645_s8  ;;  %p7651_p5 = scmp.lt.s32.totalorder %s7645_s8, %s7645_s8 }
  0x11   :  { %p7652_p6 = por %p7651_p5, %p7650_p4 }
  0x13   :  { %p7653_p7 = pnand %p7652_p6, %p7646_p3 }
  0x15   :  { %7656 = shalt.err (!%p7653_p7)
}
  0x16   :  { %s7800_s20 = smov 64   ;;  %s7801_s21 = smov 4  }
  0x17   :  { %44 = dma.hbm_to_vmem [thread:$0]  %s10125_s1, 6272, %s39_s12, [#allocation7], %s7800_s20, %s7800_s20, %s7801_s21  }
  0x18   :  { %s7802_s24 = smov [#allocation9]   ;;  %s7803_s26 = smov [#allocation3]  }
  0x19   :  { %s63_s25 = sshll.u32 %s7802_s24, 4  ;;  %s26_s27 = sshll.u32 %s7803_s26, 4  ;;  %s64_s25 = int_to_ptr.vmem [resolvable:$true] %s63_s25  ;;  %s27_s27 = int_to_ptr.vmem [resolvable:$true] %s26_s27 }
  0x1a   :  { %s7657_s30 = scalar_lea.hbm %s10128_s4, 16 }
  0x1b   :  { %p7658_p8 = scmp.ne.s32.totalorder %s10128_s4, %s7657_s30  ;;  %p7661_p9 = scmp.lt.u32.totalorder %s7657_s30, %s10128_s4 }
  0x1d   :  { %p7663_p10 = pnand %p7661_p9, %p7658_p8 }
  0x1f   :  { %7666 = shalt.err (!%p7663_p10)
}
  0x20   :  { %s7667_s1 = scalar_lea.vmem %s64_s25, 16  ;;  %s7671_s12 = scalar_lea.vmem %s64_s25, 32 }
  0x21   :  { %p7668_p11 = scmp.ne.s32.totalorder %s64_s25, %s7667_s1  ;;  %p7672_p12 = scmp.lt.s32.totalorder %s64_s25, %s64_s25 }
  0x22   :  { %p7673_p13 = scmp.lt.s32.totalorder %s7671_s12, %s7667_s1 }
  0x24   :  { %p7674_p0 = por %p7673_p13, %p7672_p12 }
  0x26   :  { %p7675_p1 = pnand %p7674_p0, %p7668_p11 }
  0x28   :  { %7678 = shalt.err (!%p7675_p1)
}
  0x29   :  { %66 = dma.hbm_to_vmem [thread:$0]  %s10128_s4, 16, %s64_s25, [#allocation10]  }
  0x2a   :  { %s7679_s19 = scalar_lea.hbm %s10124_s0, 87808 }
  0x2b   :  { %p7680_p2 = scmp.ne.s32.totalorder %s10124_s0, %s7679_s19  ;;  %p7683_p3 = scmp.lt.u32.totalorder %s7679_s19, %s10124_s0 }
  0x2d   :  { %p7685_p4 = pnand %p7683_p3, %p7680_p2 }
  0x2f   :  { %7688 = shalt.err (!%p7685_p4)
}
  0x30   :  { %s7689_s23 = scalar_lea.vmem %s27_s27, 87808  ;;  %p7694_p6 = scmp.lt.s32.totalorder %s27_s27, %s27_s27 }
  0x31   :  { %p7690_p5 = scmp.ne.s32.totalorder %s27_s27, %s7689_s23  ;;  %p7695_p7 = scmp.lt.s32.totalorder %s7689_s23, %s7689_s23 }
  0x33   :  { %p7696_p8 = por %p7695_p7, %p7694_p6 }
  0x35   :  { %p7697_p9 = pnand %p7696_p8, %p7690_p5 }
  0x37   :  { %7700 = shalt.err (!%p7697_p9)
}
  0x38   :  { %s7804_s4 = smov 896   ;;  %s7805_s24 = smov 56  }
  0x39   :  { %32 = dma.hbm_to_vmem [thread:$0]  %s10124_s0, 87808, %s27_s27, [#allocation4], %s7804_s4, %s7804_s4, %s7805_s24  }
  0x3a   :  { %s7806_s28 = smov [#allocation8]   ;;  %s7807_s30 = smov [#allocation11]  }
  0x3b   :  { %s51_s29 = sshll.u32 %s7806_s28, 4  ;;  %s75_s10 = sshll.u32 %s7807_s30, 4  ;;  %s52_s29 = int_to_ptr.vmem [resolvable:$true] %s51_s29  ;;  %s76_s10 = int_to_ptr.vmem [resolvable:$true] %s75_s10 }
  0x3c   :  { %s7701_s14 = scalar_lea.hbm %s10126_s2, 16 }
  0x3d   :  { %p7702_p10 = scmp.ne.s32.totalorder %s10126_s2, %s7701_s14  ;;  %p7705_p11 = scmp.lt.u32.totalorder %s7701_s14, %s10126_s2 }
  0x3f   :  { %p7707_p12 = pnand %p7705_p11, %p7702_p10 }
  0x41   :  { %7710 = shalt.err (!%p7707_p12)
}
  0x42   :  { %s7711_s0 = scalar_lea.vmem %s52_s29, 16  ;;  %s7715_s27 = scalar_lea.vmem %s52_s29, 32 }
  0x43   :  { %p7712_p13 = scmp.ne.s32.totalorder %s52_s29, %s7711_s0  ;;  %p7716_p0 = scmp.lt.s32.totalorder %s52_s29, %s52_s29 }
  0x44   :  { %p7717_p1 = scmp.lt.s32.totalorder %s7715_s27, %s7711_s0 }
  0x46   :  { %p7718_p2 = por %p7717_p1, %p7716_p0 }
  0x48   :  { %p7719_p3 = pnand %p7718_p2, %p7712_p13 }
  0x4a   :  { %7722 = shalt.err (!%p7719_p3)
}
  0x4b   :  { %54 = dma.hbm_to_vmem [thread:$0]  %s10126_s2, 16, %s52_s29, [#allocation7]  }
  0x4c   :  { %s7723_s20 = scalar_lea.hbm %s10130_s6, 16 }
  0x4d   :  { %p7724_p4 = scmp.ne.s32.totalorder %s10130_s6, %s7723_s20  ;;  %p7727_p5 = scmp.lt.u32.totalorder %s7723_s20, %s10130_s6 }
  0x4f   :  { %p7729_p6 = pnand %p7727_p5, %p7724_p4 }
  0x51   :  { %7732 = shalt.err (!%p7729_p6)
}
  0x52   :  { %s7733_s24 = scalar_lea.vmem %s76_s10, 16  ;;  %s7737_s25 = scalar_lea.vmem %s76_s10, 32 }
  0x53   :  { %p7734_p7 = scmp.ne.s32.totalorder %s76_s10, %s7733_s24  ;;  %p7738_p8 = scmp.lt.s32.totalorder %s76_s10, %s76_s10 }
  0x54   :  { %p7739_p9 = scmp.lt.s32.totalorder %s7737_s25, %s7733_s24 }
  0x56   :  { %p7740_p10 = por %p7739_p9, %p7738_p8 }
  0x58   :  { %p7741_p11 = pnand %p7740_p10, %p7734_p7 }
  0x5a   :  { %7744 = shalt.err (!%p7741_p11)
}
  0x5b   :  { %78 = dma.hbm_to_vmem [thread:$0]  %s10130_s6, 16, %s76_s10, [#allocation10]  }
  0x5c   :  { %s7808_s28 = smov [#allocation12]   ;;  %s7745_s13 = scalar_lea.hbm %s10131_s7, 16 }
  0x5d   :  { %s85_s29 = sshll.u32 %s7808_s28, 4  ;;  %p7746_p12 = scmp.ne.s32.totalorder %s10131_s7, %s7745_s13  ;;  %s86_s29 = int_to_ptr.vmem [resolvable:$true] %s85_s29 }
  0x5e   :  { %p7749_p13 = scmp.lt.u32.totalorder %s7745_s13, %s10131_s7 }
  0x60   :  { %p7751_p0 = pnand %p7749_p13, %p7746_p12 }
  0x62   :  { %7754 = shalt.err (!%p7751_p0)
}
  0x63   :  { %s7755_s16 = scalar_lea.vmem %s86_s29, 16  ;;  %s7759_s6 = scalar_lea.vmem %s86_s29, 32 }
  0x64   :  { %p7756_p1 = scmp.ne.s32.totalorder %s86_s29, %s7755_s16  ;;  %p7760_p2 = scmp.lt.s32.totalorder %s86_s29, %s86_s29 }
  0x65   :  { %p7761_p3 = scmp.lt.s32.totalorder %s7759_s6, %s7755_s16 }
  0x67   :  { %p7762_p4 = por %p7761_p3, %p7760_p2 }
  0x69   :  { %p7763_p5 = pnand %p7762_p4, %p7756_p1 }
  0x6b   :  { %7766 = shalt.err (!%p7763_p5)
}
  0x6c   :  { %88 = dma.hbm_to_vmem [thread:$0]  %s10131_s7, 16, %s86_s29, [#allocation13]  }
  0x6d   :  { %7789 = dma.done.wait [#allocation4], 87808  }
  0x6e   :  { %7790 = vsyncadd [#allocation4], 4294879488 }
  0x6f   :  { %7791 = dma.done.wait [#allocation7], 6288  }
  0x70   :  { %7792 = vsyncadd [#allocation7], 4294961008 }
  0x71   :  { %7793 = dma.done.wait [#allocation10], 32  }
  0x72   :  { %7794 = vsyncadd [#allocation10], 4294967264 }
  0x73   :  { %7795 = dma.done.wait [#allocation13], 16  }
  0x74   :  { %7796 = vsyncadd [#allocation13], 4294967280  ;;  %v7809_v1 = vmov 0   ;;  %v7571_v2 = vld [vmem:[#allocation6] sm:$0xff]   ;;  %v7572_v3 = vld [vmem:[#allocation6 + $0x8] sm:$0xff]   ;;  %vm1538_vm0 = vcmask 130048  }
  0x75   :  { %1686 = vmatprep.subr.bf16.mxu0 %v7809_v1  ;;  %7570 = vset.pattern.permute.xlu0 %v7809_v1  ;;  %v7573_v4 = vld [vmem:[#allocation6 + $0x10] sm:$0xff]   ;;  %v7574_v5 = vld [vmem:[#allocation6 + $0x18] sm:$0xff]   ;;  %v7575_v6 = vld [vmem:[#allocation6 + $0x20] sm:$0xff]   ;;  %vm7811_vm1 = vmmov 0  }
  0x76   :  { %1687 = vmatpush1.bf16.msra.mxu0 %v7571_v2  ;;  %v111_v7 = vld [vmem:[#allocation3 + $0x8] sm:$0xff]  ;;  %v118_v8 = vld [vmem:[#allocation3 + $0x40] sm:$0xff]  ;;  %v7576_v10 = vld [vmem:[#allocation6 + $0x28] sm:$0xff]  }
  0x77   :  { %1688 = vmatprep.subr.bf16.mxu0 %v7809_v1  ;;  %v797_v9 = vpack.c.bf16 %v118_v8, %v111_v7  ;;  %v7577_v11 = vld [vmem:[#allocation6 + $0x30] sm:$0xff]   ;;  %v7578_v12 = vld [vmem:[#allocation6 + $0x38] sm:$0xff]   ;;  %v7579_v13 = vld [vmem:[#allocation6 + $0x40] sm:$0xff]  }
  0x78   :  { %v7580_v14 = vld [vmem:[#allocation6 + $0x48] sm:$0xff]   ;;  %v7581_v15 = vld [vmem:[#allocation6 + $0x50] sm:$0xff]   ;;  %v7582_v16 = vld [vmem:[#allocation6 + $0x58] sm:$0xff]  }
  0x79   :  { %1718 = vmatprep.mubr.bf16.mxu0 %v797_v9  ;;  %v7583_v17 = vld [vmem:[#allocation6 + $0x60] sm:$0xff]   ;;  %v7584_v18 = vld [vmem:[#allocation6 + $0x68] sm:$0xff]   ;;  %v7585_v19 = vld [vmem:[#allocation6 + $0x70] sm:$0xff]  }
  0x7a   :  { %1689 = vmatpush1.bf16.msra.mxu0 %v7572_v3  ;;  %v7586_v20 = vld [vmem:[#allocation6 + $0x78] sm:$0xff]   ;;  %v110_v21 = vld [vmem:[#allocation3] sm:$0xff]  ;;  %v117_v22 = vld [vmem:[#allocation3 + $0x38] sm:$0xff] }
  0x7b   :  { %1690 = vmatprep.subr.bf16.mxu0 %v7809_v1  ;;  %v125_v23 = vld [vmem:[#allocation3 + $0x78] sm:$0xff]  ;;  %v132_v24 = vld [vmem:[#allocation3 + $0xb0] sm:$0xff]  ;;  %v796_v25 = vpack.c.bf16 %v117_v22, %v110_v21  ;;  %v131_v28 = vld [vmem:[#allocation3 + $0xa8] sm:$0xff] }
  0x7c   :  { %v804_v26 = vpack.c.bf16 %v132_v24, %v125_v23  ;;  %v124_v27 = vld [vmem:[#allocation3 + $0x70] sm:$0xff]  ;;  %v139_v29 = vld [vmem:[#allocation3 + $0xe8] sm:$0xff]  ;;  %v146_v30 = vld [vmem:[#allocation3 + $0x120] sm:$0xff] }
  0x7d   :  { %v803_v31 = vpack.c.bf16 %v131_v28, %v124_v27  ;;  %v811_v32 = vpack.c.bf16 %v146_v30, %v139_v29  ;;  %v138_v33 = vld [vmem:[#allocation3 + $0xe0] sm:$0xff]  ;;  %v145_v34 = vld [vmem:[#allocation3 + $0x118] sm:$0xff]  ;;  %v160_v36 = vld [vmem:[#allocation3 + $0x190] sm:$0xff] }
  0x7e   :  { %1691 = vmatpush1.bf16.msra.mxu0 %v7573_v4  ;;  %v153_v35 = vld [vmem:[#allocation3 + $0x158] sm:$0xff]  ;;  %v810_v37 = vpack.c.bf16 %v145_v34, %v138_v33  ;;  %v152_v39 = vld [vmem:[#allocation3 + $0x150] sm:$0xff]  ;;  %v159_v40 = vld [vmem:[#allocation3 + $0x188] sm:$0xff] }
  0x7f   :  { %1692 = vmatprep.subr.bf16.mxu0 %v7809_v1  ;;  %v818_v38 = vpack.c.bf16 %v160_v36, %v153_v35  ;;  %v167_v41 = vld [vmem:[#allocation3 + $0x1c8] sm:$0xff]  ;;  %v174_v42 = vld [vmem:[#allocation3 + $0x200] sm:$0xff]  ;;  %v817_v43 = vpack.c.bf16 %v159_v40, %v152_v39  ;;  %v173_v46 = vld [vmem:[#allocation3 + $0x1f8] sm:$0xff] }
  0x80   :  { %v825_v44 = vpack.c.bf16 %v174_v42, %v167_v41  ;;  %v166_v45 = vld [vmem:[#allocation3 + $0x1c0] sm:$0xff]  ;;  %v181_v47 = vld [vmem:[#allocation3 + $0x238] sm:$0xff]  ;;  %v188_v48 = vld [vmem:[#allocation3 + $0x270] sm:$0xff] }
  0x81   :  { %v824_v49 = vpack.c.bf16 %v173_v46, %v166_v45  ;;  %v832_v50 = vpack.c.bf16 %v188_v48, %v181_v47  ;;  %v180_v51 = vld [vmem:[#allocation3 + $0x230] sm:$0xff]  ;;  %v187_v52 = vld [vmem:[#allocation3 + $0x268] sm:$0xff]  ;;  %v202_v54 = vld [vmem:[#allocation3 + $0x2e0] sm:$0xff] }
  0x82   :  { %1693 = vmatpush1.bf16.msra.mxu0 %v7574_v5  ;;  %v195_v53 = vld [vmem:[#allocation3 + $0x2a8] sm:$0xff]  ;;  %v831_v55 = vpack.c.bf16 %v187_v52, %v180_v51  ;;  %v194_v57 = vld [vmem:[#allocation3 + $0x2a0] sm:$0xff]  ;;  %v201_v58 = vld [vmem:[#allocation3 + $0x2d8] sm:$0xff] }
  0x83   :  { %1694 = vmatprep.subr.bf16.mxu0 %v7809_v1  ;;  %v839_v56 = vpack.c.bf16 %v202_v54, %v195_v53  ;;  %v209_v59 = vld [vmem:[#allocation3 + $0x318] sm:$0xff]  ;;  %v216_v60 = vld [vmem:[#allocation3 + $0x350] sm:$0xff]  ;;  %v838_v61 = vpack.c.bf16 %v201_v58, %v194_v57  ;;  %v215_v0 = vld [vmem:[#allocation3 + $0x348] sm:$0xff] }
  0x84   :  { %v846_v62 = vpack.c.bf16 %v216_v60, %v209_v59  ;;  %v208_v63 = vld [vmem:[#allocation3 + $0x310] sm:$0xff]  ;;  %v223_v2 = vld [vmem:[#allocation3 + $0x388] sm:$0xff]  ;;  %v230_v3 = vld [vmem:[#allocation3 + $0x3c0] sm:$0xff] }
  0x85   :  { %v845_v4 = vpack.c.bf16 %v215_v0, %v208_v63  ;;  %v853_v5 = vpack.c.bf16 %v230_v3, %v223_v2  ;;  %v229_v7 = vld [vmem:[#allocation3 + $0x3b8] sm:$0xff]  ;;  %v244_v9 = vld [vmem:[#allocation3 + $0x430] sm:$0xff]  ;;  %v279_v27 = vld [vmem:[#allocation3 + $0x548] sm:$0xff] }
  0x86   :  { %1695 = vmatpush1.bf16.msra.mxu0 %v7575_v6  ;;  %v222_v6 = vld [vmem:[#allocation3 + $0x380] sm:$0xff]  ;;  %v237_v8 = vld [vmem:[#allocation3 + $0x3f8] sm:$0xff]  ;;  %v272_v22 = vld [vmem:[#allocation3 + $0x510] sm:$0xff] }
  0x87   :  { %1696 = vmatprep.subr.bf16.mxu0 %v7809_v1  ;;  %v265_v21 = vld [vmem:[#allocation3 + $0x4d8] sm:$0xff]  ;;  %v286_v28 = vld [vmem:[#allocation3 + $0x580] sm:$0xff]  ;;  %v300_v34 = vld [vmem:[#allocation3 + $0x5f0] sm:$0xff] }
  0x88   :  { %v874_v24 = vpack.c.bf16 %v272_v22, %v265_v21  ;;  %v881_v30 = vpack.c.bf16 %v286_v28, %v279_v27  ;;  %v293_v33 = vld [vmem:[#allocation3 + $0x5b8] sm:$0xff]  ;;  %v299_v39 = vld [vmem:[#allocation3 + $0x5e8] sm:$0xff]  ;;  %v314_v41 = vld [vmem:[#allocation3 + $0x660] sm:$0xff] }
  0x89   :  { %v888_v36 = vpack.c.bf16 %v300_v34, %v293_v33  ;;  %v307_v40 = vld [vmem:[#allocation3 + $0x628] sm:$0xff]  ;;  %v313_v45 = vld [vmem:[#allocation3 + $0x658] sm:$0xff]  ;;  %v328_v47 = vld [vmem:[#allocation3 + $0x6d0] sm:$0xff] }
  0x8a   :  { %1697 = vmatpush1.bf16.msra.mxu0 %v7576_v10  ;;  %v852_v10 = vpack.c.bf16 %v229_v7, %v222_v6  ;;  %v321_v46 = vld [vmem:[#allocation3 + $0x698] sm:$0xff]  ;;  %v327_v51 = vld [vmem:[#allocation3 + $0x6c8] sm:$0xff]  ;;  %v342_v53 = vld [vmem:[#allocation3 + $0x740] sm:$0xff] }
  0x8b   :  { %1698 = vmatprep.subr.bf16.mxu0 %v7809_v1  ;;  %v335_v52 = vld [vmem:[#allocation3 + $0x708] sm:$0xff]  ;;  %v334_v57 = vld [vmem:[#allocation3 + $0x700] sm:$0xff]  ;;  %v341_v58 = vld [vmem:[#allocation3 + $0x738] sm:$0xff] }
  0x8c   :  { %v349_v59 = vld [vmem:[#allocation3 + $0x778] sm:$0xff]  ;;  %v356_v60 = vld [vmem:[#allocation3 + $0x7b0] sm:$0xff]  ;;  %v355_v0 = vld [vmem:[#allocation3 + $0x7a8] sm:$0xff] }
  0x8d   :  { %v348_v63 = vld [vmem:[#allocation3 + $0x770] sm:$0xff]  ;;  %v363_v2 = vld [vmem:[#allocation3 + $0x7e8] sm:$0xff]  ;;  %v370_v3 = vld [vmem:[#allocation3 + $0x820] sm:$0xff] }
  0x8e   :  { %1699 = vmatpush1.bf16.msra.mxu0 %v7577_v11  ;;  %v860_v11 = vpack.c.bf16 %v244_v9, %v237_v8  ;;  %v362_v6 = vld [vmem:[#allocation3 + $0x7e0] sm:$0xff]  ;;  %v369_v7 = vld [vmem:[#allocation3 + $0x818] sm:$0xff]  ;;  %v384_v9 = vld [vmem:[#allocation3 + $0x890] sm:$0xff] }
  0x8f   :  { %1700 = vmatprep.subr.bf16.mxu0 %v7809_v1  ;;  %v377_v8 = vld [vmem:[#allocation3 + $0x858] sm:$0xff]  ;;  %v412_v22 = vld [vmem:[#allocation3 + $0x970] sm:$0xff]  ;;  %v419_v27 = vld [vmem:[#allocation3 + $0x9a8] sm:$0xff] }
  0x90   :  { %v405_v21 = vld [vmem:[#allocation3 + $0x938] sm:$0xff]  ;;  %v426_v28 = vld [vmem:[#allocation3 + $0x9e0] sm:$0xff] }
  0x91   :  { %v425_v33 = vld [vmem:[#allocation3 + $0x9d8] sm:$0xff] }
  0x92   :  { %1701 = vmatpush1.bf16.msra.mxu0 %v7578_v12  ;;  %v236_v12 = vld [vmem:[#allocation3 + $0x3f0] sm:$0xff]  ;;  %v433_v34 = vld [vmem:[#allocation3 + $0xa18] sm:$0xff] }
  0x93   :  { %1702 = vmatprep.subr.bf16.mxu0 %v7809_v1 }
  0x96   :  { %1703 = vmatpush1.bf16.msra.mxu0 %v7579_v13  ;;  %v243_v13 = vld [vmem:[#allocation3 + $0x428] sm:$0xff] }
  0x97   :  { %1704 = vmatprep.subr.bf16.mxu0 %v7809_v1 }
  0x9a   :  { %1705 = vmatpush1.bf16.msra.mxu0 %v7580_v14  ;;  %v251_v14 = vld [vmem:[#allocation3 + $0x468] sm:$0xff] }
  0x9b   :  { %1706 = vmatprep.subr.bf16.mxu0 %v7809_v1 }
  0x9e   :  { %1707 = vmatpush1.bf16.msra.mxu0 %v7581_v15  ;;  %v258_v15 = vld [vmem:[#allocation3 + $0x4a0] sm:$0xff] }
  0x9f   :  { %1708 = vmatprep.subr.bf16.mxu0 %v7809_v1 }
  0xa2   :  { %1709 = vmatpush1.bf16.msra.mxu0 %v7582_v16  ;;  %v859_v16 = vpack.c.bf16 %v243_v13, %v236_v12  ;;  %v7590_v12 = vld [vmem:[#allocation6 + $0x98] sm:$0xff]   ;;  %v376_v13 = vld [vmem:[#allocation3 + $0x850] sm:$0xff] }
  0xa3   :  { %1710 = vmatprep.subr.bf16.mxu0 %v7809_v1 }
  0xa6   :  { %1711 = vmatpush1.bf16.msra.mxu0 %v7583_v17  ;;  %v867_v17 = vpack.c.bf16 %v258_v15, %v251_v14  ;;  %v383_v14 = vld [vmem:[#allocation3 + $0x888] sm:$0xff] }
  0xa7   :  { %1712 = vmatprep.subr.bf16.mxu0 %v7809_v1  ;;  %v391_v15 = vld [vmem:[#allocation3 + $0x8c8] sm:$0xff] }
  0xaa   :  { %1713 = vmatpush1.bf16.msra.mxu0 %v7584_v18  ;;  %v7587_v18 = vld [vmem:[#allocation6 + $0x80] sm:$0xff]  }
  0xab   :  { %1714 = vmatprep.subr.bf16.mxu0 %v7809_v1 }
  0xae   :  { %1715 = vmatpush1.bf16.msra.mxu0 %v7585_v19  ;;  %v250_v19 = vld [vmem:[#allocation3 + $0x460] sm:$0xff] }
  0xaf   :  { %1716 = vmatprep.subr.bf16.mxu0 %v7809_v1 }
  0xb2   :  { %1717 = vmatpush1.bf16.msra.mxu0 %v7586_v20  ;;  %v257_v20 = vld [vmem:[#allocation3 + $0x498] sm:$0xff] }
  0xb3   :  { %2111 = vmatprep.subr.bf16.mxu0 %v7809_v1  ;;  %v866_v23 = vpack.c.bf16 %v257_v20, %v250_v19  ;;  %v390_v19 = vld [vmem:[#allocation3 + $0x8c0] sm:$0xff]  ;;  %v397_v20 = vld [vmem:[#allocation3 + $0x8f8] sm:$0xff] }
  0xb5   :  { %1719 = vmatmul.mubr.bf16.vlgmr.msra.gmra.mrb[0].mxu0 %v796_v25  ;;  %v264_v25 = vld [vmem:[#allocation3 + $0x4d0] sm:$0xff] }
  0xb6   :  { %1726 = vmatprep.mubr.bf16.mxu0 %v804_v26  ;;  %2112 = vmatpush1.bf16.msra.mxu0 %v7587_v18  ;;  %v271_v26 = vld [vmem:[#allocation3 + $0x508] sm:$0xff] }
  0xb7   :  { %2113 = vmatprep.subr.bf16.mxu0 %v7809_v1  ;;  %v873_v29 = vpack.c.bf16 %v271_v26, %v264_v25  ;;  %v404_v25 = vld [vmem:[#allocation3 + $0x930] sm:$0xff]  ;;  %v411_v26 = vld [vmem:[#allocation3 + $0x968] sm:$0xff] }
  0xbd   :  { %1727 = vmatmul.mubr.bf16.gmra.mrb[4].mxu0 %v803_v31  ;;  %v278_v31 = vld [vmem:[#allocation3 + $0x540] sm:$0xff] }
  0xbe   :  { %1734 = vmatprep.mubr.bf16.mxu0 %v811_v32  ;;  %v285_v32 = vld [vmem:[#allocation3 + $0x578] sm:$0xff] }
  0xbf   :  { %v880_v35 = vpack.c.bf16 %v285_v32, %v278_v31  ;;  %v7591_v31 = vld [vmem:[#allocation6 + $0xa0] sm:$0xff]   ;;  %v418_v32 = vld [vmem:[#allocation3 + $0x9a0] sm:$0xff] }
  0xc5   :  { %1735 = vmatmul.mubr.bf16.gmra.mrb[8].mxu0 %v810_v37  ;;  %v7588_v37 = vld [vmem:[#allocation6 + $0x88] sm:$0xff]  }
  0xc6   :  { %1742 = vmatprep.mubr.bf16.mxu0 %v818_v38  ;;  %v292_v38 = vld [vmem:[#allocation3 + $0x5b0] sm:$0xff]  ;;  %2114 = vmatpush1.bf16.msra.mxu0 %v7588_v37 }
  0xc7   :  { %2115 = vmatprep.subr.bf16.mxu0 %v7809_v1  ;;  %v887_v42 = vpack.c.bf16 %v299_v39, %v292_v38  ;;  %v432_v38 = vld [vmem:[#allocation3 + $0xa10] sm:$0xff]  ;;  %v439_v39 = vld [vmem:[#allocation3 + $0xa48] sm:$0xff] }
  0xcd   :  { %1743 = vmatmul.mubr.bf16.gmra.mrb[12].mxu0 %v817_v43  ;;  %v895_v43 = vpack.c.bf16 %v314_v41, %v307_v40  ;;  %v447_v40 = vld [vmem:[#allocation3 + $0xa88] sm:$0xff]  ;;  %v454_v41 = vld [vmem:[#allocation3 + $0xac0] sm:$0xff] }
  0xce   :  { %1750 = vmatprep.mubr.bf16.mxu0 %v825_v44  ;;  %v306_v44 = vld [vmem:[#allocation3 + $0x620] sm:$0xff] }
  0xcf   :  { %v894_v48 = vpack.c.bf16 %v313_v45, %v306_v44  ;;  %v446_v44 = vld [vmem:[#allocation3 + $0xa80] sm:$0xff]  ;;  %v453_v45 = vld [vmem:[#allocation3 + $0xab8] sm:$0xff] }
  0xd5   :  { %1751 = vmatmul.mubr.bf16.gmra.mrb[16].mxu0 %v824_v49  ;;  %v902_v49 = vpack.c.bf16 %v328_v47, %v321_v46  ;;  %v461_v46 = vld [vmem:[#allocation3 + $0xaf8] sm:$0xff]  ;;  %v468_v47 = vld [vmem:[#allocation3 + $0xb30] sm:$0xff] }
  0xd6   :  { %1758 = vmatprep.mubr.bf16.mxu0 %v832_v50  ;;  %v320_v50 = vld [vmem:[#allocation3 + $0x690] sm:$0xff] }
  0xd7   :  { %v901_v54 = vpack.c.bf16 %v327_v51, %v320_v50  ;;  %v7592_v50 = vld [vmem:[#allocation6 + $0xa8] sm:$0xff]   ;;  %v460_v51 = vld [vmem:[#allocation3 + $0xaf0] sm:$0xff] }
  0xdd   :  { %1759 = vmatmul.mubr.bf16.gmra.mrb[20].mxu0 %v831_v55  ;;  %v909_v55 = vpack.c.bf16 %v342_v53, %v335_v52  ;;  %v467_v52 = vld [vmem:[#allocation3 + $0xb28] sm:$0xff] }
  0xde   :  { %1766 = vmatprep.mubr.bf16.mxu0 %v839_v56  ;;  %v7589_v56 = vld [vmem:[#allocation6 + $0x90] sm:$0xff]   ;;  %v475_v53 = vld [vmem:[#allocation3 + $0xb68] sm:$0xff] }
  0xdf   :  { %2116 = vmatpush1.bf16.msra.mxu0 %v7589_v56 }
  0xe0   :  { %2117 = vmatprep.subr.bf16.mxu0 %v7809_v1 }
  0xe3   :  { %2118 = vmatpush1.bf16.msra.mxu0 %v7590_v12 }
  0xe4   :  { %2119 = vmatprep.subr.bf16.mxu0 %v7809_v1 }
  0xe5   :  { %1767 = vmatmul.mubr.bf16.gmra.mrb[24].mxu0 %v838_v61  ;;  %v908_v61 = vpack.c.bf16 %v341_v58, %v334_v57  ;;  %v474_v57 = vld [vmem:[#allocation3 + $0xb60] sm:$0xff]  ;;  %v481_v58 = vld [vmem:[#allocation3 + $0xb98] sm:$0xff] }
  0xe6   :  { %1774 = vmatprep.mubr.bf16.mxu0 %v846_v62  ;;  %v916_v62 = vpack.c.bf16 %v356_v60, %v349_v59  ;;  %v489_v59 = vld [vmem:[#allocation3 + $0xbd8] sm:$0xff]  ;;  %v496_v60 = vld [vmem:[#allocation3 + $0xc10] sm:$0xff] }
  0xe7   :  { %2120 = vmatpush1.bf16.msra.mxu0 %v7591_v31  ;;  %v7598_v31 = vld [vmem:[#allocation6 + $0xd8] sm:$0xff]  }
  0xe8   :  { %2121 = vmatprep.subr.bf16.mxu0 %v7809_v1 }
  0xeb   :  { %2122 = vmatpush1.bf16.msra.mxu0 %v7592_v50 }
  0xec   :  { %2123 = vmatprep.subr.bf16.mxu0 %v7809_v1 }
  0xed   :  { %1775 = vmatmul.mubr.bf16.gmra.mrb[28].mxu0 %v845_v4  ;;  %v915_v4 = vpack.c.bf16 %v355_v0, %v348_v63  ;;  %v488_v63 = vld [vmem:[#allocation3 + $0xbd0] sm:$0xff]  ;;  %v495_v0 = vld [vmem:[#allocation3 + $0xc08] sm:$0xff] }
  0xee   :  { %1782 = vmatprep.mubr.bf16.mxu0 %v853_v5  ;;  %v923_v5 = vpack.c.bf16 %v370_v3, %v363_v2  ;;  %v503_v2 = vld [vmem:[#allocation3 + $0xc48] sm:$0xff]  ;;  %v510_v3 = vld [vmem:[#allocation3 + $0xc80] sm:$0xff] }
  0xf5   :  { %1783 = vmatmul.mubr.bf16.gmra.mrb[32].mxu0 %v852_v10  ;;  %v922_v10 = vpack.c.bf16 %v369_v7, %v362_v6  ;;  %v7593_v6 = vld [vmem:[#allocation6 + $0xb0] sm:$0xff]  }
  0xf6   :  { %1790 = vmatprep.mubr.bf16.mxu0 %v860_v11  ;;  %v930_v11 = vpack.c.bf16 %v384_v9, %v377_v8  ;;  %v502_v7 = vld [vmem:[#allocation3 + $0xc40] sm:$0xff]  ;;  %v509_v8 = vld [vmem:[#allocation3 + $0xc78] sm:$0xff]  ;;  %2124 = vmatpush1.bf16.msra.mxu0 %v7593_v6 }
  0xf7   :  { %v517_v9 = vld [vmem:[#allocation3 + $0xcb8] sm:$0xff]  ;;  %2125 = vmatprep.subr.bf16.mxu0 %v7809_v1 }
  0xfd   :  { %1791 = vmatmul.mubr.bf16.gmra.mrb[36].mxu0 %v859_v16  ;;  %v398_v16 = vld [vmem:[#allocation3 + $0x900] sm:$0xff] }
  0xfe   :  { %1798 = vmatprep.mubr.bf16.mxu0 %v867_v17  ;;  %v929_v17 = vpack.c.bf16 %v383_v14, %v376_v13  ;;  %v937_v18 = vpack.c.bf16 %v398_v16, %v391_v15  ;;  %v7594_v13 = vld [vmem:[#allocation6 + $0xb8] sm:$0xff]   ;;  %v516_v14 = vld [vmem:[#allocation3 + $0xcb0] sm:$0xff] }
  0xff   :  { %v523_v15 = vld [vmem:[#allocation3 + $0xce8] sm:$0xff]  ;;  %2126 = vmatpush1.bf16.msra.mxu0 %v7594_v13  ;;  %v642_v13 = vld [vmem:[#allocation3 + $0x10a0] sm:$0xff] }
 0x100   :  { %v531_v16 = vld [vmem:[#allocation3 + $0xd28] sm:$0xff]  ;;  %2127 = vmatprep.subr.bf16.mxu0 %v7809_v1 }
 0x105   :  { %1799 = vmatmul.mubr.bf16.gmra.mrb[40].mxu0 %v866_v23  ;;  %v936_v23 = vpack.c.bf16 %v397_v20, %v390_v19  ;;  %v7595_v20 = vld [vmem:[#allocation6 + $0xc0] sm:$0xff]  }
 0x106   :  { %1806 = vmatprep.mubr.bf16.mxu0 %v874_v24  ;;  %v944_v24 = vpack.c.bf16 %v412_v22, %v405_v21  ;;  %v530_v21 = vld [vmem:[#allocation3 + $0xd20] sm:$0xff]  ;;  %v537_v22 = vld [vmem:[#allocation3 + $0xd58] sm:$0xff]  ;;  %2128 = vmatpush1.bf16.msra.mxu0 %v7595_v20  ;;  %v663_v20 = vld [vmem:[#allocation3 + $0x1148] sm:$0xff] }
 0x107   :  { %2129 = vmatprep.subr.bf16.mxu0 %v7809_v1 }
 0x10d   :  { %1807 = vmatmul.mubr.bf16.gmra.mrb[44].mxu0 %v873_v29  ;;  %v943_v29 = vpack.c.bf16 %v411_v26, %v404_v25  ;;  %v552_v25 = vld [vmem:[#allocation3 + $0xdd0] sm:$0xff]  ;;  %v1006_v26 = vpack.c.bf16 %v537_v22, %v530_v21  ;;  %v671_v21 = vld [vmem:[#allocation3 + $0x1188] sm:$0xff]  ;;  %v678_v22 = vld [vmem:[#allocation3 + $0x11c0] sm:$0xff] }
 0x10e   :  { %1814 = vmatprep.mubr.bf16.mxu0 %v881_v30  ;;  %v951_v30 = vpack.c.bf16 %v426_v28, %v419_v27  ;;  %v7597_v28 = vld [vmem:[#allocation6 + $0xd0] sm:$0xff]  }
 0x115   :  { %1815 = vmatmul.mubr.bf16.gmra.mrb[48].mxu0 %v880_v35  ;;  %v440_v35 = vld [vmem:[#allocation3 + $0xa50] sm:$0xff] }
 0x116   :  { %1822 = vmatprep.mubr.bf16.mxu0 %v888_v36  ;;  %v950_v36 = vpack.c.bf16 %v425_v33, %v418_v32  ;;  %v958_v37 = vpack.c.bf16 %v440_v35, %v433_v34  ;;  %v559_v32 = vld [vmem:[#allocation3 + $0xe08] sm:$0xff]  ;;  %v566_v33 = vld [vmem:[#allocation3 + $0xe40] sm:$0xff] }
 0x117   :  { %v1021_v35 = vpack.c.bf16 %v566_v33, %v559_v32  ;;  %v691_v32 = vld [vmem:[#allocation3 + $0x1228] sm:$0xff] }
 0x118   :  { %v699_v33 = vld [vmem:[#allocation3 + $0x1268] sm:$0xff] }
 0x11d   :  { %1823 = vmatmul.mubr.bf16.gmra.mrb[52].mxu0 %v887_v42  ;;  %v957_v42 = vpack.c.bf16 %v439_v39, %v432_v38  ;;  %v565_v38 = vld [vmem:[#allocation3 + $0xe38] sm:$0xff] }
 0x11e   :  { %1830 = vmatprep.mubr.bf16.mxu0 %v895_v43  ;;  %v965_v43 = vpack.c.bf16 %v454_v41, %v447_v40  ;;  %v7600_v39 = vld [vmem:[#allocation6 + $0xe8] sm:$0xff]   ;;  %v580_v41 = vld [vmem:[#allocation3 + $0xeb0] sm:$0xff] }
 0x11f   :  { %v573_v40 = vld [vmem:[#allocation3 + $0xe78] sm:$0xff] }
 0x125   :  { %1831 = vmatmul.mubr.bf16.gmra.mrb[56].mxu0 %v894_v48  ;;  %v964_v48 = vpack.c.bf16 %v453_v45, %v446_v44  ;;  %v7601_v44 = vld [vmem:[#allocation6 + $0xf0] sm:$0xff]   ;;  %v572_v45 = vld [vmem:[#allocation3 + $0xe70] sm:$0xff] }
 0x126   :  { %1838 = vmatprep.mubr.bf16.mxu0 %v902_v49  ;;  %v972_v49 = vpack.c.bf16 %v468_v47, %v461_v46  ;;  %v579_v46 = vld [vmem:[#allocation3 + $0xea8] sm:$0xff] }
 0x127   :  { %v7602_v47 = vld [vmem:[#allocation6 + $0xf8] sm:$0xff]   ;;  %v1027_v50 = vpack.c.bf16 %v579_v46, %v572_v45  ;;  %v734_v46 = vld [vmem:[#allocation3 + $0x1380] sm:$0xff] }
 0x128   :  { %v727_v45 = vld [vmem:[#allocation3 + $0x1348] sm:$0xff] }
 0x12d   :  { %1839 = vmatmul.mubr.bf16.gmra.mrb[60].mxu0 %v901_v54  ;;  %v482_v54 = vld [vmem:[#allocation3 + $0xba0] sm:$0xff] }
 0x12e   :  { %1846 = vmatprep.mubr.bf16.mxu0 %v909_v55  ;;  %v971_v55 = vpack.c.bf16 %v467_v52, %v460_v51  ;;  %v979_v56 = vpack.c.bf16 %v482_v54, %v475_v53  ;;  %v586_v52 = vld [vmem:[#allocation3 + $0xee0] sm:$0xff]  ;;  %v593_v53 = vld [vmem:[#allocation3 + $0xf18] sm:$0xff] }
 0x12f   :  { %v601_v54 = vld [vmem:[#allocation3 + $0xf58] sm:$0xff] }
 0x135   :  { %1847 = vmatmul.mubr.bf16.gmra.mrb[64].mxu0 %v908_v61  ;;  %v978_v61 = vpack.c.bf16 %v481_v58, %v474_v57  ;;  %v600_v58 = vld [vmem:[#allocation3 + $0xf50] sm:$0xff] }
 0x136   :  { %1854 = vmatprep.mubr.bf16.mxu0 %v916_v62  ;;  %v986_v62 = vpack.c.bf16 %v496_v60, %v489_v59  ;;  %v607_v59 = vld [vmem:[#allocation3 + $0xf88] sm:$0xff] }
 0x137   :  { %v615_v60 = vld [vmem:[#allocation3 + $0xfc8] sm:$0xff] }
 0x13d   :  { %1855 = vmatmul.mubr.bf16.gmra.mrb[68].mxu0 %v915_v4  ;;  %v985_v4 = vpack.c.bf16 %v495_v0, %v488_v63  ;;  %v614_v0 = vld [vmem:[#allocation3 + $0xfc0] sm:$0xff] }
 0x13e   :  { %1862 = vmatprep.mubr.bf16.mxu0 %v923_v5  ;;  %v993_v5 = vpack.c.bf16 %v510_v3, %v503_v2  ;;  %v621_v2 = vld [vmem:[#allocation3 + $0xff8] sm:$0xff] }
 0x13f   :  { %v629_v3 = vld [vmem:[#allocation3 + $0x1038] sm:$0xff] }
 0x145   :  { %1863 = vmatmul.mubr.bf16.gmra.mrb[72].mxu0 %v922_v10  ;;  %v524_v10 = vld [vmem:[#allocation3 + $0xcf0] sm:$0xff] }
 0x146   :  { %1870 = vmatprep.mubr.bf16.mxu0 %v930_v11  ;;  %v992_v11 = vpack.c.bf16 %v509_v8, %v502_v7  ;;  %v1000_v12 = vpack.c.bf16 %v524_v10, %v517_v9  ;;  %v628_v7 = vld [vmem:[#allocation3 + $0x1030] sm:$0xff]  ;;  %v635_v8 = vld [vmem:[#allocation3 + $0x1068] sm:$0xff]  ;;  %v650_v10 = vld [vmem:[#allocation3 + $0x10e0] sm:$0xff] }
 0x147   :  { %v643_v9 = vld [vmem:[#allocation3 + $0x10a8] sm:$0xff] }
 0x14d   :  { %1871 = vmatmul.mubr.bf16.gmra.mrb[76].mxu0 %v929_v17  ;;  %v538_v17 = vld [vmem:[#allocation3 + $0xd60] sm:$0xff] }
 0x14e   :  { %1878 = vmatprep.mubr.bf16.mxu0 %v937_v18  ;;  %v999_v18 = vpack.c.bf16 %v523_v15, %v516_v14  ;;  %v1007_v19 = vpack.c.bf16 %v538_v17, %v531_v16  ;;  %v649_v14 = vld [vmem:[#allocation3 + $0x10d8] sm:$0xff]  ;;  %v664_v16 = vld [vmem:[#allocation3 + $0x1150] sm:$0xff] }
 0x14f   :  { %v657_v15 = vld [vmem:[#allocation3 + $0x1118] sm:$0xff]  ;;  %v1062_v17 = vpack.c.bf16 %v649_v14, %v642_v13  ;;  %v120_v13 = vld [vmem:[#allocation3 + $0x50] sm:$0xff] }
 0x155   :  { %1879 = vmatmul.mubr.bf16.gmra.mrb[80].mxu0 %v936_v23  ;;  %v7596_v23 = vld [vmem:[#allocation6 + $0xc8] sm:$0xff]  }
 0x156   :  { %1886 = vmatprep.mubr.bf16.mxu0 %v944_v24  ;;  %v545_v24 = vld [vmem:[#allocation3 + $0xd98] sm:$0xff]  ;;  %2130 = vmatpush1.bf16.msra.mxu0 %v7596_v23 }
 0x157   :  { %v1014_v27 = vpack.c.bf16 %v552_v25, %v545_v24  ;;  %2131 = vmatprep.subr.bf16.mxu0 %v7809_v1  ;;  %v1077_v24 = vpack.c.bf16 %v678_v22, %v671_v21  ;;  %v670_v25 = vld [vmem:[#allocation3 + $0x1180] sm:$0xff] }
 0x158   :  { %v126_v22 = vld [vmem:[#allocation3 + $0x80] sm:$0xff] }
 0x15a   :  { %2132 = vmatpush1.bf16.msra.mxu0 %v7597_v28  ;;  %v692_v28 = vld [vmem:[#allocation3 + $0x1230] sm:$0xff] }
 0x15b   :  { %2133 = vmatprep.subr.bf16.mxu0 %v7809_v1 }
 0x15d   :  { %1887 = vmatmul.mubr.bf16.gmra.mrb[84].mxu0 %v943_v29  ;;  %v544_v29 = vld [vmem:[#allocation3 + $0xd90] sm:$0xff] }
 0x15e   :  { %1894 = vmatprep.mubr.bf16.mxu0 %v951_v30  ;;  %v551_v30 = vld [vmem:[#allocation3 + $0xdc8] sm:$0xff]  ;;  %2134 = vmatpush1.bf16.msra.mxu0 %v7598_v31  ;;  %v684_v31 = vld [vmem:[#allocation3 + $0x11f0] sm:$0xff] }
 0x15f   :  { %v1013_v34 = vpack.c.bf16 %v551_v30, %v544_v29  ;;  %2135 = vmatprep.subr.bf16.mxu0 %v7809_v1 }
 0x165   :  { %1895 = vmatmul.mubr.bf16.gmra.mrb[88].mxu0 %v950_v36  ;;  %v7599_v36 = vld [vmem:[#allocation6 + $0xe0] sm:$0xff]  }
 0x166   :  { %1902 = vmatprep.mubr.bf16.mxu0 %v958_v37  ;;  %v558_v37 = vld [vmem:[#allocation3 + $0xe00] sm:$0xff]  ;;  %2136 = vmatpush1.bf16.msra.mxu0 %v7599_v36 }
 0x167   :  { %2137 = vmatprep.subr.bf16.mxu0 %v7809_v1 }
 0x16a   :  { %2138 = vmatpush1.bf16.msra.mxu0 %v7600_v39  ;;  %v713_v39 = vld [vmem:[#allocation3 + $0x12d8] sm:$0xff] }
 0x16b   :  { %2139 = vmatprep.subr.bf16.mxu0 %v7809_v1 }
 0x16d   :  { %1903 = vmatmul.mubr.bf16.gmra.mrb[92].mxu0 %v957_v42  ;;  %v1020_v42 = vpack.c.bf16 %v565_v38, %v558_v37  ;;  %v698_v37 = vld [vmem:[#allocation3 + $0x1260] sm:$0xff]  ;;  %v705_v38 = vld [vmem:[#allocation3 + $0x1298] sm:$0xff] }
 0x16e   :  { %1910 = vmatprep.mubr.bf16.mxu0 %v965_v43  ;;  %v1028_v43 = vpack.c.bf16 %v580_v41, %v573_v40  ;;  %2140 = vmatpush1.bf16.msra.mxu0 %v7601_v44  ;;  %v720_v40 = vld [vmem:[#allocation3 + $0x1310] sm:$0xff]  ;;  %v1090_v41 = vpack.c.bf16 %v705_v38, %v698_v37  ;;  %v719_v44 = vld [vmem:[#allocation3 + $0x1308] sm:$0xff] }
 0x16f   :  { %2141 = vmatprep.subr.bf16.mxu0 %v7809_v1  ;;  %v176_v37 = vld [vmem:[#allocation3 + $0x210] sm:$0xff] }
 0x172   :  { %2142 = vmatpush1.bf16.msra.mxu0 %v7602_v47 }
 0x173   :  { %2536 = vmatprep.subr.bf16.mxu0 %v7809_v1 }
 0x175   :  { %1911 = vmatmul.mubr.bf16.gmra.mrb[96].mxu0 %v964_v48  ;;  %v587_v48 = vld [vmem:[#allocation3 + $0xee8] sm:$0xff] }
 0x176   :  { %1918 = vmatprep.mubr.bf16.mxu0 %v972_v49  ;;  %v594_v49 = vld [vmem:[#allocation3 + $0xf20] sm:$0xff] }
 0x177   :  { %v1035_v51 = vpack.c.bf16 %v594_v49, %v587_v48  ;;  %v1105_v48 = vpack.c.bf16 %v734_v46, %v727_v45  ;;  %v726_v49 = vld [vmem:[#allocation3 + $0x1340] sm:$0xff] }
 0x178   :  { %v182_v46 = vld [vmem:[#allocation3 + $0x240] sm:$0xff] }
 0x17d   :  { %1919 = vmatmul.mubr.bf16.gmra.mrb[100].mxu0 %v971_v55  ;;  %v608_v55 = vld [vmem:[#allocation3 + $0xf90] sm:$0xff] }
 0x17e   :  { %1926 = vmatprep.mubr.bf16.mxu0 %v979_v56  ;;  %v1034_v56 = vpack.c.bf16 %v593_v53, %v586_v52  ;;  %v1042_v57 = vpack.c.bf16 %v608_v55, %v601_v54  ;;  %v748_v52 = vld [vmem:[#allocation3 + $0x13f0] sm:$0xff] }
 0x17f   :  { %v740_v55 = vld [vmem:[#allocation3 + $0x13b0] sm:$0xff] }
 0x185   :  { %1927 = vmatmul.mubr.bf16.gmra.mrb[104].mxu0 %v978_v61  ;;  %v622_v61 = vld [vmem:[#allocation3 + $0x1000] sm:$0xff] }
 0x186   :  { %1934 = vmatprep.mubr.bf16.mxu0 %v986_v62  ;;  %v1041_v62 = vpack.c.bf16 %v607_v59, %v600_v58  ;;  %v1049_v63 = vpack.c.bf16 %v622_v61, %v615_v60  ;;  %v762_v58 = vld [vmem:[#allocation3 + $0x1460] sm:$0xff] }
 0x187   :  { %v754_v61 = vld [vmem:[#allocation3 + $0x1420] sm:$0xff] }
 0x18d   :  { %1935 = vmatmul.mubr.bf16.gmra.mrb[108].mxu0 %v985_v4  ;;  %v636_v4 = vld [vmem:[#allocation3 + $0x1070] sm:$0xff] }
 0x18e   :  { %1942 = vmatprep.mubr.bf16.mxu0 %v993_v5  ;;  %v1048_v5 = vpack.c.bf16 %v621_v2, %v614_v0  ;;  %v1056_v6 = vpack.c.bf16 %v636_v4, %v629_v3  ;;  %v776_v0 = vld [vmem:[#allocation3 + $0x14d0] sm:$0xff] }
 0x18f   :  { %v768_v4 = vld [vmem:[#allocation3 + $0x1490] sm:$0xff] }
 0x195   :  { %1943 = vmatmul.mubr.bf16.gmra.mrb[112].mxu0 %v992_v11  ;;  %v1055_v11 = vpack.c.bf16 %v635_v8, %v628_v7  ;;  %v790_v7 = vld [vmem:[#allocation3 + $0x1540] sm:$0xff] }
 0x196   :  { %1950 = vmatprep.mubr.bf16.mxu0 %v1000_v12  ;;  %v1063_v12 = vpack.c.bf16 %v650_v10, %v643_v9  ;;  %v782_v10 = vld [vmem:[#allocation3 + $0x1500] sm:$0xff] }
 0x19d   :  { %1951 = vmatmul.mubr.bf16.gmra.mrb[116].mxu0 %v999_v18  ;;  %v1070_v18 = vpack.c.bf16 %v664_v16, %v657_v15  ;;  %v112_v16 = vld [vmem:[#allocation3 + $0x10] sm:$0xff] }
 0x19e   :  { %1958 = vmatprep.mubr.bf16.mxu0 %v1007_v19  ;;  %v656_v19 = vld [vmem:[#allocation3 + $0x1110] sm:$0xff] }
 0x19f   :  { %v1069_v23 = vpack.c.bf16 %v663_v20, %v656_v19  ;;  %v134_v19 = vld [vmem:[#allocation3 + $0xc0] sm:$0xff] }
 0x1a5   :  { %1959 = vmatmul.mubr.bf16.gmra.mrb[120].mxu0 %v1006_v26  ;;  %v677_v26 = vld [vmem:[#allocation3 + $0x11b8] sm:$0xff] }
 0x1a6   :  { %1966 = vmatprep.mubr.bf16.mxu0 %v1014_v27  ;;  %v685_v27 = vld [vmem:[#allocation3 + $0x11f8] sm:$0xff]  ;;  %v1076_v29 = vpack.c.bf16 %v677_v26, %v670_v25  ;;  %v148_v25 = vld [vmem:[#allocation3 + $0x130] sm:$0xff] }
 0x1a7   :  { %v1084_v30 = vpack.c.bf16 %v692_v28, %v685_v27  ;;  %v140_v28 = vld [vmem:[#allocation3 + $0xf0] sm:$0xff] }
 0x1ad   :  { %1967 = vmatmul.mubr.bf16.gmra.mrb[124].mxu0 %v1013_v34  ;;  %v706_v34 = vld [vmem:[#allocation3 + $0x12a0] sm:$0xff] }
 0x1ae   :  { %1974 = vmatprep.mubr.bf16.mxu0 %v1021_v35  ;;  %v1083_v35 = vpack.c.bf16 %v691_v32, %v684_v31  ;;  %v1091_v36 = vpack.c.bf16 %v706_v34, %v699_v33  ;;  %v162_v31 = vld [vmem:[#allocation3 + $0x1a0] sm:$0xff] }
 0x1af   :  { %v154_v34 = vld [vmem:[#allocation3 + $0x160] sm:$0xff] }
 0x1b5   :  { %1975 = vmatmul.mubr.bf16.gmra.mrb[128].mxu0 %v1020_v42  ;;  %v1098_v42 = vpack.c.bf16 %v720_v40, %v713_v39  ;;  %v168_v40 = vld [vmem:[#allocation3 + $0x1d0] sm:$0xff] }
 0x1b6   :  { %1982 = vmatprep.mubr.bf16.mxu0 %v1028_v43  ;;  %v712_v43 = vld [vmem:[#allocation3 + $0x12d0] sm:$0xff] }
 0x1b7   :  { %v1097_v47 = vpack.c.bf16 %v719_v44, %v712_v43  ;;  %v190_v43 = vld [vmem:[#allocation3 + $0x280] sm:$0xff] }
 0x1bd   :  { %1983 = vmatmul.mubr.bf16.gmra.mrb[132].mxu0 %v1027_v50  ;;  %v733_v50 = vld [vmem:[#allocation3 + $0x1378] sm:$0xff] }
 0x1be   :  { %1990 = vmatprep.mubr.bf16.mxu0 %v1035_v51  ;;  %v741_v51 = vld [vmem:[#allocation3 + $0x13b8] sm:$0xff]  ;;  %v1104_v53 = vpack.c.bf16 %v733_v50, %v726_v49  ;;  %v204_v49 = vld [vmem:[#allocation3 + $0x2f0] sm:$0xff] }
 0x1bf   :  { %v1112_v54 = vpack.c.bf16 %v748_v52, %v741_v51  ;;  %v196_v52 = vld [vmem:[#allocation3 + $0x2b0] sm:$0xff] }
 0x1c5   :  { %1991 = vmatmul.mubr.bf16.gmra.mrb[136].mxu0 %v1034_v56  ;;  %v747_v56 = vld [vmem:[#allocation3 + $0x13e8] sm:$0xff] }
 0x1c6   :  { %1998 = vmatprep.mubr.bf16.mxu0 %v1042_v57  ;;  %v755_v57 = vld [vmem:[#allocation3 + $0x1428] sm:$0xff]  ;;  %v1111_v59 = vpack.c.bf16 %v747_v56, %v740_v55  ;;  %v218_v55 = vld [vmem:[#allocation3 + $0x360] sm:$0xff] }
 0x1c7   :  { %v1119_v60 = vpack.c.bf16 %v762_v58, %v755_v57  ;;  %v210_v58 = vld [vmem:[#allocation3 + $0x320] sm:$0xff] }
 0x1cd   :  { %1999 = vmatmul.mubr.bf16.gmra.mrb[140].mxu0 %v1041_v62  ;;  %v761_v62 = vld [vmem:[#allocation3 + $0x1458] sm:$0xff] }
 0x1ce   :  { %2006 = vmatprep.mubr.bf16.mxu0 %v1049_v63  ;;  %v769_v63 = vld [vmem:[#allocation3 + $0x1498] sm:$0xff]  ;;  %v1118_v2 = vpack.c.bf16 %v761_v62, %v754_v61  ;;  %v232_v61 = vld [vmem:[#allocation3 + $0x3d0] sm:$0xff] }
 0x1cf   :  { %v1126_v3 = vpack.c.bf16 %v776_v0, %v769_v63  ;;  %v224_v0 = vld [vmem:[#allocation3 + $0x390] sm:$0xff] }
 0x1d5   :  { %2007 = vmatmul.mubr.bf16.gmra.mrb[144].mxu0 %v1048_v5  ;;  %v775_v5 = vld [vmem:[#allocation3 + $0x14c8] sm:$0xff] }
 0x1d6   :  { %2014 = vmatprep.mubr.bf16.mxu0 %v1056_v6  ;;  %v783_v6 = vld [vmem:[#allocation3 + $0x1508] sm:$0xff]  ;;  %v1125_v8 = vpack.c.bf16 %v775_v5, %v768_v4  ;;  %v246_v4 = vld [vmem:[#allocation3 + $0x440] sm:$0xff] }
 0x1d7   :  { %v1133_v9 = vpack.c.bf16 %v790_v7, %v783_v6  ;;  %v238_v7 = vld [vmem:[#allocation3 + $0x400] sm:$0xff] }
 0x1dd   :  { %2015 = vmatmul.mubr.bf16.gmra.mrb[148].mxu0 %v1055_v11  ;;  %v789_v11 = vld [vmem:[#allocation3 + $0x1538] sm:$0xff] }
 0x1de   :  { %2022 = vmatprep.mubr.bf16.mxu0 %v1063_v12  ;;  %v113_v12 = vld [vmem:[#allocation3 + $0x18] sm:$0xff]  ;;  %v1132_v14 = vpack.c.bf16 %v789_v11, %v782_v10  ;;  %v260_v10 = vld [vmem:[#allocation3 + $0x4b0] sm:$0xff] }
 0x1df   :  { %v799_v15 = vpack.c.bf16 %v120_v13, %v113_v12  ;;  %v7603_v13 = vld [vmem:[#allocation6 + $0x100] sm:$0xff]  }
 0x1e5   :  { %2023 = vmatmul.mubr.bf16.gmra.mrb[152].mxu0 %v1062_v17  ;;  %v119_v17 = vld [vmem:[#allocation3 + $0x48] sm:$0xff] }
 0x1e6   :  { %2030 = vmatprep.mubr.bf16.mxu0 %v1070_v18  ;;  %v127_v18 = vld [vmem:[#allocation3 + $0x88] sm:$0xff]  ;;  %v798_v20 = vpack.c.bf16 %v119_v17, %v112_v16  ;;  %v274_v17 = vld [vmem:[#allocation3 + $0x520] sm:$0xff] }
 0x1e7   :  { %v806_v21 = vpack.c.bf16 %v134_v19, %v127_v18  ;;  %v267_v16 = vld [vmem:[#allocation3 + $0x4e8] sm:$0xff] }
 0x1e8   :  { %v876_v19 = vpack.c.bf16 %v274_v17, %v267_v16  ;;  %v407_v16 = vld [vmem:[#allocation3 + $0x948] sm:$0xff]  ;;  %v414_v17 = vld [vmem:[#allocation3 + $0x980] sm:$0xff] }
 0x1ed   :  { %2031 = vmatmul.mubr.bf16.gmra.mrb[156].mxu0 %v1069_v23  ;;  %v133_v23 = vld [vmem:[#allocation3 + $0xb8] sm:$0xff] }
 0x1ee   :  { %2038 = vmatprep.mubr.bf16.mxu0 %v1077_v24  ;;  %v141_v24 = vld [vmem:[#allocation3 + $0xf8] sm:$0xff]  ;;  %v805_v26 = vpack.c.bf16 %v133_v23, %v126_v22  ;;  %v288_v23 = vld [vmem:[#allocation3 + $0x590] sm:$0xff] }
 0x1ef   :  { %v813_v27 = vpack.c.bf16 %v148_v25, %v141_v24  ;;  %v281_v22 = vld [vmem:[#allocation3 + $0x558] sm:$0xff] }
 0x1f0   :  { %v883_v25 = vpack.c.bf16 %v288_v23, %v281_v22  ;;  %v421_v22 = vld [vmem:[#allocation3 + $0x9b8] sm:$0xff]  ;;  %v428_v23 = vld [vmem:[#allocation3 + $0x9f0] sm:$0xff] }
 0x1f5   :  { %2039 = vmatmul.mubr.bf16.gmra.mrb[160].mxu0 %v1076_v29  ;;  %v147_v29 = vld [vmem:[#allocation3 + $0x128] sm:$0xff] }
 0x1f6   :  { %2046 = vmatprep.mubr.bf16.mxu0 %v1084_v30  ;;  %v155_v30 = vld [vmem:[#allocation3 + $0x168] sm:$0xff]  ;;  %v812_v32 = vpack.c.bf16 %v147_v29, %v140_v28  ;;  %v302_v29 = vld [vmem:[#allocation3 + $0x600] sm:$0xff] }
 0x1f7   :  { %v820_v33 = vpack.c.bf16 %v162_v31, %v155_v30  ;;  %v295_v28 = vld [vmem:[#allocation3 + $0x5c8] sm:$0xff] }
 0x1f8   :  { %v890_v31 = vpack.c.bf16 %v302_v29, %v295_v28  ;;  %v427_v28 = vld [vmem:[#allocation3 + $0x9e8] sm:$0xff] }
 0x1f9   :  { %v435_v29 = vld [vmem:[#allocation3 + $0xa28] sm:$0xff] }
 0x1fd   :  { %2047 = vmatmul.mubr.bf16.gmra.mrb[164].mxu0 %v1083_v35  ;;  %v161_v35 = vld [vmem:[#allocation3 + $0x198] sm:$0xff] }
 0x1fe   :  { %2054 = vmatprep.mubr.bf16.mxu0 %v1091_v36  ;;  %v169_v36 = vld [vmem:[#allocation3 + $0x1d8] sm:$0xff]  ;;  %v819_v38 = vpack.c.bf16 %v161_v35, %v154_v34 }
 0x1ff   :  { %v827_v39 = vpack.c.bf16 %v176_v37, %v169_v36  ;;  %v301_v34 = vld [vmem:[#allocation3 + $0x5f8] sm:$0xff]  ;;  %v316_v36 = vld [vmem:[#allocation3 + $0x670] sm:$0xff] }
 0x200   :  { %v309_v35 = vld [vmem:[#allocation3 + $0x638] sm:$0xff] }
 0x205   :  { %2055 = vmatmul.mubr.bf16.gmra.mrb[168].mxu0 %v1090_v41  ;;  %v175_v41 = vld [vmem:[#allocation3 + $0x208] sm:$0xff] }
 0x206   :  { %2062 = vmatprep.mubr.bf16.mxu0 %v1098_v42  ;;  %v183_v42 = vld [vmem:[#allocation3 + $0x248] sm:$0xff]  ;;  %v826_v44 = vpack.c.bf16 %v175_v41, %v168_v40 }
 0x207   :  { %v834_v45 = vpack.c.bf16 %v190_v43, %v183_v42  ;;  %v315_v40 = vld [vmem:[#allocation3 + $0x668] sm:$0xff]  ;;  %v330_v42 = vld [vmem:[#allocation3 + $0x6e0] sm:$0xff] }
 0x208   :  { %v323_v41 = vld [vmem:[#allocation3 + $0x6a8] sm:$0xff] }
 0x20d   :  { %2063 = vmatmul.mubr.bf16.gmra.mrb[172].mxu0 %v1097_v47  ;;  %v189_v47 = vld [vmem:[#allocation3 + $0x278] sm:$0xff] }
 0x20e   :  { %2070 = vmatprep.mubr.bf16.mxu0 %v1105_v48  ;;  %v197_v48 = vld [vmem:[#allocation3 + $0x2b8] sm:$0xff]  ;;  %v833_v50 = vpack.c.bf16 %v189_v47, %v182_v46 }
 0x20f   :  { %v841_v51 = vpack.c.bf16 %v204_v49, %v197_v48  ;;  %v329_v46 = vld [vmem:[#allocation3 + $0x6d8] sm:$0xff]  ;;  %v344_v48 = vld [vmem:[#allocation3 + $0x750] sm:$0xff] }
 0x210   :  { %v337_v47 = vld [vmem:[#allocation3 + $0x718] sm:$0xff] }
 0x215   :  { %2071 = vmatmul.mubr.bf16.gmra.mrb[176].mxu0 %v1104_v53  ;;  %v203_v53 = vld [vmem:[#allocation3 + $0x2e8] sm:$0xff] }
 0x216   :  { %2078 = vmatprep.mubr.bf16.mxu0 %v1112_v54  ;;  %v211_v54 = vld [vmem:[#allocation3 + $0x328] sm:$0xff]  ;;  %v840_v56 = vpack.c.bf16 %v203_v53, %v196_v52  ;;  %v336_v52 = vld [vmem:[#allocation3 + $0x710] sm:$0xff] }
 0x217   :  { %v848_v57 = vpack.c.bf16 %v218_v55, %v211_v54  ;;  %v343_v53 = vld [vmem:[#allocation3 + $0x748] sm:$0xff]  ;;  %v358_v55 = vld [vmem:[#allocation3 + $0x7c0] sm:$0xff] }
 0x218   :  { %v351_v54 = vld [vmem:[#allocation3 + $0x788] sm:$0xff] }
 0x21d   :  { %2079 = vmatmul.mubr.bf16.gmra.mrb[180].mxu0 %v1111_v59  ;;  %v217_v59 = vld [vmem:[#allocation3 + $0x358] sm:$0xff] }
 0x21e   :  { %2086 = vmatprep.mubr.bf16.mxu0 %v1119_v60  ;;  %v225_v60 = vld [vmem:[#allocation3 + $0x398] sm:$0xff]  ;;  %v847_v62 = vpack.c.bf16 %v217_v59, %v210_v58  ;;  %v350_v58 = vld [vmem:[#allocation3 + $0x780] sm:$0xff] }
 0x21f   :  { %v855_v63 = vpack.c.bf16 %v232_v61, %v225_v60  ;;  %v357_v59 = vld [vmem:[#allocation3 + $0x7b8] sm:$0xff]  ;;  %v372_v61 = vld [vmem:[#allocation3 + $0x830] sm:$0xff] }
 0x220   :  { %v365_v60 = vld [vmem:[#allocation3 + $0x7f8] sm:$0xff] }
 0x225   :  { %2087 = vmatmul.mubr.bf16.gmra.mrb[184].mxu0 %v1118_v2  ;;  %v231_v2 = vld [vmem:[#allocation3 + $0x3c8] sm:$0xff] }
 0x226   :  { %2094 = vmatprep.mubr.bf16.mxu0 %v1126_v3  ;;  %v239_v3 = vld [vmem:[#allocation3 + $0x408] sm:$0xff]  ;;  %v854_v5 = vpack.c.bf16 %v231_v2, %v224_v0  ;;  %v364_v0 = vld [vmem:[#allocation3 + $0x7f0] sm:$0xff] }
 0x227   :  { %v862_v6 = vpack.c.bf16 %v246_v4, %v239_v3  ;;  %v371_v2 = vld [vmem:[#allocation3 + $0x828] sm:$0xff]  ;;  %v386_v4 = vld [vmem:[#allocation3 + $0x8a0] sm:$0xff] }
 0x228   :  { %v379_v3 = vld [vmem:[#allocation3 + $0x868] sm:$0xff] }
 0x22d   :  { %2095 = vmatmul.mubr.bf16.gmra.mrb[188].mxu0 %v1125_v8  ;;  %v245_v8 = vld [vmem:[#allocation3 + $0x438] sm:$0xff] }
 0x22e   :  { %2102 = vmatprep.mubr.bf16.mxu0 %v1133_v9  ;;  %v253_v9 = vld [vmem:[#allocation3 + $0x478] sm:$0xff]  ;;  %v861_v11 = vpack.c.bf16 %v245_v8, %v238_v7  ;;  %v7606_v7 = vld [vmem:[#allocation6 + $0x118] sm:$0xff]   ;;  %v378_v8 = vld [vmem:[#allocation3 + $0x860] sm:$0xff] }
 0x22f   :  { %v869_v12 = vpack.c.bf16 %v260_v10, %v253_v9  ;;  %v385_v9 = vld [vmem:[#allocation3 + $0x898] sm:$0xff] }
 0x230   :  { %v393_v10 = vld [vmem:[#allocation3 + $0x8d8] sm:$0xff] }
 0x235   :  { %2103 = vmatmul.mubr.bf16.gmra.mrb[192].mxu0 %v1132_v14  ;;  %v252_v14 = vld [vmem:[#allocation3 + $0x470] sm:$0xff] }
 0x236   :  { %2143 = vmatprep.mubr.bf16.mxu0 %v799_v15  ;;  %v259_v15 = vld [vmem:[#allocation3 + $0x4a8] sm:$0xff] }
 0x237   :  { %v868_v18 = vpack.c.bf16 %v259_v15, %v252_v14  ;;  %v392_v14 = vld [vmem:[#allocation3 + $0x8d0] sm:$0xff]  ;;  %v399_v15 = vld [vmem:[#allocation3 + $0x908] sm:$0xff] }
 0x23d   :  { %2144 = vmatmul.mubr.bf16.vlgmr.msra.gmra.mrb[0].mxu0 %v798_v20  ;;  %v266_v20 = vld [vmem:[#allocation3 + $0x4e0] sm:$0xff] }
 0x23e   :  { %2151 = vmatprep.mubr.bf16.mxu0 %v806_v21  ;;  %2537 = vmatpush1.bf16.msra.mxu0 %v7603_v13  ;;  %v273_v21 = vld [vmem:[#allocation3 + $0x518] sm:$0xff] }
 0x23f   :  { %2538 = vmatprep.subr.bf16.mxu0 %v7809_v1  ;;  %v875_v24 = vpack.c.bf16 %v273_v21, %v266_v20  ;;  %v406_v20 = vld [vmem:[#allocation3 + $0x940] sm:$0xff]  ;;  %v413_v21 = vld [vmem:[#allocation3 + $0x978] sm:$0xff] }
 0x245   :  { %2152 = vmatmul.mubr.bf16.gmra.mrb[4].mxu0 %v805_v26  ;;  %v280_v26 = vld [vmem:[#allocation3 + $0x550] sm:$0xff] }
 0x246   :  { %2159 = vmatprep.mubr.bf16.mxu0 %v813_v27  ;;  %v287_v27 = vld [vmem:[#allocation3 + $0x588] sm:$0xff] }
 0x247   :  { %v882_v30 = vpack.c.bf16 %v287_v27, %v280_v26  ;;  %v7607_v26 = vld [vmem:[#allocation6 + $0x120] sm:$0xff]  }
 0x248   :  { %v420_v27 = vld [vmem:[#allocation3 + $0x9b0] sm:$0xff] }
 0x24d   :  { %2160 = vmatmul.mubr.bf16.gmra.mrb[8].mxu0 %v812_v32  ;;  %v7604_v32 = vld [vmem:[#allocation6 + $0x108] sm:$0xff]  }
 0x24e   :  { %2167 = vmatprep.mubr.bf16.mxu0 %v820_v33  ;;  %v294_v33 = vld [vmem:[#allocation3 + $0x5c0] sm:$0xff]  ;;  %2539 = vmatpush1.bf16.msra.mxu0 %v7604_v32 }
 0x24f   :  { %2540 = vmatprep.subr.bf16.mxu0 %v7809_v1  ;;  %v889_v37 = vpack.c.bf16 %v301_v34, %v294_v33  ;;  %v434_v33 = vld [vmem:[#allocation3 + $0xa20] sm:$0xff]  ;;  %v441_v34 = vld [vmem:[#allocation3 + $0xa58] sm:$0xff] }
 0x255   :  { %2168 = vmatmul.mubr.bf16.gmra.mrb[12].mxu0 %v819_v38  ;;  %v897_v38 = vpack.c.bf16 %v316_v36, %v309_v35  ;;  %v449_v35 = vld [vmem:[#allocation3 + $0xa98] sm:$0xff]  ;;  %v456_v36 = vld [vmem:[#allocation3 + $0xad0] sm:$0xff] }
 0x256   :  { %2175 = vmatprep.mubr.bf16.mxu0 %v827_v39  ;;  %v308_v39 = vld [vmem:[#allocation3 + $0x630] sm:$0xff] }
 0x257   :  { %v896_v43 = vpack.c.bf16 %v315_v40, %v308_v39  ;;  %v448_v39 = vld [vmem:[#allocation3 + $0xa90] sm:$0xff]  ;;  %v455_v40 = vld [vmem:[#allocation3 + $0xac8] sm:$0xff] }
 0x25d   :  { %2176 = vmatmul.mubr.bf16.gmra.mrb[16].mxu0 %v826_v44  ;;  %v904_v44 = vpack.c.bf16 %v330_v42, %v323_v41  ;;  %v463_v41 = vld [vmem:[#allocation3 + $0xb08] sm:$0xff]  ;;  %v470_v42 = vld [vmem:[#allocation3 + $0xb40] sm:$0xff] }
 0x25e   :  { %2183 = vmatprep.mubr.bf16.mxu0 %v834_v45  ;;  %v322_v45 = vld [vmem:[#allocation3 + $0x6a0] sm:$0xff] }
 0x25f   :  { %v903_v49 = vpack.c.bf16 %v329_v46, %v322_v45  ;;  %v7608_v45 = vld [vmem:[#allocation6 + $0x128] sm:$0xff]   ;;  %v462_v46 = vld [vmem:[#allocation3 + $0xb00] sm:$0xff] }
 0x265   :  { %2184 = vmatmul.mubr.bf16.gmra.mrb[20].mxu0 %v833_v50  ;;  %v911_v50 = vpack.c.bf16 %v344_v48, %v337_v47  ;;  %v469_v47 = vld [vmem:[#allocation3 + $0xb38] sm:$0xff] }
 0x266   :  { %2191 = vmatprep.mubr.bf16.mxu0 %v841_v51  ;;  %v7605_v51 = vld [vmem:[#allocation6 + $0x110] sm:$0xff]   ;;  %v477_v48 = vld [vmem:[#allocation3 + $0xb78] sm:$0xff] }
 0x267   :  { %2541 = vmatpush1.bf16.msra.mxu0 %v7605_v51 }
 0x268   :  { %2542 = vmatprep.subr.bf16.mxu0 %v7809_v1 }
 0x26b   :  { %2543 = vmatpush1.bf16.msra.mxu0 %v7606_v7 }
 0x26c   :  { %2544 = vmatprep.subr.bf16.mxu0 %v7809_v1 }
 0x26d   :  { %2192 = vmatmul.mubr.bf16.gmra.mrb[24].mxu0 %v840_v56  ;;  %v910_v56 = vpack.c.bf16 %v343_v53, %v336_v52  ;;  %v476_v52 = vld [vmem:[#allocation3 + $0xb70] sm:$0xff]  ;;  %v483_v53 = vld [vmem:[#allocation3 + $0xba8] sm:$0xff] }
 0x26e   :  { %2199 = vmatprep.mubr.bf16.mxu0 %v848_v57  ;;  %v918_v57 = vpack.c.bf16 %v358_v55, %v351_v54  ;;  %v491_v54 = vld [vmem:[#allocation3 + $0xbe8] sm:$0xff]  ;;  %v498_v55 = vld [vmem:[#allocation3 + $0xc20] sm:$0xff] }
 0x26f   :  { %2545 = vmatpush1.bf16.msra.mxu0 %v7607_v26  ;;  %v7614_v26 = vld [vmem:[#allocation6 + $0x158] sm:$0xff]  }
 0x270   :  { %2546 = vmatprep.subr.bf16.mxu0 %v7809_v1 }
 0x273   :  { %2547 = vmatpush1.bf16.msra.mxu0 %v7608_v45 }
 0x274   :  { %2548 = vmatprep.subr.bf16.mxu0 %v7809_v1 }
 0x275   :  { %2200 = vmatmul.mubr.bf16.gmra.mrb[28].mxu0 %v847_v62  ;;  %v917_v62 = vpack.c.bf16 %v357_v59, %v350_v58  ;;  %v490_v58 = vld [vmem:[#allocation3 + $0xbe0] sm:$0xff]  ;;  %v497_v59 = vld [vmem:[#allocation3 + $0xc18] sm:$0xff] }
 0x276   :  { %2207 = vmatprep.mubr.bf16.mxu0 %v855_v63  ;;  %v925_v63 = vpack.c.bf16 %v372_v61, %v365_v60  ;;  %v505_v60 = vld [vmem:[#allocation3 + $0xc58] sm:$0xff]  ;;  %v512_v61 = vld [vmem:[#allocation3 + $0xc90] sm:$0xff] }
 0x27d   :  { %2208 = vmatmul.mubr.bf16.gmra.mrb[32].mxu0 %v854_v5  ;;  %v924_v5 = vpack.c.bf16 %v371_v2, %v364_v0  ;;  %v7609_v0 = vld [vmem:[#allocation6 + $0x130] sm:$0xff]   ;;  %v504_v2 = vld [vmem:[#allocation3 + $0xc50] sm:$0xff] }
 0x27e   :  { %2215 = vmatprep.mubr.bf16.mxu0 %v862_v6  ;;  %v932_v6 = vpack.c.bf16 %v386_v4, %v379_v3  ;;  %v511_v3 = vld [vmem:[#allocation3 + $0xc88] sm:$0xff]  ;;  %2549 = vmatpush1.bf16.msra.mxu0 %v7609_v0  ;;  %v630_v0 = vld [vmem:[#allocation3 + $0x1040] sm:$0xff] }
 0x27f   :  { %v519_v4 = vld [vmem:[#allocation3 + $0xcc8] sm:$0xff]  ;;  %2550 = vmatprep.subr.bf16.mxu0 %v7809_v1 }
 0x285   :  { %2216 = vmatmul.mubr.bf16.gmra.mrb[36].mxu0 %v861_v11  ;;  %v400_v11 = vld [vmem:[#allocation3 + $0x910] sm:$0xff] }
 0x286   :  { %2223 = vmatprep.mubr.bf16.mxu0 %v869_v12  ;;  %v931_v12 = vpack.c.bf16 %v385_v9, %v378_v8  ;;  %v939_v13 = vpack.c.bf16 %v400_v11, %v393_v10  ;;  %v7610_v8 = vld [vmem:[#allocation6 + $0x138] sm:$0xff]   ;;  %v518_v9 = vld [vmem:[#allocation3 + $0xcc0] sm:$0xff]  ;;  %v525_v10 = vld [vmem:[#allocation3 + $0xcf8] sm:$0xff] }
 0x287   :  { %v533_v11 = vld [vmem:[#allocation3 + $0xd38] sm:$0xff]  ;;  %2551 = vmatpush1.bf16.msra.mxu0 %v7610_v8  ;;  %v651_v8 = vld [vmem:[#allocation3 + $0x10e8] sm:$0xff] }
 0x288   :  { %2552 = vmatprep.subr.bf16.mxu0 %v7809_v1 }
 0x28d   :  { %2224 = vmatmul.mubr.bf16.gmra.mrb[40].mxu0 %v868_v18  ;;  %v938_v18 = vpack.c.bf16 %v399_v15, %v392_v14  ;;  %v7611_v15 = vld [vmem:[#allocation6 + $0x140] sm:$0xff]  }
 0x28e   :  { %2231 = vmatprep.mubr.bf16.mxu0 %v876_v19  ;;  %v946_v19 = vpack.c.bf16 %v414_v17, %v407_v16  ;;  %v532_v16 = vld [vmem:[#allocation3 + $0xd30] sm:$0xff]  ;;  %v539_v17 = vld [vmem:[#allocation3 + $0xd68] sm:$0xff]  ;;  %2553 = vmatpush1.bf16.msra.mxu0 %v7611_v15  ;;  %v10134_v15 = vmov 0.0  }
 0x28f   :  { %2554 = vmatprep.subr.bf16.mxu0 %v7809_v1  ;;  %6929 = vmatprep.subr.bf16.mxu1 %v10134_v15 }
 0x290   :  { %6335 = vmatprep.mubr.msk.bf16.mxu1 %vm7811_vm1, %v10134_v15 }
 0x295   :  { %2232 = vmatmul.mubr.bf16.gmra.mrb[44].mxu0 %v875_v24  ;;  %v945_v24 = vpack.c.bf16 %v413_v21, %v406_v20  ;;  %v554_v20 = vld [vmem:[#allocation3 + $0xde0] sm:$0xff]  ;;  %v1008_v21 = vpack.c.bf16 %v539_v17, %v532_v16  ;;  %v7989_v16 = vld [vmem:[#allocation6 + $0x180] sm:$0xff]   ;;  %v673_v17 = vld [vmem:[#allocation3 + $0x1198] sm:$0xff] }
 0x296   :  { %2239 = vmatprep.mubr.bf16.mxu0 %v883_v25  ;;  %v953_v25 = vpack.c.bf16 %v428_v23, %v421_v22  ;;  %v7613_v23 = vld [vmem:[#allocation6 + $0x150] sm:$0xff]   ;;  %6930 = vmatpush3.bf16.msra.mxu1 %v7989_v16 }
 0x297   :  { %6507 = vmatprep.subr.bf16.mxu1 %v10134_v15 }
 0x29d   :  { %2240 = vmatmul.mubr.bf16.gmra.mrb[48].mxu0 %v882_v30  ;;  %v442_v30 = vld [vmem:[#allocation3 + $0xa60] sm:$0xff] }
 0x29e   :  { %2247 = vmatprep.mubr.bf16.mxu0 %v890_v31  ;;  %v952_v31 = vpack.c.bf16 %v427_v28, %v420_v27  ;;  %v960_v32 = vpack.c.bf16 %v442_v30, %v435_v29  ;;  %v561_v27 = vld [vmem:[#allocation3 + $0xe18] sm:$0xff]  ;;  %v568_v28 = vld [vmem:[#allocation3 + $0xe50] sm:$0xff] }
 0x29f   :  { %v1023_v30 = vpack.c.bf16 %v568_v28, %v561_v27  ;;  %v694_v27 = vld [vmem:[#allocation3 + $0x1240] sm:$0xff] }
 0x2a5   :  { %2248 = vmatmul.mubr.bf16.gmra.mrb[52].mxu0 %v889_v37  ;;  %v959_v37 = vpack.c.bf16 %v441_v34, %v434_v33  ;;  %v567_v33 = vld [vmem:[#allocation3 + $0xe48] sm:$0xff]  ;;  %v7616_v34 = vld [vmem:[#allocation6 + $0x168] sm:$0xff]  }
 0x2a6   :  { %2255 = vmatprep.mubr.bf16.mxu0 %v897_v38  ;;  %v967_v38 = vpack.c.bf16 %v456_v36, %v449_v35  ;;  %v575_v35 = vld [vmem:[#allocation3 + $0xe88] sm:$0xff]  ;;  %v582_v36 = vld [vmem:[#allocation3 + $0xec0] sm:$0xff] }
 0x2ad   :  { %2256 = vmatmul.mubr.bf16.gmra.mrb[56].mxu0 %v896_v43  ;;  %v966_v43 = vpack.c.bf16 %v455_v40, %v448_v39  ;;  %v7617_v39 = vld [vmem:[#allocation6 + $0x170] sm:$0xff]  }
 0x2ae   :  { %2263 = vmatprep.mubr.bf16.mxu0 %v904_v44  ;;  %v974_v44 = vpack.c.bf16 %v470_v42, %v463_v41  ;;  %v574_v40 = vld [vmem:[#allocation3 + $0xe80] sm:$0xff]  ;;  %v581_v41 = vld [vmem:[#allocation3 + $0xeb8] sm:$0xff]  ;;  %v7618_v42 = vld [vmem:[#allocation6 + $0x178] sm:$0xff]  }
 0x2af   :  { %v1029_v45 = vpack.c.bf16 %v581_v41, %v574_v40  ;;  %v235_v40 = vld [vmem:[#allocation3 + $0x3e8] sm:$0xff] }
 0x2b5   :  { %2264 = vmatmul.mubr.bf16.gmra.mrb[60].mxu0 %v903_v49  ;;  %v484_v49 = vld [vmem:[#allocation3 + $0xbb0] sm:$0xff] }
 0x2b6   :  { %2271 = vmatprep.mubr.bf16.mxu0 %v911_v50  ;;  %v973_v50 = vpack.c.bf16 %v469_v47, %v462_v46  ;;  %v981_v51 = vpack.c.bf16 %v484_v49, %v477_v48  ;;  %v588_v47 = vld [vmem:[#allocation3 + $0xef0] sm:$0xff]  ;;  %v595_v48 = vld [vmem:[#allocation3 + $0xf28] sm:$0xff] }
 0x2b7   :  { %v603_v49 = vld [vmem:[#allocation3 + $0xf68] sm:$0xff] }
 0x2bd   :  { %2272 = vmatmul.mubr.bf16.gmra.mrb[64].mxu0 %v910_v56  ;;  %v980_v56 = vpack.c.bf16 %v483_v53, %v476_v52  ;;  %v602_v53 = vld [vmem:[#allocation3 + $0xf60] sm:$0xff] }
 0x2be   :  { %2279 = vmatprep.mubr.bf16.mxu0 %v918_v57  ;;  %v988_v57 = vpack.c.bf16 %v498_v55, %v491_v54  ;;  %v609_v54 = vld [vmem:[#allocation3 + $0xf98] sm:$0xff] }
 0x2bf   :  { %v617_v55 = vld [vmem:[#allocation3 + $0xfd8] sm:$0xff] }
 0x2c5   :  { %2280 = vmatmul.mubr.bf16.gmra.mrb[68].mxu0 %v917_v62  ;;  %v987_v62 = vpack.c.bf16 %v497_v59, %v490_v58  ;;  %v623_v59 = vld [vmem:[#allocation3 + $0x1008] sm:$0xff] }
 0x2c6   :  { %2287 = vmatprep.mubr.bf16.mxu0 %v925_v63  ;;  %v995_v63 = vpack.c.bf16 %v512_v61, %v505_v60  ;;  %v631_v60 = vld [vmem:[#allocation3 + $0x1048] sm:$0xff]  ;;  %v638_v61 = vld [vmem:[#allocation3 + $0x1080] sm:$0xff] }
 0x2cd   :  { %2288 = vmatmul.mubr.bf16.gmra.mrb[72].mxu0 %v924_v5  ;;  %v526_v5 = vld [vmem:[#allocation3 + $0xd00] sm:$0xff] }
 0x2ce   :  { %2295 = vmatprep.mubr.bf16.mxu0 %v932_v6  ;;  %v994_v6 = vpack.c.bf16 %v511_v3, %v504_v2  ;;  %v1002_v7 = vpack.c.bf16 %v526_v5, %v519_v4  ;;  %v637_v2 = vld [vmem:[#allocation3 + $0x1078] sm:$0xff]  ;;  %v652_v4 = vld [vmem:[#allocation3 + $0x10f0] sm:$0xff] }
 0x2cf   :  { %v645_v3 = vld [vmem:[#allocation3 + $0x10b8] sm:$0xff]  ;;  %v1057_v5 = vpack.c.bf16 %v637_v2, %v630_v0  ;;  %v270_v2 = vld [vmem:[#allocation3 + $0x500] sm:$0xff] }
 0x2d5   :  { %2296 = vmatmul.mubr.bf16.gmra.mrb[76].mxu0 %v931_v12  ;;  %v540_v12 = vld [vmem:[#allocation3 + $0xd70] sm:$0xff] }
 0x2d6   :  { %2303 = vmatprep.mubr.bf16.mxu0 %v939_v13  ;;  %v1001_v13 = vpack.c.bf16 %v525_v10, %v518_v9  ;;  %v1009_v14 = vpack.c.bf16 %v540_v12, %v533_v11  ;;  %v659_v9 = vld [vmem:[#allocation3 + $0x1128] sm:$0xff]  ;;  %v666_v10 = vld [vmem:[#allocation3 + $0x1160] sm:$0xff] }
 0x2d7   :  { %v1072_v12 = vpack.c.bf16 %v666_v10, %v659_v9 }
 0x2dd   :  { %2304 = vmatmul.mubr.bf16.gmra.mrb[80].mxu0 %v938_v18  ;;  %v7612_v18 = vld [vmem:[#allocation6 + $0x148] sm:$0xff]  }
 0x2de   :  { %2311 = vmatprep.mubr.bf16.mxu0 %v946_v19  ;;  %v547_v19 = vld [vmem:[#allocation3 + $0xda8] sm:$0xff]  ;;  %2555 = vmatpush1.bf16.msra.mxu0 %v7612_v18  ;;  %v680_v18 = vld [vmem:[#allocation3 + $0x11d0] sm:$0xff] }
 0x2df   :  { %v1016_v22 = vpack.c.bf16 %v554_v20, %v547_v19  ;;  %2556 = vmatprep.subr.bf16.mxu0 %v7809_v1  ;;  %v1079_v20 = vpack.c.bf16 %v680_v18, %v673_v17  ;;  %v763_v17 = vld [vmem:[#allocation3 + $0x1468] sm:$0xff] }
 0x2e0   :  { %v771_v18 = vld [vmem:[#allocation3 + $0x14a8] sm:$0xff] }
 0x2e2   :  { %2557 = vmatpush1.bf16.msra.mxu0 %v7613_v23 }
 0x2e3   :  { %2558 = vmatprep.subr.bf16.mxu0 %v7809_v1 }
 0x2e5   :  { %2312 = vmatmul.mubr.bf16.gmra.mrb[84].mxu0 %v945_v24  ;;  %v546_v24 = vld [vmem:[#allocation3 + $0xda0] sm:$0xff] }
 0x2e6   :  { %2319 = vmatprep.mubr.bf16.mxu0 %v953_v25  ;;  %v553_v25 = vld [vmem:[#allocation3 + $0xdd8] sm:$0xff]  ;;  %2559 = vmatpush1.bf16.msra.mxu0 %v7614_v26  ;;  %v687_v26 = vld [vmem:[#allocation3 + $0x1208] sm:$0xff] }
 0x2e7   :  { %v1015_v29 = vpack.c.bf16 %v553_v25, %v546_v24  ;;  %2560 = vmatprep.subr.bf16.mxu0 %v7809_v1  ;;  %v672_v24 = vld [vmem:[#allocation3 + $0x1190] sm:$0xff]  ;;  %v679_v25 = vld [vmem:[#allocation3 + $0x11c8] sm:$0xff] }
 0x2e8   :  { %v1078_v28 = vpack.c.bf16 %v679_v25, %v672_v24  ;;  %v770_v25 = vld [vmem:[#allocation3 + $0x14a0] sm:$0xff] }
 0x2ed   :  { %2320 = vmatmul.mubr.bf16.gmra.mrb[88].mxu0 %v952_v31  ;;  %v7615_v31 = vld [vmem:[#allocation6 + $0x160] sm:$0xff]  }
 0x2ee   :  { %2327 = vmatprep.mubr.bf16.mxu0 %v960_v32  ;;  %v560_v32 = vld [vmem:[#allocation3 + $0xe10] sm:$0xff]  ;;  %2561 = vmatpush1.bf16.msra.mxu0 %v7615_v31  ;;  %v221_v31 = vld [vmem:[#allocation3 + $0x378] sm:$0xff] }
 0x2ef   :  { %2562 = vmatprep.subr.bf16.mxu0 %v7809_v1 }
 0x2f2   :  { %2563 = vmatpush1.bf16.msra.mxu0 %v7616_v34  ;;  %v693_v34 = vld [vmem:[#allocation3 + $0x1238] sm:$0xff] }
 0x2f3   :  { %2564 = vmatprep.subr.bf16.mxu0 %v7809_v1 }
 0x2f5   :  { %2328 = vmatmul.mubr.bf16.gmra.mrb[92].mxu0 %v959_v37  ;;  %v1022_v37 = vpack.c.bf16 %v567_v33, %v560_v32  ;;  %v686_v33 = vld [vmem:[#allocation3 + $0x1200] sm:$0xff] }
 0x2f6   :  { %2335 = vmatprep.mubr.bf16.mxu0 %v967_v38  ;;  %v1030_v38 = vpack.c.bf16 %v582_v36, %v575_v35  ;;  %2565 = vmatpush1.bf16.msra.mxu0 %v7617_v39  ;;  %v701_v35 = vld [vmem:[#allocation3 + $0x1278] sm:$0xff]  ;;  %v708_v36 = vld [vmem:[#allocation3 + $0x12b0] sm:$0xff] }
 0x2f7   :  { %2566 = vmatprep.subr.bf16.mxu0 %v7809_v1  ;;  %v616_v1 = vld [vmem:[#allocation3 + $0xfd0] sm:$0xff] }
 0x2f8   :  { %v228_v39 = vld [vmem:[#allocation3 + $0x3b0] sm:$0xff] }
 0x2f9   :  { %v858_v41 = vpack.c.bf16 %v235_v40, %v228_v39  ;;  %v326_v40 = vld [vmem:[#allocation3 + $0x6c0] sm:$0xff] }
 0x2fa   :  { %2567 = vmatpush1.bf16.msra.mxu0 %v7618_v42  ;;  %v700_v42 = vld [vmem:[#allocation3 + $0x1270] sm:$0xff] }
 0x2fb   :  { %6309 = vmatprep.subr.bf16.mxu0 %v10134_v15 }
 0x2fd   :  { %2336 = vmatmul.mubr.bf16.gmra.mrb[96].mxu0 %v966_v43  ;;  %v589_v43 = vld [vmem:[#allocation3 + $0xef8] sm:$0xff] }
 0x2fe   :  { %2343 = vmatprep.mubr.bf16.mxu0 %v974_v44  ;;  %v596_v44 = vld [vmem:[#allocation3 + $0xf30] sm:$0xff] }
 0x2ff   :  { %v1037_v46 = vpack.c.bf16 %v596_v44, %v589_v43  ;;  %v707_v43 = vld [vmem:[#allocation3 + $0x12a8] sm:$0xff] }
 0x300   :  { %v715_v44 = vld [vmem:[#allocation3 + $0x12e8] sm:$0xff] }
 0x305   :  { %2344 = vmatmul.mubr.bf16.gmra.mrb[100].mxu0 %v973_v50  ;;  %v610_v50 = vld [vmem:[#allocation3 + $0xfa0] sm:$0xff] }
 0x306   :  { %2351 = vmatprep.mubr.bf16.mxu0 %v981_v51  ;;  %v1036_v51 = vpack.c.bf16 %v595_v48, %v588_v47  ;;  %v1044_v52 = vpack.c.bf16 %v610_v50, %v603_v49  ;;  %v242_v48 = vld [vmem:[#allocation3 + $0x420] sm:$0xff]  ;;  %v249_v49 = vld [vmem:[#allocation3 + $0x458] sm:$0xff] }
 0x307   :  { %v865_v50 = vpack.c.bf16 %v249_v49, %v242_v48  ;;  %v340_v49 = vld [vmem:[#allocation3 + $0x730] sm:$0xff] }
 0x30d   :  { %2352 = vmatmul.mubr.bf16.gmra.mrb[104].mxu0 %v980_v56  ;;  %v624_v56 = vld [vmem:[#allocation3 + $0x1010] sm:$0xff] }
 0x30e   :  { %2359 = vmatprep.mubr.bf16.mxu0 %v988_v57  ;;  %v1043_v57 = vpack.c.bf16 %v609_v54, %v602_v53  ;;  %v1051_v58 = vpack.c.bf16 %v624_v56, %v617_v55  ;;  %v729_v53 = vld [vmem:[#allocation3 + $0x1358] sm:$0xff]  ;;  %v736_v54 = vld [vmem:[#allocation3 + $0x1390] sm:$0xff] }
 0x30f   :  { %v1107_v56 = vpack.c.bf16 %v736_v54, %v729_v53  ;;  %v135_v53 = vld [vmem:[#allocation3 + $0xc8] sm:$0xff] }
 0x310   :  { %v143_v54 = vld [vmem:[#allocation3 + $0x108] sm:$0xff] }
 0x315   :  { %2360 = vmatmul.mubr.bf16.gmra.mrb[108].mxu0 %v987_v62  ;;  %v1050_v62 = vpack.c.bf16 %v623_v59, %v616_v1  ;;  %v728_v59 = vld [vmem:[#allocation3 + $0x1350] sm:$0xff] }
 0x316   :  { %2367 = vmatprep.mubr.bf16.mxu0 %v995_v63  ;;  %v1058_v63 = vpack.c.bf16 %v638_v61, %v631_v60  ;;  %v735_v60 = vld [vmem:[#allocation3 + $0x1388] sm:$0xff] }
 0x317   :  { %v743_v61 = vld [vmem:[#allocation3 + $0x13c8] sm:$0xff] }
 0x31d   :  { %2368 = vmatmul.mubr.bf16.gmra.mrb[112].mxu0 %v994_v6  ;;  %v1065_v6 = vpack.c.bf16 %v652_v4, %v645_v3  ;;  %v277_v3 = vld [vmem:[#allocation3 + $0x538] sm:$0xff] }
 0x31e   :  { %2375 = vmatprep.mubr.bf16.mxu0 %v1002_v7  ;;  %v644_v7 = vld [vmem:[#allocation3 + $0x10b0] sm:$0xff]  ;;  %v879_v4 = vpack.c.bf16 %v277_v3, %v270_v2  ;;  %v375_v3 = vld [vmem:[#allocation3 + $0x848] sm:$0xff] }
 0x31f   :  { %v1064_v11 = vpack.c.bf16 %v651_v8, %v644_v7  ;;  %v757_v7 = vld [vmem:[#allocation3 + $0x1438] sm:$0xff]  ;;  %v764_v8 = vld [vmem:[#allocation3 + $0x1470] sm:$0xff] }
 0x320   :  { %v1121_v10 = vpack.c.bf16 %v764_v8, %v757_v7  ;;  %v368_v2 = vld [vmem:[#allocation3 + $0x810] sm:$0xff]  ;;  %v171_v7 = vld [vmem:[#allocation3 + $0x1e8] sm:$0xff]  ;;  %v178_v8 = vld [vmem:[#allocation3 + $0x220] sm:$0xff] }
 0x325   :  { %2376 = vmatmul.mubr.bf16.gmra.mrb[116].mxu0 %v1001_v13  ;;  %v658_v13 = vld [vmem:[#allocation3 + $0x1120] sm:$0xff] }
 0x326   :  { %2383 = vmatprep.mubr.bf16.mxu0 %v1009_v14  ;;  %v665_v14 = vld [vmem:[#allocation3 + $0x1158] sm:$0xff] }
 0x327   :  { %v1071_v19 = vpack.c.bf16 %v665_v14, %v658_v13  ;;  %v756_v14 = vld [vmem:[#allocation3 + $0x1430] sm:$0xff] }
 0x32d   :  { %2384 = vmatmul.mubr.bf16.gmra.mrb[120].mxu0 %v1008_v21  ;;  %v200_v21 = vld [vmem:[#allocation3 + $0x2d0] sm:$0xff] }
 0x32e   :  { %2391 = vmatprep.mubr.bf16.mxu0 %v1016_v22  ;;  %v207_v22 = vld [vmem:[#allocation3 + $0x308] sm:$0xff] }
 0x32f   :  { %v844_v23 = vpack.c.bf16 %v207_v22, %v200_v21  ;;  %v298_v22 = vld [vmem:[#allocation3 + $0x5e0] sm:$0xff] }
 0x331   :  { %6336 = vmatmul.mubr.msk.bf16.vlgmr.msra.gmra.mrb[0].mxu1 %vm1538_vm0, %v844_v23  ;;  %v305_v23 = vld [vmem:[#allocation3 + $0x618] sm:$0xff] }
 0x332   :  { %6339 = vmatprep.mubr.msk.bf16.mxu1 %vm7811_vm1, %v10134_v15  ;;  %v893_v24 = vpack.c.bf16 %v305_v23, %v298_v22  ;;  %v396_v22 = vld [vmem:[#allocation3 + $0x8f0] sm:$0xff]  ;;  %v403_v23 = vld [vmem:[#allocation3 + $0x928] sm:$0xff] }
 0x335   :  { %2392 = vmatmul.mubr.bf16.gmra.mrb[124].mxu0 %v1015_v29  ;;  %v1086_v29 = vpack.c.bf16 %v694_v27, %v687_v26  ;;  %v777_v26 = vld [vmem:[#allocation3 + $0x14d8] sm:$0xff] }
 0x336   :  { %2399 = vmatprep.mubr.bf16.mxu0 %v1023_v30  ;;  %v214_v30 = vld [vmem:[#allocation3 + $0x340] sm:$0xff]  ;;  %v785_v27 = vld [vmem:[#allocation3 + $0x1518] sm:$0xff] }
 0x337   :  { %v851_v32 = vpack.c.bf16 %v221_v31, %v214_v30  ;;  %v312_v31 = vld [vmem:[#allocation3 + $0x650] sm:$0xff] }
 0x339   :  { %6340 = vmatmul.mubr.msk.bf16.gmra.mrb[4].mxu1 %vm1538_vm0, %v851_v32  ;;  %v319_v32 = vld [vmem:[#allocation3 + $0x688] sm:$0xff] }
 0x33a   :  { %6343 = vmatprep.mubr.msk.bf16.mxu1 %vm7811_vm1, %v10134_v15 }
 0x33d   :  { %2400 = vmatmul.mubr.bf16.gmra.mrb[128].mxu0 %v1022_v37  ;;  %v1085_v37 = vpack.c.bf16 %v693_v34, %v686_v33  ;;  %v900_v33 = vpack.c.bf16 %v319_v32, %v312_v31  ;;  %v784_v34 = vld [vmem:[#allocation3 + $0x1510] sm:$0xff]  ;;  %v410_v31 = vld [vmem:[#allocation3 + $0x960] sm:$0xff]  ;;  %v417_v32 = vld [vmem:[#allocation3 + $0x998] sm:$0xff] }
 0x33e   :  { %2407 = vmatprep.mubr.bf16.mxu0 %v1030_v38  ;;  %v1093_v38 = vpack.c.bf16 %v708_v36, %v701_v35  ;;  %v791_v35 = vld [vmem:[#allocation3 + $0x1548] sm:$0xff] }
 0x33f   :  { %v115_v36 = vld [vmem:[#allocation3 + $0x28] sm:$0xff] }
 0x341   :  { %6344 = vmatmul.mubr.msk.bf16.gmra.mrb[8].mxu1 %vm1538_vm0, %v858_v41  ;;  %v333_v41 = vld [vmem:[#allocation3 + $0x6f8] sm:$0xff] }
 0x342   :  { %6347 = vmatprep.mubr.msk.bf16.mxu1 %vm7811_vm1, %v10134_v15 }
 0x345   :  { %2408 = vmatmul.mubr.bf16.gmra.mrb[132].mxu0 %v1029_v45  ;;  %v722_v45 = vld [vmem:[#allocation3 + $0x1320] sm:$0xff] }
 0x346   :  { %2415 = vmatprep.mubr.bf16.mxu0 %v1037_v46  ;;  %v1092_v46 = vpack.c.bf16 %v707_v43, %v700_v42  ;;  %v1100_v47 = vpack.c.bf16 %v722_v45, %v715_v44  ;;  %v907_v42 = vpack.c.bf16 %v333_v41, %v326_v40  ;;  %v114_v43 = vld [vmem:[#allocation3 + $0x20] sm:$0xff]  ;;  %v121_v44 = vld [vmem:[#allocation3 + $0x58] sm:$0xff]  ;;  %v424_v40 = vld [vmem:[#allocation3 + $0x9d0] sm:$0xff] }
 0x347   :  { %v129_v45 = vld [vmem:[#allocation3 + $0x98] sm:$0xff]  ;;  %v431_v41 = vld [vmem:[#allocation3 + $0xa08] sm:$0xff] }
 0x349   :  { %6348 = vmatmul.mubr.msk.bf16.gmra.mrb[12].mxu1 %vm1538_vm0, %v865_v50  ;;  %v347_v50 = vld [vmem:[#allocation3 + $0x768] sm:$0xff] }
 0x34a   :  { %6351 = vmatprep.mubr.msk.bf16.mxu1 %vm7811_vm1, %v10134_v15 }
 0x34d   :  { %2416 = vmatmul.mubr.bf16.gmra.mrb[136].mxu0 %v1036_v51  ;;  %v714_v51 = vld [vmem:[#allocation3 + $0x12e0] sm:$0xff] }
 0x34e   :  { %2423 = vmatprep.mubr.bf16.mxu0 %v1044_v52  ;;  %v721_v52 = vld [vmem:[#allocation3 + $0x1318] sm:$0xff] }
 0x34f   :  { %v1099_v55 = vpack.c.bf16 %v721_v52, %v714_v51  ;;  %v914_v51 = vpack.c.bf16 %v347_v50, %v340_v49  ;;  %v128_v52 = vld [vmem:[#allocation3 + $0x90] sm:$0xff]  ;;  %v438_v49 = vld [vmem:[#allocation3 + $0xa40] sm:$0xff]  ;;  %v445_v50 = vld [vmem:[#allocation3 + $0xa78] sm:$0xff] }
 0x355   :  { %2424 = vmatmul.mubr.bf16.gmra.mrb[140].mxu0 %v1043_v57  ;;  %v256_v57 = vld [vmem:[#allocation3 + $0x490] sm:$0xff] }
 0x356   :  { %2431 = vmatprep.mubr.bf16.mxu0 %v1051_v58  ;;  %v263_v58 = vld [vmem:[#allocation3 + $0x4c8] sm:$0xff] }
 0x357   :  { %v872_v1 = vpack.c.bf16 %v263_v58, %v256_v57  ;;  %v354_v58 = vld [vmem:[#allocation3 + $0x7a0] sm:$0xff] }
 0x359   :  { %6352 = vmatmul.mubr.msk.bf16.gmra.mrb[16].mxu1 %vm1538_vm0, %v872_v1  ;;  %v361_v1 = vld [vmem:[#allocation3 + $0x7d8] sm:$0xff] }
 0x35a   :  { %6355 = vmatprep.mubr.msk.bf16.mxu1 %vm7811_vm1, %v10134_v15 }
 0x35d   :  { %2432 = vmatmul.mubr.bf16.gmra.mrb[144].mxu0 %v1050_v62  ;;  %v750_v62 = vld [vmem:[#allocation3 + $0x1400] sm:$0xff] }
 0x35e   :  { %2439 = vmatprep.mubr.bf16.mxu0 %v1058_v63  ;;  %v1106_v63 = vpack.c.bf16 %v735_v60, %v728_v59  ;;  %v1114_v0 = vpack.c.bf16 %v750_v62, %v743_v61  ;;  %v921_v59 = vpack.c.bf16 %v361_v1, %v354_v58  ;;  %v142_v60 = vld [vmem:[#allocation3 + $0x100] sm:$0xff]  ;;  %v149_v61 = vld [vmem:[#allocation3 + $0x138] sm:$0xff]  ;;  %v452_v58 = vld [vmem:[#allocation3 + $0xab0] sm:$0xff] }
 0x35f   :  { %v157_v62 = vld [vmem:[#allocation3 + $0x178] sm:$0xff]  ;;  %v459_v1 = vld [vmem:[#allocation3 + $0xae8] sm:$0xff] }
 0x361   :  { %6356 = vmatmul.mubr.msk.bf16.gmra.mrb[20].mxu1 %vm1538_vm0, %v879_v4  ;;  %v928_v4 = vpack.c.bf16 %v375_v3, %v368_v2  ;;  %v466_v2 = vld [vmem:[#allocation3 + $0xb20] sm:$0xff]  ;;  %v473_v3 = vld [vmem:[#allocation3 + $0xb58] sm:$0xff] }
 0x362   :  { %6359 = vmatprep.mubr.msk.bf16.mxu1 %vm7811_vm1, %v10134_v15 }
 0x365   :  { %2440 = vmatmul.mubr.bf16.gmra.mrb[148].mxu0 %v1057_v5  ;;  %v742_v5 = vld [vmem:[#allocation3 + $0x13c0] sm:$0xff] }
 0x366   :  { %2447 = vmatprep.mubr.bf16.mxu0 %v1065_v6  ;;  %v749_v6 = vld [vmem:[#allocation3 + $0x13f8] sm:$0xff] }
 0x367   :  { %v1113_v9 = vpack.c.bf16 %v749_v6, %v742_v5  ;;  %v156_v5 = vld [vmem:[#allocation3 + $0x170] sm:$0xff]  ;;  %v163_v6 = vld [vmem:[#allocation3 + $0x1a8] sm:$0xff] }
 0x36d   :  { %2448 = vmatmul.mubr.bf16.gmra.mrb[152].mxu0 %v1064_v11  ;;  %v284_v11 = vld [vmem:[#allocation3 + $0x570] sm:$0xff] }
 0x36e   :  { %2455 = vmatprep.mubr.bf16.mxu0 %v1072_v12  ;;  %v291_v12 = vld [vmem:[#allocation3 + $0x5a8] sm:$0xff] }
 0x36f   :  { %v886_v13 = vpack.c.bf16 %v291_v12, %v284_v11  ;;  %v382_v11 = vld [vmem:[#allocation3 + $0x880] sm:$0xff]  ;;  %v389_v12 = vld [vmem:[#allocation3 + $0x8b8] sm:$0xff] }
 0x371   :  { %6360 = vmatmul.mubr.msk.bf16.gmra.mrb[24].mxu1 %vm1538_vm0, %v886_v13  ;;  %v935_v13 = vpack.c.bf16 %v389_v12, %v382_v11  ;;  %v480_v11 = vld [vmem:[#allocation3 + $0xb90] sm:$0xff]  ;;  %v487_v12 = vld [vmem:[#allocation3 + $0xbc8] sm:$0xff] }
 0x372   :  { %6363 = vmatprep.mubr.msk.bf16.mxu1 %vm7811_vm1, %v10134_v15 }
 0x375   :  { %2456 = vmatmul.mubr.bf16.gmra.mrb[156].mxu0 %v1071_v19  ;;  %v778_v19 = vld [vmem:[#allocation3 + $0x14e0] sm:$0xff] }
 0x376   :  { %2463 = vmatprep.mubr.bf16.mxu0 %v1079_v20  ;;  %v1120_v20 = vpack.c.bf16 %v763_v17, %v756_v14  ;;  %v1128_v21 = vpack.c.bf16 %v778_v19, %v771_v18  ;;  %v170_v14 = vld [vmem:[#allocation3 + $0x1e0] sm:$0xff]  ;;  %v177_v17 = vld [vmem:[#allocation3 + $0x218] sm:$0xff]  ;;  %v192_v19 = vld [vmem:[#allocation3 + $0x290] sm:$0xff] }
 0x377   :  { %v185_v18 = vld [vmem:[#allocation3 + $0x258] sm:$0xff] }
 0x379   :  { %6364 = vmatmul.mubr.msk.bf16.gmra.mrb[28].mxu1 %vm1538_vm0, %v893_v24  ;;  %v942_v24 = vpack.c.bf16 %v403_v23, %v396_v22  ;;  %v494_v22 = vld [vmem:[#allocation3 + $0xc00] sm:$0xff]  ;;  %v501_v23 = vld [vmem:[#allocation3 + $0xc38] sm:$0xff] }
 0x37a   :  { %6367 = vmatprep.mubr.msk.bf16.mxu1 %vm7811_vm1, %v10134_v15 }
 0x37d   :  { %2464 = vmatmul.mubr.bf16.gmra.mrb[160].mxu0 %v1078_v28  ;;  %v792_v28 = vld [vmem:[#allocation3 + $0x1550] sm:$0xff] }
 0x37e   :  { %2471 = vmatprep.mubr.bf16.mxu0 %v1086_v29  ;;  %v1127_v29 = vpack.c.bf16 %v777_v26, %v770_v25  ;;  %v1135_v30 = vpack.c.bf16 %v792_v28, %v785_v27  ;;  %v184_v25 = vld [vmem:[#allocation3 + $0x250] sm:$0xff]  ;;  %v191_v26 = vld [vmem:[#allocation3 + $0x288] sm:$0xff]  ;;  %v206_v28 = vld [vmem:[#allocation3 + $0x300] sm:$0xff] }
 0x37f   :  { %v199_v27 = vld [vmem:[#allocation3 + $0x2c8] sm:$0xff] }
 0x381   :  { %6368 = vmatmul.mubr.msk.bf16.gmra.mrb[32].mxu1 %vm1538_vm0, %v900_v33  ;;  %v949_v33 = vpack.c.bf16 %v417_v32, %v410_v31  ;;  %v508_v31 = vld [vmem:[#allocation3 + $0xc70] sm:$0xff]  ;;  %v515_v32 = vld [vmem:[#allocation3 + $0xca8] sm:$0xff] }
 0x382   :  { %6371 = vmatprep.mubr.msk.bf16.mxu1 %vm7811_vm1, %v10134_v15 }
 0x385   :  { %2472 = vmatmul.mubr.bf16.gmra.mrb[164].mxu0 %v1085_v37  ;;  %v122_v37 = vld [vmem:[#allocation3 + $0x60] sm:$0xff] }
 0x386   :  { %2479 = vmatprep.mubr.bf16.mxu0 %v1093_v38  ;;  %v1134_v38 = vpack.c.bf16 %v791_v35, %v784_v34  ;;  %v801_v39 = vpack.c.bf16 %v122_v37, %v115_v36  ;;  %v198_v34 = vld [vmem:[#allocation3 + $0x2c0] sm:$0xff]  ;;  %v205_v35 = vld [vmem:[#allocation3 + $0x2f8] sm:$0xff]  ;;  %v220_v37 = vld [vmem:[#allocation3 + $0x370] sm:$0xff] }
 0x387   :  { %v213_v36 = vld [vmem:[#allocation3 + $0x338] sm:$0xff] }
 0x389   :  { %6372 = vmatmul.mubr.msk.bf16.gmra.mrb[36].mxu1 %vm1538_vm0, %v907_v42  ;;  %v956_v42 = vpack.c.bf16 %v431_v41, %v424_v40  ;;  %v522_v40 = vld [vmem:[#allocation3 + $0xce0] sm:$0xff]  ;;  %v529_v41 = vld [vmem:[#allocation3 + $0xd18] sm:$0xff] }
 0x38a   :  { %6375 = vmatprep.mubr.msk.bf16.mxu1 %vm7811_vm1, %v10134_v15 }
 0x38d   :  { %2480 = vmatmul.mubr.bf16.gmra.mrb[168].mxu0 %v1092_v46  ;;  %v136_v46 = vld [vmem:[#allocation3 + $0xd0] sm:$0xff] }
 0x38e   :  { %2487 = vmatprep.mubr.bf16.mxu0 %v1100_v47  ;;  %v800_v47 = vpack.c.bf16 %v121_v44, %v114_v43  ;;  %v808_v48 = vpack.c.bf16 %v136_v46, %v129_v45  ;;  %v212_v43 = vld [vmem:[#allocation3 + $0x330] sm:$0xff]  ;;  %v219_v44 = vld [vmem:[#allocation3 + $0x368] sm:$0xff]  ;;  %v234_v46 = vld [vmem:[#allocation3 + $0x3e0] sm:$0xff] }
 0x38f   :  { %v227_v45 = vld [vmem:[#allocation3 + $0x3a8] sm:$0xff] }
 0x391   :  { %6376 = vmatmul.mubr.msk.bf16.gmra.mrb[40].mxu1 %vm1538_vm0, %v914_v51  ;;  %v963_v51 = vpack.c.bf16 %v445_v50, %v438_v49  ;;  %v536_v49 = vld [vmem:[#allocation3 + $0xd50] sm:$0xff]  ;;  %v543_v50 = vld [vmem:[#allocation3 + $0xd88] sm:$0xff] }
 0x392   :  { %6379 = vmatprep.mubr.msk.bf16.mxu1 %vm7811_vm1, %v10134_v15 }
 0x395   :  { %2488 = vmatmul.mubr.bf16.gmra.mrb[172].mxu0 %v1099_v55  ;;  %v150_v55 = vld [vmem:[#allocation3 + $0x140] sm:$0xff] }
 0x396   :  { %2495 = vmatprep.mubr.bf16.mxu0 %v1107_v56  ;;  %v807_v56 = vpack.c.bf16 %v135_v53, %v128_v52  ;;  %v815_v57 = vpack.c.bf16 %v150_v55, %v143_v54  ;;  %v226_v52 = vld [vmem:[#allocation3 + $0x3a0] sm:$0xff]  ;;  %v233_v53 = vld [vmem:[#allocation3 + $0x3d8] sm:$0xff]  ;;  %v248_v55 = vld [vmem:[#allocation3 + $0x450] sm:$0xff] }
 0x397   :  { %v241_v54 = vld [vmem:[#allocation3 + $0x418] sm:$0xff] }
 0x399   :  { %6380 = vmatmul.mubr.msk.bf16.gmra.mrb[44].mxu1 %vm1538_vm0, %v921_v59  ;;  %v970_v59 = vpack.c.bf16 %v459_v1, %v452_v58  ;;  %v550_v58 = vld [vmem:[#allocation3 + $0xdc0] sm:$0xff]  ;;  %v557_v1 = vld [vmem:[#allocation3 + $0xdf8] sm:$0xff] }
 0x39a   :  { %6383 = vmatprep.mubr.msk.bf16.mxu1 %vm7811_vm1, %v10134_v15 }
 0x39d   :  { %2496 = vmatmul.mubr.bf16.gmra.mrb[176].mxu0 %v1106_v63  ;;  %v164_v63 = vld [vmem:[#allocation3 + $0x1b0] sm:$0xff] }
 0x39e   :  { %2503 = vmatprep.mubr.bf16.mxu0 %v1114_v0  ;;  %v822_v0 = vpack.c.bf16 %v164_v63, %v157_v62  ;;  %v255_v62 = vld [vmem:[#allocation3 + $0x488] sm:$0xff]  ;;  %v262_v63 = vld [vmem:[#allocation3 + $0x4c0] sm:$0xff] }
 0x3a1   :  { %6384 = vmatmul.mubr.msk.bf16.gmra.mrb[48].mxu1 %vm1538_vm0, %v928_v4  ;;  %v977_v4 = vpack.c.bf16 %v473_v3, %v466_v2  ;;  %v564_v2 = vld [vmem:[#allocation3 + $0xe30] sm:$0xff]  ;;  %v571_v3 = vld [vmem:[#allocation3 + $0xe68] sm:$0xff] }
 0x3a2   :  { %6387 = vmatprep.mubr.msk.bf16.mxu1 %vm7811_vm1, %v10134_v15 }
 0x3a5   :  { %2504 = vmatmul.mubr.bf16.gmra.mrb[180].mxu0 %v1113_v9  ;;  %v821_v9 = vpack.c.bf16 %v163_v6, %v156_v5  ;;  %v254_v5 = vld [vmem:[#allocation3 + $0x480] sm:$0xff]  ;;  %v261_v6 = vld [vmem:[#allocation3 + $0x4b8] sm:$0xff] }
 0x3a6   :  { %2511 = vmatprep.mubr.bf16.mxu0 %v1121_v10  ;;  %v829_v10 = vpack.c.bf16 %v178_v8, %v171_v7  ;;  %v269_v7 = vld [vmem:[#allocation3 + $0x4f8] sm:$0xff]  ;;  %v276_v8 = vld [vmem:[#allocation3 + $0x530] sm:$0xff] }
 0x3a9   :  { %6388 = vmatmul.mubr.msk.bf16.gmra.mrb[52].mxu1 %vm1538_vm0, %v935_v13  ;;  %v984_v13 = vpack.c.bf16 %v487_v12, %v480_v11 }
 0x3aa   :  { %6391 = vmatprep.mubr.msk.bf16.mxu1 %vm7811_vm1, %v10134_v15 }
 0x3ad   :  { %2512 = vmatmul.mubr.bf16.gmra.mrb[184].mxu0 %v1120_v20  ;;  %v828_v20 = vpack.c.bf16 %v177_v17, %v170_v14  ;;  %v268_v14 = vld [vmem:[#allocation3 + $0x4f0] sm:$0xff]  ;;  %v275_v17 = vld [vmem:[#allocation3 + $0x528] sm:$0xff] }
 0x3ae   :  { %2519 = vmatprep.mubr.bf16.mxu0 %v1128_v21  ;;  %v836_v21 = vpack.c.bf16 %v192_v19, %v185_v18  ;;  %v283_v18 = vld [vmem:[#allocation3 + $0x568] sm:$0xff]  ;;  %v290_v19 = vld [vmem:[#allocation3 + $0x5a0] sm:$0xff] }
 0x3b1   :  { %6392 = vmatmul.mubr.msk.bf16.gmra.mrb[56].mxu1 %vm1538_vm0, %v942_v24  ;;  %v991_v24 = vpack.c.bf16 %v501_v23, %v494_v22  ;;  %v381_v22 = vld [vmem:[#allocation3 + $0x878] sm:$0xff]  ;;  %v388_v23 = vld [vmem:[#allocation3 + $0x8b0] sm:$0xff] }
 0x3b2   :  { %6395 = vmatprep.mubr.msk.bf16.mxu1 %vm7811_vm1, %v10134_v15 }
 0x3b5   :  { %2520 = vmatmul.mubr.bf16.gmra.mrb[188].mxu0 %v1127_v29  ;;  %v835_v29 = vpack.c.bf16 %v191_v26, %v184_v25  ;;  %v282_v25 = vld [vmem:[#allocation3 + $0x560] sm:$0xff]  ;;  %v289_v26 = vld [vmem:[#allocation3 + $0x598] sm:$0xff] }
 0x3b6   :  { %2527 = vmatprep.mubr.bf16.mxu0 %v1135_v30  ;;  %v843_v30 = vpack.c.bf16 %v206_v28, %v199_v27  ;;  %v297_v27 = vld [vmem:[#allocation3 + $0x5d8] sm:$0xff]  ;;  %v304_v28 = vld [vmem:[#allocation3 + $0x610] sm:$0xff] }
 0x3b9   :  { %6396 = vmatmul.mubr.msk.bf16.gmra.mrb[60].mxu1 %vm1538_vm0, %v949_v33  ;;  %v998_v33 = vpack.c.bf16 %v515_v32, %v508_v31 }
 0x3ba   :  { %6399 = vmatprep.mubr.msk.bf16.mxu1 %vm7811_vm1, %v10134_v15 }
 0x3bd   :  { %2528 = vmatmul.mubr.bf16.gmra.mrb[192].mxu0 %v1134_v38  ;;  %v842_v38 = vpack.c.bf16 %v205_v35, %v198_v34  ;;  %v296_v34 = vld [vmem:[#allocation3 + $0x5d0] sm:$0xff]  ;;  %v303_v35 = vld [vmem:[#allocation3 + $0x608] sm:$0xff] }
 0x3be   :  { %2568 = vmatprep.mubr.bf16.mxu0 %v801_v39  ;;  %v850_v39 = vpack.c.bf16 %v220_v37, %v213_v36  ;;  %v311_v36 = vld [vmem:[#allocation3 + $0x648] sm:$0xff]  ;;  %v318_v37 = vld [vmem:[#allocation3 + $0x680] sm:$0xff] }
 0x3c1   :  { %6400 = vmatmul.mubr.msk.bf16.gmra.mrb[64].mxu1 %vm1538_vm0, %v956_v42  ;;  %v1005_v42 = vpack.c.bf16 %v529_v41, %v522_v40 }
 0x3c2   :  { %6403 = vmatprep.mubr.msk.bf16.mxu1 %vm7811_vm1, %v10134_v15 }
 0x3c5   :  { %2569 = vmatmul.mubr.bf16.vlgmr.msra.gmra.mrb[0].mxu0 %v800_v47  ;;  %v849_v47 = vpack.c.bf16 %v219_v44, %v212_v43  ;;  %v310_v43 = vld [vmem:[#allocation3 + $0x640] sm:$0xff]  ;;  %v317_v44 = vld [vmem:[#allocation3 + $0x678] sm:$0xff] }
 0x3c6   :  { %2576 = vmatprep.mubr.bf16.mxu0 %v808_v48  ;;  %6310 = vmatpush3.bf16.msra.mxu0 %v7989_v16  ;;  %v814_v16 = vpack.c.bf16 %v149_v61, %v142_v60  ;;  %v857_v48 = vpack.c.bf16 %v234_v46, %v227_v45  ;;  %v240_v60 = vld [vmem:[#allocation3 + $0x410] sm:$0xff]  ;;  %v247_v61 = vld [vmem:[#allocation3 + $0x448] sm:$0xff]  ;;  %v325_v45 = vld [vmem:[#allocation3 + $0x6b8] sm:$0xff] }
 0x3c7   :  { %v332_v46 = vld [vmem:[#allocation3 + $0x6f0] sm:$0xff] }
 0x3c9   :  { %6404 = vmatmul.mubr.msk.bf16.gmra.mrb[68].mxu1 %vm1538_vm0, %v963_v51  ;;  %v1012_v51 = vpack.c.bf16 %v543_v50, %v536_v49  ;;  %v416_v49 = vld [vmem:[#allocation3 + $0x990] sm:$0xff] }
 0x3ca   :  { %6407 = vmatprep.mubr.msk.bf16.mxu1 %vm7811_vm1, %v10134_v15 }
 0x3cd   :  { %2577 = vmatmul.mubr.bf16.gmra.mrb[4].mxu0 %v807_v56  ;;  %v856_v56 = vpack.c.bf16 %v233_v53, %v226_v52  ;;  %v324_v52 = vld [vmem:[#allocation3 + $0x6b0] sm:$0xff]  ;;  %v331_v53 = vld [vmem:[#allocation3 + $0x6e8] sm:$0xff] }
 0x3ce   :  { %2584 = vmatprep.mubr.bf16.mxu0 %v815_v57  ;;  %v864_v57 = vpack.c.bf16 %v248_v55, %v241_v54  ;;  %v339_v54 = vld [vmem:[#allocation3 + $0x728] sm:$0xff]  ;;  %v346_v55 = vld [vmem:[#allocation3 + $0x760] sm:$0xff] }
 0x3d1   :  { %6408 = vmatmul.mubr.msk.bf16.gmra.mrb[72].mxu1 %vm1538_vm0, %v970_v59  ;;  %v1019_v59 = vpack.c.bf16 %v557_v1, %v550_v58  ;;  %v408_v1 = vld [vmem:[#allocation3 + $0x950] sm:$0xff] }
 0x3d2   :  { %6411 = vmatprep.mubr.msk.bf16.mxu1 %vm7811_vm1, %v10134_v15 }
 0x3d5   :  { %2585 = vmatmul.mubr.bf16.gmra.mrb[8].mxu0 %v814_v16  ;;  %v863_v16 = vpack.c.bf16 %v247_v61, %v240_v60  ;;  %v338_v60 = vld [vmem:[#allocation3 + $0x720] sm:$0xff]  ;;  %v345_v61 = vld [vmem:[#allocation3 + $0x758] sm:$0xff] }
 0x3d6   :  { %2592 = vmatprep.mubr.bf16.mxu0 %v822_v0  ;;  %v871_v0 = vpack.c.bf16 %v262_v63, %v255_v62  ;;  %v353_v62 = vld [vmem:[#allocation3 + $0x798] sm:$0xff]  ;;  %v360_v63 = vld [vmem:[#allocation3 + $0x7d0] sm:$0xff] }
 0x3d9   :  { %6412 = vmatmul.mubr.msk.bf16.gmra.mrb[76].mxu1 %vm1538_vm0, %v977_v4  ;;  %v1026_v4 = vpack.c.bf16 %v571_v3, %v564_v2  ;;  %v634_v3 = vld [vmem:[#allocation3 + $0x1060] sm:$0xff] }
 0x3da   :  { %6415 = vmatprep.mubr.msk.bf16.mxu1 %vm7811_vm1, %v10134_v15 }
 0x3dd   :  { %2593 = vmatmul.mubr.bf16.gmra.mrb[12].mxu0 %v821_v9  ;;  %v870_v9 = vpack.c.bf16 %v261_v6, %v254_v5  ;;  %v352_v5 = vld [vmem:[#allocation3 + $0x790] sm:$0xff]  ;;  %v359_v6 = vld [vmem:[#allocation3 + $0x7c8] sm:$0xff] }
 0x3de   :  { %2600 = vmatprep.mubr.bf16.mxu0 %v829_v10  ;;  %v878_v10 = vpack.c.bf16 %v276_v8, %v269_v7  ;;  %v367_v7 = vld [vmem:[#allocation3 + $0x808] sm:$0xff]  ;;  %v374_v8 = vld [vmem:[#allocation3 + $0x840] sm:$0xff] }
 0x3e1   :  { %6416 = vmatmul.mubr.msk.bf16.gmra.mrb[80].mxu1 %vm1538_vm0, %v984_v13 }
 0x3e2   :  { %6419 = vmatprep.mubr.msk.bf16.mxu1 %vm7811_vm1, %v10134_v15 }
 0x3e5   :  { %2601 = vmatmul.mubr.bf16.gmra.mrb[16].mxu0 %v828_v20  ;;  %v877_v20 = vpack.c.bf16 %v275_v17, %v268_v14  ;;  %v578_v14 = vld [vmem:[#allocation3 + $0xea0] sm:$0xff]  ;;  %v585_v17 = vld [vmem:[#allocation3 + $0xed8] sm:$0xff] }
 0x3e6   :  { %2608 = vmatprep.mubr.bf16.mxu0 %v836_v21  ;;  %v885_v21 = vpack.c.bf16 %v290_v19, %v283_v18  ;;  %v1033_v18 = vpack.c.bf16 %v585_v17, %v578_v14 }
 0x3e9   :  { %6420 = vmatmul.mubr.msk.bf16.gmra.mrb[84].mxu1 %vm1538_vm0, %v991_v24 }
 0x3ea   :  { %6423 = vmatprep.mubr.msk.bf16.mxu1 %vm7811_vm1, %v10134_v15 }
 0x3ed   :  { %2609 = vmatmul.mubr.bf16.gmra.mrb[20].mxu0 %v835_v29  ;;  %v884_v29 = vpack.c.bf16 %v289_v26, %v282_v25  ;;  %v934_v25 = vpack.c.bf16 %v388_v23, %v381_v22 }
 0x3ee   :  { %2616 = vmatprep.mubr.bf16.mxu0 %v843_v30  ;;  %v892_v30 = vpack.c.bf16 %v304_v28, %v297_v27 }
 0x3f1   :  { %6424 = vmatmul.mubr.msk.bf16.gmra.mrb[88].mxu1 %vm1538_vm0, %v998_v33  ;;  %v380_v33 = vld [vmem:[#allocation3 + $0x870] sm:$0xff] }
 0x3f2   :  { %6427 = vmatprep.mubr.msk.bf16.mxu1 %vm7811_vm1, %v10134_v15 }
 0x3f5   :  { %2617 = vmatmul.mubr.bf16.gmra.mrb[24].mxu0 %v842_v38  ;;  %v891_v38 = vpack.c.bf16 %v303_v35, %v296_v34  ;;  %v387_v34 = vld [vmem:[#allocation3 + $0x8a8] sm:$0xff] }
 0x3f6   :  { %2624 = vmatprep.mubr.bf16.mxu0 %v850_v39  ;;  %v899_v39 = vpack.c.bf16 %v318_v37, %v311_v36  ;;  %v395_v35 = vld [vmem:[#allocation3 + $0x8e8] sm:$0xff]  ;;  %v402_v36 = vld [vmem:[#allocation3 + $0x920] sm:$0xff]  ;;  %v933_v37 = vpack.c.bf16 %v387_v34, %v380_v33 }
 0x3f9   :  { %6428 = vmatmul.mubr.msk.bf16.gmra.mrb[92].mxu1 %vm1538_vm0, %v1005_v42  ;;  %v606_v42 = vld [vmem:[#allocation3 + $0xf80] sm:$0xff] }
 0x3fa   :  { %6431 = vmatprep.mubr.msk.bf16.mxu1 %vm7811_vm1, %v10134_v15 }
 0x3fd   :  { %2625 = vmatmul.mubr.bf16.gmra.mrb[28].mxu0 %v849_v47  ;;  %v898_v47 = vpack.c.bf16 %v317_v44, %v310_v43  ;;  %v613_v43 = vld [vmem:[#allocation3 + $0xfb8] sm:$0xff] }
 0x3fe   :  { %2632 = vmatprep.mubr.bf16.mxu0 %v857_v48  ;;  %v906_v48 = vpack.c.bf16 %v332_v46, %v325_v45  ;;  %v1047_v44 = vpack.c.bf16 %v613_v43, %v606_v42  ;;  %v394_v46 = vld [vmem:[#allocation3 + $0x8e0] sm:$0xff]  ;;  %v457_v42 = vld [vmem:[#allocation3 + $0xad8] sm:$0xff] }
 0x3ff   :  { %v465_v43 = vld [vmem:[#allocation3 + $0xb18] sm:$0xff] }
 0x401   :  { %6432 = vmatmul.mubr.msk.bf16.gmra.mrb[96].mxu1 %vm1538_vm0, %v1012_v51 }
 0x402   :  { %6435 = vmatprep.mubr.msk.bf16.mxu1 %vm7811_vm1, %v10134_v15 }
 0x404   :  { %v8078_v11 = vpop.f32.mrb[0].mxu1 }
 0x405   :  { %2633 = vmatmul.mubr.bf16.gmra.mrb[32].mxu0 %v856_v56  ;;  %v905_v56 = vpack.c.bf16 %v331_v53, %v324_v52  ;;  %v6337_v12 = vpop.f32.mrb[1].mxu1 }
 0x406   :  { %2640 = vmatprep.mubr.bf16.mxu0 %v864_v57  ;;  %v913_v57 = vpack.c.bf16 %v346_v55, %v339_v54  ;;  %v8080_v13 = vpop.f32.mrb[2].mxu1  ;;  %v620_v55 = vld [vmem:[#allocation3 + $0xff0] sm:$0xff] }
 0x407   :  { %v6338_v19 = vpop.f32.mrb[3].mxu1 }
 0x409   :  { %6436 = vmatmul.mubr.msk.bf16.gmra.mrb[100].mxu1 %vm1538_vm0, %v1019_v59  ;;  %v415_v59 = vld [vmem:[#allocation3 + $0x988] sm:$0xff] }
 0x40a   :  { %6439 = vmatprep.mubr.msk.bf16.mxu1 %vm7811_vm1, %v10134_v15 }
 0x40c   :  { %v8085_v26 = vpop.f32.mrb[4].mxu1 }
 0x40d   :  { %2641 = vmatmul.mubr.bf16.gmra.mrb[36].mxu0 %v863_v16  ;;  %v912_v16 = vpack.c.bf16 %v345_v61, %v338_v60  ;;  %v6341_v27 = vpop.f32.mrb[5].mxu1  ;;  %v423_v60 = vld [vmem:[#allocation3 + $0x9c8] sm:$0xff]  ;;  %v430_v61 = vld [vmem:[#allocation3 + $0xa00] sm:$0xff] }
 0x40e   :  { %2648 = vmatprep.mubr.bf16.mxu0 %v871_v0  ;;  %v920_v0 = vpack.c.bf16 %v360_v63, %v353_v62  ;;  %v8087_v28 = vpop.f32.mrb[6].mxu1  ;;  %v947_v62 = vpack.c.bf16 %v415_v59, %v408_v1  ;;  %v955_v63 = vpack.c.bf16 %v430_v61, %v423_v60  ;;  %v451_v27 = vld [vmem:[#allocation3 + $0xaa8] sm:$0xff]  ;;  %v486_v1 = vld [vmem:[#allocation3 + $0xbc0] sm:$0xff] }
 0x40f   :  { %v6342_v32 = vpop.f32.mrb[7].mxu1 }
 0x411   :  { %6440 = vmatmul.mubr.msk.bf16.gmra.mrb[104].mxu1 %vm1538_vm0, %v1026_v4  ;;  %v641_v4 = vld [vmem:[#allocation3 + $0x1098] sm:$0xff] }
 0x412   :  { %6443 = vmatprep.mubr.msk.bf16.mxu1 %vm7811_vm1, %v10134_v15 }
 0x415   :  { %2649 = vmatmul.mubr.bf16.gmra.mrb[40].mxu0 %v870_v9  ;;  %v919_v9 = vpack.c.bf16 %v359_v6, %v352_v5  ;;  %v1061_v5 = vpack.c.bf16 %v641_v4, %v634_v3  ;;  %v697_v3 = vld [vmem:[#allocation3 + $0x1258] sm:$0xff] }
 0x416   :  { %2656 = vmatprep.mubr.bf16.mxu0 %v878_v10  ;;  %v927_v10 = vpack.c.bf16 %v374_v8, %v367_v7  ;;  %v422_v7 = vld [vmem:[#allocation3 + $0x9c0] sm:$0xff]  ;;  %v429_v8 = vld [vmem:[#allocation3 + $0x9f8] sm:$0xff] }
 0x417   :  { %v954_v12 = vpack.c.bf16 %v429_v8, %v422_v7  ;;  %v485_v7 = vld [vmem:[#allocation3 + $0xbb8] sm:$0xff] }
 0x418   :  { %v493_v8 = vld [vmem:[#allocation3 + $0xbf8] sm:$0xff] }
 0x419   :  { %6444 = vmatmul.mubr.msk.bf16.gmra.mrb[108].mxu1 %vm1538_vm0, %v1033_v18 }
 0x41a   :  { %6447 = vmatprep.mubr.msk.bf16.mxu1 %vm7811_vm1, %v10134_v15 }
 0x41d   :  { %2657 = vmatmul.mubr.bf16.gmra.mrb[44].mxu0 %v877_v20  ;;  %v366_v20 = vld [vmem:[#allocation3 + $0x800] sm:$0xff] }
 0x41e   :  { %2664 = vmatprep.mubr.bf16.mxu0 %v885_v21  ;;  %v373_v21 = vld [vmem:[#allocation3 + $0x838] sm:$0xff] }
 0x41f   :  { %v926_v24 = vpack.c.bf16 %v373_v21, %v366_v20  ;;  %v648_v20 = vld [vmem:[#allocation3 + $0x10d0] sm:$0xff]  ;;  %v655_v21 = vld [vmem:[#allocation3 + $0x1108] sm:$0xff] }
 0x420   :  { %v1068_v22 = vpack.c.bf16 %v655_v21, %v648_v20  ;;  %v704_v21 = vld [vmem:[#allocation3 + $0x1290] sm:$0xff] }
 0x425   :  { %2665 = vmatmul.mubr.bf16.gmra.mrb[48].mxu0 %v884_v29  ;;  %v592_v29 = vld [vmem:[#allocation3 + $0xf10] sm:$0xff] }
 0x426   :  { %2672 = vmatprep.mubr.bf16.mxu0 %v892_v30  ;;  %v599_v30 = vld [vmem:[#allocation3 + $0xf48] sm:$0xff] }
 0x427   :  { %v1040_v31 = vpack.c.bf16 %v599_v30, %v592_v29  ;;  %v458_v29 = vld [vmem:[#allocation3 + $0xae0] sm:$0xff] }
 0x429   :  { %6448 = vmatmul.mubr.msk.bf16.gmra.mrb[112].mxu1 %vm1538_vm0, %v1040_v31  ;;  %v969_v31 = vpack.c.bf16 %v458_v29, %v451_v27  ;;  %v499_v27 = vld [vmem:[#allocation3 + $0xc28] sm:$0xff] }
 0x42a   :  { %6451 = vmatprep.mubr.msk.bf16.mxu1 %vm7811_vm1, %v10134_v15  ;;  %v507_v29 = vld [vmem:[#allocation3 + $0xc68] sm:$0xff] }
 0x42d   :  { %2673 = vmatmul.mubr.bf16.gmra.mrb[52].mxu0 %v891_v38  ;;  %v941_v38 = vpack.c.bf16 %v402_v36, %v395_v35  ;;  %v662_v35 = vld [vmem:[#allocation3 + $0x1140] sm:$0xff]  ;;  %v669_v36 = vld [vmem:[#allocation3 + $0x1178] sm:$0xff] }
 0x42e   :  { %2680 = vmatprep.mubr.bf16.mxu0 %v899_v39  ;;  %v8092_v39 = vpop.f32.mrb[8].mxu1 }
 0x42f   :  { %v6345_v40 = vpop.f32.mrb[9].mxu1 }
 0x430   :  { %v8094_v41 = vpop.f32.mrb[10].mxu1  ;;  %v450_v40 = vld [vmem:[#allocation3 + $0xaa0] sm:$0xff] }
 0x431   :  { %v6346_v45 = vpop.f32.mrb[11].mxu1  ;;  %6452 = vmatmul.mubr.msk.bf16.gmra.mrb[116].mxu1 %vm1538_vm0, %v1047_v44  ;;  %v472_v44 = vld [vmem:[#allocation3 + $0xb50] sm:$0xff] }
 0x432   :  { %6455 = vmatprep.mubr.msk.bf16.mxu1 %vm7811_vm1, %v10134_v15  ;;  %v8099_v52 = vpop.f32.mrb[12].mxu1  ;;  %v968_v45 = vpack.c.bf16 %v457_v42, %v450_v40  ;;  %v725_v40 = vld [vmem:[#allocation3 + $0x1338] sm:$0xff] }
 0x433   :  { %v6349_v53 = vpop.f32.mrb[13].mxu1 }
 0x434   :  { %v8101_v54 = vpop.f32.mrb[14].mxu1 }
 0x435   :  { %2681 = vmatmul.mubr.bf16.gmra.mrb[56].mxu0 %v898_v47  ;;  %v401_v47 = vld [vmem:[#allocation3 + $0x918] sm:$0xff]  ;;  %v6350_v58 = vpop.f32.mrb[15].mxu1 }
 0x436   :  { %2688 = vmatprep.mubr.bf16.mxu0 %v906_v48  ;;  %v409_v48 = vld [vmem:[#allocation3 + $0x958] sm:$0xff]  ;;  %v940_v50 = vpack.c.bf16 %v401_v47, %v394_v46  ;;  %v976_v46 = vpack.c.bf16 %v472_v44, %v465_v43  ;;  %v479_v58 = vld [vmem:[#allocation3 + $0xb88] sm:$0xff]  ;;  %v506_v44 = vld [vmem:[#allocation3 + $0xc60] sm:$0xff] }
 0x437   :  { %v948_v51 = vpack.c.bf16 %v416_v49, %v409_v48  ;;  %v983_v60 = vpack.c.bf16 %v486_v1, %v479_v58  ;;  %v739_v58 = vld [vmem:[#allocation3 + $0x13a8] sm:$0xff] }
 0x43d   :  { %2689 = vmatmul.mubr.bf16.gmra.mrb[60].mxu0 %v905_v56  ;;  %v627_v56 = vld [vmem:[#allocation3 + $0x1028] sm:$0xff] }
 0x43e   :  { %2696 = vmatprep.mubr.bf16.mxu0 %v913_v57  ;;  %v1054_v57 = vpack.c.bf16 %v627_v56, %v620_v55  ;;  %v464_v56 = vld [vmem:[#allocation3 + $0xb10] sm:$0xff] }
 0x440   :  { %6456 = vmatmul.mubr.msk.bf16.gmra.mrb[120].mxu1 %vm1538_vm0, %v1054_v57  ;;  %v471_v57 = vld [vmem:[#allocation3 + $0xb48] sm:$0xff] }
 0x441   :  { %6459 = vmatprep.mubr.msk.bf16.mxu1 %vm7811_vm1, %v10134_v15  ;;  %v975_v59 = vpack.c.bf16 %v471_v57, %v464_v56  ;;  %v732_v57 = vld [vmem:[#allocation3 + $0x1370] sm:$0xff] }
 0x442   :  { %v1110_v1 = vpack.c.bf16 %v739_v58, %v732_v57  ;;  %v774_v57 = vld [vmem:[#allocation3 + $0x14c0] sm:$0xff]  ;;  %v781_v58 = vld [vmem:[#allocation3 + $0x14f8] sm:$0xff] }
 0x445   :  { %2697 = vmatmul.mubr.bf16.gmra.mrb[64].mxu0 %v912_v16  ;;  %v8106_v16 = vpop.f32.mrb[16].mxu1 }
 0x446   :  { %2704 = vmatprep.mubr.bf16.mxu0 %v920_v0  ;;  %v6353_v0 = vpop.f32.mrb[17].mxu1 }
 0x447   :  { %v8108_v2 = vpop.f32.mrb[18].mxu1  ;;  %v690_v0 = vld [vmem:[#allocation3 + $0x1220] sm:$0xff] }
 0x448   :  { %v6354_v6 = vpop.f32.mrb[19].mxu1  ;;  %6460 = vmatmul.mubr.msk.bf16.gmra.mrb[124].mxu1 %vm1538_vm0, %v1061_v5  ;;  %v1089_v4 = vpack.c.bf16 %v697_v3, %v690_v0  ;;  %v535_v0 = vld [vmem:[#allocation3 + $0xd48] sm:$0xff]  ;;  %v542_v3 = vld [vmem:[#allocation3 + $0xd80] sm:$0xff] }
 0x449   :  { %6463 = vmatprep.mubr.msk.bf16.mxu1 %vm7811_vm1, %v10134_v15  ;;  %v8113_v17 = vpop.f32.mrb[20].mxu1  ;;  %v478_v6 = vld [vmem:[#allocation3 + $0xb80] sm:$0xff] }
 0x44a   :  { %v6357_v18 = vpop.f32.mrb[21].mxu1 }
 0x44b   :  { %v8115_v19 = vpop.f32.mrb[22].mxu1 }
 0x44c   :  { %v6358_v23 = vpop.f32.mrb[23].mxu1 }
 0x44d   :  { %2705 = vmatmul.mubr.bf16.gmra.mrb[68].mxu0 %v919_v9  ;;  %v437_v9 = vld [vmem:[#allocation3 + $0xa38] sm:$0xff]  ;;  %v8120_v32 = vpop.f32.mrb[24].mxu1 }
 0x44e   :  { %2712 = vmatprep.mubr.bf16.mxu0 %v927_v10  ;;  %v444_v10 = vld [vmem:[#allocation3 + $0xa70] sm:$0xff]  ;;  %v6361_v33 = vpop.f32.mrb[25].mxu1 }
 0x44f   :  { %v962_v14 = vpack.c.bf16 %v444_v10, %v437_v9  ;;  %v8122_v34 = vpop.f32.mrb[26].mxu1  ;;  %v500_v9 = vld [vmem:[#allocation3 + $0xc30] sm:$0xff]  ;;  %v982_v10 = vpack.c.bf16 %v485_v7, %v478_v6 }
 0x450   :  { %6464 = vmatmul.mubr.msk.bf16.gmra.mrb[128].mxu1 %vm1538_vm0, %v1068_v22  ;;  %v711_v22 = vld [vmem:[#allocation3 + $0x12c8] sm:$0xff] }
 0x451   :  { %6467 = vmatprep.mubr.msk.bf16.mxu1 %vm7811_vm1, %v10134_v15  ;;  %v1096_v23 = vpack.c.bf16 %v711_v22, %v704_v21  ;;  %v534_v21 = vld [vmem:[#allocation3 + $0xd40] sm:$0xff]  ;;  %v541_v22 = vld [vmem:[#allocation3 + $0xd78] sm:$0xff] }
 0x455   :  { %2713 = vmatmul.mubr.bf16.gmra.mrb[72].mxu0 %v926_v24  ;;  %v436_v24 = vld [vmem:[#allocation3 + $0xa30] sm:$0xff] }
 0x456   :  { %2720 = vmatprep.mubr.bf16.mxu0 %v934_v25  ;;  %v443_v25 = vld [vmem:[#allocation3 + $0xa68] sm:$0xff] }
 0x457   :  { %v961_v30 = vpack.c.bf16 %v443_v25, %v436_v24  ;;  %v492_v25 = vld [vmem:[#allocation3 + $0xbf0] sm:$0xff] }
 0x45d   :  { %2721 = vmatmul.mubr.bf16.gmra.mrb[76].mxu0 %v933_v37  ;;  %v1075_v37 = vpack.c.bf16 %v669_v36, %v662_v35 }
 0x45e   :  { %2728 = vmatprep.mubr.bf16.mxu0 %v941_v38  ;;  %v6362_v38 = vpop.f32.mrb[27].mxu1 }
 0x45f   :  { %6468 = vmatmul.mubr.msk.bf16.gmra.mrb[132].mxu1 %vm1538_vm0, %v1075_v37  ;;  %v8127_v47 = vpop.f32.mrb[28].mxu1  ;;  %v718_v38 = vld [vmem:[#allocation3 + $0x1300] sm:$0xff] }
 0x460   :  { %6471 = vmatprep.mubr.msk.bf16.mxu1 %vm7811_vm1, %v10134_v15  ;;  %v6365_v48 = vpop.f32.mrb[29].mxu1  ;;  %v1103_v42 = vpack.c.bf16 %v725_v40, %v718_v38 }
 0x461   :  { %v8129_v49 = vpop.f32.mrb[30].mxu1  ;;  %v528_v48 = vld [vmem:[#allocation3 + $0xd10] sm:$0xff] }
 0x462   :  { %v6366_v55 = vpop.f32.mrb[31].mxu1 }
 0x463   :  { %v8134_v61 = vpop.f32.mrb[32].mxu1 }
 0x465   :  { %2729 = vmatmul.mubr.bf16.gmra.mrb[80].mxu0 %v940_v50  ;;  %v676_v50 = vld [vmem:[#allocation3 + $0x11b0] sm:$0xff] }
 0x466   :  { %2736 = vmatprep.mubr.bf16.mxu0 %v948_v51  ;;  %v683_v51 = vld [vmem:[#allocation3 + $0x11e8] sm:$0xff] }
 0x467   :  { %v1082_v53 = vpack.c.bf16 %v683_v51, %v676_v50 }
 0x469   :  { %6472 = vmatmul.mubr.msk.bf16.gmra.mrb[136].mxu1 %vm1538_vm0, %v1082_v53 }
 0x46a   :  { %6475 = vmatprep.mubr.msk.bf16.mxu1 %vm7811_vm1, %v10134_v15 }
 0x46d   :  { %2737 = vmatmul.mubr.bf16.gmra.mrb[84].mxu0 %v947_v62  ;;  %v6369_v62 = vpop.f32.mrb[33].mxu1 }
 0x46e   :  { %2744 = vmatprep.mubr.bf16.mxu0 %v955_v63  ;;  %v8136_v63 = vpop.f32.mrb[34].mxu1  ;;  %v527_v62 = vld [vmem:[#allocation3 + $0xd08] sm:$0xff] }
 0x46f   :  { %v6370_v5 = vpop.f32.mrb[35].mxu1 }
 0x470   :  { %v1011_v5 = vpack.c.bf16 %v542_v3, %v535_v0  ;;  %v577_v0 = vld [vmem:[#allocation3 + $0xe98] sm:$0xff]  ;;  %v584_v3 = vld [vmem:[#allocation3 + $0xed0] sm:$0xff] }
 0x471   :  { %6476 = vmatmul.mubr.msk.bf16.gmra.mrb[140].mxu1 %vm1538_vm0, %v1089_v4 }
 0x472   :  { %6479 = vmatprep.mubr.msk.bf16.mxu1 %vm7811_vm1, %v10134_v15 }
 0x475   :  { %2745 = vmatmul.mubr.bf16.gmra.mrb[88].mxu0 %v954_v12  ;;  %v990_v12 = vpack.c.bf16 %v500_v9, %v493_v8  ;;  %v746_v9 = vld [vmem:[#allocation3 + $0x13e0] sm:$0xff] }
 0x476   :  { %2752 = vmatprep.mubr.bf16.mxu0 %v962_v14  ;;  %v8141_v14 = vpop.f32.mrb[36].mxu1 }
 0x477   :  { %v6373_v18 = vpop.f32.mrb[37].mxu1 }
 0x478   :  { %v8143_v20 = vpop.f32.mrb[38].mxu1 }
 0x479   :  { %v6374_v24 = vpop.f32.mrb[39].mxu1  ;;  %6480 = vmatmul.mubr.msk.bf16.gmra.mrb[144].mxu1 %vm1538_vm0, %v1096_v23  ;;  %v549_v23 = vld [vmem:[#allocation3 + $0xdb8] sm:$0xff] }
 0x47a   :  { %6483 = vmatprep.mubr.msk.bf16.mxu1 %vm7811_vm1, %v10134_v15  ;;  %v8148_v35 = vpop.f32.mrb[40].mxu1  ;;  %v556_v24 = vld [vmem:[#allocation3 + $0xdf0] sm:$0xff] }
 0x47b   :  { %v6377_v36 = vpop.f32.mrb[41].mxu1 }
 0x47c   :  { %v8150_v37 = vpop.f32.mrb[42].mxu1  ;;  %v767_v36 = vld [vmem:[#allocation3 + $0x1488] sm:$0xff] }
 0x47d   :  { %2753 = vmatmul.mubr.bf16.gmra.mrb[92].mxu0 %v961_v30  ;;  %v514_v30 = vld [vmem:[#allocation3 + $0xca0] sm:$0xff]  ;;  %v6378_v43 = vpop.f32.mrb[43].mxu1 }
 0x47e   :  { %2760 = vmatprep.mubr.bf16.mxu0 %v969_v31  ;;  %v989_v31 = vpack.c.bf16 %v499_v27, %v492_v25  ;;  %v997_v33 = vpack.c.bf16 %v514_v30, %v507_v29  ;;  %v8155_v53 = vpop.f32.mrb[44].mxu1  ;;  %v1010_v25 = vpack.c.bf16 %v541_v22, %v534_v21  ;;  %v1018_v27 = vpack.c.bf16 %v556_v24, %v549_v23  ;;  %v555_v43 = vld [vmem:[#allocation3 + $0xde8] sm:$0xff]  ;;  %v8187_v23 = vld [vmem:[#allocation8] ss:$0 sm:$0xff]  ;;  %v576_v24 = vld [vmem:[#allocation3 + $0xe90] sm:$0xff] }
 0x47f   :  { %v6381_v55 = vpop.f32.mrb[45].mxu1 }
 0x480   :  { %v8157_v56 = vpop.f32.mrb[46].mxu1 }
 0x481   :  { %6484 = vmatmul.mubr.msk.bf16.gmra.mrb[148].mxu1 %vm1538_vm0, %v1103_v42  ;;  %v548_v42 = vld [vmem:[#allocation3 + $0xdb0] sm:$0xff] }
 0x482   :  { %6487 = vmatprep.mubr.msk.bf16.mxu1 %vm7811_vm1, %v10134_v15 }
 0x485   :  { %2761 = vmatmul.mubr.bf16.gmra.mrb[96].mxu0 %v968_v45  ;;  %v513_v45 = vld [vmem:[#allocation3 + $0xc98] sm:$0xff] }
 0x486   :  { %2768 = vmatprep.mubr.bf16.mxu0 %v976_v46  ;;  %v521_v46 = vld [vmem:[#allocation3 + $0xcd8] sm:$0xff]  ;;  %v996_v50 = vpack.c.bf16 %v513_v45, %v506_v44  ;;  %v563_v44 = vld [vmem:[#allocation3 + $0xe28] sm:$0xff]  ;;  %v570_v45 = vld [vmem:[#allocation3 + $0xe60] sm:$0xff] }
 0x487   :  { %v1004_v51 = vpack.c.bf16 %v528_v48, %v521_v46  ;;  %v1017_v46 = vpack.c.bf16 %v555_v43, %v548_v42  ;;  %v1025_v48 = vpack.c.bf16 %v570_v45, %v563_v44 }
 0x489   :  { %6488 = vmatmul.mubr.msk.bf16.gmra.mrb[152].mxu1 %vm1538_vm0, %v1110_v1  ;;  %v1131_v1 = vpack.c.bf16 %v781_v58, %v774_v57 }
 0x48a   :  { %6491 = vmatprep.mubr.msk.bf16.mxu1 %vm7811_vm1, %v10134_v15 }
 0x48d   :  { %2769 = vmatmul.mubr.bf16.gmra.mrb[100].mxu0 %v975_v59  ;;  %v6382_v59 = vpop.f32.mrb[47].mxu1 }
 0x48e   :  { %2776 = vmatprep.mubr.bf16.mxu0 %v983_v60  ;;  %v520_v60 = vld [vmem:[#allocation3 + $0xcd0] sm:$0xff]  ;;  %v8162_v6 = vpop.f32.mrb[48].mxu1 }
 0x48f   :  { %v1003_v4 = vpack.c.bf16 %v527_v62, %v520_v60  ;;  %v6385_v7 = vpop.f32.mrb[49].mxu1  ;;  %v562_v60 = vld [vmem:[#allocation3 + $0xe20] sm:$0xff]  ;;  %v569_v62 = vld [vmem:[#allocation3 + $0xe58] sm:$0xff] }
 0x490   :  { %v8164_v8 = vpop.f32.mrb[50].mxu1 }
 0x491   :  { %v6386_v18 = vpop.f32.mrb[51].mxu1 }
 0x492   :  { %v8169_v29 = vpop.f32.mrb[52].mxu1  ;;  %v795_v18 = vld [vmem:[#allocation3 + $0x1568] sm:$0xff] }
 0x493   :  { %v6389_v30 = vpop.f32.mrb[53].mxu1 }
 0x494   :  { %v598_v30 = vld [vmem:[#allocation3 + $0xf40] sm:$0xff] }
 0x495   :  { %2777 = vmatmul.mubr.bf16.gmra.mrb[104].mxu0 %v982_v10  ;;  %v753_v10 = vld [vmem:[#allocation3 + $0x1418] sm:$0xff] }
 0x496   :  { %2784 = vmatprep.mubr.bf16.mxu0 %v990_v12  ;;  %v1117_v12 = vpack.c.bf16 %v753_v10, %v746_v9 }
 0x498   :  { %6492 = vmatmul.mubr.msk.bf16.gmra.mrb[156].mxu1 %vm1538_vm0, %v1117_v12  ;;  %v788_v12 = vld [vmem:[#allocation3 + $0x1530] sm:$0xff] }
 0x499   :  { %6495 = vmatprep.mubr.msk.bf16.mxu1 %vm7811_vm1, %v10134_v15  ;;  %v1138_v21 = vpack.c.bf16 %v795_v18, %v788_v12 }
 0x49d   :  { %2785 = vmatmul.mubr.bf16.gmra.mrb[108].mxu0 %v989_v31  ;;  %v8171_v31 = vpop.f32.mrb[54].mxu1 }
 0x49e   :  { %2792 = vmatprep.mubr.bf16.mxu0 %v997_v33  ;;  %v760_v33 = vld [vmem:[#allocation3 + $0x1450] sm:$0xff]  ;;  %v6390_v40 = vpop.f32.mrb[55].mxu1 }
 0x49f   :  { %v1124_v38 = vpack.c.bf16 %v767_v36, %v760_v33 }
 0x4a1   :  { %6496 = vmatmul.mubr.msk.bf16.gmra.mrb[160].mxu1 %vm1538_vm0, %v1124_v38 }
 0x4a2   :  { %6499 = vmatprep.mubr.msk.bf16.mxu1 %vm7811_vm1, %v10134_v15 }
 0x4a5   :  { %2793 = vmatmul.mubr.bf16.gmra.mrb[112].mxu0 %v996_v50  ;;  %v8176_v50 = vpop.f32.mrb[56].mxu1 }
 0x4a6   :  { %2800 = vmatprep.mubr.bf16.mxu0 %v1004_v51  ;;  %v6393_v51 = vpop.f32.mrb[57].mxu1 }
 0x4a7   :  { %v8178_v55 = vpop.f32.mrb[58].mxu1 }
 0x4a8   :  { %v6394_v59 = vpop.f32.mrb[59].mxu1 }
 0x4a9   :  { %6500 = vmatmul.mubr.msk.bf16.gmra.mrb[164].mxu1 %vm1538_vm0, %v1131_v1  ;;  %v8183_v7 = vpop.f32.mrb[60].mxu1 }
 0x4aa   :  { %6503 = vmatprep.mubr.msk.bf16.mxu1 %vm7811_vm1, %v10134_v15  ;;  %v6397_v9 = vpop.f32.mrb[61].mxu1 }
 0x4ab   :  { %v8185_v10 = vpop.f32.mrb[62].mxu1 }
 0x4ac   :  { %v6398_v22 = vpop.f32.mrb[63].mxu1 }
 0x4ad   :  { %2801 = vmatmul.mubr.bf16.gmra.mrb[116].mxu0 %v1003_v4  ;;  %v1024_v4 = vpack.c.bf16 %v569_v62, %v562_v60  ;;  %v8193_v44 = vpop.f32.mrb[64].mxu1  ;;  %v590_v60 = vld [vmem:[#allocation3 + $0xf00] sm:$0xff]  ;;  %v597_v62 = vld [vmem:[#allocation3 + $0xf38] sm:$0xff] }
 0x4ae   :  { %2808 = vmatprep.mubr.bf16.mxu0 %v1011_v5  ;;  %v1032_v5 = vpack.c.bf16 %v584_v3, %v577_v0  ;;  %v6401_v51 = vpop.f32.mrb[65].mxu1  ;;  %v605_v3 = vld [vmem:[#allocation3 + $0xf78] sm:$0xff]  ;;  %v1038_v12 = vpack.c.bf16 %v597_v62, %v590_v60 }
 0x4af   :  { %v8197_v57 = vpop.f32.mrb[66].mxu1  ;;  %v619_v51 = vld [vmem:[#allocation3 + $0xfe8] sm:$0xff] }
 0x4b0   :  { %v6402_v59 = vpop.f32.mrb[67].mxu1 }
 0x4b1   :  { %6504 = vmatmul.mubr.msk.bf16.gmra.mrb[168].mxu1 %vm1538_vm0, %v1138_v21 }
 0x4b2   :  { %6523 = vmatprep.mubr.msk.bf16.mxu1 %vm7811_vm1, %v10134_v15 }
 0x4b5   :  { %2809 = vmatmul.mubr.bf16.gmra.mrb[120].mxu0 %v1010_v25  ;;  %v583_v25 = vld [vmem:[#allocation3 + $0xec8] sm:$0xff] }
 0x4b6   :  { %2816 = vmatprep.mubr.bf16.mxu0 %v1018_v27  ;;  %v591_v27 = vld [vmem:[#allocation3 + $0xf08] sm:$0xff]  ;;  %v1031_v40 = vpack.c.bf16 %v583_v25, %v576_v24  ;;  %v8205_v24 = vpop.f32.mrb[68].mxu1 }
 0x4b7   :  { %v1039_v43 = vpack.c.bf16 %v598_v30, %v591_v27 }
 0x4bd   :  { %2817 = vmatmul.mubr.bf16.gmra.mrb[124].mxu0 %v1017_v46 }
 0x4be   :  { %2824 = vmatprep.mubr.bf16.mxu0 %v1025_v48 }
 0x4c5   :  { %2825 = vmatmul.mubr.bf16.gmra.mrb[128].mxu0 %v1024_v4  ;;  %v612_v4 = vld [vmem:[#allocation3 + $0xfb0] sm:$0xff] }
 0x4c6   :  { %2832 = vmatprep.mubr.bf16.mxu0 %v1032_v5  ;;  %v1046_v22 = vpack.c.bf16 %v612_v4, %v605_v3 }
 0x4c8   :  { %v2618_v33 = vpop.f32.mrb[24].mxu0 }
 0x4c9   :  { %v6943_v36 = vadd.f32 %v8187_v23, %v2618_v33  ;;  %v2620_v38 = vpop.f32.mrb[25].mxu0 }
 0x4ca   :  { %v2621_v42 = vpop.f32.mrb[26].mxu0 }
 0x4cb   :  { %v6945_v45 = vadd.f32 %v8187_v23, %v2621_v42  ;;  %v6944_v46 = vadd.f32 %v6943_v36, %v8078_v11  ;;  %v2623_v48 = vpop.f32.mrb[27].mxu0  ;;  %v6405_v36 = vpop.f32.mrb[69].mxu1 }
 0x4cc   :  { %v8211_v38 = vpop.f32.mrb[70].mxu1  ;;  %v618_v36 = vld [vmem:[#allocation3 + $0xfe0] sm:$0xff] }
 0x4cd   :  { %v3496_v58 = vmul.f32 0.2, %v6944_v46  ;;  %v6946_v1 = vadd.f32 %v6945_v45, %v8080_v13  ;;  %2833 = vmatmul.mubr.bf16.gmra.mrb[132].mxu0 %v1031_v40  ;;  %vm3398_vm2 = vcmp.gt.f32.partialorder %v6944_v46, 0.0  ;;  %v604_v45 = vld [vmem:[#allocation3 + $0xf70] sm:$0xff] }
 0x4ce   :  { %2840 = vmatprep.mubr.bf16.mxu0 %v1039_v43  ;;  %v6406_v43 = vpop.f32.mrb[71].mxu1 }
 0x4cf   :  { %v3497_v0 = vmul.f32 0.2, %v6946_v1  ;;  %vm3399_vm3 = vcmp.gt.f32.partialorder %v6946_v1, 0.0  ;;  %v8201_v18 = vsel %vm3398_vm2, %v6944_v46, %v3496_v58  ;;  %v611_v46 = vld [vmem:[#allocation3 + $0xfa8] sm:$0xff]  ;;  %v626_v58 = vld [vmem:[#allocation3 + $0x1020] sm:$0xff]  ;;  %v8219_v4 = vpop.f32.mrb[72].mxu1 }
 0x4d0   :  { %v2626_v5 = vpop.f32.mrb[28].mxu0  ;;  %v1045_v60 = vpack.c.bf16 %v611_v46, %v604_v45  ;;  %v1053_v3 = vpack.c.bf16 %v626_v58, %v619_v51  ;;  %v633_v43 = vld [vmem:[#allocation3 + $0x1058] sm:$0xff]  ;;  %v640_v45 = vld [vmem:[#allocation3 + $0x1090] sm:$0xff] }
 0x4d1   :  { %v6947_v11 = vadd.f32 %v8187_v23, %v2626_v5  ;;  %v2628_v9 = vpop.f32.mrb[29].mxu0  ;;  %v8203_v21 = vsel %vm3399_vm3, %v6946_v1, %v3497_v0 }
 0x4d2   :  { %v2629_v13 = vpop.f32.mrb[30].mxu0 }
 0x4d3   :  { %v6949_v27 = vadd.f32 %v8187_v23, %v2629_v13  ;;  %v6948_v30 = vadd.f32 %v6947_v11, %v8085_v26  ;;  %v2631_v33 = vpop.f32.mrb[31].mxu0  ;;  %v6409_v13 = vpop.f32.mrb[73].mxu1 }
 0x4d5   :  { %v3498_v40 = vmul.f32 0.2, %v6948_v30  ;;  %v6950_v42 = vadd.f32 %v6949_v27, %v8087_v28  ;;  %2841 = vmatmul.mubr.bf16.gmra.mrb[136].mxu0 %v1038_v12  ;;  %vm3400_vm4 = vcmp.gt.f32.partialorder %v6948_v30, 0.0 }
 0x4d6   :  { %2848 = vmatprep.mubr.bf16.mxu0 %v1046_v22  ;;  %v8225_v22 = vpop.f32.mrb[74].mxu1 }
 0x4d7   :  { %v3499_v48 = vmul.f32 0.2, %v6950_v42  ;;  %vm3401_vm5 = vcmp.gt.f32.partialorder %v6950_v42, 0.0  ;;  %v8215_v62 = vsel %vm3400_vm4, %v6948_v30, %v3498_v40  ;;  %v6410_v33 = vpop.f32.mrb[75].mxu1  ;;  %v625_v40 = vld [vmem:[#allocation3 + $0x1018] sm:$0xff] }
 0x4d8   :  { %v2634_v1 = vpop.f32.mrb[32].mxu0  ;;  %v1052_v51 = vpack.c.bf16 %v625_v40, %v618_v36  ;;  %v639_v36 = vld [vmem:[#allocation3 + $0x1088] sm:$0xff] }
 0x4d9   :  { %v6951_v26 = vadd.f32 %v8187_v23, %v2634_v1  ;;  %v2636_v59 = vpop.f32.mrb[33].mxu0  ;;  %v8217_v0 = vsel %vm3401_vm5, %v6950_v42, %v3499_v48 }
 0x4da   :  { %v2637_v28 = vpop.f32.mrb[34].mxu0  ;;  %v8233_v59 = vpop.f32.mrb[76].mxu1 }
 0x4db   :  { %v6953_v11 = vadd.f32 %v8187_v23, %v2637_v28  ;;  %v6952_v9 = vadd.f32 %v6951_v26, %v8092_v39  ;;  %v2639_v12 = vpop.f32.mrb[35].mxu0  ;;  %v1060_v26 = vpack.c.bf16 %v640_v45, %v633_v43  ;;  %v654_v43 = vld [vmem:[#allocation3 + $0x1100] sm:$0xff] }
 0x4dc   :  { %v6413_v12 = vpop.f32.mrb[77].mxu1 }
 0x4dd   :  { %v3500_v27 = vmul.f32 0.2, %v6952_v9  ;;  %v6954_v30 = vadd.f32 %v6953_v11, %v8094_v41  ;;  %2849 = vmatmul.mubr.bf16.gmra.mrb[140].mxu0 %v1045_v60  ;;  %vm3402_vm6 = vcmp.gt.f32.partialorder %v6952_v9, 0.0  ;;  %v8239_v13 = vpop.f32.mrb[78].mxu1 }
 0x4de   :  { %2856 = vmatprep.mubr.bf16.mxu0 %v1053_v3 }
 0x4df   :  { %v3501_v42 = vmul.f32 0.2, %v6954_v30  ;;  %vm3403_vm7 = vcmp.gt.f32.partialorder %v6954_v30, 0.0  ;;  %v8229_v58 = vsel %vm3402_vm6, %v6952_v9, %v3500_v27  ;;  %v6414_v27 = vpop.f32.mrb[79].mxu1 }
 0x4e0   :  { %v2642_v46 = vpop.f32.mrb[36].mxu0 }
 0x4e1   :  { %v6955_v39 = vadd.f32 %v8187_v23, %v2642_v46  ;;  %v2644_v48 = vpop.f32.mrb[37].mxu0  ;;  %v8231_v1 = vsel %vm3403_vm7, %v6954_v30, %v3501_v42  ;;  %v632_v30 = vld [vmem:[#allocation3 + $0x1050] sm:$0xff]  ;;  %v647_v42 = vld [vmem:[#allocation3 + $0x10c8] sm:$0xff] }
 0x4e2   :  { %v2645_v41 = vpop.f32.mrb[38].mxu0 }
 0x4e3   :  { %v6957_v28 = vadd.f32 %v8187_v23, %v2645_v41  ;;  %v6956_v3 = vadd.f32 %v6955_v39, %v8099_v52  ;;  %v2647_v11 = vpop.f32.mrb[39].mxu0  ;;  %v1059_v39 = vpack.c.bf16 %v639_v36, %v632_v30  ;;  %v653_v36 = vld [vmem:[#allocation3 + $0x10f8] sm:$0xff] }
 0x4e5   :  { %v3502_v33 = vmul.f32 0.2, %v6956_v3  ;;  %v6958_v9 = vadd.f32 %v6957_v28, %v8101_v54  ;;  %2857 = vmatmul.mubr.bf16.gmra.mrb[144].mxu0 %v1052_v51  ;;  %vm3404_vm8 = vcmp.gt.f32.partialorder %v6956_v3, 0.0  ;;  %v1067_v51 = vpack.c.bf16 %v654_v43, %v647_v42  ;;  %v8247_v28 = vpop.f32.mrb[80].mxu1  ;;  %v661_v42 = vld [vmem:[#allocation3 + $0x1138] sm:$0xff]  ;;  %v668_v43 = vld [vmem:[#allocation3 + $0x1170] sm:$0xff] }
 0x4e6   :  { %2864 = vmatprep.mubr.bf16.mxu0 %v1060_v26  ;;  %v6417_v60 = vpop.f32.mrb[81].mxu1 }
 0x4e7   :  { %v3503_v40 = vmul.f32 0.2, %v6958_v9  ;;  %vm3405_vm9 = vcmp.gt.f32.partialorder %v6958_v9, 0.0  ;;  %v8243_v48 = vsel %vm3404_vm8, %v6956_v3, %v3502_v33 }
 0x4e8   :  { %v2650_v45 = vpop.f32.mrb[40].mxu0 }
 0x4e9   :  { %v6959_v52 = vadd.f32 %v8187_v23, %v2650_v45  ;;  %v2652_v46 = vpop.f32.mrb[41].mxu0  ;;  %v8245_v41 = vsel %vm3405_vm9, %v6958_v9, %v3503_v40  ;;  %v8253_v45 = vpop.f32.mrb[82].mxu1  ;;  %v646_v9 = vld [vmem:[#allocation3 + $0x10c0] sm:$0xff] }
 0x4ea   :  { %v2653_v54 = vpop.f32.mrb[42].mxu0  ;;  %v6418_v33 = vpop.f32.mrb[83].mxu1  ;;  %v1066_v60 = vpack.c.bf16 %v653_v36, %v646_v9  ;;  %v667_v36 = vld [vmem:[#allocation3 + $0x1168] sm:$0xff] }
 0x4eb   :  { %v6961_v11 = vadd.f32 %v8187_v23, %v2653_v54  ;;  %v6960_v12 = vadd.f32 %v6959_v52, %v8106_v16  ;;  %v2655_v27 = vpop.f32.mrb[43].mxu0 }
 0x4ed   :  { %v3504_v30 = vmul.f32 0.2, %v6960_v12  ;;  %v6962_v3 = vadd.f32 %v6961_v11, %v8108_v2  ;;  %2865 = vmatmul.mubr.bf16.gmra.mrb[148].mxu0 %v1059_v39  ;;  %vm3406_vm10 = vcmp.gt.f32.partialorder %v6960_v12, 0.0  ;;  %v1074_v39 = vpack.c.bf16 %v668_v43, %v661_v42  ;;  %v8261_v11 = vpop.f32.mrb[84].mxu1  ;;  %v675_v42 = vld [vmem:[#allocation3 + $0x11a8] sm:$0xff]  ;;  %v682_v43 = vld [vmem:[#allocation3 + $0x11e0] sm:$0xff] }
 0x4ee   :  { %2872 = vmatprep.mubr.bf16.mxu0 %v1067_v51  ;;  %v6421_v25 = vpop.f32.mrb[85].mxu1 }
 0x4ef   :  { %v3505_v40 = vmul.f32 0.2, %v6962_v3  ;;  %vm3407_vm11 = vcmp.gt.f32.partialorder %v6962_v3, 0.0  ;;  %v8257_v54 = vsel %vm3406_vm10, %v6960_v12, %v3504_v30 }
 0x4f0   :  { %v2658_v46 = vpop.f32.mrb[44].mxu0  ;;  %10176 = vst [vmem:[#allocation20_spill] sm:$0xff] %v8257_v54 }
 0x4f1   :  { %v6963_v16 = vadd.f32 %v8187_v23, %v2658_v46  ;;  %v2660_v52 = vpop.f32.mrb[45].mxu0  ;;  %v8259_v27 = vsel %vm3407_vm11, %v6962_v3, %v3505_v40  ;;  %v8267_v46 = vpop.f32.mrb[86].mxu1  ;;  %v660_v3 = vld [vmem:[#allocation3 + $0x1130] sm:$0xff] }
 0x4f2   :  { %10177 = vst [vmem:[#allocation21_spill] sm:$0xff] %v8259_v27  ;;  %v2661_v2 = vpop.f32.mrb[46].mxu0  ;;  %v6422_v30 = vpop.f32.mrb[87].mxu1  ;;  %v1073_v25 = vpack.c.bf16 %v667_v36, %v660_v3  ;;  %v681_v36 = vld [vmem:[#allocation3 + $0x11d8] sm:$0xff] }
 0x4f3   :  { %v6965_v33 = vadd.f32 %v8187_v23, %v2661_v2  ;;  %v6964_v26 = vadd.f32 %v6963_v16, %v8113_v17  ;;  %v2663_v5 = vpop.f32.mrb[47].mxu0 }
 0x4f5   :  { %v3506_v9 = vmul.f32 0.2, %v6964_v26  ;;  %v6966_v12 = vadd.f32 %v6965_v33, %v8115_v19  ;;  %2873 = vmatmul.mubr.bf16.gmra.mrb[152].mxu0 %v1066_v60  ;;  %vm3408_vm12 = vcmp.gt.f32.partialorder %v6964_v26, 0.0  ;;  %v1081_v60 = vpack.c.bf16 %v682_v43, %v675_v42  ;;  %v8275_v33 = vpop.f32.mrb[88].mxu1  ;;  %v689_v42 = vld [vmem:[#allocation3 + $0x1218] sm:$0xff]  ;;  %v696_v43 = vld [vmem:[#allocation3 + $0x1250] sm:$0xff] }
 0x4f6   :  { %2880 = vmatprep.mubr.bf16.mxu0 %v1074_v39  ;;  %v6425_v54 = vpop.f32.mrb[89].mxu1 }
 0x4f7   :  { %v3507_v40 = vmul.f32 0.2, %v6966_v12  ;;  %vm3409_vm13 = vcmp.gt.f32.partialorder %v6966_v12, 0.0  ;;  %v8271_v16 = vsel %vm3408_vm12, %v6964_v26, %v3506_v9 }
 0x4f8   :  { %v2666_v52 = vpop.f32.mrb[48].mxu0  ;;  %10178 = vst [vmem:[#allocation22_spill] sm:$0xff] %v8271_v16 }
 0x4f9   :  { %v6967_v17 = vadd.f32 %v8187_v23, %v2666_v52  ;;  %v2668_v5 = vpop.f32.mrb[49].mxu0  ;;  %v8273_v2 = vsel %vm3409_vm13, %v6966_v12, %v3507_v40  ;;  %v8281_v52 = vpop.f32.mrb[90].mxu1  ;;  %v674_v12 = vld [vmem:[#allocation3 + $0x11a0] sm:$0xff] }
 0x4fa   :  { %10179 = vst [vmem:[#allocation23_spill] sm:$0xff] %v8273_v2  ;;  %v2669_v19 = vpop.f32.mrb[50].mxu0  ;;  %v6426_v9 = vpop.f32.mrb[91].mxu1  ;;  %v1080_v54 = vpack.c.bf16 %v681_v36, %v674_v12  ;;  %v695_v36 = vld [vmem:[#allocation3 + $0x1248] sm:$0xff] }
 0x4fb   :  { %v6969_v30 = vadd.f32 %v8187_v23, %v2669_v19  ;;  %v6968_v51 = vadd.f32 %v6967_v17, %v8120_v32  ;;  %v2671_v15 = vpop.f32.mrb[51].mxu0 }
 0x4fd   :  { %v3508_v3 = vmul.f32 0.2, %v6968_v51  ;;  %v6970_v26 = vadd.f32 %v6969_v30, %v8122_v34  ;;  %2881 = vmatmul.mubr.bf16.gmra.mrb[156].mxu0 %v1073_v25  ;;  %vm3410_vm14 = vcmp.gt.f32.partialorder %v6968_v51, 0.0  ;;  %v1088_v25 = vpack.c.bf16 %v696_v43, %v689_v42  ;;  %v8289_v30 = vpop.f32.mrb[92].mxu1  ;;  %v703_v42 = vld [vmem:[#allocation3 + $0x1288] sm:$0xff]  ;;  %v710_v43 = vld [vmem:[#allocation3 + $0x12c0] sm:$0xff] }
 0x4fe   :  { %2888 = vmatprep.mubr.bf16.mxu0 %v1081_v60  ;;  %v6429_v2 = vpop.f32.mrb[93].mxu1 }
 0x4ff   :  { %v3509_v40 = vmul.f32 0.2, %v6970_v26  ;;  %vm3411_vm15 = vcmp.gt.f32.partialorder %v6970_v26, 0.0  ;;  %v8285_v17 = vsel %vm3410_vm14, %v6968_v51, %v3508_v3 }
 0x500   :  { %v2674_v5 = vpop.f32.mrb[52].mxu0  ;;  %10180 = vst [vmem:[#allocation24_spill] sm:$0xff] %v8285_v17 }
 0x501   :  { %v6971_v32 = vadd.f32 %v8187_v23, %v2674_v5  ;;  %v2676_v15 = vpop.f32.mrb[53].mxu0  ;;  %v8287_v19 = vsel %vm3411_vm15, %v6970_v26, %v3509_v40  ;;  %v8295_v5 = vpop.f32.mrb[94].mxu1  ;;  %v688_v26 = vld [vmem:[#allocation3 + $0x1210] sm:$0xff] }
 0x502   :  { %10181 = vst [vmem:[#allocation25_spill] sm:$0xff] %v8287_v19  ;;  %v2677_v34 = vpop.f32.mrb[54].mxu0  ;;  %v6430_v3 = vpop.f32.mrb[95].mxu1  ;;  %v1087_v2 = vpack.c.bf16 %v695_v36, %v688_v26  ;;  %v709_v36 = vld [vmem:[#allocation3 + $0x12b8] sm:$0xff] }
 0x503   :  { %v6973_v9 = vadd.f32 %v8187_v23, %v2677_v34  ;;  %v6972_v39 = vadd.f32 %v6971_v32, %v8127_v47  ;;  %v2679_v16 = vpop.f32.mrb[55].mxu0 }
 0x505   :  { %v3510_v12 = vmul.f32 0.2, %v6972_v39  ;;  %v6974_v51 = vadd.f32 %v6973_v9, %v8129_v49  ;;  %2889 = vmatmul.mubr.bf16.gmra.mrb[160].mxu0 %v1080_v54  ;;  %vm3412_vm2 = vcmp.gt.f32.partialorder %v6972_v39, 0.0  ;;  %v1095_v54 = vpack.c.bf16 %v710_v43, %v703_v42  ;;  %v8303_v9 = vpop.f32.mrb[96].mxu1  ;;  %v717_v42 = vld [vmem:[#allocation3 + $0x12f8] sm:$0xff]  ;;  %v724_v43 = vld [vmem:[#allocation3 + $0x1330] sm:$0xff] }
 0x506   :  { %2896 = vmatprep.mubr.bf16.mxu0 %v1088_v25  ;;  %v6433_v19 = vpop.f32.mrb[97].mxu1 }
 0x507   :  { %v3511_v40 = vmul.f32 0.2, %v6974_v51  ;;  %vm3413_vm3 = vcmp.gt.f32.partialorder %v6974_v51, 0.0  ;;  %v8299_v32 = vsel %vm3412_vm2, %v6972_v39, %v3510_v12 }
 0x508   :  { %v2682_v15 = vpop.f32.mrb[56].mxu0  ;;  %10182 = vst [vmem:[#allocation26_spill] sm:$0xff] %v8299_v32 }
 0x509   :  { %v6975_v47 = vadd.f32 %v8187_v23, %v2682_v15  ;;  %v2684_v16 = vpop.f32.mrb[57].mxu0  ;;  %v8301_v34 = vsel %vm3413_vm3, %v6974_v51, %v3511_v40  ;;  %v8309_v15 = vpop.f32.mrb[98].mxu1  ;;  %v702_v51 = vld [vmem:[#allocation3 + $0x1280] sm:$0xff] }
 0x50a   :  { %10183 = vst [vmem:[#allocation27_spill] sm:$0xff] %v8301_v34  ;;  %v2685_v49 = vpop.f32.mrb[58].mxu0  ;;  %v6434_v12 = vpop.f32.mrb[99].mxu1  ;;  %v1094_v19 = vpack.c.bf16 %v709_v36, %v702_v51  ;;  %v723_v36 = vld [vmem:[#allocation3 + $0x1328] sm:$0xff] }
 0x50b   :  { %v6977_v3 = vadd.f32 %v8187_v23, %v2685_v49  ;;  %v6976_v60 = vadd.f32 %v6975_v47, %v8134_v61  ;;  %v2687_v17 = vpop.f32.mrb[59].mxu0 }
 0x50d   :  { %v3512_v26 = vmul.f32 0.2, %v6976_v60  ;;  %v6978_v39 = vadd.f32 %v6977_v3, %v8136_v63  ;;  %2897 = vmatmul.mubr.bf16.gmra.mrb[164].mxu0 %v1087_v2  ;;  %vm3414_vm4 = vcmp.gt.f32.partialorder %v6976_v60, 0.0  ;;  %v1102_v2 = vpack.c.bf16 %v724_v43, %v717_v42  ;;  %v8317_v3 = vpop.f32.mrb[100].mxu1  ;;  %v731_v42 = vld [vmem:[#allocation3 + $0x1368] sm:$0xff]  ;;  %v738_v43 = vld [vmem:[#allocation3 + $0x13a0] sm:$0xff] }
 0x50e   :  { %2904 = vmatprep.mubr.bf16.mxu0 %v1095_v54  ;;  %v6437_v34 = vpop.f32.mrb[101].mxu1 }
 0x50f   :  { %v3513_v40 = vmul.f32 0.2, %v6978_v39  ;;  %vm3415_vm5 = vcmp.gt.f32.partialorder %v6978_v39, 0.0  ;;  %v8313_v47 = vsel %vm3414_vm4, %v6976_v60, %v3512_v26 }
 0x510   :  { %v2690_v16 = vpop.f32.mrb[60].mxu0  ;;  %10184 = vst [vmem:[#allocation28_spill] sm:$0xff] %v8313_v47 }
 0x511   :  { %v6979_v61 = vadd.f32 %v8187_v23, %v2690_v16  ;;  %v2692_v17 = vpop.f32.mrb[61].mxu0  ;;  %v8315_v49 = vsel %vm3415_vm5, %v6978_v39, %v3513_v40  ;;  %v8323_v16 = vpop.f32.mrb[102].mxu1  ;;  %v716_v39 = vld [vmem:[#allocation3 + $0x12f0] sm:$0xff] }
 0x512   :  { %10185 = vst [vmem:[#allocation29_spill] sm:$0xff] %v8315_v49  ;;  %v2693_v63 = vpop.f32.mrb[62].mxu0  ;;  %v6438_v26 = vpop.f32.mrb[103].mxu1  ;;  %v1101_v34 = vpack.c.bf16 %v723_v36, %v716_v39  ;;  %v737_v36 = vld [vmem:[#allocation3 + $0x1398] sm:$0xff] }
 0x513   :  { %v6981_v12 = vadd.f32 %v8187_v23, %v2693_v63  ;;  %v6980_v25 = vadd.f32 %v6979_v61, %v8141_v14  ;;  %v2695_v32 = vpop.f32.mrb[63].mxu0 }
 0x515   :  { %v3514_v51 = vmul.f32 0.2, %v6980_v25  ;;  %v6982_v60 = vadd.f32 %v6981_v12, %v8143_v20  ;;  %2905 = vmatmul.mubr.bf16.gmra.mrb[168].mxu0 %v1094_v19  ;;  %vm3416_vm6 = vcmp.gt.f32.partialorder %v6980_v25, 0.0  ;;  %v1109_v19 = vpack.c.bf16 %v738_v43, %v731_v42  ;;  %v8331_v12 = vpop.f32.mrb[104].mxu1  ;;  %v745_v42 = vld [vmem:[#allocation3 + $0x13d8] sm:$0xff]  ;;  %v752_v43 = vld [vmem:[#allocation3 + $0x1410] sm:$0xff] }
 0x516   :  { %2912 = vmatprep.mubr.bf16.mxu0 %v1102_v2  ;;  %v6441_v49 = vpop.f32.mrb[105].mxu1  ;;  %v766_v2 = vld [vmem:[#allocation3 + $0x1480] sm:$0xff] }
 0x517   :  { %v3515_v40 = vmul.f32 0.2, %v6982_v60  ;;  %vm3417_vm7 = vcmp.gt.f32.partialorder %v6982_v60, 0.0  ;;  %v8327_v61 = vsel %vm3416_vm6, %v6980_v25, %v3514_v51 }
 0x518   :  { %v2698_v17 = vpop.f32.mrb[64].mxu0  ;;  %10186 = vst [vmem:[#allocation30_spill] sm:$0xff] %v8327_v61 }
 0x519   :  { %v6983_v14 = vadd.f32 %v8187_v23, %v2698_v17  ;;  %v2700_v32 = vpop.f32.mrb[65].mxu0  ;;  %v8329_v63 = vsel %vm3417_vm7, %v6982_v60, %v3515_v40  ;;  %v8337_v17 = vpop.f32.mrb[106].mxu1  ;;  %v730_v60 = vld [vmem:[#allocation3 + $0x1360] sm:$0xff] }
 0x51a   :  { %10187 = vst [vmem:[#allocation31_spill] sm:$0xff] %v8329_v63  ;;  %v2701_v20 = vpop.f32.mrb[66].mxu0  ;;  %v6442_v51 = vpop.f32.mrb[107].mxu1  ;;  %v1108_v32 = vpack.c.bf16 %v737_v36, %v730_v60 }
 0x51b   :  { %v6985_v26 = vadd.f32 %v8187_v23, %v2701_v20  ;;  %v6984_v54 = vadd.f32 %v6983_v14, %v8148_v35  ;;  %v2703_v47 = vpop.f32.mrb[67].mxu0  ;;  %v7620_v35 = vld [vmem:[%s10127_s3] sm:$0xff]   ;;  %v10190_v51 = vmov 0.0  }
 0x51c   :  { %6508 = vmatpush3.bf16.msra.mxu1 %v7620_v35  ;;  %v759_v35 = vld [vmem:[#allocation3 + $0x1448] sm:$0xff] }
 0x51d   :  { %v3516_v39 = vmul.f32 0.2, %v6984_v54  ;;  %v6986_v25 = vadd.f32 %v6985_v26, %v8150_v37  ;;  %2913 = vmatmul.mubr.bf16.gmra.mrb[172].mxu0 %v1101_v34  ;;  %vm3418_vm8 = vcmp.gt.f32.partialorder %v6984_v54, 0.0  ;;  %v8348_v26 = vpop.f32.mrb[108].mxu1  ;;  %6509 = vmatprep.subr.bf16.mxu1 %v10190_v51 }
 0x51e   :  { %2920 = vmatprep.mubr.bf16.mxu0 %v1109_v19  ;;  %v1116_v19 = vpack.c.bf16 %v752_v43, %v745_v42  ;;  %v6445_v60 = vpop.f32.mrb[109].mxu1  ;;  %v751_v42 = vld [vmem:[#allocation3 + $0x1408] sm:$0xff] }
 0x51f   :  { %v3517_v40 = vmul.f32 0.2, %v6986_v25  ;;  %vm3419_vm9 = vcmp.gt.f32.partialorder %v6986_v25, 0.0  ;;  %v8344_v37 = vsel %vm3418_vm8, %v6984_v54, %v3516_v39  ;;  %v8355_v36 = vpop.f32.mrb[110].mxu1 }
 0x520   :  { %v2706_v47 = vpop.f32.mrb[68].mxu0  ;;  %10188 = vst [vmem:[#allocation32_spill] sm:$0xff] %v8344_v37 }
 0x521   :  { %v6987_v49 = vadd.f32 %v8187_v23, %v2706_v47  ;;  %v2708_v14 = vpop.f32.mrb[69].mxu0  ;;  %v8346_v34 = vsel %vm3419_vm9, %v6986_v25, %v3517_v40  ;;  %v6446_v25 = vpop.f32.mrb[111].mxu1  ;;  %v744_v40 = vld [vmem:[#allocation3 + $0x13d0] sm:$0xff] }
 0x522   :  { %10189 = vst [vmem:[#allocation33_spill] sm:$0xff] %v8346_v34  ;;  %v2709_v20 = vpop.f32.mrb[70].mxu0 }
 0x523   :  { %v6989_v61 = vadd.f32 %v8187_v23, %v2709_v20  ;;  %v6988_v47 = vadd.f32 %v6987_v49, %v8155_v53  ;;  %v2711_v14 = vpop.f32.mrb[71].mxu0 }
 0x524   :  { %v1115_v14 = vpack.c.bf16 %v751_v42, %v744_v40 }
 0x525   :  { %v3518_v54 = vmul.f32 0.2, %v6988_v47  ;;  %v6990_v39 = vadd.f32 %v6989_v61, %v8157_v56  ;;  %2921 = vmatmul.mubr.bf16.gmra.mrb[176].mxu0 %v1108_v32  ;;  %vm3420_vm10 = vcmp.gt.f32.partialorder %v6988_v47, 0.0  ;;  %v1123_v61 = vpack.c.bf16 %v766_v2, %v759_v35  ;;  %v8363_v32 = vpop.f32.mrb[112].mxu1  ;;  %v758_v2 = vld [vmem:[#allocation3 + $0x1440] sm:$0xff]  ;;  %v780_v35 = vld [vmem:[#allocation3 + $0x14f0] sm:$0xff] }
 0x526   :  { %2928 = vmatprep.mubr.bf16.mxu0 %v1116_v19  ;;  %v6449_v27 = vpop.f32.mrb[113].mxu1 }
 0x527   :  { %v3519_v43 = vmul.f32 0.2, %v6990_v39  ;;  %vm3421_vm11 = vcmp.gt.f32.partialorder %v6990_v39, 0.0  ;;  %v8359_v60 = vsel %vm3420_vm10, %v6988_v47, %v3518_v54 }
 0x528   :  { %v2714_v20 = vpop.f32.mrb[72].mxu0  ;;  %10191 = vst [vmem:[#allocation34_spill] sm:$0xff] %v8359_v60 }
 0x529   :  { %v6991_v53 = vadd.f32 %v8187_v23, %v2714_v20  ;;  %v2716_v49 = vpop.f32.mrb[73].mxu0  ;;  %v8361_v37 = vsel %vm3421_vm11, %v6990_v39, %v3519_v43  ;;  %v8369_v20 = vpop.f32.mrb[114].mxu1  ;;  %v765_v39 = vld [vmem:[#allocation3 + $0x1478] sm:$0xff] }
 0x52a   :  { %10192 = vst [vmem:[#allocation35_spill] sm:$0xff] %v8361_v37  ;;  %v2717_v56 = vpop.f32.mrb[74].mxu0  ;;  %v6450_v54 = vpop.f32.mrb[115].mxu1  ;;  %v773_v43 = vld [vmem:[#allocation3 + $0x14b8] sm:$0xff]  ;;  %v1122_v27 = vpack.c.bf16 %v765_v39, %v758_v2  ;;  %v779_v39 = vld [vmem:[#allocation3 + $0x14e8] sm:$0xff] }
 0x52b   :  { %v6993_v25 = vadd.f32 %v8187_v23, %v2717_v56  ;;  %v6992_v34 = vadd.f32 %v6991_v53, %v8162_v6  ;;  %v2719_v63 = vpop.f32.mrb[75].mxu0 }
 0x52d   :  { %v3520_v40 = vmul.f32 0.2, %v6992_v34  ;;  %v6994_v47 = vadd.f32 %v6993_v25, %v8164_v8  ;;  %2929 = vmatmul.mubr.bf16.gmra.mrb[180].mxu0 %v1115_v14  ;;  %vm3422_vm12 = vcmp.gt.f32.partialorder %v6992_v34, 0.0  ;;  %v1130_v14 = vpack.c.bf16 %v780_v35, %v773_v43  ;;  %v8377_v25 = vpop.f32.mrb[116].mxu1  ;;  %v787_v43 = vld [vmem:[#allocation3 + $0x1528] sm:$0xff]  ;;  %v794_v35 = vld [vmem:[#allocation3 + $0x1560] sm:$0xff] }
 0x52e   :  { %2936 = vmatprep.mubr.bf16.mxu0 %v1123_v61  ;;  %v6453_v37 = vpop.f32.mrb[117].mxu1 }
 0x52f   :  { %v3521_v42 = vmul.f32 0.2, %v6994_v47  ;;  %vm3423_vm13 = vcmp.gt.f32.partialorder %v6994_v47, 0.0  ;;  %v8373_v53 = vsel %vm3422_vm12, %v6992_v34, %v3520_v40 }
 0x530   :  { %v2722_v49 = vpop.f32.mrb[76].mxu0  ;;  %10193 = vst [vmem:[#allocation36_spill] sm:$0xff] %v8373_v53 }
 0x531   :  { %v6995_v6 = vadd.f32 %v8187_v23, %v2722_v49  ;;  %v2724_v63 = vpop.f32.mrb[77].mxu0  ;;  %v8375_v56 = vsel %vm3423_vm13, %v6994_v47, %v3521_v42  ;;  %v8383_v49 = vpop.f32.mrb[118].mxu1  ;;  %v772_v47 = vld [vmem:[#allocation3 + $0x14b0] sm:$0xff] }
 0x532   :  { %10194 = vst [vmem:[#allocation37_spill] sm:$0xff] %v8375_v56  ;;  %v2725_v8 = vpop.f32.mrb[78].mxu0  ;;  %v6454_v40 = vpop.f32.mrb[119].mxu1  ;;  %v1129_v37 = vpack.c.bf16 %v779_v39, %v772_v47  ;;  %v793_v39 = vld [vmem:[#allocation3 + $0x1558] sm:$0xff] }
 0x533   :  { %v6997_v54 = vadd.f32 %v8187_v23, %v2725_v8  ;;  %v6996_v19 = vadd.f32 %v6995_v6, %v8169_v29  ;;  %v2727_v60 = vpop.f32.mrb[79].mxu0 }
 0x535   :  { %v3522_v2 = vmul.f32 0.2, %v6996_v19  ;;  %v6998_v34 = vadd.f32 %v6997_v54, %v8171_v31  ;;  %2937 = vmatmul.mubr.bf16.gmra.mrb[184].mxu0 %v1122_v27  ;;  %vm3424_vm14 = vcmp.gt.f32.partialorder %v6996_v19, 0.0  ;;  %v1137_v27 = vpack.c.bf16 %v794_v35, %v787_v43  ;;  %v8391_v54 = vpop.f32.mrb[120].mxu1 }
 0x536   :  { %2944 = vmatprep.mubr.bf16.mxu0 %v1130_v14  ;;  %v6457_v56 = vpop.f32.mrb[121].mxu1 }
 0x537   :  { %v3523_v42 = vmul.f32 0.2, %v6998_v34  ;;  %vm3425_vm15 = vcmp.gt.f32.partialorder %v6998_v34, 0.0  ;;  %v8387_v6 = vsel %vm3424_vm14, %v6996_v19, %v3522_v2 }
 0x538   :  { %v2730_v63 = vpop.f32.mrb[80].mxu0 }
 0x539   :  { %v6999_v29 = vadd.f32 %v8187_v23, %v2730_v63  ;;  %v2732_v60 = vpop.f32.mrb[81].mxu0  ;;  %v8389_v8 = vsel %vm3425_vm15, %v6998_v34, %v3523_v42  ;;  %v8397_v63 = vpop.f32.mrb[122].mxu1  ;;  %v786_v34 = vld [vmem:[#allocation3 + $0x1520] sm:$0xff] }
 0x53a   :  { %v2733_v31 = vpop.f32.mrb[82].mxu0  ;;  %v6458_v2 = vpop.f32.mrb[123].mxu1 }
 0x53b   :  { %v7001_v40 = vadd.f32 %v8187_v23, %v2733_v31  ;;  %v7000_v61 = vadd.f32 %v6999_v29, %v8176_v50  ;;  %v2735_v53 = vpop.f32.mrb[83].mxu0  ;;  %v1136_v50 = vpack.c.bf16 %v793_v39, %v786_v34  ;;  %v8405_v31 = vpop.f32.mrb[124].mxu1  ;;  %v123_v34 = vld [vmem:[#allocation3 + $0x68] sm:$0xff] }
 0x53c   :  { %v6461_v2 = vpop.f32.mrb[125].mxu1 }
 0x53d   :  { %v3524_v47 = vmul.f32 0.2, %v7000_v61  ;;  %v7002_v19 = vadd.f32 %v7001_v40, %v8178_v55  ;;  %2945 = vmatmul.mubr.bf16.gmra.mrb[188].mxu0 %v1129_v37  ;;  %vm3426_vm2 = vcmp.gt.f32.partialorder %v7000_v61, 0.0  ;;  %v8411_v14 = vpop.f32.mrb[126].mxu1 }
 0x53e   :  { %2952 = vmatprep.mubr.bf16.mxu0 %v1137_v27 }
 0x53f   :  { %v3525_v42 = vmul.f32 0.2, %v7002_v19  ;;  %vm3427_vm3 = vcmp.gt.f32.partialorder %v7002_v19, 0.0  ;;  %v8401_v53 = vsel %vm3426_vm2, %v7000_v61, %v3524_v47  ;;  %v6462_v47 = vpop.f32.mrb[127].mxu1 }
 0x540   :  { %v2738_v43 = vpop.f32.mrb[84].mxu0  ;;  %10195 = vst [vmem:[#allocation38_spill] sm:$0xff] %v8401_v53  ;;  %v8426_v2 = vpop.f32.mrb[128].mxu1 }
 0x541   :  { %v7003_v35 = vadd.f32 %v8187_v23, %v2738_v43  ;;  %v2740_v60 = vpop.f32.mrb[85].mxu0  ;;  %v8403_v56 = vsel %vm3427_vm3, %v7002_v19, %v3525_v42  ;;  %v116_v19 = vld [vmem:[#allocation3 + $0x30] sm:$0xff] }
 0x542   :  { %v2741_v29 = vpop.f32.mrb[86].mxu0 }
 0x543   :  { %v7005_v37 = vadd.f32 %v8187_v23, %v2741_v29  ;;  %v7004_v27 = vadd.f32 %v7003_v35, %v8183_v7  ;;  %v2743_v40 = vpop.f32.mrb[87].mxu0 }
 0x544   :  { %v802_v40 = vpack.c.bf16 %v123_v34, %v116_v19 }
 0x545   :  { %v3526_v43 = vmul.f32 0.2, %v7004_v27  ;;  %v7006_v61 = vadd.f32 %v7005_v37, %v8185_v10  ;;  %2953 = vmatmul.mubr.bf16.gmra.mrb[192].mxu0 %v1136_v50  ;;  %vm3428_vm4 = vcmp.gt.f32.partialorder %v7004_v27, 0.0  ;;  %v7621_v37 = vld [vmem:[%s10127_s3 + $0x8] sm:$0xff]  }
 0x546   :  { %6311 = vmatprep.mubr.msk.bf16.mxu0 %vm7811_vm1, %v10190_v51  ;;  %6510 = vmatpush3.bf16.msra.mxu1 %v7621_v37 }
 0x547   :  { %vm3429_vm5 = vcmp.gt.f32.partialorder %v7006_v61, 0.0  ;;  %v3527_v39 = vmul.f32 0.2, %v7006_v61  ;;  %v8416_v60 = vsel %vm3428_vm4, %v7004_v27, %v3526_v43  ;;  %6511 = vmatprep.subr.bf16.mxu1 %v10190_v51 }
 0x548   :  { %v2746_v42 = vpop.f32.mrb[88].mxu0  ;;  %10196 = vst [vmem:[#allocation39_spill] sm:$0xff] %v8416_v60 }
 0x549   :  { %v8418_v7 = vsel %vm3429_vm5, %v7006_v61, %v3527_v39  ;;  %v7007_v35 = vadd.f32 %v8187_v23, %v2746_v42  ;;  %v2748_v29 = vpop.f32.mrb[89].mxu0  ;;  %v6465_v61 = vpop.f32.mrb[129].mxu1 }
 0x54a   :  { %10197 = vst [vmem:[#allocation40_spill] sm:$0xff] %v8418_v7  ;;  %v2749_v50 = vpop.f32.mrb[90].mxu0  ;;  %v8430_v39 = vpop.f32.mrb[130].mxu1  ;;  %v130_v29 = vld [vmem:[#allocation3 + $0xa0] sm:$0xff] }
 0x54b   :  { %v7009_v47 = vadd.f32 %v8187_v23, %v2749_v50  ;;  %v7008_v27 = vadd.f32 %v7007_v35, %v8193_v44  ;;  %v2751_v43 = vpop.f32.mrb[91].mxu0  ;;  %v6466_v42 = vpop.f32.mrb[131].mxu1  ;;  %v137_v50 = vld [vmem:[#allocation3 + $0xd8] sm:$0xff] }
 0x54c   :  { %v8444_v10 = vpop.f32.mrb[132].mxu1 }
 0x54d   :  { %v3528_v19 = vmul.f32 0.2, %v7008_v27  ;;  %v7010_v34 = vadd.f32 %v7009_v47, %v8197_v57  ;;  %6312 = vmatmul.mubr.msk.bf16.vlgmr.msra.gmra.mrb[0].mxu0 %vm1538_vm0, %v802_v40  ;;  %vm3430_vm6 = vcmp.gt.f32.partialorder %v7008_v27, 0.0  ;;  %v809_v40 = vpack.c.bf16 %v137_v50, %v130_v29  ;;  %v6469_v53 = vpop.f32.mrb[133].mxu1  ;;  %v144_v50 = vld [vmem:[#allocation3 + $0x110] sm:$0xff] }
 0x54e   :  { %6315 = vmatprep.mubr.msk.bf16.mxu0 %vm7811_vm1, %v10190_v51 }
 0x54f   :  { %vm3431_vm7 = vcmp.gt.f32.partialorder %v7010_v34, 0.0  ;;  %v3529_v44 = vmul.f32 0.2, %v7010_v34  ;;  %v8437_v37 = vsel %vm3430_vm6, %v7008_v27, %v3528_v19  ;;  %v8448_v27 = vpop.f32.mrb[134].mxu1 }
 0x550   :  { %v2754_v35 = vpop.f32.mrb[92].mxu0  ;;  %10198 = vst [vmem:[#allocation41_spill] sm:$0xff] %v8437_v37  ;;  %v6470_v29 = vpop.f32.mrb[135].mxu1 }
 0x551   :  { %v8439_v43 = vsel %vm3431_vm7, %v7010_v34, %v3529_v44  ;;  %v7011_v57 = vadd.f32 %v8187_v23, %v2754_v35  ;;  %v2756_v47 = vpop.f32.mrb[93].mxu0  ;;  %v151_v44 = vld [vmem:[#allocation3 + $0x148] sm:$0xff] }
 0x552   :  { %10199 = vst [vmem:[#allocation42_spill] sm:$0xff] %v8439_v43  ;;  %v2757_v42 = vpop.f32.mrb[94].mxu0 }
 0x553   :  { %v7013_v55 = vadd.f32 %v8187_v23, %v2757_v42  ;;  %v7012_v60 = vadd.f32 %v7011_v57, %v8205_v24  ;;  %v2759_v7 = vpop.f32.mrb[95].mxu0  ;;  %v8461_v42 = vpop.f32.mrb[136].mxu1 }
 0x554   :  { %v6473_v43 = vpop.f32.mrb[137].mxu1 }
 0x555   :  { %v3530_v19 = vmul.f32 0.2, %v7012_v60  ;;  %v7014_v34 = vadd.f32 %v7013_v55, %v8211_v38  ;;  %6316 = vmatmul.mubr.msk.bf16.gmra.mrb[4].mxu0 %vm1538_vm0, %v809_v40  ;;  %vm3432_vm8 = vcmp.gt.f32.partialorder %v7012_v60, 0.0  ;;  %v816_v38 = vpack.c.bf16 %v151_v44, %v144_v50  ;;  %v158_v44 = vld [vmem:[#allocation3 + $0x180] sm:$0xff]  ;;  %v8475_v43 = vld [vmem:[#allocation8] ss:$0 sm:$0xff] }
 0x556   :  { %6319 = vmatprep.mubr.msk.bf16.mxu0 %vm7811_vm1, %v10190_v51 }
 0x557   :  { %vm3433_vm9 = vcmp.gt.f32.partialorder %v7014_v34, 0.0  ;;  %v3531_v35 = vmul.f32 0.2, %v7014_v34  ;;  %v8454_v24 = vsel %vm3432_vm8, %v7012_v60, %v3530_v19  ;;  %v8465_v60 = vpop.f32.mrb[138].mxu1 }
 0x558   :  { %v2762_v47 = vpop.f32.mrb[96].mxu0  ;;  %10200 = vst [vmem:[#allocation43_spill] sm:$0xff] %v8454_v24  ;;  %v6474_v50 = vpop.f32.mrb[139].mxu1 }
 0x559   :  { %v8456_v53 = vsel %vm3433_vm9, %v7014_v34, %v3531_v35  ;;  %v7015_v7 = vadd.f32 %v8187_v23, %v2762_v47  ;;  %v2764_v57 = vpop.f32.mrb[97].mxu0  ;;  %v165_v35 = vld [vmem:[#allocation3 + $0x1b8] sm:$0xff] }
 0x55a   :  { %10201 = vst [vmem:[#allocation44_spill] sm:$0xff] %v8456_v53  ;;  %v2765_v40 = vpop.f32.mrb[98].mxu0  ;;  %v823_v57 = vpack.c.bf16 %v165_v35, %v158_v44  ;;  %v172_v35 = vld [vmem:[#allocation3 + $0x1f0] sm:$0xff] }
 0x55b   :  { %v7017_v29 = vadd.f32 %v8187_v23, %v2765_v40  ;;  %v7016_v61 = vadd.f32 %v7015_v7, %v8219_v4  ;;  %v2767_v37 = vpop.f32.mrb[99].mxu0 }
 0x55d   :  { %v3532_v19 = vmul.f32 0.2, %v7016_v61  ;;  %v7018_v34 = vadd.f32 %v7017_v29, %v8225_v22  ;;  %6320 = vmatmul.mubr.msk.bf16.gmra.mrb[8].mxu0 %vm1538_vm0, %v816_v38  ;;  %vm3434_vm10 = vcmp.gt.f32.partialorder %v7016_v61, 0.0  ;;  %v8480_v29 = vpop.f32.mrb[140].mxu1 }
 0x55e   :  { %6323 = vmatprep.mubr.msk.bf16.mxu0 %vm7811_vm1, %v10190_v51 }
 0x55f   :  { %vm3435_vm11 = vcmp.gt.f32.partialorder %v7018_v34, 0.0  ;;  %v3533_v23 = vmul.f32 0.2, %v7018_v34  ;;  %v8471_v4 = vsel %vm3434_vm10, %v7016_v61, %v3532_v19  ;;  %v6477_v19 = vpop.f32.mrb[141].mxu1 }
 0x560   :  { %v2770_v47 = vpop.f32.mrb[100].mxu0  ;;  %10202 = vst [vmem:[#allocation45_spill] sm:$0xff] %v8471_v4 }
 0x561   :  { %v8473_v37 = vsel %vm3435_vm11, %v7018_v34, %v3533_v23  ;;  %v7019_v22 = vadd.f32 %v8475_v43, %v2770_v47  ;;  %v2772_v7 = vpop.f32.mrb[101].mxu0  ;;  %v8484_v34 = vpop.f32.mrb[142].mxu1  ;;  %v179_v47 = vld [vmem:[#allocation3 + $0x228] sm:$0xff] }
 0x562   :  { %10203 = vst [vmem:[#allocation46_spill] sm:$0xff] %v8473_v37  ;;  %v2773_v40 = vpop.f32.mrb[102].mxu0  ;;  %v6478_v44 = vpop.f32.mrb[143].mxu1 }
 0x563   :  { %v7021_v50 = vadd.f32 %v8475_v43, %v2773_v40  ;;  %v7020_v55 = vadd.f32 %v7019_v22, %v8233_v59  ;;  %v2775_v61 = vpop.f32.mrb[103].mxu0  ;;  %v8497_v44 = vpop.f32.mrb[144].mxu1 }
 0x564   :  { %v6481_v53 = vpop.f32.mrb[145].mxu1 }
 0x565   :  { %v3534_v23 = vmul.f32 0.2, %v7020_v55  ;;  %v7022_v24 = vadd.f32 %v7021_v50, %v8239_v13  ;;  %6324 = vmatmul.mubr.msk.bf16.gmra.mrb[12].mxu0 %vm1538_vm0, %v823_v57  ;;  %vm3436_vm12 = vcmp.gt.f32.partialorder %v7020_v55, 0.0  ;;  %v830_v13 = vpack.c.bf16 %v179_v47, %v172_v35  ;;  %v186_v47 = vld [vmem:[#allocation3 + $0x260] sm:$0xff] }
 0x566   :  { %6327 = vmatprep.mubr.msk.bf16.mxu0 %vm7811_vm1, %v10190_v51 }
 0x567   :  { %vm3437_vm13 = vcmp.gt.f32.partialorder %v7022_v24, 0.0  ;;  %v3535_v7 = vmul.f32 0.2, %v7022_v24  ;;  %v8490_v59 = vsel %vm3436_vm12, %v7020_v55, %v3534_v23  ;;  %v8501_v55 = vpop.f32.mrb[146].mxu1 }
 0x568   :  { %v2778_v40 = vpop.f32.mrb[104].mxu0  ;;  %v6482_v35 = vpop.f32.mrb[147].mxu1 }
 0x569   :  { %v8492_v22 = vsel %vm3437_vm13, %v7022_v24, %v3535_v7  ;;  %v7023_v61 = vadd.f32 %v8475_v43, %v2778_v40  ;;  %v2780_v19 = vpop.f32.mrb[105].mxu0  ;;  %v193_v7 = vld [vmem:[#allocation3 + $0x298] sm:$0xff]  ;;  %v8517_v35 = vpop.f32.mrb[148].mxu1 }
 0x56a   :  { %v2781_v50 = vpop.f32.mrb[106].mxu0 }
 0x56b   :  { %v7025_v38 = vadd.f32 %v8475_v43, %v2781_v50  ;;  %v7024_v4 = vadd.f32 %v7023_v61, %v8247_v28  ;;  %v2783_v37 = vpop.f32.mrb[107].mxu0  ;;  %v7622_v50 = vld [vmem:[%s10127_s3 + $0x10] sm:$0xff]  }
 0x56c   :  { %6512 = vmatpush3.bf16.msra.mxu1 %v7622_v50 }
 0x56d   :  { %v3536_v24 = vmul.f32 0.2, %v7024_v4  ;;  %v7026_v23 = vadd.f32 %v7025_v38, %v8253_v45  ;;  %6328 = vmatmul.mubr.msk.bf16.gmra.mrb[16].mxu0 %vm1538_vm0, %v830_v13  ;;  %vm3438_vm14 = vcmp.gt.f32.partialorder %v7024_v4, 0.0  ;;  %v837_v45 = vpack.c.bf16 %v193_v7, %v186_v47  ;;  %6513 = vmatprep.subr.bf16.mxu1 %v10190_v51 }
 0x56e   :  { %6331 = vmatprep.mubr.msk.bf16.mxu0 %vm7811_vm1, %v10190_v51 }
 0x56f   :  { %vm3439_vm15 = vcmp.gt.f32.partialorder %v7026_v23, 0.0  ;;  %v3537_v40 = vmul.f32 0.2, %v7026_v23  ;;  %v8507_v28 = vsel %vm3438_vm14, %v7024_v4, %v3536_v24 }
 0x570   :  { %v2786_v19 = vpop.f32.mrb[108].mxu0  ;;  %10204 = vst [vmem:[#allocation47_spill] sm:$0xff] %v8507_v28 }
 0x571   :  { %v8509_v53 = vsel %vm3439_vm15, %v7026_v23, %v3537_v40  ;;  %v7027_v37 = vadd.f32 %v8475_v43, %v2786_v19  ;;  %v2788_v61 = vpop.f32.mrb[109].mxu0  ;;  %v6485_v23 = vpop.f32.mrb[149].mxu1 }
 0x572   :  { %10205 = vst [vmem:[#allocation48_spill] sm:$0xff] %v8509_v53  ;;  %v2789_v13 = vpop.f32.mrb[110].mxu0  ;;  %v8521_v40 = vpop.f32.mrb[150].mxu1 }
 0x573   :  { %v7029_v57 = vadd.f32 %v8475_v43, %v2789_v13  ;;  %v7028_v4 = vadd.f32 %v7027_v37, %v8261_v11  ;;  %v2791_v24 = vpop.f32.mrb[111].mxu0  ;;  %v6486_v19 = vpop.f32.mrb[151].mxu1 }
 0x575   :  { %v3538_v47 = vmul.f32 0.2, %v7028_v4  ;;  %v7030_v7 = vadd.f32 %v7029_v57, %v8267_v46  ;;  %6332 = vmatmul.mubr.msk.bf16.gmra.mrb[20].mxu0 %vm1538_vm0, %v837_v45  ;;  %vm3440_vm2 = vcmp.gt.f32.partialorder %v7028_v4, 0.0  ;;  %v8533_v57 = vpop.f32.mrb[152].mxu1 }
 0x576   :  { %v6489_v28 = vpop.f32.mrb[153].mxu1 }
 0x577   :  { %vm3441_vm3 = vcmp.gt.f32.partialorder %v7030_v7, 0.0  ;;  %v3539_v61 = vmul.f32 0.2, %v7030_v7  ;;  %v8526_v13 = vsel %vm3440_vm2, %v7028_v4, %v3538_v47  ;;  %v8537_v53 = vpop.f32.mrb[154].mxu1 }
 0x578   :  { %v2794_v38 = vpop.f32.mrb[112].mxu0  ;;  %10206 = vst [vmem:[#allocation49_spill] sm:$0xff] %v8526_v13 }
 0x579   :  { %v8528_v11 = vsel %vm3441_vm3, %v7030_v7, %v3539_v61  ;;  %v7031_v37 = vadd.f32 %v8475_v43, %v2794_v38  ;;  %v2796_v50 = vpop.f32.mrb[113].mxu0  ;;  %v6490_v7 = vpop.f32.mrb[155].mxu1 }
 0x57a   :  { %10207 = vst [vmem:[#allocation50_spill] sm:$0xff] %v8528_v11  ;;  %v2797_v46 = vpop.f32.mrb[114].mxu0 }
 0x57b   :  { %v7033_v45 = vadd.f32 %v8475_v43, %v2797_v46  ;;  %v7032_v23 = vadd.f32 %v7031_v37, %v8275_v33  ;;  %v2799_v19 = vpop.f32.mrb[115].mxu0  ;;  %v8547_v37 = vpop.f32.mrb[156].mxu1 }
 0x57c   :  { %v6493_v7 = vpop.f32.mrb[157].mxu1 }
 0x57d   :  { %v3540_v4 = vmul.f32 0.2, %v7032_v23  ;;  %v7034_v47 = vadd.f32 %v7033_v45, %v8281_v52  ;;  %vm3442_vm0 = vcmp.gt.f32.partialorder %v7032_v23, 0.0  ;;  %v8551_v11 = vpop.f32.mrb[158].mxu1 }
 0x57f   :  { %vm3443_vm4 = vcmp.gt.f32.partialorder %v7034_v47, 0.0  ;;  %v3541_v38 = vmul.f32 0.2, %v7034_v47  ;;  %v8540_v50 = vsel %vm3442_vm0, %v7032_v23, %v3540_v4 }
 0x580   :  { %v2802_v61 = vpop.f32.mrb[116].mxu0  ;;  %10208 = vst [vmem:[#allocation51_spill] sm:$0xff] %v8540_v50 }
 0x581   :  { %v8542_v24 = vsel %vm3443_vm4, %v7034_v47, %v3541_v38  ;;  %v7035_v46 = vadd.f32 %v8475_v43, %v2802_v61  ;;  %v2804_v13 = vpop.f32.mrb[117].mxu0  ;;  %v6494_v47 = vpop.f32.mrb[159].mxu1 }
 0x582   :  { %10209 = vst [vmem:[#allocation52_spill] sm:$0xff] %v8542_v24  ;;  %v2805_v28 = vpop.f32.mrb[118].mxu0 }
 0x583   :  { %v7037_v52 = vadd.f32 %v8475_v43, %v2805_v28  ;;  %v7036_v45 = vadd.f32 %v7035_v46, %v8289_v30  ;;  %v2807_v19 = vpop.f32.mrb[119].mxu0 }
 0x584   :  { %v8561_v19 = vpop.f32.mrb[160].mxu1 }
 0x585   :  { %v3542_v23 = vmul.f32 0.2, %v7036_v45  ;;  %v7038_v4 = vadd.f32 %v7037_v52, %v8295_v5  ;;  %vm3444_vm5 = vcmp.gt.f32.partialorder %v7036_v45, 0.0  ;;  %v6497_v47 = vpop.f32.mrb[161].mxu1 }
 0x586   :  { %v8565_v24 = vpop.f32.mrb[162].mxu1 }
 0x587   :  { %vm3445_vm6 = vcmp.gt.f32.partialorder %v7038_v4, 0.0  ;;  %v3543_v13 = vmul.f32 0.2, %v7038_v4  ;;  %v8554_v61 = vsel %vm3444_vm5, %v7036_v45, %v3542_v23 }
 0x588   :  { %v2810_v38 = vpop.f32.mrb[120].mxu0  ;;  %10210 = vst [vmem:[#allocation53_spill] sm:$0xff] %v8554_v61 }
 0x589   :  { %v8556_v33 = vsel %vm3445_vm6, %v7038_v4, %v3543_v13  ;;  %v7039_v28 = vadd.f32 %v8475_v43, %v2810_v38  ;;  %v2812_v50 = vpop.f32.mrb[121].mxu0  ;;  %v6498_v4 = vpop.f32.mrb[163].mxu1 }
 0x58a   :  { %10211 = vst [vmem:[#allocation54_spill] sm:$0xff] %v8556_v33  ;;  %v2813_v46 = vpop.f32.mrb[122].mxu0 }
 0x58b   :  { %v7041_v5 = vadd.f32 %v8475_v43, %v2813_v46  ;;  %v7040_v52 = vadd.f32 %v7039_v28, %v8303_v9  ;;  %v2815_v7 = vpop.f32.mrb[123].mxu0 }
 0x58c   :  { %v8575_v7 = vpop.f32.mrb[164].mxu1 }
 0x58d   :  { %v3544_v45 = vmul.f32 0.2, %v7040_v52  ;;  %v7042_v23 = vadd.f32 %v7041_v5, %v8309_v15  ;;  %vm3446_vm7 = vcmp.gt.f32.partialorder %v7040_v52, 0.0  ;;  %v6501_v4 = vpop.f32.mrb[165].mxu1 }
 0x58e   :  { %v8579_v33 = vpop.f32.mrb[166].mxu1 }
 0x58f   :  { %vm3447_vm8 = vcmp.gt.f32.partialorder %v7042_v23, 0.0  ;;  %v3545_v50 = vmul.f32 0.2, %v7042_v23  ;;  %v8568_v38 = vsel %vm3446_vm7, %v7040_v52, %v3544_v45 }
 0x590   :  { %v2818_v13 = vpop.f32.mrb[124].mxu0 }
 0x591   :  { %v8570_v30 = vsel %vm3447_vm8, %v7042_v23, %v3545_v50  ;;  %v7043_v46 = vadd.f32 %v8475_v43, %v2818_v13  ;;  %v2820_v61 = vpop.f32.mrb[125].mxu0  ;;  %v6502_v23 = vpop.f32.mrb[167].mxu1 }
 0x592   :  { %v2821_v28 = vpop.f32.mrb[126].mxu0  ;;  %v7623_v61 = vld [vmem:[%s10127_s3 + $0x18] sm:$0xff]   ;;  %v8596_v23 = vpop.f32.mrb[168].mxu1 }
 0x593   :  { %v7045_v15 = vadd.f32 %v8475_v43, %v2821_v28  ;;  %v7044_v5 = vadd.f32 %v7043_v46, %v8317_v3  ;;  %v2823_v47 = vpop.f32.mrb[127].mxu0  ;;  %6514 = vmatpush3.bf16.msra.mxu1 %v7623_v61 }
 0x594   :  { %6515 = vmatprep.subr.bf16.mxu1 %v10190_v51 }
 0x595   :  { %v3546_v52 = vmul.f32 0.2, %v7044_v5  ;;  %v7046_v45 = vadd.f32 %v7045_v15, %v8323_v16  ;;  %vm3448_vm9 = vcmp.gt.f32.partialorder %v7044_v5, 0.0  ;;  %v7624_v16 = vld [vmem:[%s10127_s3 + $0x20] sm:$0xff]   ;;  %v7625_v15 = vld [vmem:[%s10127_s3 + $0x28] sm:$0xff]  }
 0x597   :  { %vm3449_vm10 = vcmp.gt.f32.partialorder %v7046_v45, 0.0  ;;  %v3547_v50 = vmul.f32 0.2, %v7046_v45  ;;  %v8586_v3 = vsel %vm3448_vm9, %v7044_v5, %v3546_v52  ;;  %6516 = vmatpush3.bf16.msra.mxu1 %v7624_v16 }
 0x598   :  { %v2826_v13 = vpop.f32.mrb[128].mxu0  ;;  %10212 = vst [vmem:[#allocation55_spill] sm:$0xff] %v8586_v3  ;;  %6517 = vmatprep.subr.bf16.mxu1 %v10190_v51 }
 0x599   :  { %v8588_v46 = vsel %vm3449_vm10, %v7046_v45, %v3547_v50  ;;  %v7047_v28 = vadd.f32 %v8475_v43, %v2826_v13  ;;  %v2828_v47 = vpop.f32.mrb[129].mxu0  ;;  %v6505_v45 = vpop.f32.mrb[169].mxu1 }
 0x59a   :  { %10213 = vst [vmem:[#allocation56_spill] sm:$0xff] %v8588_v46  ;;  %v2829_v4 = vpop.f32.mrb[130].mxu0  ;;  %v8600_v50 = vpop.f32.mrb[170].mxu1 }
 0x59b   :  { %v7049_v61 = vadd.f32 %v8475_v43, %v2829_v4  ;;  %v7048_v5 = vadd.f32 %v7047_v28, %v8331_v12  ;;  %v2831_v52 = vpop.f32.mrb[131].mxu0  ;;  %v6506_v9 = vpop.f32.mrb[171].mxu1  ;;  %6518 = vmatpush3.bf16.msra.mxu1 %v7625_v15 }
 0x59c   :  { %6519 = vmatprep.subr.bf16.mxu1 %v10190_v51 }
 0x59d   :  { %v3548_v13 = vmul.f32 0.2, %v7048_v5  ;;  %v7050_v47 = vadd.f32 %v7049_v61, %v8337_v17  ;;  %vm3450_vm11 = vcmp.gt.f32.partialorder %v7048_v5, 0.0  ;;  %v7626_v17 = vld [vmem:[%s10127_s3 + $0x30] sm:$0xff]  }
 0x59f   :  { %vm3451_vm12 = vcmp.gt.f32.partialorder %v7050_v47, 0.0  ;;  %v3549_v4 = vmul.f32 0.2, %v7050_v47  ;;  %v8608_v28 = vsel %vm3450_vm11, %v7048_v5, %v3548_v13  ;;  %6520 = vmatpush3.bf16.msra.mxu1 %v7626_v17 }
 0x5a0   :  { %v2834_v12 = vpop.f32.mrb[132].mxu0  ;;  %10214 = vst [vmem:[#allocation57_spill] sm:$0xff] %v8608_v28  ;;  %6521 = vmatprep.subr.bf16.mxu1 %v10190_v51 }
 0x5a1   :  { %v8610_v16 = vsel %vm3451_vm12, %v7050_v47, %v3549_v4  ;;  %v7051_v52 = vadd.f32 %v8475_v43, %v2834_v12  ;;  %v2836_v45 = vpop.f32.mrb[133].mxu0  ;;  %v7627_v47 = vld [vmem:[%s10127_s3 + $0x38] sm:$0xff]  }
 0x5a2   :  { %v2837_v61 = vpop.f32.mrb[134].mxu0 }
 0x5a3   :  { %v7053_v15 = vadd.f32 %v8475_v43, %v2837_v61  ;;  %v7052_v3 = vadd.f32 %v7051_v52, %v8348_v26  ;;  %v2839_v46 = vpop.f32.mrb[135].mxu0  ;;  %6522 = vmatpush3.bf16.msra.mxu1 %v7627_v47 }
 0x5a4   :  { %6719 = vmatprep.subr.bf16.mxu1 %v10190_v51 }
 0x5a5   :  { %v3550_v5 = vmul.f32 0.2, %v7052_v3  ;;  %v7054_v13 = vadd.f32 %v7053_v15, %v8355_v36  ;;  %vm3452_vm13 = vcmp.gt.f32.partialorder %v7052_v3, 0.0 }
 0x5a7   :  { %vm3453_vm14 = vcmp.gt.f32.partialorder %v7054_v13, 0.0  ;;  %v3551_v4 = vmul.f32 0.2, %v7054_v13  ;;  %v8626_v45 = vsel %vm3452_vm13, %v7052_v3, %v3550_v5 }
 0x5a8   :  { %v2842_v12 = vpop.f32.mrb[136].mxu0 }
 0x5a9   :  { %v8628_v26 = vsel %vm3453_vm14, %v7054_v13, %v3551_v4  ;;  %v7055_v46 = vadd.f32 %v8475_v43, %v2842_v12  ;;  %v2844_v52 = vpop.f32.mrb[137].mxu0 }
 0x5aa   :  { %v2845_v17 = vpop.f32.mrb[138].mxu0 }
 0x5ab   :  { %v7057_v61 = vadd.f32 %v8475_v43, %v2845_v17  ;;  %v7056_v15 = vadd.f32 %v7055_v46, %v8363_v32  ;;  %v2847_v9 = vpop.f32.mrb[139].mxu0 }
 0x5ad   :  { %v3552_v47 = vmul.f32 0.2, %v7056_v15  ;;  %v7058_v28 = vadd.f32 %v7057_v61, %v8369_v20  ;;  %vm3454_vm15 = vcmp.gt.f32.partialorder %v7056_v15, 0.0 }
 0x5af   :  { %vm3455_vm2 = vcmp.gt.f32.partialorder %v7058_v28, 0.0  ;;  %v3553_v3 = vmul.f32 0.2, %v7058_v28  ;;  %v8636_v13 = vsel %vm3454_vm15, %v7056_v15, %v3552_v47 }
 0x5b0   :  { %v2850_v5 = vpop.f32.mrb[140].mxu0 }
 0x5b1   :  { %v8638_v4 = vsel %vm3455_vm2, %v7058_v28, %v3553_v3  ;;  %v7059_v12 = vadd.f32 %v8475_v43, %v2850_v5  ;;  %v2852_v52 = vpop.f32.mrb[141].mxu0 }
 0x5b2   :  { %v2853_v36 = vpop.f32.mrb[142].mxu0 }
 0x5b3   :  { %v7061_v32 = vadd.f32 %v8475_v43, %v2853_v36  ;;  %v7060_v9 = vadd.f32 %v7059_v12, %v8377_v25  ;;  %v2855_v20 = vpop.f32.mrb[143].mxu0 }
 0x5b5   :  { %v3554_v46 = vmul.f32 0.2, %v7060_v9  ;;  %v7062_v61 = vadd.f32 %v7061_v32, %v8383_v49  ;;  %vm3456_vm3 = vcmp.gt.f32.partialorder %v7060_v9, 0.0 }
 0x5b7   :  { %vm3457_vm0 = vcmp.gt.f32.partialorder %v7062_v61, 0.0  ;;  %v3555_v15 = vmul.f32 0.2, %v7062_v61  ;;  %v8646_v47 = vsel %vm3456_vm3, %v7060_v9, %v3554_v46 }
 0x5b8   :  { %v2858_v28 = vpop.f32.mrb[144].mxu0 }
 0x5b9   :  { %v8648_v3 = vsel %vm3457_vm0, %v7062_v61, %v3555_v15  ;;  %v7063_v5 = vadd.f32 %v8475_v43, %v2858_v28  ;;  %v2860_v52 = vpop.f32.mrb[145].mxu0 }
 0x5ba   :  { %v2861_v17 = vpop.f32.mrb[146].mxu0 }
 0x5bb   :  { %v7065_v25 = vadd.f32 %v8475_v43, %v2861_v17  ;;  %v7064_v12 = vadd.f32 %v7063_v5, %v8391_v54  ;;  %v2863_v49 = vpop.f32.mrb[147].mxu0 }
 0x5bd   :  { %v3556_v32 = vmul.f32 0.2, %v7064_v12  ;;  %v7066_v20 = vadd.f32 %v7065_v25, %v8397_v63  ;;  %vm3458_vm4 = vcmp.gt.f32.partialorder %v7064_v12, 0.0 }
 0x5bf   :  { %vm3459_vm5 = vcmp.gt.f32.partialorder %v7066_v20, 0.0  ;;  %v3557_v9 = vmul.f32 0.2, %v7066_v20  ;;  %v8656_v61 = vsel %vm3458_vm4, %v7064_v12, %v3556_v32 }
 0x5c0   :  { %v2866_v46 = vpop.f32.mrb[148].mxu0 }
 0x5c1   :  { %v8658_v15 = vsel %vm3459_vm5, %v7066_v20, %v3557_v9  ;;  %v7067_v28 = vadd.f32 %v8475_v43, %v2866_v46  ;;  %v2868_v52 = vpop.f32.mrb[149].mxu0 }
 0x5c2   :  { %v2869_v36 = vpop.f32.mrb[150].mxu0 }
 0x5c3   :  { %v7069_v54 = vadd.f32 %v8475_v43, %v2869_v36  ;;  %v7068_v5 = vadd.f32 %v7067_v28, %v8405_v31  ;;  %v2871_v63 = vpop.f32.mrb[151].mxu0 }
 0x5c5   :  { %v3558_v25 = vmul.f32 0.2, %v7068_v5  ;;  %v7070_v49 = vadd.f32 %v7069_v54, %v8411_v14  ;;  %vm3460_vm6 = vcmp.gt.f32.partialorder %v7068_v5, 0.0 }
 0x5c7   :  { %vm3461_vm7 = vcmp.gt.f32.partialorder %v7070_v49, 0.0  ;;  %v3559_v12 = vmul.f32 0.2, %v7070_v49  ;;  %v8666_v20 = vsel %vm3460_vm6, %v7068_v5, %v3558_v25 }
 0x5c8   :  { %v2874_v32 = vpop.f32.mrb[152].mxu0 }
 0x5c9   :  { %v8668_v9 = vsel %vm3461_vm7, %v7070_v49, %v3559_v12  ;;  %v7071_v46 = vadd.f32 %v8475_v43, %v2874_v32  ;;  %v2876_v52 = vpop.f32.mrb[153].mxu0 }
 0x5ca   :  { %v2877_v17 = vpop.f32.mrb[154].mxu0 }
 0x5cb   :  { %v7073_v31 = vadd.f32 %v8475_v43, %v2877_v17  ;;  %v7072_v28 = vadd.f32 %v7071_v46, %v8426_v2  ;;  %v2879_v14 = vpop.f32.mrb[155].mxu0 }
 0x5cd   :  { %v3560_v54 = vmul.f32 0.2, %v7072_v28  ;;  %v7074_v63 = vadd.f32 %v7073_v31, %v8430_v39  ;;  %vm3462_vm8 = vcmp.gt.f32.partialorder %v7072_v28, 0.0 }
 0x5cf   :  { %vm3463_vm9 = vcmp.gt.f32.partialorder %v7074_v63, 0.0  ;;  %v3561_v5 = vmul.f32 0.2, %v7074_v63  ;;  %v8676_v49 = vsel %vm3462_vm8, %v7072_v28, %v3560_v54 }
 0x5d0   :  { %v2882_v25 = vpop.f32.mrb[156].mxu0 }
 0x5d1   :  { %v8678_v12 = vsel %vm3463_vm9, %v7074_v63, %v3561_v5  ;;  %v7075_v32 = vadd.f32 %v8475_v43, %v2882_v25  ;;  %v2884_v52 = vpop.f32.mrb[157].mxu0 }
 0x5d2   :  { %v2885_v36 = vpop.f32.mrb[158].mxu0 }
 0x5d3   :  { %v7077_v2 = vadd.f32 %v8475_v43, %v2885_v36  ;;  %v7076_v46 = vadd.f32 %v7075_v32, %v8444_v10  ;;  %v2887_v39 = vpop.f32.mrb[159].mxu0 }
 0x5d5   :  { %v3562_v31 = vmul.f32 0.2, %v7076_v46  ;;  %v7078_v14 = vadd.f32 %v7077_v2, %v8448_v27  ;;  %vm3464_vm10 = vcmp.gt.f32.partialorder %v7076_v46, 0.0 }
 0x5d7   :  { %vm3465_vm11 = vcmp.gt.f32.partialorder %v7078_v14, 0.0  ;;  %v3563_v28 = vmul.f32 0.2, %v7078_v14  ;;  %v8686_v63 = vsel %vm3464_vm10, %v7076_v46, %v3562_v31 }
 0x5d8   :  { %v2890_v54 = vpop.f32.mrb[160].mxu0 }
 0x5d9   :  { %v8688_v5 = vsel %vm3465_vm11, %v7078_v14, %v3563_v28  ;;  %v7079_v25 = vadd.f32 %v8475_v43, %v2890_v54  ;;  %v2892_v52 = vpop.f32.mrb[161].mxu0 }
 0x5da   :  { %v2893_v17 = vpop.f32.mrb[162].mxu0 }
 0x5db   :  { %v7081_v10 = vadd.f32 %v8475_v43, %v2893_v17  ;;  %v7080_v32 = vadd.f32 %v7079_v25, %v8461_v42  ;;  %v2895_v27 = vpop.f32.mrb[163].mxu0 }
 0x5dd   :  { %v3564_v2 = vmul.f32 0.2, %v7080_v32  ;;  %v7082_v39 = vadd.f32 %v7081_v10, %v8465_v60  ;;  %vm3466_vm12 = vcmp.gt.f32.partialorder %v7080_v32, 0.0 }
 0x5df   :  { %vm3467_vm13 = vcmp.gt.f32.partialorder %v7082_v39, 0.0  ;;  %v3565_v46 = vmul.f32 0.2, %v7082_v39  ;;  %v8696_v14 = vsel %vm3466_vm12, %v7080_v32, %v3564_v2 }
 0x5e0   :  { %v2898_v31 = vpop.f32.mrb[164].mxu0 }
 0x5e1   :  { %v8698_v28 = vsel %vm3467_vm13, %v7082_v39, %v3565_v46  ;;  %v7083_v54 = vadd.f32 %v8475_v43, %v2898_v31  ;;  %v2900_v52 = vpop.f32.mrb[165].mxu0 }
 0x5e2   :  { %v2901_v36 = vpop.f32.mrb[166].mxu0 }
 0x5e3   :  { %v7085_v42 = vadd.f32 %v8475_v43, %v2901_v36  ;;  %v7084_v25 = vadd.f32 %v7083_v54, %v8480_v29  ;;  %v2903_v60 = vpop.f32.mrb[167].mxu0 }
 0x5e5   :  { %v3566_v10 = vmul.f32 0.2, %v7084_v25  ;;  %v7086_v27 = vadd.f32 %v7085_v42, %v8484_v34  ;;  %vm3468_vm14 = vcmp.gt.f32.partialorder %v7084_v25, 0.0 }
 0x5e7   :  { %vm3469_vm15 = vcmp.gt.f32.partialorder %v7086_v27, 0.0  ;;  %v3567_v32 = vmul.f32 0.2, %v7086_v27  ;;  %v8706_v39 = vsel %vm3468_vm14, %v7084_v25, %v3566_v10 }
 0x5e8   :  { %v2906_v2 = vpop.f32.mrb[168].mxu0 }
 0x5e9   :  { %v8708_v46 = vsel %vm3469_vm15, %v7086_v27, %v3567_v32  ;;  %v7087_v31 = vadd.f32 %v8475_v43, %v2906_v2  ;;  %v2908_v52 = vpop.f32.mrb[169].mxu0 }
 0x5ea   :  { %v2909_v17 = vpop.f32.mrb[170].mxu0 }
 0x5eb   :  { %v7089_v29 = vadd.f32 %v8475_v43, %v2909_v17  ;;  %v7088_v54 = vadd.f32 %v7087_v31, %v8497_v44  ;;  %v2911_v34 = vpop.f32.mrb[171].mxu0 }
 0x5ed   :  { %v3568_v42 = vmul.f32 0.2, %v7088_v54  ;;  %v7090_v60 = vadd.f32 %v7089_v29, %v8501_v55  ;;  %vm3470_vm2 = vcmp.gt.f32.partialorder %v7088_v54, 0.0 }
 0x5ef   :  { %vm3471_vm3 = vcmp.gt.f32.partialorder %v7090_v60, 0.0  ;;  %v3569_v25 = vmul.f32 0.2, %v7090_v60  ;;  %v8716_v27 = vsel %vm3470_vm2, %v7088_v54, %v3568_v42 }
 0x5f0   :  { %v2914_v10 = vpop.f32.mrb[172].mxu0 }
 0x5f1   :  { %v8718_v32 = vsel %vm3471_vm3, %v7090_v60, %v3569_v25  ;;  %v7091_v2 = vadd.f32 %v8475_v43, %v2914_v10  ;;  %v2916_v52 = vpop.f32.mrb[173].mxu0 }
 0x5f2   :  { %v2917_v36 = vpop.f32.mrb[174].mxu0 }
 0x5f3   :  { %v7093_v44 = vadd.f32 %v8475_v43, %v2917_v36  ;;  %v7092_v31 = vadd.f32 %v7091_v2, %v8517_v35  ;;  %v2919_v55 = vpop.f32.mrb[175].mxu0 }
 0x5f5   :  { %v3570_v29 = vmul.f32 0.2, %v7092_v31  ;;  %v7094_v34 = vadd.f32 %v7093_v44, %v8521_v40  ;;  %vm3472_vm0 = vcmp.gt.f32.partialorder %v7092_v31, 0.0 }
 0x5f7   :  { %vm3473_vm4 = vcmp.gt.f32.partialorder %v7094_v34, 0.0  ;;  %v3571_v54 = vmul.f32 0.2, %v7094_v34  ;;  %v8726_v60 = vsel %vm3472_vm0, %v7092_v31, %v3570_v29 }
 0x5f8   :  { %v2922_v42 = vpop.f32.mrb[176].mxu0 }
 0x5f9   :  { %v8728_v25 = vsel %vm3473_vm4, %v7094_v34, %v3571_v54  ;;  %v7095_v10 = vadd.f32 %v8475_v43, %v2922_v42  ;;  %v2924_v52 = vpop.f32.mrb[177].mxu0 }
 0x5fa   :  { %v2925_v17 = vpop.f32.mrb[178].mxu0 }
 0x5fb   :  { %v7097_v35 = vadd.f32 %v8475_v43, %v2925_v17  ;;  %v7096_v2 = vadd.f32 %v7095_v10, %v8533_v57  ;;  %v2927_v40 = vpop.f32.mrb[179].mxu0 }
 0x5fd   :  { %v3572_v44 = vmul.f32 0.2, %v7096_v2  ;;  %v7098_v55 = vadd.f32 %v7097_v35, %v8537_v53  ;;  %vm3474_vm5 = vcmp.gt.f32.partialorder %v7096_v2, 0.0 }
 0x5ff   :  { %vm3475_vm6 = vcmp.gt.f32.partialorder %v7098_v55, 0.0  ;;  %v3573_v31 = vmul.f32 0.2, %v7098_v55  ;;  %v8736_v34 = vsel %vm3474_vm5, %v7096_v2, %v3572_v44 }
 0x600   :  { %v2930_v29 = vpop.f32.mrb[180].mxu0 }
 0x601   :  { %v8738_v54 = vsel %vm3475_vm6, %v7098_v55, %v3573_v31  ;;  %v7099_v42 = vadd.f32 %v8475_v43, %v2930_v29  ;;  %v2932_v52 = vpop.f32.mrb[181].mxu0 }
 0x602   :  { %v2933_v36 = vpop.f32.mrb[182].mxu0 }
 0x603   :  { %v7101_v57 = vadd.f32 %v8475_v43, %v2933_v36  ;;  %v7100_v10 = vadd.f32 %v7099_v42, %v8547_v37  ;;  %v2935_v53 = vpop.f32.mrb[183].mxu0 }
 0x605   :  { %v3574_v35 = vmul.f32 0.2, %v7100_v10  ;;  %v7102_v40 = vadd.f32 %v7101_v57, %v8551_v11  ;;  %vm3476_vm7 = vcmp.gt.f32.partialorder %v7100_v10, 0.0 }
 0x607   :  { %vm3477_vm8 = vcmp.gt.f32.partialorder %v7102_v40, 0.0  ;;  %v3575_v2 = vmul.f32 0.2, %v7102_v40  ;;  %v8746_v55 = vsel %vm3476_vm7, %v7100_v10, %v3574_v35 }
 0x608   :  { %v2938_v44 = vpop.f32.mrb[184].mxu0 }
 0x609   :  { %v8748_v31 = vsel %vm3477_vm8, %v7102_v40, %v3575_v2  ;;  %v7103_v29 = vadd.f32 %v8475_v43, %v2938_v44  ;;  %v2940_v52 = vpop.f32.mrb[185].mxu0 }
 0x60a   :  { %v2941_v17 = vpop.f32.mrb[186].mxu0 }
 0x60b   :  { %v7105_v37 = vadd.f32 %v8475_v43, %v2941_v17  ;;  %v7104_v42 = vadd.f32 %v7103_v29, %v8561_v19  ;;  %v2943_v11 = vpop.f32.mrb[187].mxu0 }
 0x60d   :  { %v3576_v57 = vmul.f32 0.2, %v7104_v42  ;;  %v7106_v53 = vadd.f32 %v7105_v37, %v8565_v24  ;;  %vm3478_vm9 = vcmp.gt.f32.partialorder %v7104_v42, 0.0 }
 0x60f   :  { %vm3479_vm10 = vcmp.gt.f32.partialorder %v7106_v53, 0.0  ;;  %v3577_v10 = vmul.f32 0.2, %v7106_v53  ;;  %v8756_v40 = vsel %vm3478_vm9, %v7104_v42, %v3576_v57 }
 0x610   :  { %v2946_v35 = vpop.f32.mrb[188].mxu0 }
 0x611   :  { %v8758_v2 = vsel %vm3479_vm10, %v7106_v53, %v3577_v10  ;;  %v7107_v44 = vadd.f32 %v8475_v43, %v2946_v35  ;;  %v2948_v52 = vpop.f32.mrb[189].mxu0 }
 0x612   :  { %v2949_v36 = vpop.f32.mrb[190].mxu0 }
 0x613   :  { %v7109_v19 = vadd.f32 %v8475_v43, %v2949_v36  ;;  %v7108_v29 = vadd.f32 %v7107_v44, %v8575_v7  ;;  %v2951_v24 = vpop.f32.mrb[191].mxu0 }
 0x615   :  { %v3578_v37 = vmul.f32 0.2, %v7108_v29  ;;  %v7110_v11 = vadd.f32 %v7109_v19, %v8579_v33  ;;  %vm3480_vm11 = vcmp.gt.f32.partialorder %v7108_v29, 0.0 }
 0x617   :  { %vm3481_vm12 = vcmp.gt.f32.partialorder %v7110_v11, 0.0  ;;  %v3579_v42 = vmul.f32 0.2, %v7110_v11  ;;  %v8766_v53 = vsel %vm3480_vm11, %v7108_v29, %v3578_v37 }
 0x618   :  { %v2954_v57 = vpop.f32.mrb[192].mxu0  ;;  %10215 = vst [vmem:[#allocation58_spill] sm:$0xff] %v8766_v53 }
 0x619   :  { %v8768_v10 = vsel %vm3481_vm12, %v7110_v11, %v3579_v42  ;;  %v7111_v35 = vadd.f32 %v8475_v43, %v2954_v57  ;;  %v2956_v52 = vpop.f32.mrb[193].mxu0 }
 0x61a   :  { %v2957_v17 = vpop.f32.mrb[194].mxu0 }
 0x61b   :  { %v7113_v7 = vadd.f32 %v8475_v43, %v2957_v17  ;;  %v7112_v44 = vadd.f32 %v7111_v35, %v8596_v23  ;;  %v2959_v33 = vpop.f32.mrb[195].mxu0 }
 0x61d   :  { %v3580_v19 = vmul.f32 0.2, %v7112_v44  ;;  %v7114_v24 = vadd.f32 %v7113_v7, %v8600_v50  ;;  %vm3482_vm13 = vcmp.gt.f32.partialorder %v7112_v44, 0.0 }
 0x61f   :  { %vm3483_vm14 = vcmp.gt.f32.partialorder %v7114_v24, 0.0  ;;  %v3581_v29 = vmul.f32 0.2, %v7114_v24  ;;  %v8776_v11 = vsel %vm3482_vm13, %v7112_v44, %v3580_v19 }
 0x620   :  { %v2995_v37 = vpop.f32.mrb[0].mxu0  ;;  %10216 = vst [vmem:[#allocation59_spill] sm:$0xff] %v8776_v11 }
 0x621   :  { %v8778_v42 = vsel %vm3483_vm14, %v7114_v24, %v3581_v29  ;;  %v6931_v57 = vadd.f32 %v8475_v43, %v2995_v37  ;;  %v6313_v52 = vpop.f32.mrb[1].mxu0 }
 0x622   :  { %v2998_v36 = vpop.f32.mrb[2].mxu0 }
 0x623   :  { %v3484_v23 = vmul.f32 0.2, %v6931_v57  ;;  %v6932_v35 = vadd.f32 %v8475_v43, %v2998_v36  ;;  %v6314_v33 = vpop.f32.mrb[3].mxu0  ;;  %vm3386_vm15 = vcmp.gt.f32.partialorder %v6931_v57, 0.0 }
 0x625   :  { %vm3387_vm2 = vcmp.gt.f32.partialorder %v6932_v35, 0.0  ;;  %v3485_v50 = vmul.f32 0.2, %v6932_v35  ;;  %v3582_v7 = vsel %vm3386_vm15, %v6931_v57, %v3484_v23 }
 0x627   :  { %v3583_v53 = vsel %vm3387_vm2, %v6932_v35, %v3485_v50 }
 0x628   :  { %v3680_v44 = vpack.c.bf16 %v3583_v53, %v3582_v7  ;;  %v3003_v19 = vpop.f32.mrb[4].mxu0 }
 0x629   :  { %v6933_v24 = vadd.f32 %v8475_v43, %v3003_v19  ;;  %v6317_v29 = vpop.f32.mrb[5].mxu0 }
 0x62a   :  { %v3006_v37 = vpop.f32.mrb[6].mxu0  ;;  %6524 = vmatmul.mubr.bf16.vlgmr.msra.gmra.mrb[172].mxu1 %v3680_v44 }
 0x62b   :  { %v3486_v52 = vmul.f32 0.2, %v6933_v24  ;;  %v6934_v17 = vadd.f32 %v8475_v43, %v3006_v37  ;;  %v6318_v11 = vpop.f32.mrb[7].mxu0  ;;  %6527 = vmatprep.mubr.msk.bf16.mxu1 %vm7811_vm1, %v10190_v51  ;;  %vm3388_vm3 = vcmp.gt.f32.partialorder %v6933_v24, 0.0 }
 0x62d   :  { %vm3389_vm0 = vcmp.gt.f32.partialorder %v6934_v17, 0.0  ;;  %v3487_v36 = vmul.f32 0.2, %v6934_v17  ;;  %v3584_v33 = vsel %vm3388_vm3, %v6933_v24, %v3486_v52 }
 0x62f   :  { %v3585_v57 = vsel %vm3389_vm0, %v6934_v17, %v3487_v36 }
 0x630   :  { %v3011_v23 = vpop.f32.mrb[8].mxu0  ;;  %v3681_v53 = vpack.c.bf16 %v3585_v57, %v3584_v33 }
 0x631   :  { %v6935_v35 = vadd.f32 %v8475_v43, %v3011_v23  ;;  %v6321_v50 = vpop.f32.mrb[9].mxu0 }
 0x632   :  { %v3014_v7 = vpop.f32.mrb[10].mxu0  ;;  %6528 = vmatmul.mubr.bf16.gmra.mrb[176].mxu1 %v3681_v53 }
 0x633   :  { %v3488_v44 = vmul.f32 0.2, %v6935_v35  ;;  %v6936_v19 = vadd.f32 %v8475_v43, %v3014_v7  ;;  %v6322_v29 = vpop.f32.mrb[11].mxu0  ;;  %6531 = vmatprep.mubr.msk.bf16.mxu1 %vm7811_vm1, %v10190_v51  ;;  %vm3390_vm4 = vcmp.gt.f32.partialorder %v6935_v35, 0.0 }
 0x635   :  { %vm3391_vm5 = vcmp.gt.f32.partialorder %v6936_v19, 0.0  ;;  %v3489_v11 = vmul.f32 0.2, %v6936_v19  ;;  %v3586_v37 = vsel %vm3390_vm4, %v6935_v35, %v3488_v44 }
 0x637   :  { %v3587_v24 = vsel %vm3391_vm5, %v6936_v19, %v3489_v11 }
 0x638   :  { %v3019_v17 = vpop.f32.mrb[12].mxu0  ;;  %v3682_v52 = vpack.c.bf16 %v3587_v24, %v3586_v37 }
 0x639   :  { %v6937_v36 = vadd.f32 %v8475_v43, %v3019_v17  ;;  %v6325_v33 = vpop.f32.mrb[13].mxu0 }
 0x63a   :  { %v3022_v57 = vpop.f32.mrb[14].mxu0  ;;  %6532 = vmatmul.mubr.bf16.gmra.mrb[180].mxu1 %v3682_v52 }
 0x63b   :  { %v3490_v23 = vmul.f32 0.2, %v6937_v36  ;;  %v6938_v53 = vadd.f32 %v8475_v43, %v3022_v57  ;;  %v6326_v50 = vpop.f32.mrb[15].mxu0  ;;  %6535 = vmatprep.mubr.msk.bf16.mxu1 %vm7811_vm1, %v10190_v51  ;;  %vm3392_vm6 = vcmp.gt.f32.partialorder %v6937_v36, 0.0 }
 0x63d   :  { %vm3393_vm7 = vcmp.gt.f32.partialorder %v6938_v53, 0.0  ;;  %v3491_v7 = vmul.f32 0.2, %v6938_v53  ;;  %v3588_v29 = vsel %vm3392_vm6, %v6937_v36, %v3490_v23 }
 0x63f   :  { %v3589_v35 = vsel %vm3393_vm7, %v6938_v53, %v3491_v7 }
 0x640   :  { %v3027_v44 = vpop.f32.mrb[16].mxu0  ;;  %v3683_v19 = vpack.c.bf16 %v3589_v35, %v3588_v29 }
 0x641   :  { %v6939_v11 = vadd.f32 %v8475_v43, %v3027_v44  ;;  %v6329_v37 = vpop.f32.mrb[17].mxu0 }
 0x642   :  { %v3030_v24 = vpop.f32.mrb[18].mxu0  ;;  %6536 = vmatmul.mubr.bf16.gmra.mrb[184].mxu1 %v3683_v19 }
 0x643   :  { %v3492_v17 = vmul.f32 0.2, %v6939_v11  ;;  %v6940_v52 = vadd.f32 %v8475_v43, %v3030_v24  ;;  %v6330_v33 = vpop.f32.mrb[19].mxu0  ;;  %6539 = vmatprep.mubr.msk.bf16.mxu1 %vm7811_vm1, %v10190_v51  ;;  %vm3394_vm8 = vcmp.gt.f32.partialorder %v6939_v11, 0.0 }
 0x645   :  { %vm3395_vm9 = vcmp.gt.f32.partialorder %v6940_v52, 0.0  ;;  %v3493_v57 = vmul.f32 0.2, %v6940_v52  ;;  %v3590_v50 = vsel %vm3394_vm8, %v6939_v11, %v3492_v17 }
 0x647   :  { %v3591_v36 = vsel %vm3395_vm9, %v6940_v52, %v3493_v57  ;;  %v10217_v52 = vpack.c.bf16 %v8203_v21, %v8201_v18  ;;  %v10219_v57 = vpack.c.bf16 %v8231_v1, %v8229_v58  ;;  %v10220_v18 = vpack.c.bf16 %v8245_v41, %v8243_v48  ;;  %v7628_v21 = vld [vmem:[%s10129_s5] sm:$0xff]  }
 0x648   :  { %v3035_v23 = vpop.f32.mrb[20].mxu0  ;;  %v3684_v53 = vpack.c.bf16 %v3591_v36, %v3590_v50  ;;  %6720 = vmatpush3.bf16.msra.mxu1 %v7628_v21  ;;  %v10224_v1 = vld [vmem:[#allocation23_spill] sm:$0xff]  ;;  %v10225_v48 = vld [vmem:[#allocation22_spill] sm:$0xff]  ;;  %v10227_v50 = vld [vmem:[#allocation25_spill] sm:$0xff] }
 0x649   :  { %v6941_v7 = vadd.f32 %v8475_v43, %v3035_v23  ;;  %v6333_v29 = vpop.f32.mrb[21].mxu0  ;;  %6721 = vmatprep.subr.bf16.mxu1 %v10190_v51  ;;  %v10226_v41 = vpack.c.bf16 %v10224_v1, %v10225_v48  ;;  %v10228_v36 = vld [vmem:[#allocation24_spill] sm:$0xff]  ;;  %v10245_v21 = vld [vmem:[#allocation37_spill] sm:$0xff]  ;;  %v10249_v1 = vld [vmem:[#allocation38_spill] sm:$0xff] }
 0x64a   :  { %v3038_v35 = vpop.f32.mrb[22].mxu0  ;;  %6540 = vmatmul.mubr.bf16.gmra.mrb[188].mxu1 %v3684_v53  ;;  %v10229_v23 = vpack.c.bf16 %v10227_v50, %v10228_v36  ;;  %v10230_v53 = vld [vmem:[#allocation27_spill] sm:$0xff]  ;;  %v10250_v48 = vpack.c.bf16 %v8403_v56, %v10249_v1  ;;  %v10255_v56 = vld [vmem:[#allocation41_spill] sm:$0xff] }
 0x64b   :  { %v3494_v44 = vmul.f32 0.2, %v6941_v7  ;;  %v6942_v19 = vadd.f32 %v8475_v43, %v3038_v35  ;;  %v6334_v37 = vpop.f32.mrb[23].mxu0  ;;  %6543 = vmatprep.mubr.msk.bf16.mxu1 %vm7811_vm1, %v10190_v51  ;;  %vm3396_vm10 = vcmp.gt.f32.partialorder %v6941_v7, 0.0  ;;  %v10218_v43 = vpack.c.bf16 %v8217_v0, %v8215_v62  ;;  %v10221_v62 = vld [vmem:[#allocation21_spill] sm:$0xff]  ;;  %v10222_v0 = vld [vmem:[#allocation20_spill] sm:$0xff] }
 0x64c   :  { %v10223_v58 = vpack.c.bf16 %v10221_v62, %v10222_v0  ;;  %v10233_v35 = vld [vmem:[#allocation29_spill] sm:$0xff]  ;;  %v10236_v37 = vld [vmem:[#allocation31_spill] sm:$0xff]  ;;  %v10246_v62 = vld [vmem:[#allocation36_spill] sm:$0xff] }
 0x64d   :  { %vm3397_vm11 = vcmp.gt.f32.partialorder %v6942_v19, 0.0  ;;  %v3495_v24 = vmul.f32 0.2, %v6942_v19  ;;  %v3592_v33 = vsel %vm3396_vm10, %v6941_v7, %v3494_v44  ;;  %v10231_v7 = vld [vmem:[#allocation26_spill] sm:$0xff]  ;;  %v10234_v44 = vld [vmem:[#allocation28_spill] sm:$0xff]  ;;  %v10247_v0 = vpack.c.bf16 %v10245_v21, %v10246_v62  ;;  %v10252_v50 = vld [vmem:[#allocation39_spill] sm:$0xff] }
 0x64e   :  { %v10232_v29 = vpack.c.bf16 %v10230_v53, %v10231_v7  ;;  %v10257_v53 = vld [vmem:[#allocation44_spill] sm:$0xff]  ;;  %v10258_v7 = vld [vmem:[#allocation43_spill] sm:$0xff] }
 0x64f   :  { %v3593_v11 = vsel %vm3397_vm11, %v6942_v19, %v3495_v24  ;;  %v10235_v19 = vpack.c.bf16 %v10233_v35, %v10234_v44  ;;  %v10237_v24 = vld [vmem:[#allocation30_spill] sm:$0xff]  ;;  %v10261_v44 = vld [vmem:[#allocation45_spill] sm:$0xff] }
 0x650   :  { %v3685_v17 = vpack.c.bf16 %v3593_v11, %v3592_v33  ;;  %v10238_v33 = vpack.c.bf16 %v10236_v37, %v10237_v24  ;;  %v10239_v11 = vld [vmem:[#allocation33_spill] sm:$0xff]  ;;  %v10260_v35 = vld [vmem:[#allocation46_spill] sm:$0xff]  ;;  %v10263_v37 = vpack.c.bf16 %v8492_v22, %v8490_v59  ;;  %v10264_v24 = vld [vmem:[#allocation48_spill] sm:$0xff] }
 0x652   :  { %6544 = vmatmul.mubr.bf16.gmra.mrb[192].mxu1 %v3685_v17  ;;  %v10240_v17 = vld [vmem:[#allocation32_spill] sm:$0xff] }
 0x653   :  { %6547 = vmatprep.mubr.msk.bf16.mxu1 %vm7811_vm1, %v10190_v51 }
 0x65a   :  { %6548 = vmatmul.mubr.bf16.gmra.mrb[196].mxu1 %v10217_v52  ;;  %v10241_v52 = vpack.c.bf16 %v10239_v11, %v10240_v17  ;;  %v8917_v17 = vld [vmem:[#allocation9] ss:$0 sm:$0xff] }
 0x65b   :  { %6551 = vmatprep.mubr.msk.bf16.mxu1 %vm7811_vm1, %v10190_v51 }
 0x662   :  { %6552 = vmatmul.mubr.bf16.gmra.mrb[200].mxu1 %v10218_v43  ;;  %v10242_v43 = vld [vmem:[#allocation35_spill] sm:$0xff] }
 0x663   :  { %6555 = vmatprep.mubr.msk.bf16.mxu1 %vm7811_vm1, %v10190_v51 }
 0x66a   :  { %6556 = vmatmul.mubr.bf16.gmra.mrb[204].mxu1 %v10219_v57  ;;  %v10243_v57 = vld [vmem:[#allocation34_spill] sm:$0xff] }
 0x66b   :  { %6559 = vmatprep.mubr.msk.bf16.mxu1 %vm7811_vm1, %v10190_v51 }
 0x672   :  { %6560 = vmatmul.mubr.bf16.gmra.mrb[208].mxu1 %v10220_v18  ;;  %v10244_v18 = vpack.c.bf16 %v10242_v43, %v10243_v57 }
 0x673   :  { %6563 = vmatprep.mubr.msk.bf16.mxu1 %vm7811_vm1, %v10190_v51 }
 0x67a   :  { %6564 = vmatmul.mubr.bf16.gmra.mrb[212].mxu1 %v10223_v58  ;;  %v10248_v58 = vpack.c.bf16 %v8389_v8, %v8387_v6  ;;  %v7629_v6 = vld [vmem:[%s10129_s5 + $0x8] sm:$0xff]   ;;  %v10254_v8 = vld [vmem:[#allocation42_spill] sm:$0xff] }
 0x67b   :  { %6567 = vmatprep.mubr.msk.bf16.mxu1 %vm7811_vm1, %v10190_v51  ;;  %6722 = vmatpush3.bf16.msra.mxu1 %v7629_v6 }
 0x67c   :  { %6723 = vmatprep.subr.bf16.mxu1 %v10190_v51 }
 0x682   :  { %6568 = vmatmul.mubr.bf16.gmra.mrb[216].mxu1 %v10226_v41  ;;  %v10251_v41 = vld [vmem:[#allocation40_spill] sm:$0xff] }
 0x683   :  { %6571 = vmatprep.mubr.msk.bf16.mxu1 %vm7811_vm1, %v10190_v51  ;;  %v10253_v36 = vpack.c.bf16 %v10251_v41, %v10252_v50 }
 0x68a   :  { %6572 = vmatmul.mubr.bf16.gmra.mrb[220].mxu1 %v10229_v23  ;;  %v10256_v23 = vpack.c.bf16 %v10254_v8, %v10255_v56 }
 0x68b   :  { %6575 = vmatprep.mubr.msk.bf16.mxu1 %vm7811_vm1, %v10190_v51 }
 0x692   :  { %6576 = vmatmul.mubr.bf16.gmra.mrb[224].mxu1 %v10232_v29  ;;  %v10259_v29 = vpack.c.bf16 %v10257_v53, %v10258_v7 }
 0x693   :  { %6579 = vmatprep.mubr.msk.bf16.mxu1 %vm7811_vm1, %v10190_v51 }
 0x69a   :  { %6580 = vmatmul.mubr.bf16.gmra.mrb[228].mxu1 %v10235_v19  ;;  %v10262_v19 = vpack.c.bf16 %v10260_v35, %v10261_v44  ;;  %v10270_v35 = vld [vmem:[#allocation52_spill] sm:$0xff]  ;;  %v10271_v44 = vld [vmem:[#allocation51_spill] sm:$0xff] }
 0x69b   :  { %6583 = vmatprep.mubr.msk.bf16.mxu1 %vm7811_vm1, %v10190_v51 }
 0x6a2   :  { %6584 = vmatmul.mubr.bf16.gmra.mrb[232].mxu1 %v10238_v33  ;;  %v10265_v33 = vld [vmem:[#allocation47_spill] sm:$0xff] }
 0x6a3   :  { %6587 = vmatprep.mubr.msk.bf16.mxu1 %vm7811_vm1, %v10190_v51  ;;  %v10266_v11 = vpack.c.bf16 %v10264_v24, %v10265_v33 }
 0x6aa   :  { %6588 = vmatmul.mubr.bf16.gmra.mrb[236].mxu1 %v10241_v52 }
 0x6ab   :  { %6591 = vmatprep.mubr.msk.bf16.mxu1 %vm7811_vm1, %v10190_v51 }
 0x6b2   :  { %6592 = vmatmul.mubr.bf16.gmra.mrb[240].mxu1 %v10244_v18 }
 0x6b3   :  { %6595 = vmatprep.mubr.msk.bf16.mxu1 %vm7811_vm1, %v10190_v51 }
 0x6ba   :  { %6596 = vmatmul.mubr.bf16.gmra.mrb[244].mxu1 %v10247_v0  ;;  %v10267_v0 = vld [vmem:[#allocation50_spill] sm:$0xff] }
 0x6bb   :  { %6599 = vmatprep.mubr.msk.bf16.mxu1 %vm7811_vm1, %v10190_v51 }
 0x6c2   :  { %6600 = vmatmul.mubr.bf16.gmra.mrb[248].mxu1 %v10248_v58  ;;  %v10268_v58 = vld [vmem:[#allocation49_spill] sm:$0xff] }
 0x6c3   :  { %6603 = vmatprep.mubr.msk.bf16.mxu1 %vm7811_vm1, %v10190_v51  ;;  %v10269_v1 = vpack.c.bf16 %v10267_v0, %v10268_v58  ;;  %v10274_v0 = vld [vmem:[#allocation53_spill] sm:$0xff] }
 0x6ca   :  { %6604 = vmatmul.mubr.bf16.gmra.mrb[252].mxu1 %v10250_v48 }
 0x6cb   :  { %6607 = vmatprep.mubr.msk.bf16.mxu1 %vm7811_vm1, %v10190_v51 }
 0x6d2   :  { %6608 = vmatmul.mubr.bf16.gmra.mrb[0].mxu1 %v10253_v36 }
 0x6d3   :  { %6611 = vmatprep.mubr.msk.bf16.mxu1 %vm7811_vm1, %v10190_v51 }
 0x6da   :  { %6612 = vmatmul.mubr.bf16.gmra.mrb[4].mxu1 %v10256_v23 }
 0x6db   :  { %6615 = vmatprep.mubr.msk.bf16.mxu1 %vm7811_vm1, %v10190_v51 }
 0x6e2   :  { %6616 = vmatmul.mubr.bf16.gmra.mrb[8].mxu1 %v10259_v29 }
 0x6e3   :  { %6619 = vmatprep.mubr.msk.bf16.mxu1 %vm7811_vm1, %v10190_v51 }
 0x6ea   :  { %6620 = vmatmul.mubr.bf16.gmra.mrb[12].mxu1 %v10262_v19  ;;  %v10272_v19 = vpack.c.bf16 %v10270_v35, %v10271_v44 }
 0x6eb   :  { %6623 = vmatprep.mubr.msk.bf16.mxu1 %vm7811_vm1, %v10190_v51 }
 0x6f2   :  { %6624 = vmatmul.mubr.bf16.gmra.mrb[16].mxu1 %v10263_v37 }
 0x6f3   :  { %6627 = vmatprep.mubr.msk.bf16.mxu1 %vm7811_vm1, %v10190_v51 }
 0x6fa   :  { %6628 = vmatmul.mubr.bf16.gmra.mrb[20].mxu1 %v10266_v11 }
 0x6fb   :  { %6631 = vmatprep.mubr.msk.bf16.mxu1 %vm7811_vm1, %v10190_v51 }
 0x6fd   :  { %v3834_v52 = vpop.f32.mrb[172].mxu1 }
 0x6fe   :  { %v3835_v43 = vadd.f32 %v8917_v17, %v3834_v52  ;;  %v6525_v57 = vpop.f32.mrb[173].mxu1 }
 0x6ff   :  { %v3837_v18 = vpop.f32.mrb[174].mxu1 }
 0x700   :  { %v4323_v21 = vmul.f32 0.2, %v3835_v43  ;;  %v3838_v59 = vadd.f32 %v8917_v17, %v3837_v18  ;;  %v6526_v22 = vpop.f32.mrb[175].mxu1  ;;  %vm4225_vm12 = vcmp.gt.f32.partialorder %v3835_v43, 0.0 }
 0x702   :  { %vm4226_vm13 = vcmp.gt.f32.partialorder %v3838_v59, 0.0  ;;  %v4324_v62 = vmul.f32 0.2, %v3838_v59  ;;  %6632 = vmatmul.mubr.bf16.gmra.mrb[24].mxu1 %v10269_v1  ;;  %v8928_v48 = vsel %vm4225_vm12, %v3835_v43, %v4323_v21 }
 0x703   :  { %6635 = vmatprep.mubr.msk.bf16.mxu1 %vm7811_vm1, %v10190_v51 }
 0x704   :  { %v8930_v41 = vsel %vm4226_vm13, %v3838_v59, %v4324_v62  ;;  %v10273_v62 = vld [vmem:[#allocation54_spill] sm:$0xff] }
 0x705   :  { %v4519_v50 = vpack.c.bf16 %v8930_v41, %v8928_v48  ;;  %v3842_v36 = vpop.f32.mrb[176].mxu1  ;;  %v10275_v58 = vpack.c.bf16 %v10273_v62, %v10274_v0  ;;  %v10277_v0 = vld [vmem:[#allocation56_spill] sm:$0xff] }
 0x706   :  { %v3843_v6 = vadd.f32 %v8917_v17, %v3842_v36  ;;  %v6529_v8 = vpop.f32.mrb[177].mxu1 }
 0x707   :  { %v3845_v56 = vpop.f32.mrb[178].mxu1 }
 0x708   :  { %v4325_v23 = vmul.f32 0.2, %v3843_v6  ;;  %v3846_v53 = vadd.f32 %v8917_v17, %v3845_v56  ;;  %v6530_v7 = vpop.f32.mrb[179].mxu1  ;;  %vm4227_vm14 = vcmp.gt.f32.partialorder %v3843_v6, 0.0 }
 0x70a   :  { %vm4228_vm15 = vcmp.gt.f32.partialorder %v3846_v53, 0.0  ;;  %v4326_v29 = vmul.f32 0.2, %v3846_v53  ;;  %6636 = vmatmul.mubr.bf16.gmra.mrb[28].mxu1 %v10272_v19  ;;  %v8941_v37 = vsel %vm4227_vm14, %v3843_v6, %v4325_v23  ;;  %v10276_v19 = vpack.c.bf16 %v8570_v30, %v8568_v38 }
 0x70b   :  { %6639 = vmatprep.mubr.msk.bf16.mxu1 %vm7811_vm1, %v10190_v51 }
 0x70c   :  { %v8943_v24 = vsel %vm4228_vm15, %v3846_v53, %v4326_v29 }
 0x70d   :  { %v4520_v33 = vpack.c.bf16 %v8943_v24, %v8941_v37  ;;  %v3850_v11 = vpop.f32.mrb[180].mxu1 }
 0x70e   :  { %v3851_v52 = vadd.f32 %v8917_v17, %v3850_v11  ;;  %v6533_v43 = vpop.f32.mrb[181].mxu1 }
 0x70f   :  { %v3853_v57 = vpop.f32.mrb[182].mxu1 }
 0x710   :  { %v4327_v18 = vmul.f32 0.2, %v3851_v52  ;;  %v3854_v21 = vadd.f32 %v8917_v17, %v3853_v57  ;;  %v6534_v59 = vpop.f32.mrb[183].mxu1  ;;  %vm4229_vm2 = vcmp.gt.f32.partialorder %v3851_v52, 0.0 }
 0x712   :  { %vm4230_vm3 = vcmp.gt.f32.partialorder %v3854_v21, 0.0  ;;  %v4328_v22 = vmul.f32 0.2, %v3854_v21  ;;  %6640 = vmatmul.mubr.bf16.gmra.mrb[32].mxu1 %v10275_v58  ;;  %v8954_v1 = vsel %vm4229_vm2, %v3851_v52, %v4327_v18  ;;  %v10278_v58 = vld [vmem:[#allocation55_spill] sm:$0xff] }
 0x713   :  { %6643 = vmatprep.mubr.msk.bf16.mxu1 %vm7811_vm1, %v10190_v51 }
 0x714   :  { %v8956_v36 = vsel %vm4230_vm3, %v3854_v21, %v4328_v22 }
 0x715   :  { %v4521_v6 = vpack.c.bf16 %v8956_v36, %v8954_v1  ;;  %v3858_v8 = vpop.f32.mrb[184].mxu1 }
 0x716   :  { %v3859_v56 = vadd.f32 %v8917_v17, %v3858_v8  ;;  %v6537_v23 = vpop.f32.mrb[185].mxu1  ;;  %v10279_v8 = vpack.c.bf16 %v10277_v0, %v10278_v58 }
 0x717   :  { %v3861_v53 = vpop.f32.mrb[186].mxu1 }
 0x718   :  { %v4329_v7 = vmul.f32 0.2, %v3859_v56  ;;  %v3862_v29 = vadd.f32 %v8917_v17, %v3861_v53  ;;  %v6538_v35 = vpop.f32.mrb[187].mxu1  ;;  %vm4231_vm0 = vcmp.gt.f32.partialorder %v3859_v56, 0.0 }
 0x71a   :  { %vm4232_vm4 = vcmp.gt.f32.partialorder %v3862_v29, 0.0  ;;  %v4330_v44 = vmul.f32 0.2, %v3862_v29  ;;  %6644 = vmatmul.mubr.bf16.gmra.mrb[36].mxu1 %v10276_v19  ;;  %v8967_v11 = vsel %vm4231_vm0, %v3859_v56, %v4329_v7 }
 0x71b   :  { %6647 = vmatprep.mubr.msk.bf16.mxu1 %vm7811_vm1, %v10190_v51 }
 0x71c   :  { %v8969_v52 = vsel %vm4232_vm4, %v3862_v29, %v4330_v44 }
 0x71d   :  { %v4522_v43 = vpack.c.bf16 %v8969_v52, %v8967_v11  ;;  %v3866_v57 = vpop.f32.mrb[188].mxu1 }
 0x71e   :  { %v3867_v18 = vadd.f32 %v8917_v17, %v3866_v57  ;;  %v6541_v21 = vpop.f32.mrb[189].mxu1 }
 0x71f   :  { %v3869_v59 = vpop.f32.mrb[190].mxu1 }
 0x720   :  { %v4331_v22 = vmul.f32 0.2, %v3867_v18  ;;  %v3870_v62 = vadd.f32 %v8917_v17, %v3869_v59  ;;  %v6542_v30 = vpop.f32.mrb[191].mxu1  ;;  %vm4233_vm5 = vcmp.gt.f32.partialorder %v3867_v18, 0.0 }
 0x722   :  { %vm4234_vm6 = vcmp.gt.f32.partialorder %v3870_v62, 0.0  ;;  %v4332_v38 = vmul.f32 0.2, %v3870_v62  ;;  %6648 = vmatmul.mubr.bf16.gmra.mrb[40].mxu1 %v10279_v8  ;;  %v8980_v56 = vsel %vm4233_vm5, %v3867_v18, %v4331_v22  ;;  %v7630_v18 = vld [vmem:[%s10129_s5 + $0x10] sm:$0xff]   ;;  %v7631_v8 = vld [vmem:[%s10129_s5 + $0x18] sm:$0xff]   ;;  %s7813_s5 = smov [#allocation14]  }
 0x723   :  { %6651 = vmatprep.mubr.msk.bf16.mxu1 %vm7811_vm1, %v10190_v51  ;;  %v10280_v22 = vld [vmem:[#allocation57_spill] sm:$0xff]  ;;  %6724 = vmatpush3.bf16.msra.mxu1 %v7630_v18  ;;  %s5915_s15 = sshll.u32 %s7813_s5, 4  ;;  %s5916_s15 = int_to_ptr.vmem [resolvable:$true] %s5915_s15 }
 0x724   :  { %v8982_v23 = vsel %vm4234_vm6, %v3870_v62, %v4332_v38  ;;  %v10281_v62 = vpack.c.bf16 %v8610_v16, %v10280_v22  ;;  %6725 = vmatprep.subr.bf16.mxu1 %v10190_v51  ;;  %s7767_s16 = scalar_lea.vmem %s5916_s15, 112  ;;  %s7771_s6 = scalar_lea.vmem %s5916_s15, 128 }
 0x725   :  { %v4523_v53 = vpack.c.bf16 %v8982_v23, %v8980_v56  ;;  %v3874_v7 = vpop.f32.mrb[192].mxu1  ;;  %p7768_p6 = scmp.ne.s32.totalorder %s5916_s15, %s7767_s16  ;;  %p7772_p7 = scmp.lt.s32.totalorder %s5916_s15, %s5916_s15 }
 0x726   :  { %v3875_v29 = vadd.f32 %v8917_v17, %v3874_v7  ;;  %v6545_v35 = vpop.f32.mrb[193].mxu1  ;;  %p7773_p8 = scmp.lt.s32.totalorder %s7771_s6, %s7767_s16 }
 0x727   :  { %v3877_v44 = vpop.f32.mrb[194].mxu1  ;;  %6726 = vmatpush3.bf16.msra.mxu1 %v7631_v8 }
 0x728   :  { %v4333_v19 = vmul.f32 0.2, %v3875_v29  ;;  %v3878_v57 = vadd.f32 %v8917_v17, %v3877_v44  ;;  %v6546_v21 = vpop.f32.mrb[195].mxu1  ;;  %vm4235_vm7 = vcmp.gt.f32.partialorder %v3875_v29, 0.0  ;;  %p7774_p9 = por %p7773_p8, %p7772_p7 }
 0x729   :  { %v10282_v21 = vpack.c.bf16 %v8628_v26, %v8626_v45 }
 0x72a   :  { %vm4236_vm8 = vcmp.gt.f32.partialorder %v3878_v57, 0.0  ;;  %v4334_v59 = vmul.f32 0.2, %v3878_v57  ;;  %6652 = vmatmul.mubr.bf16.gmra.mrb[44].mxu1 %v10281_v62  ;;  %v8996_v30 = vsel %vm4235_vm7, %v3875_v29, %v4333_v19  ;;  %p7775_p10 = pnand %p7774_p9, %p7768_p6 }
 0x72b   :  { %6655 = vmatprep.mubr.msk.bf16.mxu1 %vm7811_vm1, %v10190_v51 }
 0x72c   :  { %v8998_v38 = vsel %vm4236_vm8, %v3878_v57, %v4334_v59 }
 0x72d   :  { %v3882_v58 = vpop.f32.mrb[196].mxu1 }
 0x72e   :  { %v3883_v16 = vadd.f32 %v8917_v17, %v3882_v58  ;;  %v6549_v7 = vpop.f32.mrb[197].mxu1 }
 0x72f   :  { %v3885_v35 = vpop.f32.mrb[198].mxu1 }
 0x730   :  { %v4335_v44 = vmul.f32 0.2, %v3883_v16  ;;  %v3886_v29 = vadd.f32 %v8917_v17, %v3885_v35  ;;  %v6550_v19 = vpop.f32.mrb[199].mxu1  ;;  %vm4237_vm9 = vcmp.gt.f32.partialorder %v3883_v16, 0.0 }
 0x732   :  { %vm4238_vm10 = vcmp.gt.f32.partialorder %v3886_v29, 0.0  ;;  %v4336_v57 = vmul.f32 0.2, %v3886_v29  ;;  %6656 = vmatmul.mubr.bf16.gmra.mrb[48].mxu1 %v10282_v21  ;;  %v9013_v18 = vsel %vm4237_vm9, %v3883_v16, %v4335_v44  ;;  %v10283_v16 = vpack.c.bf16 %v8638_v4, %v8636_v13 }
 0x733   :  { %6659 = vmatprep.mubr.msk.bf16.mxu1 %vm7811_vm1, %v10190_v51 }
 0x734   :  { %v9015_v59 = vsel %vm4238_vm10, %v3886_v29, %v4336_v57 }
 0x735   :  { %v3890_v62 = vpop.f32.mrb[200].mxu1 }
 0x736   :  { %v3891_v58 = vadd.f32 %v8917_v17, %v3890_v62  ;;  %v6553_v8 = vpop.f32.mrb[201].mxu1 }
 0x737   :  { %v3893_v7 = vpop.f32.mrb[202].mxu1 }
 0x738   :  { %v4337_v35 = vmul.f32 0.2, %v3891_v58  ;;  %v3894_v19 = vadd.f32 %v8917_v17, %v3893_v7  ;;  %v6554_v45 = vpop.f32.mrb[203].mxu1  ;;  %vm4239_vm11 = vcmp.gt.f32.partialorder %v3891_v58, 0.0 }
 0x73a   :  { %vm4240_vm12 = vcmp.gt.f32.partialorder %v3894_v19, 0.0  ;;  %v4338_v26 = vmul.f32 0.2, %v3894_v19  ;;  %6660 = vmatmul.mubr.bf16.gmra.mrb[52].mxu1 %v10283_v16  ;;  %v9026_v44 = vsel %vm4239_vm11, %v3891_v58, %v4337_v35  ;;  %v10284_v58 = vpack.c.bf16 %v8648_v3, %v8646_v47 }
 0x73b   :  { %6663 = vmatprep.mubr.msk.bf16.mxu1 %vm7811_vm1, %v10190_v51 }
 0x73c   :  { %v9028_v29 = vsel %vm4240_vm12, %v3894_v19, %v4338_v26 }
 0x73d   :  { %v3898_v21 = vpop.f32.mrb[204].mxu1 }
 0x73e   :  { %v3899_v62 = vadd.f32 %v8917_v17, %v3898_v21  ;;  %v6557_v8 = vpop.f32.mrb[205].mxu1 }
 0x73f   :  { %v3901_v7 = vpop.f32.mrb[206].mxu1 }
 0x740   :  { %v4339_v45 = vmul.f32 0.2, %v3899_v62  ;;  %v3902_v22 = vadd.f32 %v8917_v17, %v3901_v7  ;;  %v6558_v13 = vpop.f32.mrb[207].mxu1  ;;  %vm4241_vm13 = vcmp.gt.f32.partialorder %v3899_v62, 0.0 }
 0x742   :  { %vm4242_vm14 = vcmp.gt.f32.partialorder %v3902_v22, 0.0  ;;  %v4340_v4 = vmul.f32 0.2, %v3902_v22  ;;  %6664 = vmatmul.mubr.bf16.gmra.mrb[56].mxu1 %v10284_v58  ;;  %v9039_v35 = vsel %vm4241_vm13, %v3899_v62, %v4339_v45  ;;  %v10285_v62 = vpack.c.bf16 %v8658_v15, %v8656_v61 }
 0x743   :  { %6667 = vmatprep.mubr.msk.bf16.mxu1 %vm7811_vm1, %v10190_v51 }
 0x744   :  { %v9041_v19 = vsel %vm4242_vm14, %v3902_v22, %v4340_v4 }
 0x745   :  { %v3906_v16 = vpop.f32.mrb[208].mxu1 }
 0x746   :  { %v3907_v21 = vadd.f32 %v8917_v17, %v3906_v16  ;;  %v6561_v8 = vpop.f32.mrb[209].mxu1 }
 0x747   :  { %v3909_v7 = vpop.f32.mrb[210].mxu1 }
 0x748   :  { %v4341_v13 = vmul.f32 0.2, %v3907_v21  ;;  %v3910_v57 = vadd.f32 %v8917_v17, %v3909_v7  ;;  %v6562_v47 = vpop.f32.mrb[211].mxu1  ;;  %vm4243_vm15 = vcmp.gt.f32.partialorder %v3907_v21, 0.0 }
 0x74a   :  { %vm4244_vm2 = vcmp.gt.f32.partialorder %v3910_v57, 0.0  ;;  %v4342_v3 = vmul.f32 0.2, %v3910_v57  ;;  %6668 = vmatmul.mubr.bf16.gmra.mrb[60].mxu1 %v10285_v62  ;;  %v9052_v22 = vsel %vm4243_vm15, %v3907_v21, %v4341_v13  ;;  %v10286_v21 = vpack.c.bf16 %v8668_v9, %v8666_v20 }
 0x74b   :  { %6671 = vmatprep.mubr.msk.bf16.mxu1 %vm7811_vm1, %v10190_v51 }
 0x74c   :  { %v9054_v45 = vsel %vm4244_vm2, %v3910_v57, %v4342_v3 }
 0x74d   :  { %v3914_v58 = vpop.f32.mrb[212].mxu1 }
 0x74e   :  { %v3915_v16 = vadd.f32 %v8917_v17, %v3914_v58  ;;  %v6565_v8 = vpop.f32.mrb[213].mxu1 }
 0x74f   :  { %v3917_v7 = vpop.f32.mrb[214].mxu1 }
 0x750   :  { %v4343_v47 = vmul.f32 0.2, %v3915_v16  ;;  %v3918_v26 = vadd.f32 %v8917_v17, %v3917_v7  ;;  %v6566_v61 = vpop.f32.mrb[215].mxu1  ;;  %vm4245_vm3 = vcmp.gt.f32.partialorder %v3915_v16, 0.0 }
 0x752   :  { %vm4246_vm0 = vcmp.gt.f32.partialorder %v3918_v26, 0.0  ;;  %v4344_v15 = vmul.f32 0.2, %v3918_v26  ;;  %6672 = vmatmul.mubr.bf16.gmra.mrb[64].mxu1 %v10286_v21  ;;  %v9065_v57 = vsel %vm4245_vm3, %v3915_v16, %v4343_v47  ;;  %v10287_v16 = vpack.c.bf16 %v8678_v12, %v8676_v49 }
 0x753   :  { %6675 = vmatprep.mubr.msk.bf16.mxu1 %vm7811_vm1, %v10190_v51 }
 0x754   :  { %v9067_v13 = vsel %vm4246_vm0, %v3918_v26, %v4344_v15 }
 0x755   :  { %v3922_v62 = vpop.f32.mrb[216].mxu1 }
 0x756   :  { %v3923_v58 = vadd.f32 %v8917_v17, %v3922_v62  ;;  %v6569_v8 = vpop.f32.mrb[217].mxu1 }
 0x757   :  { %v3925_v7 = vpop.f32.mrb[218].mxu1 }
 0x758   :  { %v4345_v61 = vmul.f32 0.2, %v3923_v58  ;;  %v3926_v4 = vadd.f32 %v8917_v17, %v3925_v7  ;;  %v6570_v20 = vpop.f32.mrb[219].mxu1  ;;  %vm4247_vm4 = vcmp.gt.f32.partialorder %v3923_v58, 0.0 }
 0x75a   :  { %vm4248_vm5 = vcmp.gt.f32.partialorder %v3926_v4, 0.0  ;;  %v4346_v9 = vmul.f32 0.2, %v3926_v4  ;;  %6676 = vmatmul.mubr.bf16.gmra.mrb[68].mxu1 %v10287_v16  ;;  %v9078_v26 = vsel %vm4247_vm4, %v3923_v58, %v4345_v61  ;;  %v10288_v58 = vpack.c.bf16 %v8688_v5, %v8686_v63 }
 0x75b   :  { %6679 = vmatprep.mubr.msk.bf16.mxu1 %vm7811_vm1, %v10190_v51 }
 0x75c   :  { %v9080_v47 = vsel %vm4248_vm5, %v3926_v4, %v4346_v9 }
 0x75d   :  { %v3930_v21 = vpop.f32.mrb[220].mxu1 }
 0x75e   :  { %v3931_v62 = vadd.f32 %v8917_v17, %v3930_v21  ;;  %v6573_v8 = vpop.f32.mrb[221].mxu1 }
 0x75f   :  { %v3933_v7 = vpop.f32.mrb[222].mxu1 }
 0x760   :  { %v4347_v20 = vmul.f32 0.2, %v3931_v62  ;;  %v3934_v3 = vadd.f32 %v8917_v17, %v3933_v7  ;;  %v6574_v49 = vpop.f32.mrb[223].mxu1  ;;  %vm4249_vm6 = vcmp.gt.f32.partialorder %v3931_v62, 0.0 }
 0x762   :  { %vm4250_vm7 = vcmp.gt.f32.partialorder %v3934_v3, 0.0  ;;  %v4348_v12 = vmul.f32 0.2, %v3934_v3  ;;  %6680 = vmatmul.mubr.bf16.gmra.mrb[72].mxu1 %v10288_v58  ;;  %v9091_v4 = vsel %vm4249_vm6, %v3931_v62, %v4347_v20  ;;  %v10289_v62 = vpack.c.bf16 %v8698_v28, %v8696_v14 }
 0x763   :  { %6683 = vmatprep.mubr.msk.bf16.mxu1 %vm7811_vm1, %v10190_v51 }
 0x764   :  { %v9093_v61 = vsel %vm4250_vm7, %v3934_v3, %v4348_v12 }
 0x765   :  { %v3938_v16 = vpop.f32.mrb[224].mxu1 }
 0x766   :  { %v3939_v21 = vadd.f32 %v8917_v17, %v3938_v16  ;;  %v6577_v8 = vpop.f32.mrb[225].mxu1 }
 0x767   :  { %v3941_v7 = vpop.f32.mrb[226].mxu1 }
 0x768   :  { %v4349_v49 = vmul.f32 0.2, %v3939_v21  ;;  %v3942_v15 = vadd.f32 %v8917_v17, %v3941_v7  ;;  %v6578_v63 = vpop.f32.mrb[227].mxu1  ;;  %vm4251_vm8 = vcmp.gt.f32.partialorder %v3939_v21, 0.0 }
 0x76a   :  { %vm4252_vm9 = vcmp.gt.f32.partialorder %v3942_v15, 0.0  ;;  %v4350_v5 = vmul.f32 0.2, %v3942_v15  ;;  %6684 = vmatmul.mubr.bf16.gmra.mrb[76].mxu1 %v10289_v62  ;;  %v9104_v3 = vsel %vm4251_vm8, %v3939_v21, %v4349_v49  ;;  %v10290_v21 = vpack.c.bf16 %v8708_v46, %v8706_v39 }
 0x76b   :  { %6687 = vmatprep.mubr.msk.bf16.mxu1 %vm7811_vm1, %v10190_v51 }
 0x76c   :  { %v9106_v20 = vsel %vm4252_vm9, %v3942_v15, %v4350_v5 }
 0x76d   :  { %v3946_v58 = vpop.f32.mrb[228].mxu1 }
 0x76e   :  { %v3947_v16 = vadd.f32 %v8917_v17, %v3946_v58  ;;  %v6581_v8 = vpop.f32.mrb[229].mxu1 }
 0x76f   :  { %v3949_v7 = vpop.f32.mrb[230].mxu1 }
 0x770   :  { %v4351_v63 = vmul.f32 0.2, %v3947_v16  ;;  %v3950_v9 = vadd.f32 %v8917_v17, %v3949_v7  ;;  %v6582_v14 = vpop.f32.mrb[231].mxu1  ;;  %vm4253_vm10 = vcmp.gt.f32.partialorder %v3947_v16, 0.0 }
 0x772   :  { %vm4254_vm11 = vcmp.gt.f32.partialorder %v3950_v9, 0.0  ;;  %v4352_v28 = vmul.f32 0.2, %v3950_v9  ;;  %6688 = vmatmul.mubr.bf16.gmra.mrb[80].mxu1 %v10290_v21  ;;  %v9117_v15 = vsel %vm4253_vm10, %v3947_v16, %v4351_v63  ;;  %v10291_v16 = vpack.c.bf16 %v8718_v32, %v8716_v27 }
 0x773   :  { %6691 = vmatprep.mubr.msk.bf16.mxu1 %vm7811_vm1, %v10190_v51 }
 0x774   :  { %v9119_v49 = vsel %vm4254_vm11, %v3950_v9, %v4352_v28  ;;  %vm4607_vm11 = vcmask 523264  }
 0x775   :  { %v3954_v62 = vpop.f32.mrb[232].mxu1 }
 0x776   :  { %v3955_v58 = vadd.f32 %v8917_v17, %v3954_v62  ;;  %v6585_v8 = vpop.f32.mrb[233].mxu1 }
 0x777   :  { %v3957_v7 = vpop.f32.mrb[234].mxu1 }
 0x778   :  { %v4353_v14 = vmul.f32 0.2, %v3955_v58  ;;  %v3958_v12 = vadd.f32 %v8917_v17, %v3957_v7  ;;  %v6586_v39 = vpop.f32.mrb[235].mxu1  ;;  %vm4255_vm12 = vcmp.gt.f32.partialorder %v3955_v58, 0.0 }
 0x77a   :  { %vm4256_vm13 = vcmp.gt.f32.partialorder %v3958_v12, 0.0  ;;  %v4354_v46 = vmul.f32 0.2, %v3958_v12  ;;  %6692 = vmatmul.mubr.bf16.gmra.mrb[84].mxu1 %v10291_v16  ;;  %v9130_v9 = vsel %vm4255_vm12, %v3955_v58, %v4353_v14  ;;  %v10292_v58 = vpack.c.bf16 %v8728_v25, %v8726_v60 }
 0x77b   :  { %6695 = vmatprep.mubr.msk.bf16.mxu1 %vm7811_vm1, %v10190_v51 }
 0x77c   :  { %v9132_v63 = vsel %vm4256_vm13, %v3958_v12, %v4354_v46 }
 0x77d   :  { %v3962_v21 = vpop.f32.mrb[236].mxu1 }
 0x77e   :  { %v3963_v62 = vadd.f32 %v8917_v17, %v3962_v21  ;;  %v6589_v8 = vpop.f32.mrb[237].mxu1 }
 0x77f   :  { %v3965_v7 = vpop.f32.mrb[238].mxu1 }
 0x780   :  { %v4355_v39 = vmul.f32 0.2, %v3963_v62  ;;  %v3966_v5 = vadd.f32 %v8917_v17, %v3965_v7  ;;  %v6590_v27 = vpop.f32.mrb[239].mxu1  ;;  %vm4257_vm14 = vcmp.gt.f32.partialorder %v3963_v62, 0.0 }
 0x782   :  { %vm4258_vm15 = vcmp.gt.f32.partialorder %v3966_v5, 0.0  ;;  %v4356_v32 = vmul.f32 0.2, %v3966_v5  ;;  %6696 = vmatmul.mubr.bf16.gmra.mrb[88].mxu1 %v10292_v58  ;;  %v9143_v12 = vsel %vm4257_vm14, %v3963_v62, %v4355_v39  ;;  %v10293_v62 = vpack.c.bf16 %v8738_v54, %v8736_v34 }
 0x783   :  { %6699 = vmatprep.mubr.msk.bf16.mxu1 %vm7811_vm1, %v10190_v51 }
 0x784   :  { %v9145_v14 = vsel %vm4258_vm15, %v3966_v5, %v4356_v32 }
 0x785   :  { %v3970_v16 = vpop.f32.mrb[240].mxu1 }
 0x786   :  { %v3971_v21 = vadd.f32 %v8917_v17, %v3970_v16  ;;  %v6593_v8 = vpop.f32.mrb[241].mxu1 }
 0x787   :  { %v3973_v7 = vpop.f32.mrb[242].mxu1 }
 0x788   :  { %v4357_v27 = vmul.f32 0.2, %v3971_v21  ;;  %v3974_v28 = vadd.f32 %v8917_v17, %v3973_v7  ;;  %v6594_v60 = vpop.f32.mrb[243].mxu1  ;;  %vm4259_vm2 = vcmp.gt.f32.partialorder %v3971_v21, 0.0 }
 0x78a   :  { %vm4260_vm3 = vcmp.gt.f32.partialorder %v3974_v28, 0.0  ;;  %v4358_v25 = vmul.f32 0.2, %v3974_v28  ;;  %6700 = vmatmul.mubr.bf16.gmra.mrb[92].mxu1 %v10293_v62  ;;  %v9156_v5 = vsel %vm4259_vm2, %v3971_v21, %v4357_v27  ;;  %v10294_v21 = vpack.c.bf16 %v8748_v31, %v8746_v55 }
 0x78b   :  { %6703 = vmatprep.mubr.msk.bf16.mxu1 %vm7811_vm1, %v10190_v51 }
 0x78c   :  { %v9158_v39 = vsel %vm4260_vm3, %v3974_v28, %v4358_v25 }
 0x78d   :  { %v3978_v58 = vpop.f32.mrb[244].mxu1 }
 0x78e   :  { %v3979_v16 = vadd.f32 %v8917_v17, %v3978_v58  ;;  %v6597_v8 = vpop.f32.mrb[245].mxu1 }
 0x78f   :  { %v3981_v7 = vpop.f32.mrb[246].mxu1 }
 0x790   :  { %v4359_v60 = vmul.f32 0.2, %v3979_v16  ;;  %v3982_v46 = vadd.f32 %v8917_v17, %v3981_v7  ;;  %v6598_v34 = vpop.f32.mrb[247].mxu1  ;;  %vm4261_vm0 = vcmp.gt.f32.partialorder %v3979_v16, 0.0 }
 0x792   :  { %vm4262_vm4 = vcmp.gt.f32.partialorder %v3982_v46, 0.0  ;;  %v4360_v54 = vmul.f32 0.2, %v3982_v46  ;;  %6704 = vmatmul.mubr.bf16.gmra.mrb[96].mxu1 %v10294_v21  ;;  %v9169_v28 = vsel %vm4261_vm0, %v3979_v16, %v4359_v60  ;;  %v10295_v16 = vpack.c.bf16 %v8758_v2, %v8756_v40 }
 0x793   :  { %6707 = vmatprep.mubr.msk.bf16.mxu1 %vm7811_vm1, %v10190_v51 }
 0x794   :  { %v9171_v27 = vsel %vm4262_vm4, %v3982_v46, %v4360_v54 }
 0x795   :  { %v3986_v62 = vpop.f32.mrb[248].mxu1 }
 0x796   :  { %v3987_v58 = vadd.f32 %v8917_v17, %v3986_v62  ;;  %v6601_v8 = vpop.f32.mrb[249].mxu1 }
 0x797   :  { %v3989_v7 = vpop.f32.mrb[250].mxu1 }
 0x798   :  { %v4361_v34 = vmul.f32 0.2, %v3987_v58  ;;  %v3990_v32 = vadd.f32 %v8917_v17, %v3989_v7  ;;  %v6602_v55 = vpop.f32.mrb[251].mxu1  ;;  %vm4263_vm5 = vcmp.gt.f32.partialorder %v3987_v58, 0.0 }
 0x79a   :  { %vm4264_vm6 = vcmp.gt.f32.partialorder %v3990_v32, 0.0  ;;  %v4362_v31 = vmul.f32 0.2, %v3990_v32  ;;  %6708 = vmatmul.mubr.bf16.gmra.mrb[100].mxu1 %v10295_v16  ;;  %v9182_v46 = vsel %vm4263_vm5, %v3987_v58, %v4361_v34  ;;  %v10296_v58 = vld [vmem:[#allocation58_spill] sm:$0xff] }
 0x79b   :  { %6711 = vmatprep.mubr.msk.bf16.mxu1 %vm7811_vm1, %v10190_v51  ;;  %v10297_v34 = vpack.c.bf16 %v8768_v10, %v10296_v58 }
 0x79c   :  { %v9184_v60 = vsel %vm4264_vm6, %v3990_v32, %v4362_v31 }
 0x79d   :  { %v3994_v21 = vpop.f32.mrb[252].mxu1 }
 0x79e   :  { %v3995_v62 = vadd.f32 %v8917_v17, %v3994_v21  ;;  %v6605_v8 = vpop.f32.mrb[253].mxu1 }
 0x79f   :  { %v3997_v7 = vpop.f32.mrb[254].mxu1 }
 0x7a0   :  { %v4363_v55 = vmul.f32 0.2, %v3995_v62  ;;  %v3998_v25 = vadd.f32 %v8917_v17, %v3997_v7  ;;  %v6606_v40 = vpop.f32.mrb[255].mxu1  ;;  %vm4265_vm7 = vcmp.gt.f32.partialorder %v3995_v62, 0.0 }
 0x7a2   :  { %vm4266_vm8 = vcmp.gt.f32.partialorder %v3998_v25, 0.0  ;;  %v4364_v2 = vmul.f32 0.2, %v3998_v25  ;;  %6712 = vmatmul.mubr.bf16.gmra.mrb[104].mxu1 %v10297_v34  ;;  %v9195_v32 = vsel %vm4265_vm7, %v3995_v62, %v4363_v55  ;;  %v10298_v62 = vld [vmem:[#allocation59_spill] sm:$0xff] }
 0x7a3   :  { %6715 = vmatprep.mubr.msk.bf16.mxu1 %vm7811_vm1, %v10190_v51  ;;  %v10299_v55 = vpack.c.bf16 %v8778_v42, %v10298_v62 }
 0x7a4   :  { %v9197_v31 = vsel %vm4266_vm8, %v3998_v25, %v4364_v2 }
 0x7a5   :  { %v4002_v21 = vpop.f32.mrb[0].mxu1 }
 0x7a6   :  { %v4003_v8 = vadd.f32 %v8917_v17, %v4002_v21  ;;  %v6609_v7 = vpop.f32.mrb[1].mxu1 }
 0x7a7   :  { %v4005_v40 = vpop.f32.mrb[2].mxu1 }
 0x7a8   :  { %v4365_v54 = vmul.f32 0.2, %v4003_v8  ;;  %v4006_v0 = vadd.f32 %v8917_v17, %v4005_v40  ;;  %v6610_v10 = vpop.f32.mrb[3].mxu1  ;;  %vm4267_vm9 = vcmp.gt.f32.partialorder %v4003_v8, 0.0 }
 0x7aa   :  { %vm4268_vm10 = vcmp.gt.f32.partialorder %v4006_v0, 0.0  ;;  %v4366_v58 = vmul.f32 0.2, %v4006_v0  ;;  %6716 = vmatmul.mubr.bf16.gmra.mrb[108].mxu1 %v10299_v55  ;;  %v9208_v25 = vsel %vm4267_vm9, %v4003_v8, %v4365_v54 }
 0x7ab   :  { %6727 = vmatprep.mubr.msk.bf16.mxu1 %vm7811_vm1, %v10190_v51 }
 0x7ac   :  { %v9210_v2 = vsel %vm4268_vm10, %v4006_v0, %v4366_v58 }
 0x7ad   :  { %v4540_v34 = vpack.c.bf16 %v9210_v2, %v9208_v25  ;;  %v4010_v21 = vpop.f32.mrb[4].mxu1 }
 0x7ae   :  { %v4011_v7 = vadd.f32 %v8917_v17, %v4010_v21  ;;  %v6613_v40 = vpop.f32.mrb[5].mxu1 }
 0x7af   :  { %v4013_v10 = vpop.f32.mrb[6].mxu1 }
 0x7b0   :  { %v4367_v16 = vmul.f32 0.2, %v4011_v7  ;;  %v4014_v42 = vadd.f32 %v8917_v17, %v4013_v10  ;;  %v6614_v62 = vpop.f32.mrb[7].mxu1  ;;  %vm4269_vm12 = vcmp.gt.f32.partialorder %v4011_v7, 0.0 }
 0x7b2   :  { %vm4270_vm13 = vcmp.gt.f32.partialorder %v4014_v42, 0.0  ;;  %v4368_v55 = vmul.f32 0.2, %v4014_v42  ;;  %6728 = vmatmul.mubr.msk.bf16.vlgmr.msra.gmra.mrb[112].mxu1 %vm4607_vm11, %v4519_v50  ;;  %v9222_v0 = vsel %vm4269_vm12, %v4011_v7, %v4367_v16 }
 0x7b3   :  { %6731 = vmatprep.mubr.msk.bf16.mxu1 %vm7811_vm1, %v10190_v51 }
 0x7b4   :  { %v9224_v54 = vsel %vm4270_vm13, %v4014_v42, %v4368_v55 }
 0x7b5   :  { %v4541_v8 = vpack.c.bf16 %v9224_v54, %v9222_v0  ;;  %v4018_v58 = vpop.f32.mrb[8].mxu1 }
 0x7b6   :  { %v4019_v21 = vadd.f32 %v8917_v17, %v4018_v58  ;;  %v6617_v40 = vpop.f32.mrb[9].mxu1 }
 0x7b7   :  { %v4021_v10 = vpop.f32.mrb[10].mxu1 }
 0x7b8   :  { %v4369_v62 = vmul.f32 0.2, %v4019_v21  ;;  %v4022_v48 = vadd.f32 %v8917_v17, %v4021_v10  ;;  %v6618_v41 = vpop.f32.mrb[11].mxu1  ;;  %vm4271_vm14 = vcmp.gt.f32.partialorder %v4019_v21, 0.0 }
 0x7ba   :  { %vm4272_vm15 = vcmp.gt.f32.partialorder %v4022_v48, 0.0  ;;  %v4370_v50 = vmul.f32 0.2, %v4022_v48  ;;  %6732 = vmatmul.mubr.msk.bf16.gmra.mrb[116].mxu1 %vm4607_vm11, %v4520_v33  ;;  %v9236_v16 = vsel %vm4271_vm14, %v4019_v21, %v4369_v62 }
 0x7bb   :  { %6735 = vmatprep.mubr.msk.bf16.mxu1 %vm7811_vm1, %v10190_v51 }
 0x7bc   :  { %v9238_v7 = vsel %vm4272_vm15, %v4022_v48, %v4370_v50 }
 0x7bd   :  { %v4542_v42 = vpack.c.bf16 %v9238_v7, %v9236_v16  ;;  %v4026_v55 = vpop.f32.mrb[12].mxu1 }
 0x7be   :  { %v4027_v58 = vadd.f32 %v8917_v17, %v4026_v55  ;;  %v6621_v40 = vpop.f32.mrb[13].mxu1 }
 0x7bf   :  { %v4029_v10 = vpop.f32.mrb[14].mxu1 }
 0x7c0   :  { %v4371_v41 = vmul.f32 0.2, %v4027_v58  ;;  %v4030_v37 = vadd.f32 %v8917_v17, %v4029_v10  ;;  %v6622_v24 = vpop.f32.mrb[15].mxu1  ;;  %vm4273_vm2 = vcmp.gt.f32.partialorder %v4027_v58, 0.0 }
 0x7c2   :  { %vm4274_vm3 = vcmp.gt.f32.partialorder %v4030_v37, 0.0  ;;  %v4372_v33 = vmul.f32 0.2, %v4030_v37  ;;  %6736 = vmatmul.mubr.msk.bf16.gmra.mrb[120].mxu1 %vm4607_vm11, %v4521_v6  ;;  %v9250_v21 = vsel %vm4273_vm2, %v4027_v58, %v4371_v41 }
 0x7c3   :  { %6739 = vmatprep.mubr.msk.bf16.mxu1 %vm7811_vm1, %v10190_v51 }
 0x7c4   :  { %v9252_v62 = vsel %vm4274_vm3, %v4030_v37, %v4372_v33 }
 0x7c5   :  { %v4543_v48 = vpack.c.bf16 %v9252_v62, %v9250_v21  ;;  %v4034_v50 = vpop.f32.mrb[16].mxu1 }
 0x7c6   :  { %v4035_v55 = vadd.f32 %v8917_v17, %v4034_v50  ;;  %v6625_v40 = vpop.f32.mrb[17].mxu1 }
 0x7c7   :  { %v4037_v10 = vpop.f32.mrb[18].mxu1 }
 0x7c8   :  { %v4373_v24 = vmul.f32 0.2, %v4035_v55  ;;  %v4038_v1 = vadd.f32 %v8917_v17, %v4037_v10  ;;  %v6626_v36 = vpop.f32.mrb[19].mxu1  ;;  %vm4275_vm0 = vcmp.gt.f32.partialorder %v4035_v55, 0.0 }
 0x7ca   :  { %vm4276_vm4 = vcmp.gt.f32.partialorder %v4038_v1, 0.0  ;;  %v4374_v6 = vmul.f32 0.2, %v4038_v1  ;;  %6740 = vmatmul.mubr.msk.bf16.gmra.mrb[124].mxu1 %vm4607_vm11, %v4522_v43  ;;  %v9264_v58 = vsel %vm4275_vm0, %v4035_v55, %v4373_v24 }
 0x7cb   :  { %6743 = vmatprep.mubr.msk.bf16.mxu1 %vm7811_vm1, %v10190_v51 }
 0x7cc   :  { %v9266_v41 = vsel %vm4276_vm4, %v4038_v1, %v4374_v6 }
 0x7cd   :  { %v4544_v37 = vpack.c.bf16 %v9266_v41, %v9264_v58  ;;  %v4042_v33 = vpop.f32.mrb[20].mxu1 }
 0x7ce   :  { %v4043_v50 = vadd.f32 %v8917_v17, %v4042_v33  ;;  %v6629_v40 = vpop.f32.mrb[21].mxu1 }
 0x7cf   :  { %v4045_v10 = vpop.f32.mrb[22].mxu1 }
 0x7d0   :  { %v4375_v36 = vmul.f32 0.2, %v4043_v50  ;;  %v4046_v11 = vadd.f32 %v8917_v17, %v4045_v10  ;;  %v6630_v52 = vpop.f32.mrb[23].mxu1  ;;  %vm4277_vm5 = vcmp.gt.f32.partialorder %v4043_v50, 0.0 }
 0x7d2   :  { %vm4278_vm6 = vcmp.gt.f32.partialorder %v4046_v11, 0.0  ;;  %v4376_v43 = vmul.f32 0.2, %v4046_v11  ;;  %6744 = vmatmul.mubr.msk.bf16.gmra.mrb[128].mxu1 %vm4607_vm11, %v4523_v53  ;;  %v9278_v55 = vsel %vm4277_vm5, %v4043_v50, %v4375_v36  ;;  %v10300_v50 = vpack.c.bf16 %v8998_v38, %v8996_v30 }
 0x7d3   :  { %6747 = vmatprep.mubr.msk.bf16.mxu1 %vm7811_vm1, %v10190_v51 }
 0x7d4   :  { %v9280_v24 = vsel %vm4278_vm6, %v4046_v11, %v4376_v43 }
 0x7d5   :  { %v4050_v6 = vpop.f32.mrb[24].mxu1 }
 0x7d6   :  { %v4051_v33 = vadd.f32 %v8917_v17, %v4050_v6  ;;  %v6633_v40 = vpop.f32.mrb[25].mxu1 }
 0x7d7   :  { %v4053_v10 = vpop.f32.mrb[26].mxu1 }
 0x7d8   :  { %v4377_v52 = vmul.f32 0.2, %v4051_v33  ;;  %v4054_v56 = vadd.f32 %v8917_v17, %v4053_v10  ;;  %v6634_v23 = vpop.f32.mrb[27].mxu1  ;;  %vm4279_vm7 = vcmp.gt.f32.partialorder %v4051_v33, 0.0 }
 0x7da   :  { %vm4280_vm8 = vcmp.gt.f32.partialorder %v4054_v56, 0.0  ;;  %v4378_v53 = vmul.f32 0.2, %v4054_v56  ;;  %6748 = vmatmul.mubr.msk.bf16.gmra.mrb[132].mxu1 %vm4607_vm11, %v10300_v50  ;;  %v9292_v36 = vsel %vm4279_vm7, %v4051_v33, %v4377_v52  ;;  %v10301_v33 = vpack.c.bf16 %v9015_v59, %v9013_v18 }
 0x7db   :  { %6751 = vmatprep.mubr.msk.bf16.mxu1 %vm7811_vm1, %v10190_v51 }
 0x7dc   :  { %v9294_v11 = vsel %vm4280_vm8, %v4054_v56, %v4378_v53 }
 0x7dd   :  { %v4058_v6 = vpop.f32.mrb[28].mxu1 }
 0x7de   :  { %v4059_v40 = vadd.f32 %v8917_v17, %v4058_v6  ;;  %v6637_v10 = vpop.f32.mrb[29].mxu1 }
 0x7df   :  { %v4061_v23 = vpop.f32.mrb[30].mxu1 }
 0x7e0   :  { %v4379_v1 = vmul.f32 0.2, %v4059_v40  ;;  %v4062_v30 = vadd.f32 %v8917_v17, %v4061_v23  ;;  %v6638_v38 = vpop.f32.mrb[31].mxu1  ;;  %vm4281_vm9 = vcmp.gt.f32.partialorder %v4059_v40, 0.0 }
 0x7e2   :  { %vm4282_vm10 = vcmp.gt.f32.partialorder %v4062_v30, 0.0  ;;  %v4380_v50 = vmul.f32 0.2, %v4062_v30  ;;  %6752 = vmatmul.mubr.msk.bf16.gmra.mrb[136].mxu1 %vm4607_vm11, %v10301_v33  ;;  %v9306_v52 = vsel %vm4281_vm9, %v4059_v40, %v4379_v1  ;;  %v10302_v1 = vpack.c.bf16 %v9028_v29, %v9026_v44 }
 0x7e3   :  { %6755 = vmatprep.mubr.msk.bf16.mxu1 %vm7811_vm1, %v10190_v51 }
 0x7e4   :  { %v9308_v56 = vsel %vm4282_vm10, %v4062_v30, %v4380_v50 }
 0x7e5   :  { %v4066_v6 = vpop.f32.mrb[32].mxu1 }
 0x7e6   :  { %v4067_v10 = vadd.f32 %v8917_v17, %v4066_v6  ;;  %v6641_v23 = vpop.f32.mrb[33].mxu1 }
 0x7e7   :  { %v4069_v38 = vpop.f32.mrb[34].mxu1 }
 0x7e8   :  { %v4381_v43 = vmul.f32 0.2, %v4067_v10  ;;  %v4070_v18 = vadd.f32 %v8917_v17, %v4069_v38  ;;  %v6642_v59 = vpop.f32.mrb[35].mxu1  ;;  %vm4283_vm12 = vcmp.gt.f32.partialorder %v4067_v10, 0.0 }
 0x7ea   :  { %vm4284_vm13 = vcmp.gt.f32.partialorder %v4070_v18, 0.0  ;;  %v4382_v33 = vmul.f32 0.2, %v4070_v18  ;;  %6756 = vmatmul.mubr.msk.bf16.gmra.mrb[140].mxu1 %vm4607_vm11, %v10302_v1  ;;  %v9320_v40 = vsel %vm4283_vm12, %v4067_v10, %v4381_v43  ;;  %v10303_v43 = vpack.c.bf16 %v9041_v19, %v9039_v35 }
 0x7eb   :  { %6759 = vmatprep.mubr.msk.bf16.mxu1 %vm7811_vm1, %v10190_v51 }
 0x7ec   :  { %v9322_v30 = vsel %vm4284_vm13, %v4070_v18, %v4382_v33 }
 0x7ed   :  { %v4074_v6 = vpop.f32.mrb[36].mxu1 }
 0x7ee   :  { %v4075_v23 = vadd.f32 %v8917_v17, %v4074_v6  ;;  %v6645_v38 = vpop.f32.mrb[37].mxu1 }
 0x7ef   :  { %v4077_v59 = vpop.f32.mrb[38].mxu1 }
 0x7f0   :  { %v4383_v53 = vmul.f32 0.2, %v4075_v23  ;;  %v4078_v44 = vadd.f32 %v8917_v17, %v4077_v59  ;;  %v6646_v29 = vpop.f32.mrb[39].mxu1  ;;  %vm4285_vm14 = vcmp.gt.f32.partialorder %v4075_v23, 0.0 }
 0x7f2   :  { %vm4286_vm15 = vcmp.gt.f32.partialorder %v4078_v44, 0.0  ;;  %v4384_v1 = vmul.f32 0.2, %v4078_v44  ;;  %6760 = vmatmul.mubr.msk.bf16.gmra.mrb[144].mxu1 %vm4607_vm11, %v10303_v43  ;;  %v9334_v10 = vsel %vm4285_vm14, %v4075_v23, %v4383_v53  ;;  %v10304_v53 = vpack.c.bf16 %v9054_v45, %v9052_v22 }
 0x7f3   :  { %6763 = vmatprep.mubr.msk.bf16.mxu1 %vm7811_vm1, %v10190_v51 }
 0x7f4   :  { %v9336_v18 = vsel %vm4286_vm15, %v4078_v44, %v4384_v1 }
 0x7f5   :  { %v4082_v6 = vpop.f32.mrb[40].mxu1 }
 0x7f6   :  { %v4083_v38 = vadd.f32 %v8917_v17, %v4082_v6  ;;  %v6649_v59 = vpop.f32.mrb[41].mxu1 }
 0x7f7   :  { %v4085_v29 = vpop.f32.mrb[42].mxu1 }
 0x7f8   :  { %v4385_v50 = vmul.f32 0.2, %v4083_v38  ;;  %v4086_v35 = vadd.f32 %v8917_v17, %v4085_v29  ;;  %v6650_v19 = vpop.f32.mrb[43].mxu1  ;;  %vm4287_vm2 = vcmp.gt.f32.partialorder %v4083_v38, 0.0 }
 0x7fa   :  { %vm4288_vm3 = vcmp.gt.f32.partialorder %v4086_v35, 0.0  ;;  %v4386_v43 = vmul.f32 0.2, %v4086_v35  ;;  %6764 = vmatmul.mubr.msk.bf16.gmra.mrb[148].mxu1 %vm4607_vm11, %v10304_v53  ;;  %v9348_v23 = vsel %vm4287_vm2, %v4083_v38, %v4385_v50  ;;  %v10305_v50 = vpack.c.bf16 %v9067_v13, %v9065_v57 }
 0x7fb   :  { %6767 = vmatprep.mubr.msk.bf16.mxu1 %vm7811_vm1, %v10190_v51 }
 0x7fc   :  { %v9350_v44 = vsel %vm4288_vm3, %v4086_v35, %v4386_v43 }
 0x7fd   :  { %v4090_v6 = vpop.f32.mrb[44].mxu1 }
 0x7fe   :  { %v4091_v59 = vadd.f32 %v8917_v17, %v4090_v6  ;;  %v6653_v29 = vpop.f32.mrb[45].mxu1 }
 0x7ff   :  { %v4093_v19 = vpop.f32.mrb[46].mxu1 }
 0x800   :  { %v4387_v33 = vmul.f32 0.2, %v4091_v59  ;;  %v4094_v22 = vadd.f32 %v8917_v17, %v4093_v19  ;;  %v6654_v45 = vpop.f32.mrb[47].mxu1  ;;  %vm4289_vm0 = vcmp.gt.f32.partialorder %v4091_v59, 0.0 }
 0x802   :  { %vm4290_vm4 = vcmp.gt.f32.partialorder %v4094_v22, 0.0  ;;  %v4388_v53 = vmul.f32 0.2, %v4094_v22  ;;  %6768 = vmatmul.mubr.msk.bf16.gmra.mrb[152].mxu1 %vm4607_vm11, %v10305_v50  ;;  %v9362_v38 = vsel %vm4289_vm0, %v4091_v59, %v4387_v33  ;;  %v10306_v33 = vpack.c.bf16 %v9080_v47, %v9078_v26 }
 0x803   :  { %6771 = vmatprep.mubr.msk.bf16.mxu1 %vm7811_vm1, %v10190_v51 }
 0x804   :  { %v9364_v35 = vsel %vm4290_vm4, %v4094_v22, %v4388_v53 }
 0x805   :  { %v4098_v6 = vpop.f32.mrb[48].mxu1 }
 0x806   :  { %v4099_v29 = vadd.f32 %v8917_v17, %v4098_v6  ;;  %v6657_v19 = vpop.f32.mrb[49].mxu1  ;;  %v9382_v6 = vld [vmem:[#allocation9] ss:$0 sm:$0xff] }
 0x807   :  { %v4101_v45 = vpop.f32.mrb[50].mxu1 }
 0x808   :  { %v4389_v1 = vmul.f32 0.2, %v4099_v29  ;;  %v4102_v57 = vadd.f32 %v8917_v17, %v4101_v45  ;;  %v6658_v13 = vpop.f32.mrb[51].mxu1  ;;  %vm4291_vm5 = vcmp.gt.f32.partialorder %v4099_v29, 0.0 }
 0x80a   :  { %vm4292_vm6 = vcmp.gt.f32.partialorder %v4102_v57, 0.0  ;;  %v4390_v50 = vmul.f32 0.2, %v4102_v57  ;;  %6772 = vmatmul.mubr.msk.bf16.gmra.mrb[156].mxu1 %vm4607_vm11, %v10306_v33  ;;  %v9376_v59 = vsel %vm4291_vm5, %v4099_v29, %v4389_v1  ;;  %v10307_v29 = vpack.c.bf16 %v9093_v61, %v9091_v4 }
 0x80b   :  { %6775 = vmatprep.mubr.msk.bf16.mxu1 %vm7811_vm1, %v10190_v51 }
 0x80c   :  { %v9378_v22 = vsel %vm4292_vm6, %v4102_v57, %v4390_v50 }
 0x80d   :  { %v4106_v17 = vpop.f32.mrb[52].mxu1 }
 0x80e   :  { %v4107_v19 = vadd.f32 %v9382_v6, %v4106_v17  ;;  %v6661_v45 = vpop.f32.mrb[53].mxu1 }
 0x80f   :  { %v4109_v13 = vpop.f32.mrb[54].mxu1 }
 0x810   :  { %v4391_v26 = vmul.f32 0.2, %v4107_v19  ;;  %v4110_v47 = vadd.f32 %v9382_v6, %v4109_v13  ;;  %v6662_v33 = vpop.f32.mrb[55].mxu1  ;;  %vm4293_vm7 = vcmp.gt.f32.partialorder %v4107_v19, 0.0 }
 0x812   :  { %vm4294_vm8 = vcmp.gt.f32.partialorder %v4110_v47, 0.0  ;;  %v4392_v1 = vmul.f32 0.2, %v4110_v47  ;;  %6776 = vmatmul.mubr.msk.bf16.gmra.mrb[160].mxu1 %vm4607_vm11, %v10307_v29  ;;  %v9392_v57 = vsel %vm4293_vm7, %v4107_v19, %v4391_v26  ;;  %v10308_v19 = vpack.c.bf16 %v9106_v20, %v9104_v3 }
 0x813   :  { %6779 = vmatprep.mubr.msk.bf16.mxu1 %vm7811_vm1, %v10190_v51 }
 0x814   :  { %v9394_v50 = vsel %vm4294_vm8, %v4110_v47, %v4392_v1 }
 0x815   :  { %v4114_v45 = vpop.f32.mrb[56].mxu1 }
 0x816   :  { %v4115_v13 = vadd.f32 %v9382_v6, %v4114_v45  ;;  %v6665_v33 = vpop.f32.mrb[57].mxu1 }
 0x817   :  { %v4117_v53 = vpop.f32.mrb[58].mxu1 }
 0x818   :  { %v4393_v43 = vmul.f32 0.2, %v4115_v13  ;;  %v4118_v4 = vadd.f32 %v9382_v6, %v4117_v53  ;;  %v6666_v61 = vpop.f32.mrb[59].mxu1  ;;  %vm4295_vm9 = vcmp.gt.f32.partialorder %v4115_v13, 0.0 }
 0x81a   :  { %vm4296_vm10 = vcmp.gt.f32.partialorder %v4118_v4, 0.0  ;;  %v4394_v29 = vmul.f32 0.2, %v4118_v4  ;;  %6780 = vmatmul.mubr.msk.bf16.gmra.mrb[164].mxu1 %vm4607_vm11, %v10308_v19  ;;  %v9406_v26 = vsel %vm4295_vm9, %v4115_v13, %v4393_v43  ;;  %v10309_v43 = vpack.c.bf16 %v9119_v49, %v9117_v15 }
 0x81b   :  { %6783 = vmatprep.mubr.msk.bf16.mxu1 %vm7811_vm1, %v10190_v51 }
 0x81c   :  { %v9408_v47 = vsel %vm4296_vm10, %v4118_v4, %v4394_v29 }
 0x81d   :  { %v4122_v53 = vpop.f32.mrb[60].mxu1 }
 0x81e   :  { %v4123_v45 = vadd.f32 %v9382_v6, %v4122_v53  ;;  %v6669_v33 = vpop.f32.mrb[61].mxu1 }
 0x81f   :  { %v4125_v61 = vpop.f32.mrb[62].mxu1 }
 0x820   :  { %v4395_v17 = vmul.f32 0.2, %v4123_v45  ;;  %v4126_v3 = vadd.f32 %v9382_v6, %v4125_v61  ;;  %v6670_v20 = vpop.f32.mrb[63].mxu1  ;;  %vm4297_vm12 = vcmp.gt.f32.partialorder %v4123_v45, 0.0 }
 0x822   :  { %vm4298_vm13 = vcmp.gt.f32.partialorder %v4126_v3, 0.0  ;;  %v4396_v19 = vmul.f32 0.2, %v4126_v3  ;;  %6784 = vmatmul.mubr.msk.bf16.gmra.mrb[168].mxu1 %vm4607_vm11, %v10309_v43  ;;  %v9420_v13 = vsel %vm4297_vm12, %v4123_v45, %v4395_v17  ;;  %v10310_v17 = vpack.c.bf16 %v9132_v63, %v9130_v9 }
 0x823   :  { %6787 = vmatprep.mubr.msk.bf16.mxu1 %vm7811_vm1, %v10190_v51 }
 0x824   :  { %v9422_v4 = vsel %vm4298_vm13, %v4126_v3, %v4396_v19 }
 0x825   :  { %v4130_v53 = vpop.f32.mrb[64].mxu1 }
 0x826   :  { %v4131_v33 = vadd.f32 %v9382_v6, %v4130_v53  ;;  %v6673_v61 = vpop.f32.mrb[65].mxu1 }
 0x827   :  { %v4133_v20 = vpop.f32.mrb[66].mxu1 }
 0x828   :  { %v4397_v1 = vmul.f32 0.2, %v4131_v33  ;;  %v4134_v15 = vadd.f32 %v9382_v6, %v4133_v20  ;;  %v6674_v49 = vpop.f32.mrb[67].mxu1  ;;  %vm4299_vm14 = vcmp.gt.f32.partialorder %v4131_v33, 0.0 }
 0x82a   :  { %vm4300_vm15 = vcmp.gt.f32.partialorder %v4134_v15, 0.0  ;;  %v4398_v43 = vmul.f32 0.2, %v4134_v15  ;;  %6788 = vmatmul.mubr.msk.bf16.gmra.mrb[172].mxu1 %vm4607_vm11, %v10310_v17  ;;  %v9434_v45 = vsel %vm4299_vm14, %v4131_v33, %v4397_v1  ;;  %v10311_v1 = vpack.c.bf16 %v9145_v14, %v9143_v12 }
 0x82b   :  { %6791 = vmatprep.mubr.msk.bf16.mxu1 %vm7811_vm1, %v10190_v51 }
 0x82c   :  { %v9436_v3 = vsel %vm4300_vm15, %v4134_v15, %v4398_v43 }
 0x82d   :  { %v4138_v53 = vpop.f32.mrb[68].mxu1 }
 0x82e   :  { %v4139_v61 = vadd.f32 %v9382_v6, %v4138_v53  ;;  %v6677_v20 = vpop.f32.mrb[69].mxu1 }
 0x82f   :  { %v4141_v49 = vpop.f32.mrb[70].mxu1 }
 0x830   :  { %v4399_v29 = vmul.f32 0.2, %v4139_v61  ;;  %v4142_v9 = vadd.f32 %v9382_v6, %v4141_v49  ;;  %v6678_v63 = vpop.f32.mrb[71].mxu1  ;;  %vm4301_vm2 = vcmp.gt.f32.partialorder %v4139_v61, 0.0 }
 0x832   :  { %vm4302_vm3 = vcmp.gt.f32.partialorder %v4142_v9, 0.0  ;;  %v4400_v17 = vmul.f32 0.2, %v4142_v9  ;;  %6792 = vmatmul.mubr.msk.bf16.gmra.mrb[176].mxu1 %vm4607_vm11, %v10311_v1  ;;  %v9448_v33 = vsel %vm4301_vm2, %v4139_v61, %v4399_v29  ;;  %v10312_v29 = vpack.c.bf16 %v9158_v39, %v9156_v5 }
 0x833   :  { %6795 = vmatprep.mubr.msk.bf16.mxu1 %vm7811_vm1, %v10190_v51 }
 0x834   :  { %v9450_v15 = vsel %vm4302_vm3, %v4142_v9, %v4400_v17 }
 0x835   :  { %v4146_v53 = vpop.f32.mrb[72].mxu1 }
 0x836   :  { %v4147_v20 = vadd.f32 %v9382_v6, %v4146_v53  ;;  %v6681_v49 = vpop.f32.mrb[73].mxu1 }
 0x837   :  { %v4149_v63 = vpop.f32.mrb[74].mxu1 }
 0x838   :  { %v4401_v19 = vmul.f32 0.2, %v4147_v20  ;;  %v4150_v12 = vadd.f32 %v9382_v6, %v4149_v63  ;;  %v6682_v14 = vpop.f32.mrb[75].mxu1  ;;  %vm4303_vm0 = vcmp.gt.f32.partialorder %v4147_v20, 0.0 }
 0x83a   :  { %vm4304_vm4 = vcmp.gt.f32.partialorder %v4150_v12, 0.0  ;;  %v4402_v1 = vmul.f32 0.2, %v4150_v12  ;;  %6796 = vmatmul.mubr.msk.bf16.gmra.mrb[180].mxu1 %vm4607_vm11, %v10312_v29  ;;  %v9462_v61 = vsel %vm4303_vm0, %v4147_v20, %v4401_v19  ;;  %v10313_v19 = vpack.c.bf16 %v9171_v27, %v9169_v28 }
 0x83b   :  { %6799 = vmatprep.mubr.msk.bf16.mxu1 %vm7811_vm1, %v10190_v51 }
 0x83c   :  { %v9464_v9 = vsel %vm4304_vm4, %v4150_v12, %v4402_v1 }
 0x83d   :  { %v4154_v53 = vpop.f32.mrb[76].mxu1 }
 0x83e   :  { %v4155_v49 = vadd.f32 %v9382_v6, %v4154_v53  ;;  %v6685_v63 = vpop.f32.mrb[77].mxu1 }
 0x83f   :  { %v4157_v14 = vpop.f32.mrb[78].mxu1 }
 0x840   :  { %v4403_v43 = vmul.f32 0.2, %v4155_v49  ;;  %v4158_v5 = vadd.f32 %v9382_v6, %v4157_v14  ;;  %v6686_v39 = vpop.f32.mrb[79].mxu1  ;;  %vm4305_vm5 = vcmp.gt.f32.partialorder %v4155_v49, 0.0 }
 0x842   :  { %vm4306_vm6 = vcmp.gt.f32.partialorder %v4158_v5, 0.0  ;;  %v4404_v29 = vmul.f32 0.2, %v4158_v5  ;;  %6800 = vmatmul.mubr.msk.bf16.gmra.mrb[184].mxu1 %vm4607_vm11, %v10313_v19  ;;  %v9476_v20 = vsel %vm4305_vm5, %v4155_v49, %v4403_v43  ;;  %v10314_v43 = vpack.c.bf16 %v9184_v60, %v9182_v46 }
 0x843   :  { %6803 = vmatprep.mubr.msk.bf16.mxu1 %vm7811_vm1, %v10190_v51 }
 0x844   :  { %v9478_v12 = vsel %vm4306_vm6, %v4158_v5, %v4404_v29 }
 0x845   :  { %v4162_v53 = vpop.f32.mrb[80].mxu1 }
 0x846   :  { %v4163_v63 = vadd.f32 %v9382_v6, %v4162_v53  ;;  %v6689_v14 = vpop.f32.mrb[81].mxu1 }
 0x847   :  { %v4165_v39 = vpop.f32.mrb[82].mxu1 }
 0x848   :  { %v4405_v17 = vmul.f32 0.2, %v4163_v63  ;;  %v4166_v28 = vadd.f32 %v9382_v6, %v4165_v39  ;;  %v6690_v27 = vpop.f32.mrb[83].mxu1  ;;  %vm4307_vm7 = vcmp.gt.f32.partialorder %v4163_v63, 0.0 }
 0x84a   :  { %vm4308_vm8 = vcmp.gt.f32.partialorder %v4166_v28, 0.0  ;;  %v4406_v19 = vmul.f32 0.2, %v4166_v28  ;;  %6804 = vmatmul.mubr.msk.bf16.gmra.mrb[188].mxu1 %vm4607_vm11, %v10314_v43  ;;  %v9490_v49 = vsel %vm4307_vm7, %v4163_v63, %v4405_v17  ;;  %v10315_v17 = vpack.c.bf16 %v9197_v31, %v9195_v32 }
 0x84b   :  { %6807 = vmatprep.mubr.msk.bf16.mxu1 %vm7811_vm1, %v10190_v51 }
 0x84c   :  { %v9492_v5 = vsel %vm4308_vm8, %v4166_v28, %v4406_v19 }
 0x84d   :  { %v4170_v53 = vpop.f32.mrb[84].mxu1 }
 0x84e   :  { %v4171_v14 = vadd.f32 %v9382_v6, %v4170_v53  ;;  %v6693_v39 = vpop.f32.mrb[85].mxu1 }
 0x84f   :  { %v4173_v27 = vpop.f32.mrb[86].mxu1 }
 0x850   :  { %v4407_v1 = vmul.f32 0.2, %v4171_v14  ;;  %v4174_v46 = vadd.f32 %v9382_v6, %v4173_v27  ;;  %v6694_v60 = vpop.f32.mrb[87].mxu1  ;;  %vm4309_vm9 = vcmp.gt.f32.partialorder %v4171_v14, 0.0 }
 0x852   :  { %vm4310_vm10 = vcmp.gt.f32.partialorder %v4174_v46, 0.0  ;;  %v4408_v43 = vmul.f32 0.2, %v4174_v46  ;;  %6808 = vmatmul.mubr.msk.bf16.gmra.mrb[192].mxu1 %vm4607_vm11, %v10315_v17  ;;  %v9504_v63 = vsel %vm4309_vm9, %v4171_v14, %v4407_v1 }
 0x853   :  { %6811 = vmatprep.mubr.msk.bf16.mxu1 %vm7811_vm1, %v10190_v51 }
 0x854   :  { %v9506_v28 = vsel %vm4310_vm10, %v4174_v46, %v4408_v43 }
 0x855   :  { %v4178_v53 = vpop.f32.mrb[88].mxu1 }
 0x856   :  { %v4179_v39 = vadd.f32 %v9382_v6, %v4178_v53  ;;  %v6697_v27 = vpop.f32.mrb[89].mxu1 }
 0x857   :  { %v4181_v60 = vpop.f32.mrb[90].mxu1 }
 0x858   :  { %v4409_v29 = vmul.f32 0.2, %v4179_v39  ;;  %v4182_v32 = vadd.f32 %v9382_v6, %v4181_v60  ;;  %v6698_v31 = vpop.f32.mrb[91].mxu1  ;;  %vm4311_vm12 = vcmp.gt.f32.partialorder %v4179_v39, 0.0 }
 0x85a   :  { %vm4312_vm13 = vcmp.gt.f32.partialorder %v4182_v32, 0.0  ;;  %v4410_v17 = vmul.f32 0.2, %v4182_v32  ;;  %6812 = vmatmul.mubr.msk.bf16.gmra.mrb[196].mxu1 %vm4607_vm11, %v4540_v34  ;;  %v9518_v1 = vsel %vm4311_vm12, %v4179_v39, %v4409_v29 }
 0x85b   :  { %6815 = vmatprep.mubr.msk.bf16.mxu1 %vm7811_vm1, %v10190_v51 }
 0x85c   :  { %v9520_v14 = vsel %vm4312_vm13, %v4182_v32, %v4410_v17 }
 0x85d   :  { %v4186_v43 = vpop.f32.mrb[92].mxu1 }
 0x85e   :  { %v4187_v53 = vadd.f32 %v9382_v6, %v4186_v43  ;;  %v6701_v27 = vpop.f32.mrb[93].mxu1 }
 0x85f   :  { %v4189_v60 = vpop.f32.mrb[94].mxu1 }
 0x860   :  { %v4411_v31 = vmul.f32 0.2, %v4187_v53  ;;  %v4190_v25 = vadd.f32 %v9382_v6, %v4189_v60  ;;  %v6702_v2 = vpop.f32.mrb[95].mxu1  ;;  %vm4313_vm14 = vcmp.gt.f32.partialorder %v4187_v53, 0.0 }
 0x862   :  { %vm4314_vm15 = vcmp.gt.f32.partialorder %v4190_v25, 0.0  ;;  %v4412_v34 = vmul.f32 0.2, %v4190_v25  ;;  %6816 = vmatmul.mubr.msk.bf16.gmra.mrb[200].mxu1 %vm4607_vm11, %v4541_v8  ;;  %v9532_v29 = vsel %vm4313_vm14, %v4187_v53, %v4411_v31 }
 0x863   :  { %6819 = vmatprep.mubr.msk.bf16.mxu1 %vm7811_vm1, %v10190_v51 }
 0x864   :  { %v9534_v39 = vsel %vm4314_vm15, %v4190_v25, %v4412_v34 }
 0x865   :  { %v4194_v17 = vpop.f32.mrb[96].mxu1 }
 0x866   :  { %v4195_v43 = vadd.f32 %v9382_v6, %v4194_v17  ;;  %v6705_v27 = vpop.f32.mrb[97].mxu1 }
 0x867   :  { %v4197_v60 = vpop.f32.mrb[98].mxu1 }
 0x868   :  { %v4413_v2 = vmul.f32 0.2, %v4195_v43  ;;  %v4198_v0 = vadd.f32 %v9382_v6, %v4197_v60  ;;  %v6706_v54 = vpop.f32.mrb[99].mxu1  ;;  %vm4315_vm2 = vcmp.gt.f32.partialorder %v4195_v43, 0.0 }
 0x86a   :  { %vm4316_vm3 = vcmp.gt.f32.partialorder %v4198_v0, 0.0  ;;  %v4414_v8 = vmul.f32 0.2, %v4198_v0  ;;  %6820 = vmatmul.mubr.msk.bf16.gmra.mrb[204].mxu1 %vm4607_vm11, %v4542_v42  ;;  %v9546_v53 = vsel %vm4315_vm2, %v4195_v43, %v4413_v2 }
 0x86b   :  { %6823 = vmatprep.mubr.msk.bf16.mxu1 %vm7811_vm1, %v10190_v51 }
 0x86c   :  { %v9548_v31 = vsel %vm4316_vm3, %v4198_v0, %v4414_v8 }
 0x86d   :  { %v4202_v34 = vpop.f32.mrb[100].mxu1 }
 0x86e   :  { %v4203_v17 = vadd.f32 %v9382_v6, %v4202_v34  ;;  %v6709_v27 = vpop.f32.mrb[101].mxu1 }
 0x86f   :  { %v4205_v60 = vpop.f32.mrb[102].mxu1 }
 0x870   :  { %v4415_v54 = vmul.f32 0.2, %v4203_v17  ;;  %v4206_v16 = vadd.f32 %v9382_v6, %v4205_v60  ;;  %v6710_v7 = vpop.f32.mrb[103].mxu1  ;;  %vm4317_vm0 = vcmp.gt.f32.partialorder %v4203_v17, 0.0 }
 0x872   :  { %vm4318_vm4 = vcmp.gt.f32.partialorder %v4206_v16, 0.0  ;;  %v4416_v42 = vmul.f32 0.2, %v4206_v16  ;;  %6824 = vmatmul.mubr.msk.bf16.gmra.mrb[208].mxu1 %vm4607_vm11, %v4543_v48  ;;  %v9560_v43 = vsel %vm4317_vm0, %v4203_v17, %v4415_v54 }
 0x873   :  { %6827 = vmatprep.mubr.msk.bf16.mxu1 %vm7811_vm1, %v10190_v51 }
 0x874   :  { %v9562_v2 = vsel %vm4318_vm4, %v4206_v16, %v4416_v42 }
 0x875   :  { %v4210_v8 = vpop.f32.mrb[104].mxu1 }
 0x876   :  { %v4211_v34 = vadd.f32 %v9382_v6, %v4210_v8  ;;  %v6713_v27 = vpop.f32.mrb[105].mxu1 }
 0x877   :  { %v4213_v60 = vpop.f32.mrb[106].mxu1 }
 0x878   :  { %v4417_v7 = vmul.f32 0.2, %v4211_v34  ;;  %v4214_v21 = vadd.f32 %v9382_v6, %v4213_v60  ;;  %v6714_v62 = vpop.f32.mrb[107].mxu1  ;;  %vm4319_vm5 = vcmp.gt.f32.partialorder %v4211_v34, 0.0 }
 0x87a   :  { %vm4320_vm6 = vcmp.gt.f32.partialorder %v4214_v21, 0.0  ;;  %v4418_v48 = vmul.f32 0.2, %v4214_v21  ;;  %6828 = vmatmul.mubr.msk.bf16.gmra.mrb[212].mxu1 %vm4607_vm11, %v4544_v37  ;;  %v9574_v17 = vsel %vm4319_vm5, %v4211_v34, %v4417_v7  ;;  %v10316_v34 = vpack.c.bf16 %v9280_v24, %v9278_v55  ;;  %v9586_v7 = vld [vmem:[#allocation11] ss:$0 sm:$0xff] }
 0x87b   :  { %6831 = vmatprep.mubr.msk.bf16.mxu1 %vm7811_vm1, %v10190_v51 }
 0x87c   :  { %v9576_v54 = vsel %vm4320_vm6, %v4214_v21, %v4418_v48 }
 0x87d   :  { %v4218_v42 = vpop.f32.mrb[108].mxu1 }
 0x87e   :  { %v4219_v8 = vadd.f32 %v9382_v6, %v4218_v42  ;;  %v6717_v27 = vpop.f32.mrb[109].mxu1 }
 0x87f   :  { %v4221_v60 = vpop.f32.mrb[110].mxu1 }
 0x880   :  { %v4419_v62 = vmul.f32 0.2, %v4219_v8  ;;  %v4222_v58 = vadd.f32 %v9382_v6, %v4221_v60  ;;  %v6718_v41 = vpop.f32.mrb[111].mxu1  ;;  %vm4321_vm7 = vcmp.gt.f32.partialorder %v4219_v8, 0.0 }
 0x882   :  { %vm4322_vm8 = vcmp.gt.f32.partialorder %v4222_v58, 0.0  ;;  %v4420_v37 = vmul.f32 0.2, %v4222_v58  ;;  %6832 = vmatmul.mubr.msk.bf16.gmra.mrb[216].mxu1 %vm4607_vm11, %v10316_v34  ;;  %v9590_v21 = vsel %vm4321_vm7, %v4219_v8, %v4419_v62  ;;  %v10317_v8 = vpack.c.bf16 %v9294_v11, %v9292_v36 }
 0x883   :  { %6835 = vmatprep.mubr.msk.bf16.mxu1 %vm7811_vm1, %v10190_v51 }
 0x884   :  { %v9592_v48 = vsel %vm4322_vm8, %v4222_v58, %v4420_v37 }
 0x885   :  { %v4789_v42 = vpop.f32.mrb[112].mxu1 }
 0x886   :  { %v4790_v27 = vadd.f32 %v9586_v7, %v4789_v42  ;;  %v6729_v60 = vpop.f32.mrb[113].mxu1 }
 0x887   :  { %v4792_v41 = vpop.f32.mrb[114].mxu1 }
 0x888   :  { %v5278_v55 = vmul.f32 0.2, %v4790_v27  ;;  %v4793_v24 = vadd.f32 %v9586_v7, %v4792_v41  ;;  %v6730_v34 = vpop.f32.mrb[115].mxu1  ;;  %vm5180_vm9 = vcmp.gt.f32.partialorder %v4790_v27, 0.0 }
 0x88a   :  { %vm5181_vm10 = vcmp.gt.f32.partialorder %v4793_v24, 0.0  ;;  %v5279_v16 = vmul.f32 0.2, %v4793_v24  ;;  %6836 = vmatmul.mubr.msk.bf16.gmra.mrb[220].mxu1 %vm4607_vm11, %v10317_v8  ;;  %v9604_v62 = vsel %vm5180_vm9, %v4790_v27, %v5278_v55  ;;  %v10318_v27 = vpack.c.bf16 %v9308_v56, %v9306_v52 }
 0x88b   :  { %6839 = vmatprep.mubr.msk.bf16.mxu1 %vm7811_vm1, %v10190_v51 }
 0x88c   :  { %v9606_v58 = vsel %vm5181_vm10, %v4793_v24, %v5279_v16 }
 0x88d   :  { %v4797_v37 = vpop.f32.mrb[116].mxu1  ;;  %v5475_v42 = vpack.c.bf16 %v9606_v58, %v9604_v62 }
 0x88e   :  { %v4798_v60 = vadd.f32 %v9586_v7, %v4797_v37  ;;  %v6733_v41 = vpop.f32.mrb[117].mxu1 }
 0x88f   :  { %v4800_v34 = vpop.f32.mrb[118].mxu1 }
 0x890   :  { %v5280_v6 = vmul.f32 0.2, %v4798_v60  ;;  %v4801_v36 = vadd.f32 %v9586_v7, %v4800_v34  ;;  %v6734_v11 = vpop.f32.mrb[119].mxu1  ;;  %vm5182_vm12 = vcmp.gt.f32.partialorder %v4798_v60, 0.0 }
 0x892   :  { %vm5183_vm13 = vcmp.gt.f32.partialorder %v4801_v36, 0.0  ;;  %v5281_v8 = vmul.f32 0.2, %v4801_v36  ;;  %6840 = vmatmul.mubr.msk.bf16.gmra.mrb[224].mxu1 %vm4607_vm11, %v10318_v27  ;;  %v9618_v16 = vsel %vm5182_vm12, %v4798_v60, %v5280_v6  ;;  %v10319_v6 = vpack.c.bf16 %v9322_v30, %v9320_v40 }
 0x893   :  { %6843 = vmatprep.mubr.msk.bf16.mxu1 %vm7811_vm1, %v10190_v51 }
 0x894   :  { %v9620_v55 = vsel %vm5183_vm13, %v4801_v36, %v5281_v8 }
 0x895   :  { %v4805_v24 = vpop.f32.mrb[120].mxu1  ;;  %v5476_v37 = vpack.c.bf16 %v9620_v55, %v9618_v16 }
 0x896   :  { %v4806_v41 = vadd.f32 %v9586_v7, %v4805_v24  ;;  %v6737_v34 = vpop.f32.mrb[121].mxu1 }
 0x897   :  { %v4808_v11 = vpop.f32.mrb[122].mxu1 }
 0x898   :  { %v5282_v0 = vmul.f32 0.2, %v4806_v41  ;;  %v4809_v52 = vadd.f32 %v9586_v7, %v4808_v11  ;;  %v6738_v56 = vpop.f32.mrb[123].mxu1  ;;  %vm5184_vm14 = vcmp.gt.f32.partialorder %v4806_v41, 0.0 }
 0x89a   :  { %vm5185_vm15 = vcmp.gt.f32.partialorder %v4809_v52, 0.0  ;;  %v5283_v27 = vmul.f32 0.2, %v4809_v52  ;;  %6844 = vmatmul.mubr.msk.bf16.gmra.mrb[228].mxu1 %vm4607_vm11, %v10319_v6  ;;  %v9632_v60 = vsel %vm5184_vm14, %v4806_v41, %v5282_v0  ;;  %v10320_v0 = vpack.c.bf16 %v9336_v18, %v9334_v10 }
 0x89b   :  { %6847 = vmatprep.mubr.msk.bf16.mxu1 %vm7811_vm1, %v10190_v51  ;;  %vm5534_vm14 = vcmask 261120  }
 0x89c   :  { %v9634_v36 = vsel %vm5185_vm15, %v4809_v52, %v5283_v27 }
 0x89d   :  { %v4813_v8 = vpop.f32.mrb[124].mxu1  ;;  %v5477_v24 = vpack.c.bf16 %v9634_v36, %v9632_v60 }
 0x89e   :  { %v4814_v34 = vadd.f32 %v9586_v7, %v4813_v8  ;;  %v6741_v11 = vpop.f32.mrb[125].mxu1 }
 0x89f   :  { %v4816_v56 = vpop.f32.mrb[126].mxu1 }
 0x8a0   :  { %v5284_v25 = vmul.f32 0.2, %v4814_v34  ;;  %v4817_v40 = vadd.f32 %v9586_v7, %v4816_v56  ;;  %v6742_v30 = vpop.f32.mrb[127].mxu1  ;;  %vm5186_vm2 = vcmp.gt.f32.partialorder %v4814_v34, 0.0 }
 0x8a2   :  { %vm5187_vm3 = vcmp.gt.f32.partialorder %v4817_v40, 0.0  ;;  %v5285_v6 = vmul.f32 0.2, %v4817_v40  ;;  %6848 = vmatmul.mubr.msk.bf16.gmra.mrb[232].mxu1 %vm4607_vm11, %v10320_v0  ;;  %v9646_v41 = vsel %vm5186_vm2, %v4814_v34, %v5284_v25  ;;  %v10321_v25 = vpack.c.bf16 %v9350_v44, %v9348_v23 }
 0x8a3   :  { %6851 = vmatprep.mubr.msk.bf16.mxu1 %vm7811_vm1, %v10190_v51 }
 0x8a4   :  { %v9648_v52 = vsel %vm5187_vm3, %v4817_v40, %v5285_v6 }
 0x8a5   :  { %v4821_v27 = vpop.f32.mrb[128].mxu1  ;;  %v5478_v8 = vpack.c.bf16 %v9648_v52, %v9646_v41 }
 0x8a6   :  { %v4822_v11 = vadd.f32 %v9586_v7, %v4821_v27  ;;  %v6745_v56 = vpop.f32.mrb[129].mxu1 }
 0x8a7   :  { %v4824_v30 = vpop.f32.mrb[130].mxu1 }
 0x8a8   :  { %v5286_v32 = vmul.f32 0.2, %v4822_v11  ;;  %v4825_v10 = vadd.f32 %v9586_v7, %v4824_v30  ;;  %v6746_v18 = vpop.f32.mrb[131].mxu1  ;;  %vm5188_vm0 = vcmp.gt.f32.partialorder %v4822_v11, 0.0 }
 0x8aa   :  { %vm5189_vm4 = vcmp.gt.f32.partialorder %v4825_v10, 0.0  ;;  %v5287_v0 = vmul.f32 0.2, %v4825_v10  ;;  %6852 = vmatmul.mubr.msk.bf16.gmra.mrb[236].mxu1 %vm4607_vm11, %v10321_v25  ;;  %v9660_v34 = vsel %vm5188_vm0, %v4822_v11, %v5286_v32  ;;  %v10322_v32 = vpack.c.bf16 %v9364_v35, %v9362_v38 }
 0x8ab   :  { %6855 = vmatprep.mubr.msk.bf16.mxu1 %vm7811_vm1, %v10190_v51 }
 0x8ac   :  { %v9662_v40 = vsel %vm5189_vm4, %v4825_v10, %v5287_v0 }
 0x8ad   :  { %v4829_v6 = vpop.f32.mrb[132].mxu1  ;;  %v5479_v27 = vpack.c.bf16 %v9662_v40, %v9660_v34 }
 0x8ae   :  { %v4830_v56 = vadd.f32 %v9586_v7, %v4829_v6  ;;  %v6749_v30 = vpop.f32.mrb[133].mxu1 }
 0x8af   :  { %v4832_v18 = vpop.f32.mrb[134].mxu1 }
 0x8b0   :  { %v5288_v46 = vmul.f32 0.2, %v4830_v56  ;;  %v4833_v23 = vadd.f32 %v9586_v7, %v4832_v18  ;;  %v6750_v44 = vpop.f32.mrb[135].mxu1  ;;  %vm5190_vm5 = vcmp.gt.f32.partialorder %v4830_v56, 0.0 }
 0x8b2   :  { %vm5191_vm6 = vcmp.gt.f32.partialorder %v4833_v23, 0.0  ;;  %v5289_v25 = vmul.f32 0.2, %v4833_v23  ;;  %6856 = vmatmul.mubr.msk.bf16.gmra.mrb[240].mxu1 %vm4607_vm11, %v10322_v32  ;;  %v9674_v11 = vsel %vm5190_vm5, %v4830_v56, %v5288_v46  ;;  %v10323_v46 = vpack.c.bf16 %v9378_v22, %v9376_v59 }
 0x8b3   :  { %6859 = vmatprep.mubr.msk.bf16.mxu1 %vm7811_vm1, %v10190_v51 }
 0x8b4   :  { %v9676_v10 = vsel %vm5191_vm6, %v4833_v23, %v5289_v25 }
 0x8b5   :  { %v4837_v0 = vpop.f32.mrb[136].mxu1 }
 0x8b6   :  { %v4838_v30 = vadd.f32 %v9586_v7, %v4837_v0  ;;  %v6753_v18 = vpop.f32.mrb[137].mxu1 }
 0x8b7   :  { %v4840_v44 = vpop.f32.mrb[138].mxu1 }
 0x8b8   :  { %v5290_v19 = vmul.f32 0.2, %v4838_v30  ;;  %v4841_v38 = vadd.f32 %v9586_v7, %v4840_v44  ;;  %v6754_v35 = vpop.f32.mrb[139].mxu1  ;;  %vm5192_vm7 = vcmp.gt.f32.partialorder %v4838_v30, 0.0 }
 0x8ba   :  { %vm5193_vm8 = vcmp.gt.f32.partialorder %v4841_v38, 0.0  ;;  %v5291_v32 = vmul.f32 0.2, %v4841_v38  ;;  %6860 = vmatmul.mubr.msk.bf16.gmra.mrb[244].mxu1 %vm4607_vm11, %v10323_v46  ;;  %v9688_v56 = vsel %vm5192_vm7, %v4838_v30, %v5290_v19  ;;  %v10324_v19 = vpack.c.bf16 %v9394_v50, %v9392_v57 }
 0x8bb   :  { %6863 = vmatprep.mubr.msk.bf16.mxu1 %vm7811_vm1, %v10190_v51 }
 0x8bc   :  { %v9690_v23 = vsel %vm5193_vm8, %v4841_v38, %v5291_v32 }
 0x8bd   :  { %v4845_v25 = vpop.f32.mrb[140].mxu1 }
 0x8be   :  { %v4846_v18 = vadd.f32 %v9586_v7, %v4845_v25  ;;  %v6757_v44 = vpop.f32.mrb[141].mxu1 }
 0x8bf   :  { %v4848_v35 = vpop.f32.mrb[142].mxu1 }
 0x8c0   :  { %v5292_v6 = vmul.f32 0.2, %v4846_v18  ;;  %v4849_v59 = vadd.f32 %v9586_v7, %v4848_v35  ;;  %v6758_v22 = vpop.f32.mrb[143].mxu1  ;;  %vm5194_vm9 = vcmp.gt.f32.partialorder %v4846_v18, 0.0 }
 0x8c2   :  { %vm5195_vm10 = vcmp.gt.f32.partialorder %v4849_v59, 0.0  ;;  %v5293_v46 = vmul.f32 0.2, %v4849_v59  ;;  %6864 = vmatmul.mubr.msk.bf16.gmra.mrb[248].mxu1 %vm4607_vm11, %v10324_v19  ;;  %v9702_v30 = vsel %vm5194_vm9, %v4846_v18, %v5292_v6  ;;  %v10325_v6 = vpack.c.bf16 %v9408_v47, %v9406_v26 }
 0x8c3   :  { %6867 = vmatprep.mubr.msk.bf16.mxu1 %vm7811_vm1, %v10190_v51  ;;  %v5539_v26 = vsel %vm5534_vm14, %v5475_v42, 0 }
 0x8c4   :  { %v9704_v38 = vsel %vm5195_vm10, %v4849_v59, %v5293_v46 }
 0x8c5   :  { %v4853_v32 = vpop.f32.mrb[144].mxu1 }
 0x8c6   :  { %v4854_v44 = vadd.f32 %v9586_v7, %v4853_v32  ;;  %v6761_v35 = vpop.f32.mrb[145].mxu1 }
 0x8c7   :  { %v4856_v22 = vpop.f32.mrb[146].mxu1 }
 0x8c8   :  { %v5294_v0 = vmul.f32 0.2, %v4854_v44  ;;  %v4857_v57 = vadd.f32 %v9586_v7, %v4856_v22  ;;  %v6762_v50 = vpop.f32.mrb[147].mxu1  ;;  %vm5196_vm12 = vcmp.gt.f32.partialorder %v4854_v44, 0.0 }
 0x8ca   :  { %vm5197_vm13 = vcmp.gt.f32.partialorder %v4857_v57, 0.0  ;;  %v5295_v19 = vmul.f32 0.2, %v4857_v57  ;;  %6868 = vmatmul.mubr.msk.bf16.gmra.mrb[252].mxu1 %vm4607_vm11, %v10325_v6  ;;  %v5392_v18 = vsel %vm5196_vm12, %v4854_v44, %v5294_v0  ;;  %v10326_v44 = vpack.c.bf16 %v9422_v4, %v9420_v13 }
 0x8cb   :  { %6871 = vmatprep.mubr.msk.bf16.mxu1 %vm7811_vm1, %v10190_v51  ;;  %v5542_v13 = vsel %vm5534_vm14, %v5476_v37, 0 }
 0x8cc   :  { %v5393_v59 = vsel %vm5197_vm13, %v4857_v57, %v5295_v19 }
 0x8cd   :  { %v5483_v46 = vpack.c.bf16 %v5393_v59, %v5392_v18  ;;  %v4861_v32 = vpop.f32.mrb[148].mxu1 }
 0x8ce   :  { %v4862_v35 = vadd.f32 %v9586_v7, %v4861_v32  ;;  %v6765_v22 = vpop.f32.mrb[149].mxu1 }
 0x8cf   :  { %v4864_v50 = vpop.f32.mrb[150].mxu1  ;;  %7531 = vmatprep.subr.msk.bf16.mxu1 %vm5534_vm14, %v5483_v46 }
 0x8d0   :  { %v5296_v47 = vmul.f32 0.2, %v4862_v35  ;;  %v4865_v6 = vadd.f32 %v9586_v7, %v4864_v50  ;;  %v6766_v25 = vpop.f32.mrb[151].mxu1  ;;  %6254 = vmatpush3.bf16.xpose.msra.mxu1 %v5539_v26  ;;  %vm5198_vm15 = vcmp.gt.f32.partialorder %v4862_v35, 0.0 }
 0x8d2   :  { %vm5199_vm2 = vcmp.gt.f32.partialorder %v4865_v6, 0.0  ;;  %v5297_v0 = vmul.f32 0.2, %v4865_v6  ;;  %6872 = vmatmul.mubr.msk.bf16.gmra.mrb[0].mxu1 %vm4607_vm11, %v10326_v44  ;;  %v5394_v57 = vsel %vm5198_vm15, %v4862_v35, %v5296_v47  ;;  %v10327_v35 = vpack.c.bf16 %v9436_v3, %v9434_v45 }
 0x8d3   :  { %6875 = vmatprep.mubr.msk.bf16.mxu1 %vm7811_vm1, %v10190_v51  ;;  %v5545_v45 = vsel %vm5534_vm14, %v5477_v24, 0 }
 0x8d4   :  { %v5395_v62 = vsel %vm5199_vm2, %v4865_v6, %v5297_v0 }
 0x8d5   :  { %v5484_v58 = vpack.c.bf16 %v5395_v62, %v5394_v57  ;;  %v4869_v42 = vpop.f32.mrb[152].mxu1  ;;  %v10328_v57 = vpack.c.bf16 %v9450_v15, %v9448_v33  ;;  %v5548_v33 = vsel %vm5534_vm14, %v5478_v8, 0 }
 0x8d6   :  { %v4870_v19 = vadd.f32 %v9586_v7, %v4869_v42  ;;  %v6769_v18 = vpop.f32.mrb[153].mxu1 }
 0x8d7   :  { %v4872_v25 = vpop.f32.mrb[154].mxu1  ;;  %7532 = vmatprep.subr.msk.bf16.mxu1 %vm5534_vm14, %v5484_v58 }
 0x8d8   :  { %v5298_v4 = vmul.f32 0.2, %v4870_v19  ;;  %v4873_v59 = vadd.f32 %v9586_v7, %v4872_v25  ;;  %v6770_v46 = vpop.f32.mrb[155].mxu1  ;;  %6256 = vmatpush3.bf16.xpose.msra.mxu1 %v5542_v13  ;;  %vm5200_vm3 = vcmp.gt.f32.partialorder %v4870_v19, 0.0 }
 0x8da   :  { %vm5201_vm0 = vcmp.gt.f32.partialorder %v4873_v59, 0.0  ;;  %v5299_v32 = vmul.f32 0.2, %v4873_v59  ;;  %6876 = vmatmul.mubr.msk.bf16.gmra.mrb[4].mxu1 %vm4607_vm11, %v10327_v35  ;;  %v5396_v22 = vsel %vm5200_vm3, %v4870_v19, %v5298_v4  ;;  %v10329_v4 = vpack.c.bf16 %v9464_v9, %v9462_v61 }
 0x8db   :  { %6879 = vmatprep.mubr.msk.bf16.mxu1 %vm7811_vm1, %v10190_v51  ;;  %v5551_v61 = vsel %vm5534_vm14, %v5479_v27, 0 }
 0x8dc   :  { %v5397_v16 = vsel %vm5201_vm0, %v4873_v59, %v5299_v32 }
 0x8dd   :  { %v5485_v55 = vpack.c.bf16 %v5397_v16, %v5396_v22  ;;  %v4877_v37 = vpop.f32.mrb[156].mxu1 }
 0x8de   :  { %v4878_v50 = vadd.f32 %v9586_v7, %v4877_v37  ;;  %v6773_v26 = vpop.f32.mrb[157].mxu1  ;;  %v10330_v37 = vpack.c.bf16 %v9478_v12, %v9476_v20 }
 0x8df   :  { %v4880_v47 = vpop.f32.mrb[158].mxu1  ;;  %7533 = vmatprep.subr.msk.bf16.mxu1 %vm5534_vm14, %v5485_v55 }
 0x8e0   :  { %v5300_v3 = vmul.f32 0.2, %v4878_v50  ;;  %v4881_v6 = vadd.f32 %v9586_v7, %v4880_v47  ;;  %v6774_v0 = vpop.f32.mrb[159].mxu1  ;;  %6258 = vmatpush3.bf16.xpose.msra.mxu1 %v5545_v45  ;;  %vm5202_vm4 = vcmp.gt.f32.partialorder %v4878_v50, 0.0 }
 0x8e2   :  { %vm5203_vm5 = vcmp.gt.f32.partialorder %v4881_v6, 0.0  ;;  %v5301_v44 = vmul.f32 0.2, %v4881_v6  ;;  %6880 = vmatmul.mubr.msk.bf16.gmra.mrb[8].mxu1 %vm4607_vm11, %v10328_v57  ;;  %v5398_v62 = vsel %vm5202_vm4, %v4878_v50, %v5300_v3  ;;  %v10331_v3 = vpack.c.bf16 %v9676_v10, %v9674_v11 }
 0x8e3   :  { %6883 = vmatprep.mubr.msk.bf16.mxu1 %vm7811_vm1, %v10190_v51  ;;  %v10332_v57 = vpack.c.bf16 %v9492_v5, %v9490_v49 }
 0x8e4   :  { %v5399_v60 = vsel %vm5203_vm5, %v4881_v6, %v5301_v44  ;;  %v5554_v20 = vsel %vm5534_vm14, %v10331_v3, 0 }
 0x8e5   :  { %v5486_v36 = vpack.c.bf16 %v5399_v60, %v5398_v62  ;;  %v4885_v24 = vpop.f32.mrb[160].mxu1 }
 0x8e6   :  { %v4886_v58 = vadd.f32 %v9586_v7, %v4885_v24  ;;  %v6777_v42 = vpop.f32.mrb[161].mxu1 }
 0x8e7   :  { %v4888_v19 = vpop.f32.mrb[162].mxu1  ;;  %7534 = vmatprep.subr.msk.bf16.mxu1 %vm5534_vm14, %v5486_v36  ;;  %v10333_v42 = vpack.c.bf16 %v9690_v23, %v9688_v56 }
 0x8e8   :  { %v5302_v15 = vmul.f32 0.2, %v4886_v58  ;;  %v4889_v18 = vadd.f32 %v9586_v7, %v4888_v19  ;;  %v6778_v25 = vpop.f32.mrb[163].mxu1  ;;  %6260 = vmatpush3.bf16.xpose.msra.mxu1 %v5548_v33  ;;  %vm5204_vm6 = vcmp.gt.f32.partialorder %v4886_v58, 0.0 }
 0x8e9   :  { %v5557_v49 = vsel %vm5534_vm14, %v10333_v42, 0  ;;  %v10339_v42 = vpack.c.bf16 %v9562_v2, %v9560_v43 }
 0x8ea   :  { %vm5205_vm7 = vcmp.gt.f32.partialorder %v4889_v18, 0.0  ;;  %v5303_v13 = vmul.f32 0.2, %v4889_v18  ;;  %6884 = vmatmul.mubr.msk.bf16.gmra.mrb[12].mxu1 %vm4607_vm11, %v10329_v4  ;;  %v5400_v59 = vsel %vm5204_vm6, %v4886_v58, %v5302_v15 }
 0x8eb   :  { %6887 = vmatprep.mubr.msk.bf16.mxu1 %vm7811_vm1, %v10190_v51 }
 0x8ec   :  { %v5401_v41 = vsel %vm5205_vm7, %v4889_v18, %v5303_v13  ;;  %v10334_v18 = vpack.c.bf16 %v9506_v28, %v9504_v63 }
 0x8ed   :  { %v5487_v52 = vpack.c.bf16 %v5401_v41, %v5400_v59  ;;  %v4893_v8 = vpop.f32.mrb[164].mxu1 }
 0x8ee   :  { %v4894_v46 = vadd.f32 %v9586_v7, %v4893_v8  ;;  %v6781_v32 = vpop.f32.mrb[165].mxu1 }
 0x8ef   :  { %v4896_v35 = vpop.f32.mrb[166].mxu1  ;;  %7535 = vmatprep.subr.msk.bf16.mxu1 %vm5534_vm14, %v5487_v52  ;;  %v10335_v52 = vpack.c.bf16 %v9704_v38, %v9702_v30 }
 0x8f0   :  { %v5304_v9 = vmul.f32 0.2, %v4894_v46  ;;  %v4897_v22 = vadd.f32 %v9586_v7, %v4896_v35  ;;  %v6782_v16 = vpop.f32.mrb[167].mxu1  ;;  %6262 = vmatpush3.bf16.xpose.msra.mxu1 %v5551_v61  ;;  %vm5206_vm8 = vcmp.gt.f32.partialorder %v4894_v46, 0.0  ;;  %v10336_v35 = vpack.c.bf16 %v9520_v14, %v9518_v1 }
 0x8f1   :  { %v5560_v63 = vsel %vm5534_vm14, %v10335_v52, 0 }
 0x8f2   :  { %vm5207_vm9 = vcmp.gt.f32.partialorder %v4897_v22, 0.0  ;;  %v5305_v55 = vmul.f32 0.2, %v4897_v22  ;;  %6888 = vmatmul.mubr.msk.bf16.gmra.mrb[16].mxu1 %vm4607_vm11, %v10330_v37  ;;  %v5402_v50 = vsel %vm5206_vm8, %v4894_v46, %v5304_v9 }
 0x8f3   :  { %6891 = vmatprep.mubr.msk.bf16.mxu1 %vm7811_vm1, %v10190_v51 }
 0x8f4   :  { %v5403_v34 = vsel %vm5207_vm9, %v4897_v22, %v5305_v55 }
 0x8f5   :  { %v5488_v40 = vpack.c.bf16 %v5403_v34, %v5402_v50  ;;  %v4901_v27 = vpop.f32.mrb[168].mxu1  ;;  %v10337_v34 = vpack.c.bf16 %v9534_v39, %v9532_v29 }
 0x8f6   :  { %v4902_v26 = vadd.f32 %v9586_v7, %v4901_v27  ;;  %v6785_v47 = vpop.f32.mrb[169].mxu1 }
 0x8f7   :  { %v4904_v45 = vpop.f32.mrb[170].mxu1  ;;  %7536 = vmatprep.subr.msk.bf16.mxu1 %vm5534_vm14, %v5488_v40 }
 0x8f8   :  { %v5306_v12 = vmul.f32 0.2, %v4902_v26  ;;  %v4905_v6 = vadd.f32 %v9586_v7, %v4904_v45  ;;  %v6786_v0 = vpop.f32.mrb[171].mxu1  ;;  %6264 = vmatpush3.bf16.xpose.msra.mxu1 %v5554_v20  ;;  %vm5208_vm10 = vcmp.gt.f32.partialorder %v4902_v26, 0.0 }
 0x8f9   :  { %v10338_v0 = vpack.c.bf16 %v9548_v31, %v9546_v53 }
 0x8fa   :  { %vm5209_vm12 = vcmp.gt.f32.partialorder %v4905_v6, 0.0  ;;  %v5307_v44 = vmul.f32 0.2, %v4905_v6  ;;  %6892 = vmatmul.mubr.msk.bf16.gmra.mrb[20].mxu1 %vm4607_vm11, %v10332_v57  ;;  %v5404_v62 = vsel %vm5208_vm10, %v4902_v26, %v5306_v12 }
 0x8fb   :  { %6895 = vmatprep.mubr.msk.bf16.mxu1 %vm7811_vm1, %v10190_v51 }
 0x8fc   :  { %v5405_v11 = vsel %vm5209_vm12, %v4905_v6, %v5307_v44 }
 0x8fd   :  { %v5489_v10 = vpack.c.bf16 %v5405_v11, %v5404_v62  ;;  %v4909_v60 = vpop.f32.mrb[172].mxu1 }
 0x8fe   :  { %v4910_v36 = vadd.f32 %v9586_v7, %v4909_v60  ;;  %v6789_v24 = vpop.f32.mrb[173].mxu1 }
 0x8ff   :  { %v4912_v58 = vpop.f32.mrb[174].mxu1  ;;  %7537 = vmatprep.subr.msk.bf16.mxu1 %vm5534_vm14, %v5489_v10 }
 0x900   :  { %v5308_v5 = vmul.f32 0.2, %v4910_v36  ;;  %v4913_v19 = vadd.f32 %v9586_v7, %v4912_v58  ;;  %v6790_v33 = vpop.f32.mrb[175].mxu1  ;;  %6266 = vmatpush3.bf16.xpose.msra.mxu1 %v5557_v49  ;;  %vm5210_vm13 = vcmp.gt.f32.partialorder %v4910_v36, 0.0 }
 0x902   :  { %vm5211_vm15 = vcmp.gt.f32.partialorder %v4913_v19, 0.0  ;;  %v5309_v15 = vmul.f32 0.2, %v4913_v19  ;;  %6896 = vmatmul.mubr.msk.bf16.gmra.mrb[24].mxu1 %vm4607_vm11, %v10334_v18  ;;  %v5406_v25 = vsel %vm5210_vm13, %v4910_v36, %v5308_v5 }
 0x903   :  { %6899 = vmatprep.mubr.msk.bf16.mxu1 %vm7811_vm1, %v10190_v51 }
 0x904   :  { %v5407_v56 = vsel %vm5211_vm15, %v4913_v19, %v5309_v15 }
 0x905   :  { %v5490_v23 = vpack.c.bf16 %v5407_v56, %v5406_v25  ;;  %v4917_v13 = vpop.f32.mrb[176].mxu1 }
 0x906   :  { %v4918_v4 = vadd.f32 %v9586_v7, %v4917_v13  ;;  %v6793_v59 = vpop.f32.mrb[177].mxu1  ;;  %v10340_v13 = vpack.c.bf16 %v9576_v54, %v9574_v17 }
 0x907   :  { %v4920_v41 = vpop.f32.mrb[178].mxu1  ;;  %7538 = vmatprep.subr.msk.bf16.mxu1 %vm5534_vm14, %v5490_v23 }
 0x908   :  { %v5310_v28 = vmul.f32 0.2, %v4918_v4  ;;  %v4921_v8 = vadd.f32 %v9586_v7, %v4920_v41  ;;  %v6794_v46 = vpop.f32.mrb[179].mxu1  ;;  %6268 = vmatpush3.bf16.xpose.msra.mxu1 %v5560_v63  ;;  %vm5212_vm2 = vcmp.gt.f32.partialorder %v4918_v4, 0.0 }
 0x90a   :  { %vm5213_vm3 = vcmp.gt.f32.partialorder %v4921_v8, 0.0  ;;  %v5311_v32 = vmul.f32 0.2, %v4921_v8  ;;  %6900 = vmatmul.mubr.msk.bf16.gmra.mrb[28].mxu1 %vm4607_vm11, %v10336_v35  ;;  %v9820_v61 = vsel %vm5212_vm2, %v4918_v4, %v5310_v28 }
 0x90b   :  { %6903 = vmatprep.mubr.msk.bf16.mxu1 %vm7811_vm1, %v10190_v51 }
 0x90c   :  { %v9822_v30 = vsel %vm5213_vm3, %v4921_v8, %v5311_v32  ;;  %v9884_v32 = vld [vmem:[#allocation12] sm:$0x1] }
 0x90d   :  { %v4925_v38 = vpop.f32.mrb[180].mxu1  ;;  %v5491_v9 = vpack.c.bf16 %v9822_v30, %v9820_v61 }
 0x90e   :  { %v4926_v22 = vadd.f32 %v9586_v7, %v4925_v38  ;;  %v6797_v16 = vpop.f32.mrb[181].mxu1  ;;  %v10341_v38 = vpack.c.bf16 %v9592_v48, %v9590_v21 }
 0x90f   :  { %v4928_v55 = vpop.f32.mrb[182].mxu1 }
 0x910   :  { %v5312_v37 = vmul.f32 0.2, %v4926_v22  ;;  %v4929_v1 = vadd.f32 %v9586_v7, %v4928_v55  ;;  %v6798_v14 = vpop.f32.mrb[183].mxu1  ;;  %vm5214_vm0 = vcmp.gt.f32.partialorder %v4926_v22, 0.0 }
 0x912   :  { %vm5215_vm4 = vcmp.gt.f32.partialorder %v4929_v1, 0.0  ;;  %v5313_v50 = vmul.f32 0.2, %v4929_v1  ;;  %6904 = vmatmul.mubr.msk.bf16.gmra.mrb[32].mxu1 %vm4607_vm11, %v10337_v34  ;;  %v9834_v40 = vsel %vm5214_vm0, %v4926_v22, %v5312_v37 }
 0x913   :  { %6907 = vmatprep.mubr.msk.bf16.mxu1 %vm7811_vm1, %v10190_v51 }
 0x914   :  { %v9836_v27 = vsel %vm5215_vm4, %v4929_v1, %v5313_v50 }
 0x915   :  { %v4933_v26 = vpop.f32.mrb[184].mxu1  ;;  %v5492_v47 = vpack.c.bf16 %v9836_v27, %v9834_v40 }
 0x916   :  { %v4934_v45 = vadd.f32 %v9586_v7, %v4933_v26  ;;  %v6801_v3 = vpop.f32.mrb[185].mxu1 }
 0x917   :  { %v4936_v20 = vpop.f32.mrb[186].mxu1  ;;  %v5590_v61 = vsel %vm5534_vm14, %v5492_v47, 0 }
 0x918   :  { %v5314_v12 = vmul.f32 0.2, %v4934_v45  ;;  %v4937_v29 = vadd.f32 %v9586_v7, %v4936_v20  ;;  %v6802_v39 = vpop.f32.mrb[187].mxu1  ;;  %vm5216_vm5 = vcmp.gt.f32.partialorder %v4934_v45, 0.0 }
 0x91a   :  { %vm5217_vm6 = vcmp.gt.f32.partialorder %v4937_v29, 0.0  ;;  %v5315_v6 = vmul.f32 0.2, %v4937_v29  ;;  %6908 = vmatmul.mubr.msk.bf16.gmra.mrb[36].mxu1 %vm4607_vm11, %v10338_v0  ;;  %v9848_v44 = vsel %vm5216_vm5, %v4934_v45, %v5314_v12 }
 0x91b   :  { %6911 = vmatprep.mubr.msk.bf16.mxu1 %vm7811_vm1, %v10190_v51 }
 0x91c   :  { %v9850_v57 = vsel %vm5217_vm6, %v4937_v29, %v5315_v6 }
 0x91d   :  { %v4941_v62 = vpop.f32.mrb[188].mxu1  ;;  %v5493_v11 = vpack.c.bf16 %v9850_v57, %v9848_v44 }
 0x91e   :  { %v4942_v10 = vadd.f32 %v9586_v7, %v4941_v62  ;;  %v6805_v60 = vpop.f32.mrb[189].mxu1 }
 0x91f   :  { %v4944_v36 = vpop.f32.mrb[190].mxu1  ;;  %v5593_v40 = vsel %vm5534_vm14, %v5493_v11, 0 }
 0x920   :  { %v5316_v24 = vmul.f32 0.2, %v4942_v10  ;;  %v4945_v53 = vadd.f32 %v9586_v7, %v4944_v36  ;;  %v6806_v31 = vpop.f32.mrb[191].mxu1  ;;  %vm5218_vm7 = vcmp.gt.f32.partialorder %v4942_v10, 0.0 }
 0x922   :  { %vm5219_vm8 = vcmp.gt.f32.partialorder %v4945_v53, 0.0  ;;  %v5317_v58 = vmul.f32 0.2, %v4945_v53  ;;  %6912 = vmatmul.mubr.msk.bf16.gmra.mrb[40].mxu1 %vm4607_vm11, %v10339_v42  ;;  %v9862_v49 = vsel %vm5218_vm7, %v4942_v10, %v5316_v24 }
 0x923   :  { %6915 = vmatprep.mubr.msk.bf16.mxu1 %vm7811_vm1, %v10190_v51 }
 0x924   :  { %v9864_v5 = vsel %vm5219_vm8, %v4945_v53, %v5317_v58 }
 0x925   :  { %v4949_v19 = vpop.f32.mrb[192].mxu1  ;;  %v5494_v33 = vpack.c.bf16 %v9864_v5, %v9862_v49 }
 0x926   :  { %v4950_v15 = vadd.f32 %v9586_v7, %v4949_v19  ;;  %v6809_v18 = vpop.f32.mrb[193].mxu1 }
 0x927   :  { %v4952_v25 = vpop.f32.mrb[194].mxu1  ;;  %v5596_v57 = vsel %vm5534_vm14, %v5494_v33, 0 }
 0x928   :  { %v5318_v56 = vmul.f32 0.2, %v4950_v15  ;;  %v4953_v43 = vadd.f32 %v9586_v7, %v4952_v25  ;;  %v6810_v2 = vpop.f32.mrb[195].mxu1  ;;  %vm5220_vm9 = vcmp.gt.f32.partialorder %v4950_v15, 0.0 }
 0x92a   :  { %vm5221_vm10 = vcmp.gt.f32.partialorder %v4953_v43, 0.0  ;;  %v5319_v23 = vmul.f32 0.2, %v4953_v43  ;;  %6916 = vmatmul.mubr.msk.bf16.gmra.mrb[44].mxu1 %vm4607_vm11, %v10340_v13  ;;  %v9876_v4 = vsel %vm5220_vm9, %v4950_v15, %v5318_v56 }
 0x92b   :  { %6919 = vmatprep.mubr.msk.bf16.mxu1 %vm7811_vm1, %v10190_v51 }
 0x92c   :  { %v9878_v59 = vsel %vm5221_vm10, %v4953_v43, %v5319_v23 }
 0x92d   :  { %v4957_v41 = vpop.f32.mrb[196].mxu1  ;;  %v5495_v52 = vpack.c.bf16 %v9878_v59, %v9876_v4 }
 0x92e   :  { %v4958_v63 = vadd.f32 %v9586_v7, %v4957_v41  ;;  %v6813_v28 = vpop.f32.mrb[197].mxu1 }
 0x92f   :  { %v4960_v8 = vpop.f32.mrb[198].mxu1  ;;  %v5599_v49 = vsel %vm5534_vm14, %v5495_v52, 0 }
 0x930   :  { %v5320_v46 = vmul.f32 0.2, %v4958_v63  ;;  %v4961_v17 = vadd.f32 %v9586_v7, %v4960_v8  ;;  %v6814_v54 = vpop.f32.mrb[199].mxu1  ;;  %vm5222_vm12 = vcmp.gt.f32.partialorder %v4958_v63, 0.0  ;;  %v5587_v8 = vsel %vm5534_vm14, %v5491_v9, 0 }
 0x932   :  { %vm5223_vm13 = vcmp.gt.f32.partialorder %v4961_v17, 0.0  ;;  %v5321_v35 = vmul.f32 0.2, %v4961_v17  ;;  %6920 = vmatmul.mubr.msk.bf16.gmra.mrb[48].mxu1 %vm4607_vm11, %v10341_v38  ;;  %v9892_v22 = vsel %vm5222_vm12, %v4958_v63, %v5320_v46 }
 0x933   :  { %6269 = vmatprep.mubr.msk.bf16.mxu1 %vm5534_vm14, %v9884_v32 }
 0x934   :  { %v9894_v16 = vsel %vm5223_vm13, %v4961_v17, %v5321_v35 }
 0x935   :  { %v4965_v55 = vpop.f32.mrb[200].mxu1  ;;  %v5496_v37 = vpack.c.bf16 %v9894_v16, %v9892_v22 }
 0x936   :  { %v4966_v1 = vadd.f32 %v9586_v7, %v4965_v55  ;;  %v6817_v14 = vpop.f32.mrb[201].mxu1 }
 0x937   :  { %v4968_v50 = vpop.f32.mrb[202].mxu1  ;;  %v5602_v4 = vsel %vm5534_vm14, %v5496_v37, 0 }
 0x938   :  { %v5322_v34 = vmul.f32 0.2, %v4966_v1  ;;  %v4969_v21 = vadd.f32 %v9586_v7, %v4968_v50  ;;  %v6818_v48 = vpop.f32.mrb[203].mxu1  ;;  %vm5224_vm11 = vcmp.gt.f32.partialorder %v4966_v1, 0.0 }
 0x93a   :  { %vm5225_vm15 = vcmp.gt.f32.partialorder %v4969_v21, 0.0  ;;  %v5323_v26 = vmul.f32 0.2, %v4969_v21  ;;  %6270 = vmatmul.mubr.msk.bf16.vlgmr.msra.gmra.mrb[52].mxu1 %vm5534_vm14, %v9884_v32  ;;  %v9904_v45 = vsel %vm5224_vm11, %v4966_v1, %v5322_v34 }
 0x93b   :  { %6287 = vmatprep.mubr.msk.bf16.mxu1 %vm5534_vm14, %v9884_v32 }
 0x93c   :  { %v9906_v3 = vsel %vm5225_vm15, %v4969_v21, %v5323_v26 }
 0x93d   :  { %v4973_v20 = vpop.f32.mrb[204].mxu1  ;;  %v5497_v12 = vpack.c.bf16 %v9906_v3, %v9904_v45 }
 0x93e   :  { %v4974_v29 = vadd.f32 %v9586_v7, %v4973_v20  ;;  %v6821_v39 = vpop.f32.mrb[205].mxu1 }
 0x93f   :  { %v4976_v6 = vpop.f32.mrb[206].mxu1  ;;  %v5605_v22 = vsel %vm5534_vm14, %v5497_v12, 0 }
 0x940   :  { %v5324_v0 = vmul.f32 0.2, %v4974_v29  ;;  %v4977_v62 = vadd.f32 %v9586_v7, %v4976_v6  ;;  %v6822_v10 = vpop.f32.mrb[207].mxu1  ;;  %vm5226_vm2 = vcmp.gt.f32.partialorder %v4974_v29, 0.0 }
 0x942   :  { %vm5227_vm3 = vcmp.gt.f32.partialorder %v4977_v62, 0.0  ;;  %v5325_v60 = vmul.f32 0.2, %v4977_v62  ;;  %v9912_v36 = vsel %vm5226_vm2, %v4974_v29, %v5324_v0 }
 0x944   :  { %v9914_v24 = vsel %vm5227_vm3, %v4977_v62, %v5325_v60 }
 0x945   :  { %v4981_v53 = vpop.f32.mrb[208].mxu1  ;;  %v5498_v31 = vpack.c.bf16 %v9914_v24, %v9912_v36 }
 0x946   :  { %v4982_v58 = vadd.f32 %v9586_v7, %v4981_v53  ;;  %v6825_v42 = vpop.f32.mrb[209].mxu1  ;;  %v5524_v53 = vld [vmem:[#allocation2] sm:$0x1] }
 0x947   :  { %v4984_v19 = vpop.f32.mrb[210].mxu1  ;;  %5527 = vperm.xlu0 %7570, %v5524_v53  }
 0x948   :  { %v5326_v15 = vmul.f32 0.2, %v4982_v58  ;;  %v4985_v18 = vadd.f32 %v9586_v7, %v4984_v19  ;;  %v6826_v25 = vpop.f32.mrb[211].mxu1  ;;  %vm5228_vm0 = vcmp.gt.f32.partialorder %v4982_v58, 0.0 }
 0x94a   :  { %vm5229_vm4 = vcmp.gt.f32.partialorder %v4985_v18, 0.0  ;;  %v5327_v56 = vmul.f32 0.2, %v4985_v18  ;;  %v5424_v43 = vsel %vm5228_vm0, %v4982_v58, %v5326_v15 }
 0x94c   :  { %v5425_v2 = vsel %vm5229_vm4, %v4985_v18, %v5327_v56 }
 0x94d   :  { %v5499_v23 = vpack.c.bf16 %v5425_v2, %v5424_v43  ;;  %v4989_v13 = vpop.f32.mrb[212].mxu1 }
 0x94e   :  { %v4990_v41 = vadd.f32 %v9586_v7, %v4989_v13  ;;  %v6829_v63 = vpop.f32.mrb[213].mxu1 }
 0x94f   :  { %v4992_v28 = vpop.f32.mrb[214].mxu1  ;;  %7539 = vmatprep.subr.msk.bf16.mxu1 %vm5534_vm14, %v5499_v23 }
 0x950   :  { %v5328_v46 = vmul.f32 0.2, %v4990_v41  ;;  %v4993_v17 = vadd.f32 %v9586_v7, %v4992_v28  ;;  %v6830_v54 = vpop.f32.mrb[215].mxu1  ;;  %6272 = vmatpush3.bf16.xpose.msra.mxu1 %v5587_v8  ;;  %vm5230_vm5 = vcmp.gt.f32.partialorder %v4990_v41, 0.0 }
 0x952   :  { %vm5231_vm6 = vcmp.gt.f32.partialorder %v4993_v17, 0.0  ;;  %v5329_v35 = vmul.f32 0.2, %v4993_v17  ;;  %v5426_v38 = vsel %vm5230_vm5, %v4990_v41, %v5328_v46 }
 0x954   :  { %v5427_v55 = vsel %vm5231_vm6, %v4993_v17, %v5329_v35 }
 0x955   :  { %v5500_v1 = vpack.c.bf16 %v5427_v55, %v5426_v38  ;;  %v4997_v14 = vpop.f32.mrb[216].mxu1 }
 0x956   :  { %v4998_v50 = vadd.f32 %v9586_v7, %v4997_v14  ;;  %v6833_v34 = vpop.f32.mrb[217].mxu1 }
 0x957   :  { %v5000_v21 = vpop.f32.mrb[218].mxu1  ;;  %7540 = vmatprep.subr.msk.bf16.mxu1 %vm5534_vm14, %v5500_v1 }
 0x958   :  { %v5330_v30 = vmul.f32 0.2, %v4998_v50  ;;  %v5001_v9 = vadd.f32 %v9586_v7, %v5000_v21  ;;  %v6834_v48 = vpop.f32.mrb[219].mxu1  ;;  %6274 = vmatpush3.bf16.xpose.msra.mxu1 %v5590_v61  ;;  %vm5232_vm7 = vcmp.gt.f32.partialorder %v4998_v50, 0.0 }
 0x95a   :  { %vm5233_vm8 = vcmp.gt.f32.partialorder %v5001_v9, 0.0  ;;  %v5331_v26 = vmul.f32 0.2, %v5001_v9  ;;  %v5428_v20 = vsel %vm5232_vm7, %v4998_v50, %v5330_v30 }
 0x95c   :  { %v5429_v29 = vsel %vm5233_vm8, %v5001_v9, %v5331_v26 }
 0x95d   :  { %v5501_v39 = vpack.c.bf16 %v5429_v29, %v5428_v20  ;;  %v5005_v6 = vpop.f32.mrb[220].mxu1 }
 0x95e   :  { %v5006_v0 = vadd.f32 %v9586_v7, %v5005_v6  ;;  %v6837_v62 = vpop.f32.mrb[221].mxu1 }
 0x95f   :  { %v5008_v10 = vpop.f32.mrb[222].mxu1  ;;  %7541 = vmatprep.subr.msk.bf16.mxu1 %vm5534_vm14, %v5501_v39 }
 0x960   :  { %v5332_v27 = vmul.f32 0.2, %v5006_v0  ;;  %v5009_v47 = vadd.f32 %v9586_v7, %v5008_v10  ;;  %v6838_v60 = vpop.f32.mrb[223].mxu1  ;;  %6276 = vmatpush3.bf16.xpose.msra.mxu1 %v5593_v40  ;;  %vm5234_vm9 = vcmp.gt.f32.partialorder %v5006_v0, 0.0 }
 0x961   :  { %v9969_v60 = vld [vmem:[#allocation11] ss:$0 sm:$0xff] }
 0x962   :  { %vm5235_vm10 = vcmp.gt.f32.partialorder %v5009_v47, 0.0  ;;  %v5333_v58 = vmul.f32 0.2, %v5009_v47  ;;  %v5430_v42 = vsel %vm5234_vm9, %v5006_v0, %v5332_v27 }
 0x964   :  { %v5431_v19 = vsel %vm5235_vm10, %v5009_v47, %v5333_v58 }
 0x965   :  { %v5502_v15 = vpack.c.bf16 %v5431_v19, %v5430_v42  ;;  %v5013_v18 = vpop.f32.mrb[224].mxu1 }
 0x966   :  { %v5014_v25 = vadd.f32 %v9586_v7, %v5013_v18  ;;  %v6841_v56 = vpop.f32.mrb[225].mxu1 }
 0x967   :  { %v5016_v44 = vpop.f32.mrb[226].mxu1  ;;  %7542 = vmatprep.subr.msk.bf16.mxu1 %vm5534_vm14, %v5502_v15 }
 0x968   :  { %v5334_v11 = vmul.f32 0.2, %v5014_v25  ;;  %v5017_v43 = vadd.f32 %v9586_v7, %v5016_v44  ;;  %v6842_v2 = vpop.f32.mrb[227].mxu1  ;;  %6278 = vmatpush3.bf16.xpose.msra.mxu1 %v5596_v57  ;;  %vm5236_vm12 = vcmp.gt.f32.partialorder %v5014_v25, 0.0 }
 0x96a   :  { %vm5237_vm13 = vcmp.gt.f32.partialorder %v5017_v43, 0.0  ;;  %v5335_v23 = vmul.f32 0.2, %v5017_v43  ;;  %v5432_v13 = vsel %vm5236_vm12, %v5014_v25, %v5334_v11 }
 0x96c   :  { %v5433_v41 = vsel %vm5237_vm13, %v5017_v43, %v5335_v23 }
 0x96d   :  { %v5503_v63 = vpack.c.bf16 %v5433_v41, %v5432_v13  ;;  %v5021_v28 = vpop.f32.mrb[228].mxu1 }
 0x96e   :  { %v5022_v8 = vadd.f32 %v9586_v7, %v5021_v28  ;;  %v6845_v46 = vpop.f32.mrb[229].mxu1 }
 0x96f   :  { %v5024_v17 = vpop.f32.mrb[230].mxu1  ;;  %7543 = vmatprep.subr.msk.bf16.mxu1 %vm5534_vm14, %v5503_v63 }
 0x970   :  { %v5336_v5 = vmul.f32 0.2, %v5022_v8  ;;  %v5025_v33 = vadd.f32 %v9586_v7, %v5024_v17  ;;  %v6846_v54 = vpop.f32.mrb[231].mxu1  ;;  %6280 = vmatpush3.bf16.xpose.msra.mxu1 %v5599_v49  ;;  %vm5238_vm11 = vcmp.gt.f32.partialorder %v5022_v8, 0.0 }
 0x972   :  { %vm5239_vm15 = vcmp.gt.f32.partialorder %v5025_v33, 0.0  ;;  %v5337_v35 = vmul.f32 0.2, %v5025_v33  ;;  %v5434_v38 = vsel %vm5238_vm11, %v5022_v8, %v5336_v5 }
 0x974   :  { %v5435_v55 = vsel %vm5239_vm15, %v5025_v33, %v5337_v35 }
 0x975   :  { %v5504_v1 = vpack.c.bf16 %v5435_v55, %v5434_v38  ;;  %v5029_v14 = vpop.f32.mrb[232].mxu1 }
 0x976   :  { %v5030_v50 = vadd.f32 %v9586_v7, %v5029_v14  ;;  %v6849_v34 = vpop.f32.mrb[233].mxu1 }
 0x977   :  { %v5032_v21 = vpop.f32.mrb[234].mxu1  ;;  %7544 = vmatprep.subr.msk.bf16.mxu1 %vm5534_vm14, %v5504_v1 }
 0x978   :  { %v5338_v59 = vmul.f32 0.2, %v5030_v50  ;;  %v5033_v52 = vadd.f32 %v9586_v7, %v5032_v21  ;;  %v6850_v61 = vpop.f32.mrb[235].mxu1  ;;  %6282 = vmatpush3.bf16.xpose.msra.mxu1 %v5602_v4  ;;  %vm5240_vm2 = vcmp.gt.f32.partialorder %v5030_v50, 0.0 }
 0x97a   :  { %vm5241_vm3 = vcmp.gt.f32.partialorder %v5033_v52, 0.0  ;;  %v5339_v30 = vmul.f32 0.2, %v5033_v52  ;;  %v5436_v9 = vsel %vm5240_vm2, %v5030_v50, %v5338_v59 }
 0x97c   :  { %v5437_v48 = vsel %vm5241_vm3, %v5033_v52, %v5339_v30 }
 0x97d   :  { %v5505_v26 = vpack.c.bf16 %v5437_v48, %v5436_v9  ;;  %v5037_v20 = vpop.f32.mrb[236].mxu1 }
 0x97e   :  { %v5038_v29 = vadd.f32 %v9586_v7, %v5037_v20  ;;  %v6853_v39 = vpop.f32.mrb[237].mxu1 }
 0x97f   :  { %v5040_v6 = vpop.f32.mrb[238].mxu1  ;;  %7545 = vmatprep.subr.msk.bf16.mxu1 %vm5534_vm14, %v5505_v26 }
 0x980   :  { %v5340_v16 = vmul.f32 0.2, %v5038_v29  ;;  %v5041_v37 = vadd.f32 %v9586_v7, %v5040_v6  ;;  %v6854_v0 = vpop.f32.mrb[239].mxu1  ;;  %6284 = vmatpush3.bf16.xpose.msra.mxu1 %v5605_v22  ;;  %vm5242_vm0 = vcmp.gt.f32.partialorder %v5038_v29, 0.0  ;;  %v5608_v7 = vsel %vm5534_vm14, %v5498_v31, 0 }
 0x982   :  { %vm5243_vm4 = vcmp.gt.f32.partialorder %v5041_v37, 0.0  ;;  %v5341_v62 = vmul.f32 0.2, %v5041_v37  ;;  %v5438_v10 = vsel %vm5242_vm0, %v5038_v29, %v5340_v16 }
 0x984   :  { %v5439_v40 = vsel %vm5243_vm4, %v5041_v37, %v5341_v62 }
 0x985   :  { %v5506_v27 = vpack.c.bf16 %v5439_v40, %v5438_v10  ;;  %v5045_v47 = vpop.f32.mrb[240].mxu1 }
 0x986   :  { %v5046_v53 = vadd.f32 %v9969_v60, %v5045_v47  ;;  %v6857_v58 = vpop.f32.mrb[241].mxu1 }
 0x987   :  { %v5048_v45 = vpop.f32.mrb[242].mxu1  ;;  %7546 = vmatprep.subr.msk.bf16.mxu1 %vm5534_vm14, %v5506_v27 }
 0x988   :  { %v5342_v3 = vmul.f32 0.2, %v5046_v53  ;;  %v5049_v12 = vadd.f32 %v9969_v60, %v5048_v45  ;;  %v6858_v42 = vpop.f32.mrb[243].mxu1  ;;  %6286 = vmatpush3.bf16.xpose.msra.mxu1 %v5608_v7  ;;  %vm5244_vm5 = vcmp.gt.f32.partialorder %v5046_v53, 0.0 }
 0x98a   :  { %vm5245_vm6 = vcmp.gt.f32.partialorder %v5049_v12, 0.0  ;;  %v5343_v19 = vmul.f32 0.2, %v5049_v12  ;;  %v9978_v15 = vsel %vm5244_vm5, %v5046_v53, %v5342_v3 }
 0x98c   :  { %v9980_v18 = vsel %vm5245_vm6, %v5049_v12, %v5343_v19 }
 0x98d   :  { %v5053_v25 = vpop.f32.mrb[244].mxu1  ;;  %v5507_v56 = vpack.c.bf16 %v9980_v18, %v9978_v15 }
 0x98e   :  { %v5054_v36 = vadd.f32 %v9969_v60, %v5053_v25  ;;  %v6861_v24 = vpop.f32.mrb[245].mxu1 }
 0x98f   :  { %v5056_v31 = vpop.f32.mrb[246].mxu1  ;;  %6288 = vmatmul.mubr.msk.bf16.vlgmr.msra.gmra.mrb[56].mxu1 %vm5534_vm14, %v9884_v32 }
 0x990   :  { %v5344_v44 = vmul.f32 0.2, %v5054_v36  ;;  %v5057_v57 = vadd.f32 %v9969_v60, %v5056_v31  ;;  %v6862_v11 = vpop.f32.mrb[247].mxu1  ;;  %6305 = vmatprep.mubr.msk.bf16.mxu1 %vm5534_vm14, %v9884_v32  ;;  %vm5246_vm7 = vcmp.gt.f32.partialorder %v5054_v36, 0.0 }
 0x992   :  { %vm5247_vm8 = vcmp.gt.f32.partialorder %v5057_v57, 0.0  ;;  %v5345_v43 = vmul.f32 0.2, %v5057_v57  ;;  %v9990_v2 = vsel %vm5246_vm7, %v5054_v36, %v5344_v44 }
 0x994   :  { %v9992_v23 = vsel %vm5247_vm8, %v5057_v57, %v5345_v43 }
 0x995   :  { %v5061_v13 = vpop.f32.mrb[248].mxu1  ;;  %v5508_v41 = vpack.c.bf16 %v9992_v23, %v9990_v2 }
 0x996   :  { %v5062_v63 = vadd.f32 %v9969_v60, %v5061_v13  ;;  %v6865_v28 = vpop.f32.mrb[249].mxu1 }
 0x997   :  { %v5064_v8 = vpop.f32.mrb[250].mxu1  ;;  %v5638_v15 = vsel %vm5534_vm14, %v5508_v41, 0 }
 0x998   :  { %v5346_v46 = vmul.f32 0.2, %v5062_v63  ;;  %v5065_v17 = vadd.f32 %v9969_v60, %v5064_v8  ;;  %v6866_v49 = vpop.f32.mrb[251].mxu1  ;;  %vm5248_vm9 = vcmp.gt.f32.partialorder %v5062_v63, 0.0 }
 0x99a   :  { %vm5249_vm10 = vcmp.gt.f32.partialorder %v5065_v17, 0.0  ;;  %v5347_v5 = vmul.f32 0.2, %v5065_v17  ;;  %v9998_v33 = vsel %vm5248_vm9, %v5062_v63, %v5346_v46 }
 0x99c   :  { %v10000_v54 = vsel %vm5249_vm10, %v5065_v17, %v5347_v5 }
 0x99d   :  { %v5069_v35 = vpop.f32.mrb[252].mxu1  ;;  %v5509_v38 = vpack.c.bf16 %v10000_v54, %v9998_v33 }
 0x99e   :  { %v5070_v55 = vadd.f32 %v9969_v60, %v5069_v35  ;;  %v6869_v1 = vpop.f32.mrb[253].mxu1 }
 0x99f   :  { %v5072_v14 = vpop.f32.mrb[254].mxu1  ;;  %v5641_v2 = vsel %vm5534_vm14, %v5509_v38, 0 }
 0x9a0   :  { %v5348_v50 = vmul.f32 0.2, %v5070_v55  ;;  %v5073_v34 = vadd.f32 %v9969_v60, %v5072_v14  ;;  %v6870_v21 = vpop.f32.mrb[255].mxu1  ;;  %vm5250_vm12 = vcmp.gt.f32.partialorder %v5070_v55, 0.0 }
 0x9a2   :  { %vm5251_vm13 = vcmp.gt.f32.partialorder %v5073_v34, 0.0  ;;  %v5349_v4 = vmul.f32 0.2, %v5073_v34  ;;  %v10006_v59 = vsel %vm5250_vm12, %v5070_v55, %v5348_v50 }
 0x9a4   :  { %v10008_v52 = vsel %vm5251_vm13, %v5073_v34, %v5349_v4 }
 0x9a5   :  { %v5077_v61 = vpop.f32.mrb[0].mxu1  ;;  %v5510_v30 = vpack.c.bf16 %v10008_v52, %v10006_v59 }
 0x9a6   :  { %v5078_v9 = vadd.f32 %v9969_v60, %v5077_v61  ;;  %v6873_v48 = vpop.f32.mrb[1].mxu1 }
 0x9a7   :  { %v5080_v26 = vpop.f32.mrb[2].mxu1  ;;  %v5644_v33 = vsel %vm5534_vm14, %v5510_v30, 0 }
 0x9a8   :  { %v5350_v20 = vmul.f32 0.2, %v5078_v9  ;;  %v5081_v29 = vadd.f32 %v9969_v60, %v5080_v26  ;;  %v6874_v39 = vpop.f32.mrb[3].mxu1  ;;  %vm5252_vm11 = vcmp.gt.f32.partialorder %v5078_v9, 0.0 }
 0x9aa   :  { %vm5253_vm15 = vcmp.gt.f32.partialorder %v5081_v29, 0.0  ;;  %v5351_v6 = vmul.f32 0.2, %v5081_v29  ;;  %v10014_v22 = vsel %vm5252_vm11, %v5078_v9, %v5350_v20 }
 0x9ac   :  { %v10016_v16 = vsel %vm5253_vm15, %v5081_v29, %v5351_v6 }
 0x9ad   :  { %v5085_v37 = vpop.f32.mrb[4].mxu1  ;;  %v5511_v0 = vpack.c.bf16 %v10016_v16, %v10014_v22 }
 0x9ae   :  { %v5086_v62 = vadd.f32 %v9969_v60, %v5085_v37  ;;  %v6877_v10 = vpop.f32.mrb[5].mxu1 }
 0x9af   :  { %v5088_v40 = vpop.f32.mrb[6].mxu1  ;;  %v5635_v10 = vsel %vm5534_vm14, %v5507_v56, 0  ;;  %v5647_v59 = vsel %vm5534_vm14, %v5511_v0, 0 }
 0x9b0   :  { %v5352_v27 = vmul.f32 0.2, %v5086_v62  ;;  %v5089_v47 = vadd.f32 %v9969_v60, %v5088_v40  ;;  %v6878_v53 = vpop.f32.mrb[7].mxu1  ;;  %vm5254_vm2 = vcmp.gt.f32.partialorder %v5086_v62, 0.0 }
 0x9b2   :  { %vm5255_vm3 = vcmp.gt.f32.partialorder %v5089_v47, 0.0  ;;  %v5353_v58 = vmul.f32 0.2, %v5089_v47  ;;  %v10022_v45 = vsel %vm5254_vm2, %v5086_v62, %v5352_v27 }
 0x9b4   :  { %v10024_v7 = vsel %vm5255_vm3, %v5089_v47, %v5353_v58 }
 0x9b5   :  { %v5093_v3 = vpop.f32.mrb[8].mxu1  ;;  %v5512_v12 = vpack.c.bf16 %v10024_v7, %v10022_v45 }
 0x9b6   :  { %v5094_v42 = vadd.f32 %v9969_v60, %v5093_v3  ;;  %v6881_v19 = vpop.f32.mrb[9].mxu1 }
 0x9b7   :  { %v5096_v25 = vpop.f32.mrb[10].mxu1  ;;  %v5650_v22 = vsel %vm5534_vm14, %v5512_v12, 0 }
 0x9b8   :  { %v5354_v36 = vmul.f32 0.2, %v5094_v42  ;;  %v5097_v24 = vadd.f32 %v9969_v60, %v5096_v25  ;;  %v6882_v31 = vpop.f32.mrb[11].mxu1  ;;  %vm5256_vm0 = vcmp.gt.f32.partialorder %v5094_v42, 0.0 }
 0x9ba   :  { %vm5257_vm4 = vcmp.gt.f32.partialorder %v5097_v24, 0.0  ;;  %v5355_v44 = vmul.f32 0.2, %v5097_v24  ;;  %v10030_v57 = vsel %vm5256_vm0, %v5094_v42, %v5354_v36 }
 0x9bc   :  { %v10032_v11 = vsel %vm5257_vm4, %v5097_v24, %v5355_v44 }
 0x9bd   :  { %v5101_v43 = vpop.f32.mrb[12].mxu1  ;;  %v5513_v13 = vpack.c.bf16 %v10032_v11, %v10030_v57 }
 0x9be   :  { %v5102_v63 = vadd.f32 %v9969_v60, %v5101_v43  ;;  %v6885_v28 = vpop.f32.mrb[13].mxu1 }
 0x9bf   :  { %v5104_v8 = vpop.f32.mrb[14].mxu1  ;;  %v5653_v45 = vsel %vm5534_vm14, %v5513_v13, 0 }
 0x9c0   :  { %v5356_v46 = vmul.f32 0.2, %v5102_v63  ;;  %v5105_v17 = vadd.f32 %v9969_v60, %v5104_v8  ;;  %v6886_v49 = vpop.f32.mrb[15].mxu1  ;;  %vm5258_vm5 = vcmp.gt.f32.partialorder %v5102_v63, 0.0 }
 0x9c2   :  { %vm5259_vm6 = vcmp.gt.f32.partialorder %v5105_v17, 0.0  ;;  %v5357_v5 = vmul.f32 0.2, %v5105_v17  ;;  %v10038_v35 = vsel %vm5258_vm5, %v5102_v63, %v5356_v46 }
 0x9c4   :  { %v10040_v55 = vsel %vm5259_vm6, %v5105_v17, %v5357_v5 }
 0x9c5   :  { %v5109_v1 = vpop.f32.mrb[16].mxu1  ;;  %v5514_v14 = vpack.c.bf16 %v10040_v55, %v10038_v35 }
 0x9c6   :  { %v5110_v50 = vadd.f32 %v9969_v60, %v5109_v1  ;;  %v6889_v34 = vpop.f32.mrb[17].mxu1 }
 0x9c7   :  { %v5112_v21 = vpop.f32.mrb[18].mxu1  ;;  %v5656_v13 = vsel %vm5534_vm14, %v5514_v14, 0 }
 0x9c8   :  { %v5358_v4 = vmul.f32 0.2, %v5110_v50  ;;  %v5113_v61 = vadd.f32 %v9969_v60, %v5112_v21  ;;  %v6890_v9 = vpop.f32.mrb[19].mxu1  ;;  %vm5260_vm7 = vcmp.gt.f32.partialorder %v5110_v50, 0.0 }
 0x9ca   :  { %vm5261_vm8 = vcmp.gt.f32.partialorder %v5113_v61, 0.0  ;;  %v5359_v48 = vmul.f32 0.2, %v5113_v61  ;;  %v5456_v26 = vsel %vm5260_vm7, %v5110_v50, %v5358_v4 }
 0x9cc   :  { %v5457_v20 = vsel %vm5261_vm8, %v5113_v61, %v5359_v48 }
 0x9cd   :  { %v5515_v29 = vpack.c.bf16 %v5457_v20, %v5456_v26  ;;  %v5117_v39 = vpop.f32.mrb[20].mxu1 }
 0x9ce   :  { %v5118_v6 = vadd.f32 %v9969_v60, %v5117_v39  ;;  %v6893_v37 = vpop.f32.mrb[21].mxu1 }
 0x9cf   :  { %v5120_v62 = vpop.f32.mrb[22].mxu1  ;;  %7547 = vmatprep.subr.msk.bf16.mxu1 %vm5534_vm14, %v5515_v29 }
 0x9d0   :  { %v5360_v40 = vmul.f32 0.2, %v5118_v6  ;;  %v5121_v27 = vadd.f32 %v9969_v60, %v5120_v62  ;;  %v6894_v47 = vpop.f32.mrb[23].mxu1  ;;  %6290 = vmatpush3.bf16.xpose.msra.mxu1 %v5635_v10  ;;  %vm5262_vm9 = vcmp.gt.f32.partialorder %v5118_v6, 0.0 }
 0x9d2   :  { %vm5263_vm10 = vcmp.gt.f32.partialorder %v5121_v27, 0.0  ;;  %v5361_v53 = vmul.f32 0.2, %v5121_v27  ;;  %v5458_v58 = vsel %vm5262_vm9, %v5118_v6, %v5360_v40 }
 0x9d4   :  { %v5459_v3 = vsel %vm5263_vm10, %v5121_v27, %v5361_v53 }
 0x9d5   :  { %v5516_v42 = vpack.c.bf16 %v5459_v3, %v5458_v58  ;;  %v5125_v19 = vpop.f32.mrb[24].mxu1 }
 0x9d6   :  { %v5126_v25 = vadd.f32 %v9969_v60, %v5125_v19  ;;  %v6897_v36 = vpop.f32.mrb[25].mxu1 }
 0x9d7   :  { %v5128_v24 = vpop.f32.mrb[26].mxu1  ;;  %7548 = vmatprep.subr.msk.bf16.mxu1 %vm5534_vm14, %v5516_v42 }
 0x9d8   :  { %v5362_v18 = vmul.f32 0.2, %v5126_v25  ;;  %v5129_v56 = vadd.f32 %v9969_v60, %v5128_v24  ;;  %v6898_v31 = vpop.f32.mrb[27].mxu1  ;;  %6292 = vmatpush3.bf16.xpose.msra.mxu1 %v5638_v15  ;;  %vm5264_vm12 = vcmp.gt.f32.partialorder %v5126_v25, 0.0 }
 0x9da   :  { %vm5265_vm13 = vcmp.gt.f32.partialorder %v5129_v56, 0.0  ;;  %v5363_v44 = vmul.f32 0.2, %v5129_v56  ;;  %v5460_v43 = vsel %vm5264_vm12, %v5126_v25, %v5362_v18 }
 0x9dc   :  { %v5461_v63 = vsel %vm5265_vm13, %v5129_v56, %v5363_v44 }
 0x9dd   :  { %v5517_v28 = vpack.c.bf16 %v5461_v63, %v5460_v43  ;;  %v5133_v8 = vpop.f32.mrb[28].mxu1 }
 0x9de   :  { %v5134_v46 = vadd.f32 %v9969_v60, %v5133_v8  ;;  %v6901_v17 = vpop.f32.mrb[29].mxu1 }
 0x9df   :  { %v5136_v49 = vpop.f32.mrb[30].mxu1  ;;  %7549 = vmatprep.subr.msk.bf16.mxu1 %vm5534_vm14, %v5517_v28  ;;  %v5530_v28 = vlaneseq }
 0x9e0   :  { %v5364_v23 = vmul.f32 0.2, %v5134_v46  ;;  %v5137_v41 = vadd.f32 %v9969_v60, %v5136_v49  ;;  %v6902_v5 = vpop.f32.mrb[31].mxu1  ;;  %6294 = vmatpush3.bf16.xpose.msra.mxu1 %v5641_v2  ;;  %vm5266_vm11 = vcmp.gt.f32.partialorder %v5134_v46, 0.0 }
 0x9e1   :  { %v5531_v49 = vshrl.u32 %v5530_v28, 7 }
 0x9e2   :  { %vm5267_vm15 = vcmp.gt.f32.partialorder %v5137_v41, 0.0  ;;  %v5365_v1 = vmul.f32 0.2, %v5137_v41  ;;  %v5462_v50 = vsel %vm5266_vm11, %v5134_v46, %v5364_v23 }
 0x9e3   :  { %v5532_v57 = vsub.s32 0, %v5531_v49 }
 0x9e4   :  { %v5463_v34 = vsel %vm5267_vm15, %v5137_v41, %v5365_v1 }
 0x9e5   :  { %v5518_v21 = vpack.c.bf16 %v5463_v34, %v5462_v50  ;;  %v5141_v4 = vpop.f32.mrb[32].mxu1  ;;  %v5528_v34 = vpop.permute.xlu0 %5527 }
 0x9e6   :  { %v5142_v61 = vadd.f32 %v9969_v60, %v5141_v4  ;;  %v6905_v9 = vpop.f32.mrb[33].mxu1 }
 0x9e7   :  { %v5144_v48 = vpop.f32.mrb[34].mxu1  ;;  %7550 = vmatprep.subr.msk.bf16.mxu1 %vm5534_vm14, %v5518_v21 }
 0x9e8   :  { %v5366_v54 = vmul.f32 0.2, %v5142_v61  ;;  %v5145_v38 = vadd.f32 %v9969_v60, %v5144_v48  ;;  %v6906_v26 = vpop.f32.mrb[35].mxu1  ;;  %6296 = vmatpush3.bf16.xpose.msra.mxu1 %v5644_v33  ;;  %vm5268_vm2 = vcmp.gt.f32.partialorder %v5142_v61, 0.0  ;;  %v5533_v48 = vrot.slane %v5528_v34, %v5532_v57 }
 0x9ea   :  { %vm5269_vm3 = vcmp.gt.f32.partialorder %v5145_v38, 0.0  ;;  %v5367_v20 = vmul.f32 0.2, %v5145_v38  ;;  %v5464_v29 = vsel %vm5268_vm2, %v5142_v61, %v5366_v54 }
 0x9ec   :  { %v5465_v39 = vsel %vm5269_vm3, %v5145_v38, %v5367_v20 }
 0x9ed   :  { %v5519_v6 = vpack.c.bf16 %v5465_v39, %v5464_v29  ;;  %v5149_v37 = vpop.f32.mrb[36].mxu1 }
 0x9ee   :  { %v5150_v62 = vadd.f32 %v9969_v60, %v5149_v37  ;;  %v6909_v10 = vpop.f32.mrb[37].mxu1 }
 0x9ef   :  { %v5152_v40 = vpop.f32.mrb[38].mxu1  ;;  %7551 = vmatprep.subr.msk.bf16.mxu1 %vm5534_vm14, %v5519_v6  ;;  %v7812_v6 = vmov 1966171168  }
 0x9f0   :  { %v5368_v52 = vmul.f32 0.2, %v5150_v62  ;;  %v5153_v30 = vadd.f32 %v9969_v60, %v5152_v40  ;;  %v6910_v27 = vpop.f32.mrb[39].mxu1  ;;  %6298 = vmatpush3.bf16.xpose.msra.mxu1 %v5647_v59  ;;  %vm5270_vm0 = vcmp.gt.f32.partialorder %v5150_v62, 0.0  ;;  %v5859_v37 = vunpack.c.l.s4 %v7812_v6 }
 0x9f2   :  { %vm5271_vm4 = vcmp.gt.f32.partialorder %v5153_v30, 0.0  ;;  %v5369_v47 = vmul.f32 0.2, %v5153_v30  ;;  %v5466_v53 = vsel %vm5270_vm0, %v5150_v62, %v5368_v52  ;;  %v5860_v62 = vunpack.c.0.s8 %v5859_v37 }
 0x9f4   :  { %v5467_v58 = vsel %vm5271_vm4, %v5153_v30, %v5369_v47  ;;  %v5863_v40 = vsub.s32 %v5860_v62, %v5531_v49 }
 0x9f5   :  { %v5520_v3 = vpack.c.bf16 %v5467_v58, %v5466_v53  ;;  %v5157_v42 = vpop.f32.mrb[40].mxu1 }
 0x9f6   :  { %v5158_v19 = vadd.f32 %v9969_v60, %v5157_v42  ;;  %v6913_v25 = vpop.f32.mrb[41].mxu1 }
 0x9f7   :  { %v5160_v36 = vpop.f32.mrb[42].mxu1  ;;  %7552 = vmatprep.subr.msk.bf16.mxu1 %vm5534_vm14, %v5520_v3 }
 0x9f8   :  { %v5370_v16 = vmul.f32 0.2, %v5158_v19  ;;  %v5161_v0 = vadd.f32 %v9969_v60, %v5160_v36  ;;  %v6914_v24 = vpop.f32.mrb[43].mxu1  ;;  %6300 = vmatpush3.bf16.xpose.msra.mxu1 %v5650_v22  ;;  %vm5272_vm5 = vcmp.gt.f32.partialorder %v5158_v19, 0.0 }
 0x9fa   :  { %vm5273_vm6 = vcmp.gt.f32.partialorder %v5161_v0, 0.0  ;;  %v5371_v15 = vmul.f32 0.2, %v5161_v0  ;;  %v5468_v18 = vsel %vm5272_vm5, %v5158_v19, %v5370_v16 }
 0x9fc   :  { %v5469_v56 = vsel %vm5273_vm6, %v5161_v0, %v5371_v15 }
 0x9fd   :  { %v5521_v31 = vpack.c.bf16 %v5469_v56, %v5468_v18  ;;  %v5165_v44 = vpop.f32.mrb[44].mxu1 }
 0x9fe   :  { %v5166_v43 = vadd.f32 %v9969_v60, %v5165_v44  ;;  %v6917_v63 = vpop.f32.mrb[45].mxu1 }
 0x9ff   :  { %v5168_v8 = vpop.f32.mrb[46].mxu1  ;;  %7553 = vmatprep.subr.msk.bf16.mxu1 %vm5534_vm14, %v5521_v31 }
 0xa00   :  { %v5372_v7 = vmul.f32 0.2, %v5166_v43  ;;  %v5169_v12 = vadd.f32 %v9969_v60, %v5168_v8  ;;  %v6918_v46 = vpop.f32.mrb[47].mxu1  ;;  %6302 = vmatpush3.bf16.xpose.msra.mxu1 %v5653_v45  ;;  %vm5274_vm7 = vcmp.gt.f32.partialorder %v5166_v43, 0.0 }
 0xa02   :  { %vm5275_vm8 = vcmp.gt.f32.partialorder %v5169_v12, 0.0  ;;  %v5373_v17 = vmul.f32 0.2, %v5169_v12  ;;  %v5470_v2 = vsel %vm5274_vm7, %v5166_v43, %v5372_v7 }
 0xa04   :  { %v5471_v23 = vsel %vm5275_vm8, %v5169_v12, %v5373_v17 }
 0xa05   :  { %v5522_v41 = vpack.c.bf16 %v5471_v23, %v5470_v2  ;;  %v5173_v5 = vpop.f32.mrb[48].mxu1 }
 0xa06   :  { %v5174_v1 = vadd.f32 %v9969_v60, %v5173_v5  ;;  %v6921_v50 = vpop.f32.mrb[49].mxu1 }
 0xa07   :  { %v5176_v11 = vpop.f32.mrb[50].mxu1  ;;  %7554 = vmatprep.subr.msk.bf16.mxu1 %vm5534_vm14, %v5522_v41 }
 0xa08   :  { %v5374_v21 = vmul.f32 0.2, %v5174_v1  ;;  %v5177_v4 = vadd.f32 %v9969_v60, %v5176_v11  ;;  %v6922_v61 = vpop.f32.mrb[51].mxu1  ;;  %6304 = vmatpush3.bf16.xpose.msra.mxu1 %v5656_v13  ;;  %vm5276_vm9 = vcmp.gt.f32.partialorder %v5174_v1, 0.0 }
 0xa09   :  { %6923 = vmatprep.subr.bf16.mxu1 %v10190_v51 }
 0xa0a   :  { %vm5277_vm10 = vcmp.gt.f32.partialorder %v5177_v4, 0.0  ;;  %v5375_v9 = vmul.f32 0.2, %v5177_v4  ;;  %v5472_v33 = vsel %vm5276_vm9, %v5174_v1, %v5374_v21 }
 0xa0c   :  { %v5473_v54 = vsel %vm5277_vm10, %v5177_v4, %v5375_v9 }
 0xa0d   :  { %v5523_v38 = vpack.c.bf16 %v5473_v54, %v5472_v33  ;;  %v5719_v26 = vpop.f32.mrb[52].mxu1 }
 0xa0e   :  { %v5721_v20 = vpop.f32.mrb[53].mxu1  ;;  %v5720_v35 = vadd.f32 %v5719_v26, %v5533_v48 }
 0xa0f   :  { %6306 = vmatmul.mubr.msk.bf16.vlgmr.msra.gmra.mrb[60].mxu1 %vm5534_vm14, %v9884_v32  ;;  %v5683_v55 = vsel %vm5534_vm14, %v5523_v38, 0  ;;  %v5723_v60 = vpop.f32.mrb[54].mxu1  ;;  %v5722_v14 = vadd.f32 %v5721_v20, %v5533_v48 }
 0xa10   :  { %6924 = vmatpush3.bf16.xpose.msra.mxu1 %v5683_v55  ;;  %6925 = vmatprep.mubr.msk.bf16.mxu1 %vm7811_vm1, %v10190_v51  ;;  %v5724_v29 = vpop.f32.mrb[55].mxu1  ;;  %vm5906_vm1 = vcmp.lt.s32.totalorder %v5530_v28, 784 }
 0xa11   :  { %v5855_v39 = vcombine.low %v5720_v35, %v5722_v14 }
 0xa13   :  { %v5864_v58 = vrot.slane %v5855_v39, %v5863_v40 }
 0xa17   :  { %6926 = vmatmul.mubr.msk.bf16.vlgmr.msra.gmra.mrb[64].mxu1 %vm5534_vm14, %v9884_v32 }
 0xa62   :  { %v5760_v10 = vpop.f32.mrb[56].mxu1 }
 0xa63   :  { %v5762_v59 = vpop.f32.mrb[57].mxu1  ;;  %v5761_v52 = vadd.f32 %v5760_v10, %v5533_v48 }
 0xa64   :  { %v5764_v30 = vpop.f32.mrb[58].mxu1  ;;  %v5763_v27 = vadd.f32 %v5762_v59, %v5533_v48 }
 0xa65   :  { %v5765_v47 = vpop.f32.mrb[59].mxu1 }
 0xa66   :  { %v5856_v53 = vcombine.low %v5761_v52, %v5763_v27 }
 0xa68   :  { %v5871_v3 = vrot.slane %v5856_v53, %v5863_v40 }
 0xa6a   :  { %v5886_v42 = vcombine.low %v5864_v58, %v5871_v3 }
 0xa6c   :  { %v5894_v8 = vrot.slane %v5886_v42, %v5863_v40 }
 0xae2   :  { %v5801_v51 = vpop.f32.mrb[60].mxu1 }
 0xae3   :  { %v5802_v19 = vadd.f32 %v5801_v51, %v5533_v48  ;;  %v5803_v25 = vpop.f32.mrb[61].mxu1 }
 0xae4   :  { %v5804_v36 = vadd.f32 %v5803_v25, %v5533_v48  ;;  %v5805_v22 = vpop.f32.mrb[62].mxu1 }
 0xae5   :  { %v5806_v32 = vpop.f32.mrb[63].mxu1 }
 0xae6   :  { %v5857_v16 = vcombine.low %v5802_v19, %v5804_v36 }
 0xae8   :  { %v5878_v56 = vrot.slane %v5857_v16, %v5863_v40 }
 0xaea   :  { %v5842_v0 = vpop.f32.mrb[64].mxu1 }
 0xaeb   :  { %v5843_v24 = vadd.f32 %v5842_v0, %v5533_v48  ;;  %v6927_v15 = vpop.f32.mrb[65].mxu1 }
 0xaec   :  { %v5845_v18 = vpop.f32.mrb[66].mxu1 }
 0xaed   :  { %v5885_v31 = vrot.slane %v5843_v24, %v5863_v40  ;;  %v6928_v44 = vpop.f32.mrb[67].mxu1 }
 0xaef   :  { %v5887_v43 = vcombine.low %v5878_v56, %v5885_v31 }
 0xaf1   :  { %v5901_v63 = vrot.slane %v5887_v43, %v5863_v40 }
 0xaf3   :  { %v5902_v45 = vcombine.low %v5894_v8, %v5901_v63 }
 0xaf5   :  { %5908 = vst.msk [vmem:[#allocation14] sm:$0x7f] %vm5906_vm1, %v5902_v45 }
 0xaf6   :  { %7778 = shalt.err (!%p7775_p10)
}
 0xaf7   :  { %s7779_s7 = scalar_lea.hbm %s10133_s9, 112 }
 0xaf8   :  { %p7780_p11 = scmp.ne.s32.totalorder %s10133_s9, %s7779_s7  ;;  %p7783_p12 = scmp.lt.u32.totalorder %s7779_s7, %s10133_s9 }
 0xafa   :  { %p7785_p13 = pnand %p7783_p12, %p7780_p11 }
 0xafc   :  { %7788 = shalt.err (!%p7785_p13)
}
 0xafd   :  { %5918 = dma.vmem_to_hbm [thread:$0]  %s5916_s15, 112, %s10133_s9, [#allocation5]  }
 0xafe   :  { %7797 = dma.done.wait [#allocation5], 112  }
 0xaff   :  { %7798 = vsyncadd [#allocation5], 4294967184 }
 0xb00   :  { %5922 = vsyncpa [#allocation4], 1 }
 0xb01   :  { %5923 = vsyncpa [#allocation7], 1 }
 0xb02   :  { %5924 = vsyncpa [#allocation10], 1 }
 0xb03   :  { %5925 = vsyncpa [#allocation13], 1 }
 0xb04   :  { %5926 = vsyncpa [#allocation5], 1 }

</bundles_post_ra>
